<compile_context>
chip_gen: v6e
topology: v6e:2x2x1
jax: 0.10.0
libtpu: 0.0.40
codegen_flags: <defaults>
</compile_context>

<pallas_src>
import math
from functools import partial

import numpy as np
import jax
import jax.numpy as jnp
from jax.experimental import pallas as pl
from jax.experimental.pallas import tpu as pltpu

BN_EPS = 1e-5


# ----------------------------- Pallas kernel -----------------------------

def _fused_encoder_kernel(x_ref, emb_ref,
                          m1a_ref, sh1a_ref, m2_ref, sh2_ref,
                          mt_ref, sht_ref,
                          mout_ref, bout_ref,
                          gate_ref, cbias_ref,
                          o_ref, *, plan, d):
    """Whole Conv1d_encoder on a VMEM/vreg-resident (B, D=128) activation slab."""
    f32 = jnp.float32
    x = x_ref[...].astype(f32)                                   # (B, D)

    for kind, li, si in plan:                                    # statically unrolled (34 layers)
        x = x + emb_ref[si]                                       # + (step + context) embedding
        if kind == "res":
            # fused [attention 1x1 conv | bottleneck 1x1 conv+BN] -> (B, D + D/2)
            z = jnp.dot(x, m1a_ref[li], preferred_element_type=f32) + sh1a_ref[li]
            a = z[:, :d]                                          # attention pre-act (lane tile 0)
            h = jnp.maximum(z[:, d:], 0.0)                        # bottleneck, ReLU  (lane tile 1)
            # conv2 (k, stride, dilation) + BN + ReLU -> (B, D)
            h = jnp.dot(h, m2_ref[li], preferred_element_type=f32) + sh2_ref[li]
            h = jnp.maximum(h, 0.0)
            # gated residual (DropPath = identity in eval)
            x = x * jax.nn.sigmoid(a) + h
        else:
            # transition conv (C -> 2C, T -> T/2) + BN + ReLU, still (B, D)
            x = jnp.dot(x, mt_ref[li], preferred_element_type=f32) + sht_ref[li]
            x = jnp.maximum(x, 0.0)

    # channel_back_proj composed with ConcatSquashLinear main Linear -> (B, D), lane-dense
    out = jnp.dot(x, mout_ref[...], preferred_element_type=f32) + bout_ref[...]
    # ConcatSquashLinear ctx-dependent gate / bias (precomputed, lane-dense (B, D))
    out = out * gate_ref[...] + cbias_ref[...]
    o_ref[...] = out.astype(o_ref.dtype)


# ----------------------------- host-side layer lowering -----------------------------

def calculate_conv1d_padding(stride, kernel_size, d_in, d_out, dilation=1):
    padding = math.ceil((stride * (d_out - 1) - d_in + dilation * (kernel_size - 1) + 1) / 2)
    assert padding >= 0
    return padding


def _unfold_conv1d(w_eff, t_in, t_out, stride, pad, dil):
    """Dense operator M s.t. flat_out = flat_in @ M for a Conv1d with this geometry.

    Flat layout: index = channel * T + t (row-major over (C, T)).
    w_eff: (Cout, Cin, K) numpy array (BN scale already folded in).
    Returns M of shape (Cin*t_in, Cout*t_out).
    """
    w = np.asarray(w_eff, np.float32)
    c_out, c_in, K = w.shape
    M = np.zeros((c_in, t_in, c_out, t_out), np.float32)
    for tout in range(t_out):
        for tap in range(K):
            tin = tout * stride - pad + tap * dil
            if 0 <= tin < t_in:
                M[:, tin, :, tout] += w[:, :, tap].T
    return M.reshape(c_in * t_in, c_out * t_out)


def _bn_fold(w, b, gamma, beta):
    """Fold eval-mode BatchNorm1d (running mean=0, var=1) into conv weight / bias."""
    sc = np.asarray(gamma, np.float32) / np.sqrt(1.0 + BN_EPS)
    w_eff = np.asarray(w, np.float32) * sc[:, None, None]
    sh_eff = np.asarray(b, np.float32) * sc + np.asarray(beta, np.float32)
    return w_eff, sh_eff


def build_params(cfg):
    """Random xavier-normal init mirroring Conv1d_encoder._reset_parameters()."""
    key_holder = [jax.random.PRNGKey(0)]

    def nk():
        key_holder[0], k = jax.random.split(key_holder[0])
        return k

    def xavier(shape):
        fan_out = shape[0]
        fan_in = 1
        for s_ in shape[1:]:
            fan_in *= s_
        std = math.sqrt(2.0 / (fan_in + fan_out))
        return std * jax.random.normal(nk(), shape, dtype=jnp.float32)

    zeros = lambda *s: jnp.zeros(s, jnp.float32)
    ones = lambda *s: jnp.ones(s, jnp.float32)

    channel = cfg["T2F_encoder_sequence_length"]
    temp_dim = cfg["T2F_encoder_embed_dim"]
    res_params = list(zip([4, 4, 8, 8, 6], [5, 7, 9, 9, 11], [3, 3, 5, 3, 3], [1, 3, 5, 3, 3]))

    resnet, step_emb, ctx_emb = [], [], []
    for i, (nb, k, s, d) in enumerate(res_params):
        pad_res = calculate_conv1d_padding(s, k, temp_dim, temp_dim, d)
        for _ in range(nb):
            C = channel
            resnet.append(dict(
                type="res", k=k, s=s, d=d, pad=pad_res, C=C, T=temp_dim,
                w1=xavier((C // 2, C, 1)), b1=zeros(C // 2), g1=ones(C // 2), be1=zeros(C // 2),
                w2=xavier((C, C // 2, k)), b2=zeros(C), g2=ones(C), be2=zeros(C),
                wa=xavier((C, C, 1)), ba=zeros(C),
            ))
        step_emb.append(xavier((cfg["diffusion_num_steps"], temp_dim)))
        ctx_emb.append((xavier((temp_dim, cfg["feature_dim"])), zeros(temp_dim)))
        if i != len(res_params) - 1:
            pad_t = calculate_conv1d_padding(s, k, temp_dim, temp_dim // 2, d)
            resnet.append(dict(
                type="trans", k=k, s=s, d=d, pad=pad_t, C=channel, T=temp_dim,
                w=xavier((channel * 2, channel, k)), b=zeros(channel * 2),
                g=ones(channel * 2), be=zeros(channel * 2),
            ))
            channel *= 2
            temp_dim //= 2

    params = dict(
        resnet=resnet, step_emb=step_emb, ctx_emb=ctx_emb,
        cbp_w=xavier((cfg["T2F_encoder_sequence_length"], channel, 1)),
        cbp_b=zeros(cfg["T2F_encoder_sequence_length"]),
        csl_wl=xavier((cfg["T2F_encoder_embed_dim"], temp_dim)),
        csl_bl=zeros(cfg["T2F_encoder_embed_dim"]),
        csl_wg=xavier((cfg["T2F_encoder_embed_dim"], cfg["feature_dim"] + 3)),
        csl_bg=zeros(cfg["T2F_encoder_embed_dim"]),
        csl_wb=xavier((cfg["T2F_encoder_embed_dim"], cfg["feature_dim"] + 3)),
        final_channel=channel, final_temp=temp_dim,
    )
    cum, c = [], 0
    for j, nb in enumerate([4, 4, 8, 8, 6]):
        c += nb
        cum.append(c + j)
    params["cum_blocks"] = cum            # [4, 9, 18, 27, 34] — matches torch cumsum+arange
    return params


def build_fused_pack(params, cfg):
    """Fold BN + unfold every conv into dense matrices; fuse same-input 1x1 convs."""
    L0 = cfg["T2F_encoder_sequence_length"]
    T0 = cfg["T2F_encoder_embed_dim"]
    D = L0 * T0                       # flattened activation width (constant per stage)
    H = D // 2                        # res-block bottleneck width

    cum_blocks = params["cum_blocks"]
    m1as, sh1as, m2s, sh2s = [], [], [], []
    mts, shts = [], []
    plan, stage_shapes = [], []
    idx = n_res = n_tr = 0

    for i, layer in enumerate(params["resnet"]):
        C, T = layer["C"], layer["T"]
        assert C * T == D, "channel * temp_dim must stay constant across stages"
        while len(stage_shapes) <= idx:
            stage_shapes.append((C, T))
        if layer["type"] == "res":
            w1e, sh1 = _bn_fold(layer["w1"], layer["b1"], layer["g1"], layer["be1"])
            w2e, sh2 = _bn_fold(layer["w2"], layer["b2"], layer["g2"], layer["be2"])
            m1 = _unfold_conv1d(w1e, T, T, 1, 0, 1)                                   # (D, H)
            m2 = _unfold_conv1d(w2e, T, T, layer["s"], layer["pad"], layer["d"])      # (H, D)
            ma = _unfold_conv1d(np.asarray(layer["wa"], np.float32), T, T, 1, 0, 1)   # (D, D)
            assert m1.shape == (D, H) and m2.shape == (H, D) and ma.shape == (D, D)
            # Fuse attention gate + bottleneck conv1 (both 1x1 on the same input):
            # attention columns first so the split sits on a 128-lane tile boundary.
            m1a = np.concatenate([ma, m1], axis=1)                                    # (D, D+H)
            sh1a = np.concatenate(
                [np.repeat(np.asarray(layer["ba"], np.float32), T),
                 np.repeat(sh1, T)])[None, :]                                         # (1, D+H)
            m1as.append(m1a); sh1as.append(sh1a)
            m2s.append(m2); sh2s.append(np.repeat(sh2, T)[None, :])
            plan.append(("res", n_res, idx)); n_res += 1
        else:
            w_tr, sh_tr = _bn_fold(layer["w"], layer["b"], layer["g"], layer["be"])
            mt = _unfold_conv1d(w_tr, T, T // 2, layer["s"], layer["pad"], layer["d"])  # (D, D)
            assert mt.shape == (D, D)
            mts.append(mt)
            shts.append(np.repeat(sh_tr, T // 2)[None, :])
            plan.append(("trans", n_tr, idx)); n_tr += 1
        idx += 1 if i == cum_blocks[idx] else 0

    # channel back projection (1x1 conv, no BN/ReLU) composed with the
    # ConcatSquashLinear main Linear -> one dense lane-dense (D, D) operator.
    Tl = params["final_temp"]
    mcbp = _unfold_conv1d(np.asarray(params["cbp_w"], np.float32), Tl, Tl, 1, 0, 1)   # (D, L0*Tl)
    bcbp = np.repeat(np.asarray(params["cbp_b"], np.float32), Tl)[None, :]            # (1, L0*Tl)
    wl = np.asarray(params["csl_wl"], np.float32)          # (T0, Tl)
    bl = np.asarray(params["csl_bl"], np.float32)          # (T0,)
    mcsl = np.zeros((L0 * Tl, L0 * T0), np.float32)        # block-diag over the L0 rows
    for l in range(L0):
        mcsl[l * Tl:(l + 1) * Tl, l * T0:(l + 1) * T0] = wl.T
    bl_tile = np.tile(bl, L0)[None, :]                     # (1, D)
    m_out = mcbp @ mcsl                                    # (D, D)
    b_out = bcbp @ mcsl + bl_tile                          # (1, D)

    return dict(
        plan=tuple(plan), stage_shapes=tuple(stage_shapes),
        m1a=jnp.asarray(np.stack(m1as)), sh1a=jnp.asarray(np.stack(sh1as)),
        m2=jnp.asarray(np.stack(m2s)),   sh2=jnp.asarray(np.stack(sh2s)),
        mt=jnp.asarray(np.stack(mts)),   sht=jnp.asarray(np.stack(shts)),
        m_out=jnp.asarray(m_out), b_out=jnp.asarray(b_out),
    )


# ----------------------------- forward -----------------------------

def conv1d_encoder_forward(params, pack, inputs, context, t, beta):
    """inputs: [B, L, T]   context: [B, feature_dim]   t: python int   beta: [B]."""
    B, L0, T0 = inputs.shape
    D = L0 * T0
    t_idx = int(t) - 1   # TODO(synk): t must be a static python int (mirrors torch.tensor(t)-1 lookup)

    # per-stage (step + context) embeddings, tiled over the channel axis -> (B, D)   (plain XLA)
    embs = []
    for s, (C_s, T_s) in enumerate(pack["stage_shapes"]):
        se = params["step_emb"][s][t_idx]                       # (T_s,)
        W, b = params["ctx_emb"][s]
        ce = context @ W.T + b                                  # (B, T_s)
        embs.append(jnp.tile(ce + se[None, :], (1, C_s)))       # (B, D)
    embs = jnp.stack(embs, axis=0)                              # (n_stages, B, D)

    # ConcatSquashLinear ctx-dependent gate / bias (plain XLA), tiled over L0
    time_emb = jnp.stack([beta, jnp.sin(beta), jnp.cos(beta)], axis=1)   # (B, 3)
    ctx = jnp.concatenate([time_emb, context], axis=-1)                  # (B, F+3)
    gate = jax.nn.sigmoid(ctx @ params["csl_wg"].T + params["csl_bg"])   # (B, T0)
    cbias = ctx @ params["csl_wb"].T                                     # (B, T0)
    gate_tile = jnp.tile(gate, (1, L0))                                  # (B, D)
    cbias_tile = jnp.tile(cbias, (1, L0))                                # (B, D)

    x0 = inputs.reshape(B, D)

    kernel = partial(_fused_encoder_kernel, plan=pack["plan"], d=D)
    out_flat = pl.pallas_call(
        kernel,
        out_shape=jax.ShapeDtypeStruct((B, D), jnp.float32),
        compiler_params=pltpu.CompilerParams(vmem_limit_bytes=32 * 1024 * 1024),
    )(x0, embs,
      pack["m1a"], pack["sh1a"], pack["m2"], pack["sh2"],
      pack["mt"], pack["sht"],
      pack["m_out"], pack["b_out"],
      gate_tile, cbias_tile)

    return out_flat.reshape(B, L0, T0)


# ----------------------------- main -----------------------------

if __name__ == "__main__":
    cfg = dict(
        T2F_encoder_sequence_length=4,   # L (Conv1d channel axis)
        T2F_encoder_embed_dim=32,        # T (temporal axis; halved 4x, must be divisible by 16)
        diffusion_num_steps=10,
        feature_dim=6,
    )
    B = 2
    params = build_params(cfg)
    pack = build_fused_pack(params, cfg)

    key = jax.random.PRNGKey(0)
    k1, k2, k3 = jax.random.split(key, 3)
    inputs = jax.random.normal(k1, (B, cfg["T2F_encoder_sequence_length"],
                                    cfg["T2F_encoder_embed_dim"]), jnp.float32)
    context = jax.random.normal(k2, (B, cfg["feature_dim"]), jnp.float32)
    beta = jax.random.uniform(k3, (B,), jnp.float32, 0.01, 0.99)
    t = 5

    fwd = jax.jit(lambda a, c, bt: conv1d_encoder_forward(params, pack, a, c, t, bt))
    out = jax.block_until_ready(fwd(inputs, context, beta))

    assert out.shape == (B, cfg["T2F_encoder_sequence_length"], cfg["T2F_encoder_embed_dim"])
    assert bool(jnp.all(jnp.isfinite(out)))
    print("KERNEL_OK")
</pallas_src>

<mosaic_0001>
module attributes {stable_mosaic.version = 11 : i64} {
  func.func @_fused_encoder_kernel(%arg0: memref<2x128xf32, #tpu.memory_space<vmem>>, %arg1: memref<5x2x128xf32, #tpu.memory_space<vmem>>, %arg2: memref<30x128x192xf32, #tpu.memory_space<vmem>>, %arg3: memref<30x1x192xf32, #tpu.memory_space<vmem>>, %arg4: memref<30x64x128xf32, #tpu.memory_space<vmem>>, %arg5: memref<30x1x128xf32, #tpu.memory_space<vmem>>, %arg6: memref<4x128x128xf32, #tpu.memory_space<vmem>>, %arg7: memref<4x1x128xf32, #tpu.memory_space<vmem>>, %arg8: memref<128x128xf32, #tpu.memory_space<vmem>>, %arg9: memref<1x128xf32, #tpu.memory_space<vmem>>, %arg10: memref<2x128xf32, #tpu.memory_space<vmem>>, %arg11: memref<2x128xf32, #tpu.memory_space<vmem>>, %arg12: memref<2x128xf32, #tpu.memory_space<vmem>>) attributes {dimension_semantics = [], scalar_prefetch = 0 : i64, scratch_operands = 0 : i64, tpu.core_type = #tpu.core_type<tc>} {
    %c0 = arith.constant 0 : index
    %c0_0 = arith.constant 0 : index
    %0 = vector.load %arg0[%c0, %c0_0] : memref<2x128xf32, #tpu.memory_space<vmem>>, vector<2x128xf32>
    %c0_1 = arith.constant 0 : index
    %c0_2 = arith.constant 0 : index
    %c0_3 = arith.constant 0 : index
    %1 = vector.load %arg1[%c0_1, %c0_2, %c0_3] : memref<5x2x128xf32, #tpu.memory_space<vmem>>, vector<1x2x128xf32>
    %2 = vector.shape_cast %1 : vector<1x2x128xf32> to vector<2x128xf32>
    %3 = arith.addf %0, %2 : vector<2x128xf32>
    %c0_4 = arith.constant 0 : index
    %c0_5 = arith.constant 0 : index
    %c0_6 = arith.constant 0 : index
    %4 = vector.load %arg2[%c0_4, %c0_5, %c0_6] : memref<30x128x192xf32, #tpu.memory_space<vmem>>, vector<1x128x192xf32>
    %5 = vector.shape_cast %4 : vector<1x128x192xf32> to vector<128x192xf32>
    %cst = arith.constant dense<0.000000e+00> : vector<2x192xf32>
    %6 = tpu.matmul %3, %5, %cst {dimension_numbers = #tpu.dot_dimension_numbers<[1], [0], [0], [1], [0, 0, 1, 1], [], []>} : vector<2x128xf32>, vector<128x192xf32>, vector<2x192xf32> -> vector<2x192xf32>
    %c0_7 = arith.constant 0 : index
    %c0_8 = arith.constant 0 : index
    %c0_9 = arith.constant 0 : index
    %7 = vector.load %arg3[%c0_7, %c0_8, %c0_9] : memref<30x1x192xf32, #tpu.memory_space<vmem>>, vector<1x1x192xf32>
    %8 = vector.shape_cast %7 : vector<1x1x192xf32> to vector<1x192xf32>
    %9 = vector.broadcast %8 : vector<1x192xf32> to vector<2x192xf32>
    %10 = arith.addf %6, %9 : vector<2x192xf32>
    %11 = vector.extract_strided_slice %10 {offsets = [0, 0], sizes = [2, 128], strides = [1, 1]} : vector<2x192xf32> to vector<2x128xf32>
    %12 = vector.extract_strided_slice %10 {offsets = [0, 128], sizes = [2, 64], strides = [1, 1]} : vector<2x192xf32> to vector<2x64xf32>
    %cst_10 = arith.constant 0.000000e+00 : f32
    %13 = vector.broadcast %cst_10 : f32 to vector<2x64xf32>
    %14 = arith.maximumf %12, %13 : vector<2x64xf32>
    %c0_11 = arith.constant 0 : index
    %c0_12 = arith.constant 0 : index
    %c0_13 = arith.constant 0 : index
    %15 = vector.load %arg4[%c0_11, %c0_12, %c0_13] : memref<30x64x128xf32, #tpu.memory_space<vmem>>, vector<1x64x128xf32>
    %16 = vector.shape_cast %15 : vector<1x64x128xf32> to vector<64x128xf32>
    %cst_14 = arith.constant dense<0.000000e+00> : vector<2x128xf32>
    %17 = tpu.matmul %14, %16, %cst_14 {dimension_numbers = #tpu.dot_dimension_numbers<[1], [0], [0], [1], [0, 0, 1, 1], [], []>} : vector<2x64xf32>, vector<64x128xf32>, vector<2x128xf32> -> vector<2x128xf32>
    %c0_15 = arith.constant 0 : index
    %c0_16 = arith.constant 0 : index
    %c0_17 = arith.constant 0 : index
    %18 = vector.load %arg5[%c0_15, %c0_16, %c0_17] : memref<30x1x128xf32, #tpu.memory_space<vmem>>, vector<1x1x128xf32>
    %19 = vector.shape_cast %18 : vector<1x1x128xf32> to vector<1x128xf32>
    %20 = vector.broadcast %19 : vector<1x128xf32> to vector<2x128xf32>
    %21 = arith.addf %17, %20 : vector<2x128xf32>
    %cst_18 = arith.constant 0.000000e+00 : f32
    %22 = vector.broadcast %cst_18 : f32 to vector<2x128xf32>
    %23 = arith.maximumf %21, %22 : vector<2x128xf32>
    %24 = arith.negf %11 : vector<2x128xf32>
    %25 = math.exp %24 : vector<2x128xf32>
    %cst_19 = arith.constant 1.000000e+00 : f32
    %26 = vector.broadcast %cst_19 : f32 to vector<2x128xf32>
    %27 = arith.addf %26, %25 : vector<2x128xf32>
    %28 = arith.divf %26, %27 : vector<2x128xf32>
    %29 = arith.mulf %3, %28 : vector<2x128xf32>
    %30 = arith.addf %29, %23 : vector<2x128xf32>
    %c0_20 = arith.constant 0 : index
    %c0_21 = arith.constant 0 : index
    %c0_22 = arith.constant 0 : index
    %31 = vector.load %arg1[%c0_20, %c0_21, %c0_22] : memref<5x2x128xf32, #tpu.memory_space<vmem>>, vector<1x2x128xf32>
    %32 = vector.shape_cast %31 : vector<1x2x128xf32> to vector<2x128xf32>
    %33 = arith.addf %30, %32 : vector<2x128xf32>
    %c1 = arith.constant 1 : index
    %c0_23 = arith.constant 0 : index
    %c0_24 = arith.constant 0 : index
    %34 = vector.load %arg2[%c1, %c0_23, %c0_24] : memref<30x128x192xf32, #tpu.memory_space<vmem>>, vector<1x128x192xf32>
    %35 = vector.shape_cast %34 : vector<1x128x192xf32> to vector<128x192xf32>
    %cst_25 = arith.constant dense<0.000000e+00> : vector<2x192xf32>
    %36 = tpu.matmul %33, %35, %cst_25 {dimension_numbers = #tpu.dot_dimension_numbers<[1], [0], [0], [1], [0, 0, 1, 1], [], []>} : vector<2x128xf32>, vector<128x192xf32>, vector<2x192xf32> -> vector<2x192xf32>
    %c1_26 = arith.constant 1 : index
    %c0_27 = arith.constant 0 : index
    %c0_28 = arith.constant 0 : index
    %37 = vector.load %arg3[%c1_26, %c0_27, %c0_28] : memref<30x1x192xf32, #tpu.memory_space<vmem>>, vector<1x1x192xf32>
    %38 = vector.shape_cast %37 : vector<1x1x192xf32> to vector<1x192xf32>
    %39 = vector.broadcast %38 : vector<1x192xf32> to vector<2x192xf32>
    %40 = arith.addf %36, %39 : vector<2x192xf32>
    %41 = vector.extract_strided_slice %40 {offsets = [0, 0], sizes = [2, 128], strides = [1, 1]} : vector<2x192xf32> to vector<2x128xf32>
    %42 = vector.extract_strided_slice %40 {offsets = [0, 128], sizes = [2, 64], strides = [1, 1]} : vector<2x192xf32> to vector<2x64xf32>
    %cst_29 = arith.constant 0.000000e+00 : f32
    %43 = vector.broadcast %cst_29 : f32 to vector<2x64xf32>
    %44 = arith.maximumf %42, %43 : vector<2x64xf32>
    %c1_30 = arith.constant 1 : index
    %c0_31 = arith.constant 0 : index
    %c0_32 = arith.constant 0 : index
    %45 = vector.load %arg4[%c1_30, %c0_31, %c0_32] : memref<30x64x128xf32, #tpu.memory_space<vmem>>, vector<1x64x128xf32>
    %46 = vector.shape_cast %45 : vector<1x64x128xf32> to vector<64x128xf32>
    %cst_33 = arith.constant dense<0.000000e+00> : vector<2x128xf32>
    %47 = tpu.matmul %44, %46, %cst_33 {dimension_numbers = #tpu.dot_dimension_numbers<[1], [0], [0], [1], [0, 0, 1, 1], [], []>} : vector<2x64xf32>, vector<64x128xf32>, vector<2x128xf32> -> vector<2x128xf32>
    %c1_34 = arith.constant 1 : index
    %c0_35 = arith.constant 0 : index
    %c0_36 = arith.constant 0 : index
    %48 = vector.load %arg5[%c1_34, %c0_35, %c0_36] : memref<30x1x128xf32, #tpu.memory_space<vmem>>, vector<1x1x128xf32>
    %49 = vector.shape_cast %48 : vector<1x1x128xf32> to vector<1x128xf32>
    %50 = vector.broadcast %49 : vector<1x128xf32> to vector<2x128xf32>
    %51 = arith.addf %47, %50 : vector<2x128xf32>
    %cst_37 = arith.constant 0.000000e+00 : f32
    %52 = vector.broadcast %cst_37 : f32 to vector<2x128xf32>
    %53 = arith.maximumf %51, %52 : vector<2x128xf32>
    %54 = arith.negf %41 : vector<2x128xf32>
    %55 = math.exp %54 : vector<2x128xf32>
    %cst_38 = arith.constant 1.000000e+00 : f32
    %56 = vector.broadcast %cst_38 : f32 to vector<2x128xf32>
    %57 = arith.addf %56, %55 : vector<2x128xf32>
    %58 = arith.divf %56, %57 : vector<2x128xf32>
    %59 = arith.mulf %33, %58 : vector<2x128xf32>
    %60 = arith.addf %59, %53 : vector<2x128xf32>
    %c0_39 = arith.constant 0 : index
    %c0_40 = arith.constant 0 : index
    %c0_41 = arith.constant 0 : index
    %61 = vector.load %arg1[%c0_39, %c0_40, %c0_41] : memref<5x2x128xf32, #tpu.memory_space<vmem>>, vector<1x2x128xf32>
    %62 = vector.shape_cast %61 : vector<1x2x128xf32> to vector<2x128xf32>
    %63 = arith.addf %60, %62 : vector<2x128xf32>
    %c2 = arith.constant 2 : index
    %c0_42 = arith.constant 0 : index
    %c0_43 = arith.constant 0 : index
    %64 = vector.load %arg2[%c2, %c0_42, %c0_43] : memref<30x128x192xf32, #tpu.memory_space<vmem>>, vector<1x128x192xf32>
    %65 = vector.shape_cast %64 : vector<1x128x192xf32> to vector<128x192xf32>
    %cst_44 = arith.constant dense<0.000000e+00> : vector<2x192xf32>
    %66 = tpu.matmul %63, %65, %cst_44 {dimension_numbers = #tpu.dot_dimension_numbers<[1], [0], [0], [1], [0, 0, 1, 1], [], []>} : vector<2x128xf32>, vector<128x192xf32>, vector<2x192xf32> -> vector<2x192xf32>
    %c2_45 = arith.constant 2 : index
    %c0_46 = arith.constant 0 : index
    %c0_47 = arith.constant 0 : index
    %67 = vector.load %arg3[%c2_45, %c0_46, %c0_47] : memref<30x1x192xf32, #tpu.memory_space<vmem>>, vector<1x1x192xf32>
    %68 = vector.shape_cast %67 : vector<1x1x192xf32> to vector<1x192xf32>
    %69 = vector.broadcast %68 : vector<1x192xf32> to vector<2x192xf32>
    %70 = arith.addf %66, %69 : vector<2x192xf32>
    %71 = vector.extract_strided_slice %70 {offsets = [0, 0], sizes = [2, 128], strides = [1, 1]} : vector<2x192xf32> to vector<2x128xf32>
    %72 = vector.extract_strided_slice %70 {offsets = [0, 128], sizes = [2, 64], strides = [1, 1]} : vector<2x192xf32> to vector<2x64xf32>
    %cst_48 = arith.constant 0.000000e+00 : f32
    %73 = vector.broadcast %cst_48 : f32 to vector<2x64xf32>
    %74 = arith.maximumf %72, %73 : vector<2x64xf32>
    %c2_49 = arith.constant 2 : index
    %c0_50 = arith.constant 0 : index
    %c0_51 = arith.constant 0 : index
    %75 = vector.load %arg4[%c2_49, %c0_50, %c0_51] : memref<30x64x128xf32, #tpu.memory_space<vmem>>, vector<1x64x128xf32>
    %76 = vector.shape_cast %75 : vector<1x64x128xf32> to vector<64x128xf32>
    %cst_52 = arith.constant dense<0.000000e+00> : vector<2x128xf32>
    %77 = tpu.matmul %74, %76, %cst_52 {dimension_numbers = #tpu.dot_dimension_numbers<[1], [0], [0], [1], [0, 0, 1, 1], [], []>} : vector<2x64xf32>, vector<64x128xf32>, vector<2x128xf32> -> vector<2x128xf32>
    %c2_53 = arith.constant 2 : index
    %c0_54 = arith.constant 0 : index
    %c0_55 = arith.constant 0 : index
    %78 = vector.load %arg5[%c2_53, %c0_54, %c0_55] : memref<30x1x128xf32, #tpu.memory_space<vmem>>, vector<1x1x128xf32>
    %79 = vector.shape_cast %78 : vector<1x1x128xf32> to vector<1x128xf32>
    %80 = vector.broadcast %79 : vector<1x128xf32> to vector<2x128xf32>
    %81 = arith.addf %77, %80 : vector<2x128xf32>
    %cst_56 = arith.constant 0.000000e+00 : f32
    %82 = vector.broadcast %cst_56 : f32 to vector<2x128xf32>
    %83 = arith.maximumf %81, %82 : vector<2x128xf32>
    %84 = arith.negf %71 : vector<2x128xf32>
    %85 = math.exp %84 : vector<2x128xf32>
    %cst_57 = arith.constant 1.000000e+00 : f32
    %86 = vector.broadcast %cst_57 : f32 to vector<2x128xf32>
    %87 = arith.addf %86, %85 : vector<2x128xf32>
    %88 = arith.divf %86, %87 : vector<2x128xf32>
    %89 = arith.mulf %63, %88 : vector<2x128xf32>
    %90 = arith.addf %89, %83 : vector<2x128xf32>
    %c0_58 = arith.constant 0 : index
    %c0_59 = arith.constant 0 : index
    %c0_60 = arith.constant 0 : index
    %91 = vector.load %arg1[%c0_58, %c0_59, %c0_60] : memref<5x2x128xf32, #tpu.memory_space<vmem>>, vector<1x2x128xf32>
    %92 = vector.shape_cast %91 : vector<1x2x128xf32> to vector<2x128xf32>
    %93 = arith.addf %90, %92 : vector<2x128xf32>
    %c3 = arith.constant 3 : index
    %c0_61 = arith.constant 0 : index
    %c0_62 = arith.constant 0 : index
    %94 = vector.load %arg2[%c3, %c0_61, %c0_62] : memref<30x128x192xf32, #tpu.memory_space<vmem>>, vector<1x128x192xf32>
    %95 = vector.shape_cast %94 : vector<1x128x192xf32> to vector<128x192xf32>
    %cst_63 = arith.constant dense<0.000000e+00> : vector<2x192xf32>
    %96 = tpu.matmul %93, %95, %cst_63 {dimension_numbers = #tpu.dot_dimension_numbers<[1], [0], [0], [1], [0, 0, 1, 1], [], []>} : vector<2x128xf32>, vector<128x192xf32>, vector<2x192xf32> -> vector<2x192xf32>
    %c3_64 = arith.constant 3 : index
    %c0_65 = arith.constant 0 : index
    %c0_66 = arith.constant 0 : index
    %97 = vector.load %arg3[%c3_64, %c0_65, %c0_66] : memref<30x1x192xf32, #tpu.memory_space<vmem>>, vector<1x1x192xf32>
    %98 = vector.shape_cast %97 : vector<1x1x192xf32> to vector<1x192xf32>
    %99 = vector.broadcast %98 : vector<1x192xf32> to vector<2x192xf32>
    %100 = arith.addf %96, %99 : vector<2x192xf32>
    %101 = vector.extract_strided_slice %100 {offsets = [0, 0], sizes = [2, 128], strides = [1, 1]} : vector<2x192xf32> to vector<2x128xf32>
    %102 = vector.extract_strided_slice %100 {offsets = [0, 128], sizes = [2, 64], strides = [1, 1]} : vector<2x192xf32> to vector<2x64xf32>
    %cst_67 = arith.constant 0.000000e+00 : f32
    %103 = vector.broadcast %cst_67 : f32 to vector<2x64xf32>
    %104 = arith.maximumf %102, %103 : vector<2x64xf32>
    %c3_68 = arith.constant 3 : index
    %c0_69 = arith.constant 0 : index
    %c0_70 = arith.constant 0 : index
    %105 = vector.load %arg4[%c3_68, %c0_69, %c0_70] : memref<30x64x128xf32, #tpu.memory_space<vmem>>, vector<1x64x128xf32>
    %106 = vector.shape_cast %105 : vector<1x64x128xf32> to vector<64x128xf32>
    %cst_71 = arith.constant dense<0.000000e+00> : vector<2x128xf32>
    %107 = tpu.matmul %104, %106, %cst_71 {dimension_numbers = #tpu.dot_dimension_numbers<[1], [0], [0], [1], [0, 0, 1, 1], [], []>} : vector<2x64xf32>, vector<64x128xf32>, vector<2x128xf32> -> vector<2x128xf32>
    %c3_72 = arith.constant 3 : index
    %c0_73 = arith.constant 0 : index
    %c0_74 = arith.constant 0 : index
    %108 = vector.load %arg5[%c3_72, %c0_73, %c0_74] : memref<30x1x128xf32, #tpu.memory_space<vmem>>, vector<1x1x128xf32>
    %109 = vector.shape_cast %108 : vector<1x1x128xf32> to vector<1x128xf32>
    %110 = vector.broadcast %109 : vector<1x128xf32> to vector<2x128xf32>
    %111 = arith.addf %107, %110 : vector<2x128xf32>
    %cst_75 = arith.constant 0.000000e+00 : f32
    %112 = vector.broadcast %cst_75 : f32 to vector<2x128xf32>
    %113 = arith.maximumf %111, %112 : vector<2x128xf32>
    %114 = arith.negf %101 : vector<2x128xf32>
    %115 = math.exp %114 : vector<2x128xf32>
    %cst_76 = arith.constant 1.000000e+00 : f32
    %116 = vector.broadcast %cst_76 : f32 to vector<2x128xf32>
    %117 = arith.addf %116, %115 : vector<2x128xf32>
    %118 = arith.divf %116, %117 : vector<2x128xf32>
    %119 = arith.mulf %93, %118 : vector<2x128xf32>
    %120 = arith.addf %119, %113 : vector<2x128xf32>
    %c0_77 = arith.constant 0 : index
    %c0_78 = arith.constant 0 : index
    %c0_79 = arith.constant 0 : index
    %121 = vector.load %arg1[%c0_77, %c0_78, %c0_79] : memref<5x2x128xf32, #tpu.memory_space<vmem>>, vector<1x2x128xf32>
    %122 = vector.shape_cast %121 : vector<1x2x128xf32> to vector<2x128xf32>
    %123 = arith.addf %120, %122 : vector<2x128xf32>
    %c0_80 = arith.constant 0 : index
    %c0_81 = arith.constant 0 : index
    %c0_82 = arith.constant 0 : index
    %124 = vector.load %arg6[%c0_80, %c0_81, %c0_82] : memref<4x128x128xf32, #tpu.memory_space<vmem>>, vector<1x128x128xf32>
    %125 = vector.shape_cast %124 : vector<1x128x128xf32> to vector<128x128xf32>
    %cst_83 = arith.constant dense<0.000000e+00> : vector<2x128xf32>
    %126 = tpu.matmul %123, %125, %cst_83 {dimension_numbers = #tpu.dot_dimension_numbers<[1], [0], [0], [1], [0, 0, 1, 1], [], []>} : vector<2x128xf32>, vector<128x128xf32>, vector<2x128xf32> -> vector<2x128xf32>
    %c0_84 = arith.constant 0 : index
    %c0_85 = arith.constant 0 : index
    %c0_86 = arith.constant 0 : index
    %127 = vector.load %arg7[%c0_84, %c0_85, %c0_86] : memref<4x1x128xf32, #tpu.memory_space<vmem>>, vector<1x1x128xf32>
    %128 = vector.shape_cast %127 : vector<1x1x128xf32> to vector<1x128xf32>
    %129 = vector.broadcast %128 : vector<1x128xf32> to vector<2x128xf32>
    %130 = arith.addf %126, %129 : vector<2x128xf32>
    %cst_87 = arith.constant 0.000000e+00 : f32
    %131 = vector.broadcast %cst_87 : f32 to vector<2x128xf32>
    %132 = arith.maximumf %130, %131 : vector<2x128xf32>
    %c1_88 = arith.constant 1 : index
    %c0_89 = arith.constant 0 : index
    %c0_90 = arith.constant 0 : index
    %133 = vector.load %arg1[%c1_88, %c0_89, %c0_90] : memref<5x2x128xf32, #tpu.memory_space<vmem>>, vector<1x2x128xf32>
    %134 = vector.shape_cast %133 : vector<1x2x128xf32> to vector<2x128xf32>
    %135 = arith.addf %132, %134 : vector<2x128xf32>
    %c4 = arith.constant 4 : index
    %c0_91 = arith.constant 0 : index
    %c0_92 = arith.constant 0 : index
    %136 = vector.load %arg2[%c4, %c0_91, %c0_92] : memref<30x128x192xf32, #tpu.memory_space<vmem>>, vector<1x128x192xf32>
    %137 = vector.shape_cast %136 : vector<1x128x192xf32> to vector<128x192xf32>
    %cst_93 = arith.constant dense<0.000000e+00> : vector<2x192xf32>
    %138 = tpu.matmul %135, %137, %cst_93 {dimension_numbers = #tpu.dot_dimension_numbers<[1], [0], [0], [1], [0, 0, 1, 1], [], []>} : vector<2x128xf32>, vector<128x192xf32>, vector<2x192xf32> -> vector<2x192xf32>
    %c4_94 = arith.constant 4 : index
    %c0_95 = arith.constant 0 : index
    %c0_96 = arith.constant 0 : index
    %139 = vector.load %arg3[%c4_94, %c0_95, %c0_96] : memref<30x1x192xf32, #tpu.memory_space<vmem>>, vector<1x1x192xf32>
    %140 = vector.shape_cast %139 : vector<1x1x192xf32> to vector<1x192xf32>
    %141 = vector.broadcast %140 : vector<1x192xf32> to vector<2x192xf32>
    %142 = arith.addf %138, %141 : vector<2x192xf32>
    %143 = vector.extract_strided_slice %142 {offsets = [0, 0], sizes = [2, 128], strides = [1, 1]} : vector<2x192xf32> to vector<2x128xf32>
    %144 = vector.extract_strided_slice %142 {offsets = [0, 128], sizes = [2, 64], strides = [1, 1]} : vector<2x192xf32> to vector<2x64xf32>
    %cst_97 = arith.constant 0.000000e+00 : f32
    %145 = vector.broadcast %cst_97 : f32 to vector<2x64xf32>
    %146 = arith.maximumf %144, %145 : vector<2x64xf32>
    %c4_98 = arith.constant 4 : index
    %c0_99 = arith.constant 0 : index
    %c0_100 = arith.constant 0 : index
    %147 = vector.load %arg4[%c4_98, %c0_99, %c0_100] : memref<30x64x128xf32, #tpu.memory_space<vmem>>, vector<1x64x128xf32>
    %148 = vector.shape_cast %147 : vector<1x64x128xf32> to vector<64x128xf32>
    %cst_101 = arith.constant dense<0.000000e+00> : vector<2x128xf32>
    %149 = tpu.matmul %146, %148, %cst_101 {dimension_numbers = #tpu.dot_dimension_numbers<[1], [0], [0], [1], [0, 0, 1, 1], [], []>} : vector<2x64xf32>, vector<64x128xf32>, vector<2x128xf32> -> vector<2x128xf32>
    %c4_102 = arith.constant 4 : index
    %c0_103 = arith.constant 0 : index
    %c0_104 = arith.constant 0 : index
    %150 = vector.load %arg5[%c4_102, %c0_103, %c0_104] : memref<30x1x128xf32, #tpu.memory_space<vmem>>, vector<1x1x128xf32>
    %151 = vector.shape_cast %150 : vector<1x1x128xf32> to vector<1x128xf32>
    %152 = vector.broadcast %151 : vector<1x128xf32> to vector<2x128xf32>
    %153 = arith.addf %149, %152 : vector<2x128xf32>
    %cst_105 = arith.constant 0.000000e+00 : f32
    %154 = vector.broadcast %cst_105 : f32 to vector<2x128xf32>
    %155 = arith.maximumf %153, %154 : vector<2x128xf32>
    %156 = arith.negf %143 : vector<2x128xf32>
    %157 = math.exp %156 : vector<2x128xf32>
    %cst_106 = arith.constant 1.000000e+00 : f32
    %158 = vector.broadcast %cst_106 : f32 to vector<2x128xf32>
    %159 = arith.addf %158, %157 : vector<2x128xf32>
    %160 = arith.divf %158, %159 : vector<2x128xf32>
    %161 = arith.mulf %135, %160 : vector<2x128xf32>
    %162 = arith.addf %161, %155 : vector<2x128xf32>
    %c1_107 = arith.constant 1 : index
    %c0_108 = arith.constant 0 : index
    %c0_109 = arith.constant 0 : index
    %163 = vector.load %arg1[%c1_107, %c0_108, %c0_109] : memref<5x2x128xf32, #tpu.memory_space<vmem>>, vector<1x2x128xf32>
    %164 = vector.shape_cast %163 : vector<1x2x128xf32> to vector<2x128xf32>
    %165 = arith.addf %162, %164 : vector<2x128xf32>
    %c5 = arith.constant 5 : index
    %c0_110 = arith.constant 0 : index
    %c0_111 = arith.constant 0 : index
    %166 = vector.load %arg2[%c5, %c0_110, %c0_111] : memref<30x128x192xf32, #tpu.memory_space<vmem>>, vector<1x128x192xf32>
    %167 = vector.shape_cast %166 : vector<1x128x192xf32> to vector<128x192xf32>
    %cst_112 = arith.constant dense<0.000000e+00> : vector<2x192xf32>
    %168 = tpu.matmul %165, %167, %cst_112 {dimension_numbers = #tpu.dot_dimension_numbers<[1], [0], [0], [1], [0, 0, 1, 1], [], []>} : vector<2x128xf32>, vector<128x192xf32>, vector<2x192xf32> -> vector<2x192xf32>
    %c5_113 = arith.constant 5 : index
    %c0_114 = arith.constant 0 : index
    %c0_115 = arith.constant 0 : index
    %169 = vector.load %arg3[%c5_113, %c0_114, %c0_115] : memref<30x1x192xf32, #tpu.memory_space<vmem>>, vector<1x1x192xf32>
    %170 = vector.shape_cast %169 : vector<1x1x192xf32> to vector<1x192xf32>
    %171 = vector.broadcast %170 : vector<1x192xf32> to vector<2x192xf32>
    %172 = arith.addf %168, %171 : vector<2x192xf32>
    %173 = vector.extract_strided_slice %172 {offsets = [0, 0], sizes = [2, 128], strides = [1, 1]} : vector<2x192xf32> to vector<2x128xf32>
    %174 = vector.extract_strided_slice %172 {offsets = [0, 128], sizes = [2, 64], strides = [1, 1]} : vector<2x192xf32> to vector<2x64xf32>
    %cst_116 = arith.constant 0.000000e+00 : f32
    %175 = vector.broadcast %cst_116 : f32 to vector<2x64xf32>
    %176 = arith.maximumf %174, %175 : vector<2x64xf32>
    %c5_117 = arith.constant 5 : index
    %c0_118 = arith.constant 0 : index
    %c0_119 = arith.constant 0 : index
    %177 = vector.load %arg4[%c5_117, %c0_118, %c0_119] : memref<30x64x128xf32, #tpu.memory_space<vmem>>, vector<1x64x128xf32>
    %178 = vector.shape_cast %177 : vector<1x64x128xf32> to vector<64x128xf32>
    %cst_120 = arith.constant dense<0.000000e+00> : vector<2x128xf32>
    %179 = tpu.matmul %176, %178, %cst_120 {dimension_numbers = #tpu.dot_dimension_numbers<[1], [0], [0], [1], [0, 0, 1, 1], [], []>} : vector<2x64xf32>, vector<64x128xf32>, vector<2x128xf32> -> vector<2x128xf32>
    %c5_121 = arith.constant 5 : index
    %c0_122 = arith.constant 0 : index
    %c0_123 = arith.constant 0 : index
    %180 = vector.load %arg5[%c5_121, %c0_122, %c0_123] : memref<30x1x128xf32, #tpu.memory_space<vmem>>, vector<1x1x128xf32>
    %181 = vector.shape_cast %180 : vector<1x1x128xf32> to vector<1x128xf32>
    %182 = vector.broadcast %181 : vector<1x128xf32> to vector<2x128xf32>
    %183 = arith.addf %179, %182 : vector<2x128xf32>
    %cst_124 = arith.constant 0.000000e+00 : f32
    %184 = vector.broadcast %cst_124 : f32 to vector<2x128xf32>
    %185 = arith.maximumf %183, %184 : vector<2x128xf32>
    %186 = arith.negf %173 : vector<2x128xf32>
    %187 = math.exp %186 : vector<2x128xf32>
    %cst_125 = arith.constant 1.000000e+00 : f32
    %188 = vector.broadcast %cst_125 : f32 to vector<2x128xf32>
    %189 = arith.addf %188, %187 : vector<2x128xf32>
    %190 = arith.divf %188, %189 : vector<2x128xf32>
    %191 = arith.mulf %165, %190 : vector<2x128xf32>
    %192 = arith.addf %191, %185 : vector<2x128xf32>
    %c1_126 = arith.constant 1 : index
    %c0_127 = arith.constant 0 : index
    %c0_128 = arith.constant 0 : index
    %193 = vector.load %arg1[%c1_126, %c0_127, %c0_128] : memref<5x2x128xf32, #tpu.memory_space<vmem>>, vector<1x2x128xf32>
    %194 = vector.shape_cast %193 : vector<1x2x128xf32> to vector<2x128xf32>
    %195 = arith.addf %192, %194 : vector<2x128xf32>
    %c6 = arith.constant 6 : index
    %c0_129 = arith.constant 0 : index
    %c0_130 = arith.constant 0 : index
    %196 = vector.load %arg2[%c6, %c0_129, %c0_130] : memref<30x128x192xf32, #tpu.memory_space<vmem>>, vector<1x128x192xf32>
    %197 = vector.shape_cast %196 : vector<1x128x192xf32> to vector<128x192xf32>
    %cst_131 = arith.constant dense<0.000000e+00> : vector<2x192xf32>
    %198 = tpu.matmul %195, %197, %cst_131 {dimension_numbers = #tpu.dot_dimension_numbers<[1], [0], [0], [1], [0, 0, 1, 1], [], []>} : vector<2x128xf32>, vector<128x192xf32>, vector<2x192xf32> -> vector<2x192xf32>
    %c6_132 = arith.constant 6 : index
    %c0_133 = arith.constant 0 : index
    %c0_134 = arith.constant 0 : index
    %199 = vector.load %arg3[%c6_132, %c0_133, %c0_134] : memref<30x1x192xf32, #tpu.memory_space<vmem>>, vector<1x1x192xf32>
    %200 = vector.shape_cast %199 : vector<1x1x192xf32> to vector<1x192xf32>
    %201 = vector.broadcast %200 : vector<1x192xf32> to vector<2x192xf32>
    %202 = arith.addf %198, %201 : vector<2x192xf32>
    %203 = vector.extract_strided_slice %202 {offsets = [0, 0], sizes = [2, 128], strides = [1, 1]} : vector<2x192xf32> to vector<2x128xf32>
    %204 = vector.extract_strided_slice %202 {offsets = [0, 128], sizes = [2, 64], strides = [1, 1]} : vector<2x192xf32> to vector<2x64xf32>
    %cst_135 = arith.constant 0.000000e+00 : f32
    %205 = vector.broadcast %cst_135 : f32 to vector<2x64xf32>
    %206 = arith.maximumf %204, %205 : vector<2x64xf32>
    %c6_136 = arith.constant 6 : index
    %c0_137 = arith.constant 0 : index
    %c0_138 = arith.constant 0 : index
    %207 = vector.load %arg4[%c6_136, %c0_137, %c0_138] : memref<30x64x128xf32, #tpu.memory_space<vmem>>, vector<1x64x128xf32>
    %208 = vector.shape_cast %207 : vector<1x64x128xf32> to vector<64x128xf32>
    %cst_139 = arith.constant dense<0.000000e+00> : vector<2x128xf32>
    %209 = tpu.matmul %206, %208, %cst_139 {dimension_numbers = #tpu.dot_dimension_numbers<[1], [0], [0], [1], [0, 0, 1, 1], [], []>} : vector<2x64xf32>, vector<64x128xf32>, vector<2x128xf32> -> vector<2x128xf32>
    %c6_140 = arith.constant 6 : index
    %c0_141 = arith.constant 0 : index
    %c0_142 = arith.constant 0 : index
    %210 = vector.load %arg5[%c6_140, %c0_141, %c0_142] : memref<30x1x128xf32, #tpu.memory_space<vmem>>, vector<1x1x128xf32>
    %211 = vector.shape_cast %210 : vector<1x1x128xf32> to vector<1x128xf32>
    %212 = vector.broadcast %211 : vector<1x128xf32> to vector<2x128xf32>
    %213 = arith.addf %209, %212 : vector<2x128xf32>
    %cst_143 = arith.constant 0.000000e+00 : f32
    %214 = vector.broadcast %cst_143 : f32 to vector<2x128xf32>
    %215 = arith.maximumf %213, %214 : vector<2x128xf32>
    %216 = arith.negf %203 : vector<2x128xf32>
    %217 = math.exp %216 : vector<2x128xf32>
    %cst_144 = arith.constant 1.000000e+00 : f32
    %218 = vector.broadcast %cst_144 : f32 to vector<2x128xf32>
    %219 = arith.addf %218, %217 : vector<2x128xf32>
    %220 = arith.divf %218, %219 : vector<2x128xf32>
    %221 = arith.mulf %195, %220 : vector<2x128xf32>
    %222 = arith.addf %221, %215 : vector<2x128xf32>
    %c1_145 = arith.constant 1 : index
    %c0_146 = arith.constant 0 : index
    %c0_147 = arith.constant 0 : index
    %223 = vector.load %arg1[%c1_145, %c0_146, %c0_147] : memref<5x2x128xf32, #tpu.memory_space<vmem>>, vector<1x2x128xf32>
    %224 = vector.shape_cast %223 : vector<1x2x128xf32> to vector<2x128xf32>
    %225 = arith.addf %222, %224 : vector<2x128xf32>
    %c7 = arith.constant 7 : index
    %c0_148 = arith.constant 0 : index
    %c0_149 = arith.constant 0 : index
    %226 = vector.load %arg2[%c7, %c0_148, %c0_149] : memref<30x128x192xf32, #tpu.memory_space<vmem>>, vector<1x128x192xf32>
    %227 = vector.shape_cast %226 : vector<1x128x192xf32> to vector<128x192xf32>
    %cst_150 = arith.constant dense<0.000000e+00> : vector<2x192xf32>
    %228 = tpu.matmul %225, %227, %cst_150 {dimension_numbers = #tpu.dot_dimension_numbers<[1], [0], [0], [1], [0, 0, 1, 1], [], []>} : vector<2x128xf32>, vector<128x192xf32>, vector<2x192xf32> -> vector<2x192xf32>
    %c7_151 = arith.constant 7 : index
    %c0_152 = arith.constant 0 : index
    %c0_153 = arith.constant 0 : index
    %229 = vector.load %arg3[%c7_151, %c0_152, %c0_153] : memref<30x1x192xf32, #tpu.memory_space<vmem>>, vector<1x1x192xf32>
    %230 = vector.shape_cast %229 : vector<1x1x192xf32> to vector<1x192xf32>
    %231 = vector.broadcast %230 : vector<1x192xf32> to vector<2x192xf32>
    %232 = arith.addf %228, %231 : vector<2x192xf32>
    %233 = vector.extract_strided_slice %232 {offsets = [0, 0], sizes = [2, 128], strides = [1, 1]} : vector<2x192xf32> to vector<2x128xf32>
    %234 = vector.extract_strided_slice %232 {offsets = [0, 128], sizes = [2, 64], strides = [1, 1]} : vector<2x192xf32> to vector<2x64xf32>
    %cst_154 = arith.constant 0.000000e+00 : f32
    %235 = vector.broadcast %cst_154 : f32 to vector<2x64xf32>
    %236 = arith.maximumf %234, %235 : vector<2x64xf32>
    %c7_155 = arith.constant 7 : index
    %c0_156 = arith.constant 0 : index
    %c0_157 = arith.constant 0 : index
    %237 = vector.load %arg4[%c7_155, %c0_156, %c0_157] : memref<30x64x128xf32, #tpu.memory_space<vmem>>, vector<1x64x128xf32>
    %238 = vector.shape_cast %237 : vector<1x64x128xf32> to vector<64x128xf32>
    %cst_158 = arith.constant dense<0.000000e+00> : vector<2x128xf32>
    %239 = tpu.matmul %236, %238, %cst_158 {dimension_numbers = #tpu.dot_dimension_numbers<[1], [0], [0], [1], [0, 0, 1, 1], [], []>} : vector<2x64xf32>, vector<64x128xf32>, vector<2x128xf32> -> vector<2x128xf32>
    %c7_159 = arith.constant 7 : index
    %c0_160 = arith.constant 0 : index
    %c0_161 = arith.constant 0 : index
    %240 = vector.load %arg5[%c7_159, %c0_160, %c0_161] : memref<30x1x128xf32, #tpu.memory_space<vmem>>, vector<1x1x128xf32>
    %241 = vector.shape_cast %240 : vector<1x1x128xf32> to vector<1x128xf32>
    %242 = vector.broadcast %241 : vector<1x128xf32> to vector<2x128xf32>
    %243 = arith.addf %239, %242 : vector<2x128xf32>
    %cst_162 = arith.constant 0.000000e+00 : f32
    %244 = vector.broadcast %cst_162 : f32 to vector<2x128xf32>
    %245 = arith.maximumf %243, %244 : vector<2x128xf32>
    %246 = arith.negf %233 : vector<2x128xf32>
    %247 = math.exp %246 : vector<2x128xf32>
    %cst_163 = arith.constant 1.000000e+00 : f32
    %248 = vector.broadcast %cst_163 : f32 to vector<2x128xf32>
    %249 = arith.addf %248, %247 : vector<2x128xf32>
    %250 = arith.divf %248, %249 : vector<2x128xf32>
    %251 = arith.mulf %225, %250 : vector<2x128xf32>
    %252 = arith.addf %251, %245 : vector<2x128xf32>
    %c1_164 = arith.constant 1 : index
    %c0_165 = arith.constant 0 : index
    %c0_166 = arith.constant 0 : index
    %253 = vector.load %arg1[%c1_164, %c0_165, %c0_166] : memref<5x2x128xf32, #tpu.memory_space<vmem>>, vector<1x2x128xf32>
    %254 = vector.shape_cast %253 : vector<1x2x128xf32> to vector<2x128xf32>
    %255 = arith.addf %252, %254 : vector<2x128xf32>
    %c1_167 = arith.constant 1 : index
    %c0_168 = arith.constant 0 : index
    %c0_169 = arith.constant 0 : index
    %256 = vector.load %arg6[%c1_167, %c0_168, %c0_169] : memref<4x128x128xf32, #tpu.memory_space<vmem>>, vector<1x128x128xf32>
    %257 = vector.shape_cast %256 : vector<1x128x128xf32> to vector<128x128xf32>
    %cst_170 = arith.constant dense<0.000000e+00> : vector<2x128xf32>
    %258 = tpu.matmul %255, %257, %cst_170 {dimension_numbers = #tpu.dot_dimension_numbers<[1], [0], [0], [1], [0, 0, 1, 1], [], []>} : vector<2x128xf32>, vector<128x128xf32>, vector<2x128xf32> -> vector<2x128xf32>
    %c1_171 = arith.constant 1 : index
    %c0_172 = arith.constant 0 : index
    %c0_173 = arith.constant 0 : index
    %259 = vector.load %arg7[%c1_171, %c0_172, %c0_173] : memref<4x1x128xf32, #tpu.memory_space<vmem>>, vector<1x1x128xf32>
    %260 = vector.shape_cast %259 : vector<1x1x128xf32> to vector<1x128xf32>
    %261 = vector.broadcast %260 : vector<1x128xf32> to vector<2x128xf32>
    %262 = arith.addf %258, %261 : vector<2x128xf32>
    %cst_174 = arith.constant 0.000000e+00 : f32
    %263 = vector.broadcast %cst_174 : f32 to vector<2x128xf32>
    %264 = arith.maximumf %262, %263 : vector<2x128xf32>
    %c2_175 = arith.constant 2 : index
    %c0_176 = arith.constant 0 : index
    %c0_177 = arith.constant 0 : index
    %265 = vector.load %arg1[%c2_175, %c0_176, %c0_177] : memref<5x2x128xf32, #tpu.memory_space<vmem>>, vector<1x2x128xf32>
    %266 = vector.shape_cast %265 : vector<1x2x128xf32> to vector<2x128xf32>
    %267 = arith.addf %264, %266 : vector<2x128xf32>
    %c8 = arith.constant 8 : index
    %c0_178 = arith.constant 0 : index
    %c0_179 = arith.constant 0 : index
    %268 = vector.load %arg2[%c8, %c0_178, %c0_179] : memref<30x128x192xf32, #tpu.memory_space<vmem>>, vector<1x128x192xf32>
    %269 = vector.shape_cast %268 : vector<1x128x192xf32> to vector<128x192xf32>
    %cst_180 = arith.constant dense<0.000000e+00> : vector<2x192xf32>
    %270 = tpu.matmul %267, %269, %cst_180 {dimension_numbers = #tpu.dot_dimension_numbers<[1], [0], [0], [1], [0, 0, 1, 1], [], []>} : vector<2x128xf32>, vector<128x192xf32>, vector<2x192xf32> -> vector<2x192xf32>
    %c8_181 = arith.constant 8 : index
    %c0_182 = arith.constant 0 : index
    %c0_183 = arith.constant 0 : index
    %271 = vector.load %arg3[%c8_181, %c0_182, %c0_183] : memref<30x1x192xf32, #tpu.memory_space<vmem>>, vector<1x1x192xf32>
    %272 = vector.shape_cast %271 : vector<1x1x192xf32> to vector<1x192xf32>
    %273 = vector.broadcast %272 : vector<1x192xf32> to vector<2x192xf32>
    %274 = arith.addf %270, %273 : vector<2x192xf32>
    %275 = vector.extract_strided_slice %274 {offsets = [0, 0], sizes = [2, 128], strides = [1, 1]} : vector<2x192xf32> to vector<2x128xf32>
    %276 = vector.extract_strided_slice %274 {offsets = [0, 128], sizes = [2, 64], strides = [1, 1]} : vector<2x192xf32> to vector<2x64xf32>
    %cst_184 = arith.constant 0.000000e+00 : f32
    %277 = vector.broadcast %cst_184 : f32 to vector<2x64xf32>
    %278 = arith.maximumf %276, %277 : vector<2x64xf32>
    %c8_185 = arith.constant 8 : index
    %c0_186 = arith.constant 0 : index
    %c0_187 = arith.constant 0 : index
    %279 = vector.load %arg4[%c8_185, %c0_186, %c0_187] : memref<30x64x128xf32, #tpu.memory_space<vmem>>, vector<1x64x128xf32>
    %280 = vector.shape_cast %279 : vector<1x64x128xf32> to vector<64x128xf32>
    %cst_188 = arith.constant dense<0.000000e+00> : vector<2x128xf32>
    %281 = tpu.matmul %278, %280, %cst_188 {dimension_numbers = #tpu.dot_dimension_numbers<[1], [0], [0], [1], [0, 0, 1, 1], [], []>} : vector<2x64xf32>, vector<64x128xf32>, vector<2x128xf32> -> vector<2x128xf32>
    %c8_189 = arith.constant 8 : index
    %c0_190 = arith.constant 0 : index
    %c0_191 = arith.constant 0 : index
    %282 = vector.load %arg5[%c8_189, %c0_190, %c0_191] : memref<30x1x128xf32, #tpu.memory_space<vmem>>, vector<1x1x128xf32>
    %283 = vector.shape_cast %282 : vector<1x1x128xf32> to vector<1x128xf32>
    %284 = vector.broadcast %283 : vector<1x128xf32> to vector<2x128xf32>
    %285 = arith.addf %281, %284 : vector<2x128xf32>
    %cst_192 = arith.constant 0.000000e+00 : f32
    %286 = vector.broadcast %cst_192 : f32 to vector<2x128xf32>
    %287 = arith.maximumf %285, %286 : vector<2x128xf32>
    %288 = arith.negf %275 : vector<2x128xf32>
    %289 = math.exp %288 : vector<2x128xf32>
    %cst_193 = arith.constant 1.000000e+00 : f32
    %290 = vector.broadcast %cst_193 : f32 to vector<2x128xf32>
    %291 = arith.addf %290, %289 : vector<2x128xf32>
    %292 = arith.divf %290, %291 : vector<2x128xf32>
    %293 = arith.mulf %267, %292 : vector<2x128xf32>
    %294 = arith.addf %293, %287 : vector<2x128xf32>
    %c2_194 = arith.constant 2 : index
    %c0_195 = arith.constant 0 : index
    %c0_196 = arith.constant 0 : index
    %295 = vector.load %arg1[%c2_194, %c0_195, %c0_196] : memref<5x2x128xf32, #tpu.memory_space<vmem>>, vector<1x2x128xf32>
    %296 = vector.shape_cast %295 : vector<1x2x128xf32> to vector<2x128xf32>
    %297 = arith.addf %294, %296 : vector<2x128xf32>
    %c9 = arith.constant 9 : index
    %c0_197 = arith.constant 0 : index
    %c0_198 = arith.constant 0 : index
    %298 = vector.load %arg2[%c9, %c0_197, %c0_198] : memref<30x128x192xf32, #tpu.memory_space<vmem>>, vector<1x128x192xf32>
    %299 = vector.shape_cast %298 : vector<1x128x192xf32> to vector<128x192xf32>
    %cst_199 = arith.constant dense<0.000000e+00> : vector<2x192xf32>
    %300 = tpu.matmul %297, %299, %cst_199 {dimension_numbers = #tpu.dot_dimension_numbers<[1], [0], [0], [1], [0, 0, 1, 1], [], []>} : vector<2x128xf32>, vector<128x192xf32>, vector<2x192xf32> -> vector<2x192xf32>
    %c9_200 = arith.constant 9 : index
    %c0_201 = arith.constant 0 : index
    %c0_202 = arith.constant 0 : index
    %301 = vector.load %arg3[%c9_200, %c0_201, %c0_202] : memref<30x1x192xf32, #tpu.memory_space<vmem>>, vector<1x1x192xf32>
    %302 = vector.shape_cast %301 : vector<1x1x192xf32> to vector<1x192xf32>
    %303 = vector.broadcast %302 : vector<1x192xf32> to vector<2x192xf32>
    %304 = arith.addf %300, %303 : vector<2x192xf32>
    %305 = vector.extract_strided_slice %304 {offsets = [0, 0], sizes = [2, 128], strides = [1, 1]} : vector<2x192xf32> to vector<2x128xf32>
    %306 = vector.extract_strided_slice %304 {offsets = [0, 128], sizes = [2, 64], strides = [1, 1]} : vector<2x192xf32> to vector<2x64xf32>
    %cst_203 = arith.constant 0.000000e+00 : f32
    %307 = vector.broadcast %cst_203 : f32 to vector<2x64xf32>
    %308 = arith.maximumf %306, %307 : vector<2x64xf32>
    %c9_204 = arith.constant 9 : index
    %c0_205 = arith.constant 0 : index
    %c0_206 = arith.constant 0 : index
    %309 = vector.load %arg4[%c9_204, %c0_205, %c0_206] : memref<30x64x128xf32, #tpu.memory_space<vmem>>, vector<1x64x128xf32>
    %310 = vector.shape_cast %309 : vector<1x64x128xf32> to vector<64x128xf32>
    %cst_207 = arith.constant dense<0.000000e+00> : vector<2x128xf32>
    %311 = tpu.matmul %308, %310, %cst_207 {dimension_numbers = #tpu.dot_dimension_numbers<[1], [0], [0], [1], [0, 0, 1, 1], [], []>} : vector<2x64xf32>, vector<64x128xf32>, vector<2x128xf32> -> vector<2x128xf32>
    %c9_208 = arith.constant 9 : index
    %c0_209 = arith.constant 0 : index
    %c0_210 = arith.constant 0 : index
    %312 = vector.load %arg5[%c9_208, %c0_209, %c0_210] : memref<30x1x128xf32, #tpu.memory_space<vmem>>, vector<1x1x128xf32>
    %313 = vector.shape_cast %312 : vector<1x1x128xf32> to vector<1x128xf32>
    %314 = vector.broadcast %313 : vector<1x128xf32> to vector<2x128xf32>
    %315 = arith.addf %311, %314 : vector<2x128xf32>
    %cst_211 = arith.constant 0.000000e+00 : f32
    %316 = vector.broadcast %cst_211 : f32 to vector<2x128xf32>
    %317 = arith.maximumf %315, %316 : vector<2x128xf32>
    %318 = arith.negf %305 : vector<2x128xf32>
    %319 = math.exp %318 : vector<2x128xf32>
    %cst_212 = arith.constant 1.000000e+00 : f32
    %320 = vector.broadcast %cst_212 : f32 to vector<2x128xf32>
    %321 = arith.addf %320, %319 : vector<2x128xf32>
    %322 = arith.divf %320, %321 : vector<2x128xf32>
    %323 = arith.mulf %297, %322 : vector<2x128xf32>
    %324 = arith.addf %323, %317 : vector<2x128xf32>
    %c2_213 = arith.constant 2 : index
    %c0_214 = arith.constant 0 : index
    %c0_215 = arith.constant 0 : index
    %325 = vector.load %arg1[%c2_213, %c0_214, %c0_215] : memref<5x2x128xf32, #tpu.memory_space<vmem>>, vector<1x2x128xf32>
    %326 = vector.shape_cast %325 : vector<1x2x128xf32> to vector<2x128xf32>
    %327 = arith.addf %324, %326 : vector<2x128xf32>
    %c10 = arith.constant 10 : index
    %c0_216 = arith.constant 0 : index
    %c0_217 = arith.constant 0 : index
    %328 = vector.load %arg2[%c10, %c0_216, %c0_217] : memref<30x128x192xf32, #tpu.memory_space<vmem>>, vector<1x128x192xf32>
    %329 = vector.shape_cast %328 : vector<1x128x192xf32> to vector<128x192xf32>
    %cst_218 = arith.constant dense<0.000000e+00> : vector<2x192xf32>
    %330 = tpu.matmul %327, %329, %cst_218 {dimension_numbers = #tpu.dot_dimension_numbers<[1], [0], [0], [1], [0, 0, 1, 1], [], []>} : vector<2x128xf32>, vector<128x192xf32>, vector<2x192xf32> -> vector<2x192xf32>
    %c10_219 = arith.constant 10 : index
    %c0_220 = arith.constant 0 : index
    %c0_221 = arith.constant 0 : index
    %331 = vector.load %arg3[%c10_219, %c0_220, %c0_221] : memref<30x1x192xf32, #tpu.memory_space<vmem>>, vector<1x1x192xf32>
    %332 = vector.shape_cast %331 : vector<1x1x192xf32> to vector<1x192xf32>
    %333 = vector.broadcast %332 : vector<1x192xf32> to vector<2x192xf32>
    %334 = arith.addf %330, %333 : vector<2x192xf32>
    %335 = vector.extract_strided_slice %334 {offsets = [0, 0], sizes = [2, 128], strides = [1, 1]} : vector<2x192xf32> to vector<2x128xf32>
    %336 = vector.extract_strided_slice %334 {offsets = [0, 128], sizes = [2, 64], strides = [1, 1]} : vector<2x192xf32> to vector<2x64xf32>
    %cst_222 = arith.constant 0.000000e+00 : f32
    %337 = vector.broadcast %cst_222 : f32 to vector<2x64xf32>
    %338 = arith.maximumf %336, %337 : vector<2x64xf32>
    %c10_223 = arith.constant 10 : index
    %c0_224 = arith.constant 0 : index
    %c0_225 = arith.constant 0 : index
    %339 = vector.load %arg4[%c10_223, %c0_224, %c0_225] : memref<30x64x128xf32, #tpu.memory_space<vmem>>, vector<1x64x128xf32>
    %340 = vector.shape_cast %339 : vector<1x64x128xf32> to vector<64x128xf32>
    %cst_226 = arith.constant dense<0.000000e+00> : vector<2x128xf32>
    %341 = tpu.matmul %338, %340, %cst_226 {dimension_numbers = #tpu.dot_dimension_numbers<[1], [0], [0], [1], [0, 0, 1, 1], [], []>} : vector<2x64xf32>, vector<64x128xf32>, vector<2x128xf32> -> vector<2x128xf32>
    %c10_227 = arith.constant 10 : index
    %c0_228 = arith.constant 0 : index
    %c0_229 = arith.constant 0 : index
    %342 = vector.load %arg5[%c10_227, %c0_228, %c0_229] : memref<30x1x128xf32, #tpu.memory_space<vmem>>, vector<1x1x128xf32>
    %343 = vector.shape_cast %342 : vector<1x1x128xf32> to vector<1x128xf32>
    %344 = vector.broadcast %343 : vector<1x128xf32> to vector<2x128xf32>
    %345 = arith.addf %341, %344 : vector<2x128xf32>
    %cst_230 = arith.constant 0.000000e+00 : f32
    %346 = vector.broadcast %cst_230 : f32 to vector<2x128xf32>
    %347 = arith.maximumf %345, %346 : vector<2x128xf32>
    %348 = arith.negf %335 : vector<2x128xf32>
    %349 = math.exp %348 : vector<2x128xf32>
    %cst_231 = arith.constant 1.000000e+00 : f32
    %350 = vector.broadcast %cst_231 : f32 to vector<2x128xf32>
    %351 = arith.addf %350, %349 : vector<2x128xf32>
    %352 = arith.divf %350, %351 : vector<2x128xf32>
    %353 = arith.mulf %327, %352 : vector<2x128xf32>
    %354 = arith.addf %353, %347 : vector<2x128xf32>
    %c2_232 = arith.constant 2 : index
    %c0_233 = arith.constant 0 : index
    %c0_234 = arith.constant 0 : index
    %355 = vector.load %arg1[%c2_232, %c0_233, %c0_234] : memref<5x2x128xf32, #tpu.memory_space<vmem>>, vector<1x2x128xf32>
    %356 = vector.shape_cast %355 : vector<1x2x128xf32> to vector<2x128xf32>
    %357 = arith.addf %354, %356 : vector<2x128xf32>
    %c11 = arith.constant 11 : index
    %c0_235 = arith.constant 0 : index
    %c0_236 = arith.constant 0 : index
    %358 = vector.load %arg2[%c11, %c0_235, %c0_236] : memref<30x128x192xf32, #tpu.memory_space<vmem>>, vector<1x128x192xf32>
    %359 = vector.shape_cast %358 : vector<1x128x192xf32> to vector<128x192xf32>
    %cst_237 = arith.constant dense<0.000000e+00> : vector<2x192xf32>
    %360 = tpu.matmul %357, %359, %cst_237 {dimension_numbers = #tpu.dot_dimension_numbers<[1], [0], [0], [1], [0, 0, 1, 1], [], []>} : vector<2x128xf32>, vector<128x192xf32>, vector<2x192xf32> -> vector<2x192xf32>
    %c11_238 = arith.constant 11 : index
    %c0_239 = arith.constant 0 : index
    %c0_240 = arith.constant 0 : index
    %361 = vector.load %arg3[%c11_238, %c0_239, %c0_240] : memref<30x1x192xf32, #tpu.memory_space<vmem>>, vector<1x1x192xf32>
    %362 = vector.shape_cast %361 : vector<1x1x192xf32> to vector<1x192xf32>
    %363 = vector.broadcast %362 : vector<1x192xf32> to vector<2x192xf32>
    %364 = arith.addf %360, %363 : vector<2x192xf32>
    %365 = vector.extract_strided_slice %364 {offsets = [0, 0], sizes = [2, 128], strides = [1, 1]} : vector<2x192xf32> to vector<2x128xf32>
    %366 = vector.extract_strided_slice %364 {offsets = [0, 128], sizes = [2, 64], strides = [1, 1]} : vector<2x192xf32> to vector<2x64xf32>
    %cst_241 = arith.constant 0.000000e+00 : f32
    %367 = vector.broadcast %cst_241 : f32 to vector<2x64xf32>
    %368 = arith.maximumf %366, %367 : vector<2x64xf32>
    %c11_242 = arith.constant 11 : index
    %c0_243 = arith.constant 0 : index
    %c0_244 = arith.constant 0 : index
    %369 = vector.load %arg4[%c11_242, %c0_243, %c0_244] : memref<30x64x128xf32, #tpu.memory_space<vmem>>, vector<1x64x128xf32>
    %370 = vector.shape_cast %369 : vector<1x64x128xf32> to vector<64x128xf32>
    %cst_245 = arith.constant dense<0.000000e+00> : vector<2x128xf32>
    %371 = tpu.matmul %368, %370, %cst_245 {dimension_numbers = #tpu.dot_dimension_numbers<[1], [0], [0], [1], [0, 0, 1, 1], [], []>} : vector<2x64xf32>, vector<64x128xf32>, vector<2x128xf32> -> vector<2x128xf32>
    %c11_246 = arith.constant 11 : index
    %c0_247 = arith.constant 0 : index
    %c0_248 = arith.constant 0 : index
    %372 = vector.load %arg5[%c11_246, %c0_247, %c0_248] : memref<30x1x128xf32, #tpu.memory_space<vmem>>, vector<1x1x128xf32>
    %373 = vector.shape_cast %372 : vector<1x1x128xf32> to vector<1x128xf32>
    %374 = vector.broadcast %373 : vector<1x128xf32> to vector<2x128xf32>
    %375 = arith.addf %371, %374 : vector<2x128xf32>
    %cst_249 = arith.constant 0.000000e+00 : f32
    %376 = vector.broadcast %cst_249 : f32 to vector<2x128xf32>
    %377 = arith.maximumf %375, %376 : vector<2x128xf32>
    %378 = arith.negf %365 : vector<2x128xf32>
    %379 = math.exp %378 : vector<2x128xf32>
    %cst_250 = arith.constant 1.000000e+00 : f32
    %380 = vector.broadcast %cst_250 : f32 to vector<2x128xf32>
    %381 = arith.addf %380, %379 : vector<2x128xf32>
    %382 = arith.divf %380, %381 : vector<2x128xf32>
    %383 = arith.mulf %357, %382 : vector<2x128xf32>
    %384 = arith.addf %383, %377 : vector<2x128xf32>
    %c2_251 = arith.constant 2 : index
    %c0_252 = arith.constant 0 : index
    %c0_253 = arith.constant 0 : index
    %385 = vector.load %arg1[%c2_251, %c0_252, %c0_253] : memref<5x2x128xf32, #tpu.memory_space<vmem>>, vector<1x2x128xf32>
    %386 = vector.shape_cast %385 : vector<1x2x128xf32> to vector<2x128xf32>
    %387 = arith.addf %384, %386 : vector<2x128xf32>
    %c12 = arith.constant 12 : index
    %c0_254 = arith.constant 0 : index
    %c0_255 = arith.constant 0 : index
    %388 = vector.load %arg2[%c12, %c0_254, %c0_255] : memref<30x128x192xf32, #tpu.memory_space<vmem>>, vector<1x128x192xf32>
    %389 = vector.shape_cast %388 : vector<1x128x192xf32> to vector<128x192xf32>
    %cst_256 = arith.constant dense<0.000000e+00> : vector<2x192xf32>
    %390 = tpu.matmul %387, %389, %cst_256 {dimension_numbers = #tpu.dot_dimension_numbers<[1], [0], [0], [1], [0, 0, 1, 1], [], []>} : vector<2x128xf32>, vector<128x192xf32>, vector<2x192xf32> -> vector<2x192xf32>
    %c12_257 = arith.constant 12 : index
    %c0_258 = arith.constant 0 : index
    %c0_259 = arith.constant 0 : index
    %391 = vector.load %arg3[%c12_257, %c0_258, %c0_259] : memref<30x1x192xf32, #tpu.memory_space<vmem>>, vector<1x1x192xf32>
    %392 = vector.shape_cast %391 : vector<1x1x192xf32> to vector<1x192xf32>
    %393 = vector.broadcast %392 : vector<1x192xf32> to vector<2x192xf32>
    %394 = arith.addf %390, %393 : vector<2x192xf32>
    %395 = vector.extract_strided_slice %394 {offsets = [0, 0], sizes = [2, 128], strides = [1, 1]} : vector<2x192xf32> to vector<2x128xf32>
    %396 = vector.extract_strided_slice %394 {offsets = [0, 128], sizes = [2, 64], strides = [1, 1]} : vector<2x192xf32> to vector<2x64xf32>
    %cst_260 = arith.constant 0.000000e+00 : f32
    %397 = vector.broadcast %cst_260 : f32 to vector<2x64xf32>
    %398 = arith.maximumf %396, %397 : vector<2x64xf32>
    %c12_261 = arith.constant 12 : index
    %c0_262 = arith.constant 0 : index
    %c0_263 = arith.constant 0 : index
    %399 = vector.load %arg4[%c12_261, %c0_262, %c0_263] : memref<30x64x128xf32, #tpu.memory_space<vmem>>, vector<1x64x128xf32>
    %400 = vector.shape_cast %399 : vector<1x64x128xf32> to vector<64x128xf32>
    %cst_264 = arith.constant dense<0.000000e+00> : vector<2x128xf32>
    %401 = tpu.matmul %398, %400, %cst_264 {dimension_numbers = #tpu.dot_dimension_numbers<[1], [0], [0], [1], [0, 0, 1, 1], [], []>} : vector<2x64xf32>, vector<64x128xf32>, vector<2x128xf32> -> vector<2x128xf32>
    %c12_265 = arith.constant 12 : index
    %c0_266 = arith.constant 0 : index
    %c0_267 = arith.constant 0 : index
    %402 = vector.load %arg5[%c12_265, %c0_266, %c0_267] : memref<30x1x128xf32, #tpu.memory_space<vmem>>, vector<1x1x128xf32>
    %403 = vector.shape_cast %402 : vector<1x1x128xf32> to vector<1x128xf32>
    %404 = vector.broadcast %403 : vector<1x128xf32> to vector<2x128xf32>
    %405 = arith.addf %401, %404 : vector<2x128xf32>
    %cst_268 = arith.constant 0.000000e+00 : f32
    %406 = vector.broadcast %cst_268 : f32 to vector<2x128xf32>
    %407 = arith.maximumf %405, %406 : vector<2x128xf32>
    %408 = arith.negf %395 : vector<2x128xf32>
    %409 = math.exp %408 : vector<2x128xf32>
    %cst_269 = arith.constant 1.000000e+00 : f32
    %410 = vector.broadcast %cst_269 : f32 to vector<2x128xf32>
    %411 = arith.addf %410, %409 : vector<2x128xf32>
    %412 = arith.divf %410, %411 : vector<2x128xf32>
    %413 = arith.mulf %387, %412 : vector<2x128xf32>
    %414 = arith.addf %413, %407 : vector<2x128xf32>
    %c2_270 = arith.constant 2 : index
    %c0_271 = arith.constant 0 : index
    %c0_272 = arith.constant 0 : index
    %415 = vector.load %arg1[%c2_270, %c0_271, %c0_272] : memref<5x2x128xf32, #tpu.memory_space<vmem>>, vector<1x2x128xf32>
    %416 = vector.shape_cast %415 : vector<1x2x128xf32> to vector<2x128xf32>
    %417 = arith.addf %414, %416 : vector<2x128xf32>
    %c13 = arith.constant 13 : index
    %c0_273 = arith.constant 0 : index
    %c0_274 = arith.constant 0 : index
    %418 = vector.load %arg2[%c13, %c0_273, %c0_274] : memref<30x128x192xf32, #tpu.memory_space<vmem>>, vector<1x128x192xf32>
    %419 = vector.shape_cast %418 : vector<1x128x192xf32> to vector<128x192xf32>
    %cst_275 = arith.constant dense<0.000000e+00> : vector<2x192xf32>
    %420 = tpu.matmul %417, %419, %cst_275 {dimension_numbers = #tpu.dot_dimension_numbers<[1], [0], [0], [1], [0, 0, 1, 1], [], []>} : vector<2x128xf32>, vector<128x192xf32>, vector<2x192xf32> -> vector<2x192xf32>
    %c13_276 = arith.constant 13 : index
    %c0_277 = arith.constant 0 : index
    %c0_278 = arith.constant 0 : index
    %421 = vector.load %arg3[%c13_276, %c0_277, %c0_278] : memref<30x1x192xf32, #tpu.memory_space<vmem>>, vector<1x1x192xf32>
    %422 = vector.shape_cast %421 : vector<1x1x192xf32> to vector<1x192xf32>
    %423 = vector.broadcast %422 : vector<1x192xf32> to vector<2x192xf32>
    %424 = arith.addf %420, %423 : vector<2x192xf32>
    %425 = vector.extract_strided_slice %424 {offsets = [0, 0], sizes = [2, 128], strides = [1, 1]} : vector<2x192xf32> to vector<2x128xf32>
    %426 = vector.extract_strided_slice %424 {offsets = [0, 128], sizes = [2, 64], strides = [1, 1]} : vector<2x192xf32> to vector<2x64xf32>
    %cst_279 = arith.constant 0.000000e+00 : f32
    %427 = vector.broadcast %cst_279 : f32 to vector<2x64xf32>
    %428 = arith.maximumf %426, %427 : vector<2x64xf32>
    %c13_280 = arith.constant 13 : index
    %c0_281 = arith.constant 0 : index
    %c0_282 = arith.constant 0 : index
    %429 = vector.load %arg4[%c13_280, %c0_281, %c0_282] : memref<30x64x128xf32, #tpu.memory_space<vmem>>, vector<1x64x128xf32>
    %430 = vector.shape_cast %429 : vector<1x64x128xf32> to vector<64x128xf32>
    %cst_283 = arith.constant dense<0.000000e+00> : vector<2x128xf32>
    %431 = tpu.matmul %428, %430, %cst_283 {dimension_numbers = #tpu.dot_dimension_numbers<[1], [0], [0], [1], [0, 0, 1, 1], [], []>} : vector<2x64xf32>, vector<64x128xf32>, vector<2x128xf32> -> vector<2x128xf32>
    %c13_284 = arith.constant 13 : index
    %c0_285 = arith.constant 0 : index
    %c0_286 = arith.constant 0 : index
    %432 = vector.load %arg5[%c13_284, %c0_285, %c0_286] : memref<30x1x128xf32, #tpu.memory_space<vmem>>, vector<1x1x128xf32>
    %433 = vector.shape_cast %432 : vector<1x1x128xf32> to vector<1x128xf32>
    %434 = vector.broadcast %433 : vector<1x128xf32> to vector<2x128xf32>
    %435 = arith.addf %431, %434 : vector<2x128xf32>
    %cst_287 = arith.constant 0.000000e+00 : f32
    %436 = vector.broadcast %cst_287 : f32 to vector<2x128xf32>
    %437 = arith.maximumf %435, %436 : vector<2x128xf32>
    %438 = arith.negf %425 : vector<2x128xf32>
    %439 = math.exp %438 : vector<2x128xf32>
    %cst_288 = arith.constant 1.000000e+00 : f32
    %440 = vector.broadcast %cst_288 : f32 to vector<2x128xf32>
    %441 = arith.addf %440, %439 : vector<2x128xf32>
    %442 = arith.divf %440, %441 : vector<2x128xf32>
    %443 = arith.mulf %417, %442 : vector<2x128xf32>
    %444 = arith.addf %443, %437 : vector<2x128xf32>
    %c2_289 = arith.constant 2 : index
    %c0_290 = arith.constant 0 : index
    %c0_291 = arith.constant 0 : index
    %445 = vector.load %arg1[%c2_289, %c0_290, %c0_291] : memref<5x2x128xf32, #tpu.memory_space<vmem>>, vector<1x2x128xf32>
    %446 = vector.shape_cast %445 : vector<1x2x128xf32> to vector<2x128xf32>
    %447 = arith.addf %444, %446 : vector<2x128xf32>
    %c14 = arith.constant 14 : index
    %c0_292 = arith.constant 0 : index
    %c0_293 = arith.constant 0 : index
    %448 = vector.load %arg2[%c14, %c0_292, %c0_293] : memref<30x128x192xf32, #tpu.memory_space<vmem>>, vector<1x128x192xf32>
    %449 = vector.shape_cast %448 : vector<1x128x192xf32> to vector<128x192xf32>
    %cst_294 = arith.constant dense<0.000000e+00> : vector<2x192xf32>
    %450 = tpu.matmul %447, %449, %cst_294 {dimension_numbers = #tpu.dot_dimension_numbers<[1], [0], [0], [1], [0, 0, 1, 1], [], []>} : vector<2x128xf32>, vector<128x192xf32>, vector<2x192xf32> -> vector<2x192xf32>
    %c14_295 = arith.constant 14 : index
    %c0_296 = arith.constant 0 : index
    %c0_297 = arith.constant 0 : index
    %451 = vector.load %arg3[%c14_295, %c0_296, %c0_297] : memref<30x1x192xf32, #tpu.memory_space<vmem>>, vector<1x1x192xf32>
    %452 = vector.shape_cast %451 : vector<1x1x192xf32> to vector<1x192xf32>
    %453 = vector.broadcast %452 : vector<1x192xf32> to vector<2x192xf32>
    %454 = arith.addf %450, %453 : vector<2x192xf32>
    %455 = vector.extract_strided_slice %454 {offsets = [0, 0], sizes = [2, 128], strides = [1, 1]} : vector<2x192xf32> to vector<2x128xf32>
    %456 = vector.extract_strided_slice %454 {offsets = [0, 128], sizes = [2, 64], strides = [1, 1]} : vector<2x192xf32> to vector<2x64xf32>
    %cst_298 = arith.constant 0.000000e+00 : f32
    %457 = vector.broadcast %cst_298 : f32 to vector<2x64xf32>
    %458 = arith.maximumf %456, %457 : vector<2x64xf32>
    %c14_299 = arith.constant 14 : index
    %c0_300 = arith.constant 0 : index
    %c0_301 = arith.constant 0 : index
    %459 = vector.load %arg4[%c14_299, %c0_300, %c0_301] : memref<30x64x128xf32, #tpu.memory_space<vmem>>, vector<1x64x128xf32>
    %460 = vector.shape_cast %459 : vector<1x64x128xf32> to vector<64x128xf32>
    %cst_302 = arith.constant dense<0.000000e+00> : vector<2x128xf32>
    %461 = tpu.matmul %458, %460, %cst_302 {dimension_numbers = #tpu.dot_dimension_numbers<[1], [0], [0], [1], [0, 0, 1, 1], [], []>} : vector<2x64xf32>, vector<64x128xf32>, vector<2x128xf32> -> vector<2x128xf32>
    %c14_303 = arith.constant 14 : index
    %c0_304 = arith.constant 0 : index
    %c0_305 = arith.constant 0 : index
    %462 = vector.load %arg5[%c14_303, %c0_304, %c0_305] : memref<30x1x128xf32, #tpu.memory_space<vmem>>, vector<1x1x128xf32>
    %463 = vector.shape_cast %462 : vector<1x1x128xf32> to vector<1x128xf32>
    %464 = vector.broadcast %463 : vector<1x128xf32> to vector<2x128xf32>
    %465 = arith.addf %461, %464 : vector<2x128xf32>
    %cst_306 = arith.constant 0.000000e+00 : f32
    %466 = vector.broadcast %cst_306 : f32 to vector<2x128xf32>
    %467 = arith.maximumf %465, %466 : vector<2x128xf32>
    %468 = arith.negf %455 : vector<2x128xf32>
    %469 = math.exp %468 : vector<2x128xf32>
    %cst_307 = arith.constant 1.000000e+00 : f32
    %470 = vector.broadcast %cst_307 : f32 to vector<2x128xf32>
    %471 = arith.addf %470, %469 : vector<2x128xf32>
    %472 = arith.divf %470, %471 : vector<2x128xf32>
    %473 = arith.mulf %447, %472 : vector<2x128xf32>
    %474 = arith.addf %473, %467 : vector<2x128xf32>
    %c2_308 = arith.constant 2 : index
    %c0_309 = arith.constant 0 : index
    %c0_310 = arith.constant 0 : index
    %475 = vector.load %arg1[%c2_308, %c0_309, %c0_310] : memref<5x2x128xf32, #tpu.memory_space<vmem>>, vector<1x2x128xf32>
    %476 = vector.shape_cast %475 : vector<1x2x128xf32> to vector<2x128xf32>
    %477 = arith.addf %474, %476 : vector<2x128xf32>
    %c15 = arith.constant 15 : index
    %c0_311 = arith.constant 0 : index
    %c0_312 = arith.constant 0 : index
    %478 = vector.load %arg2[%c15, %c0_311, %c0_312] : memref<30x128x192xf32, #tpu.memory_space<vmem>>, vector<1x128x192xf32>
    %479 = vector.shape_cast %478 : vector<1x128x192xf32> to vector<128x192xf32>
    %cst_313 = arith.constant dense<0.000000e+00> : vector<2x192xf32>
    %480 = tpu.matmul %477, %479, %cst_313 {dimension_numbers = #tpu.dot_dimension_numbers<[1], [0], [0], [1], [0, 0, 1, 1], [], []>} : vector<2x128xf32>, vector<128x192xf32>, vector<2x192xf32> -> vector<2x192xf32>
    %c15_314 = arith.constant 15 : index
    %c0_315 = arith.constant 0 : index
    %c0_316 = arith.constant 0 : index
    %481 = vector.load %arg3[%c15_314, %c0_315, %c0_316] : memref<30x1x192xf32, #tpu.memory_space<vmem>>, vector<1x1x192xf32>
    %482 = vector.shape_cast %481 : vector<1x1x192xf32> to vector<1x192xf32>
    %483 = vector.broadcast %482 : vector<1x192xf32> to vector<2x192xf32>
    %484 = arith.addf %480, %483 : vector<2x192xf32>
    %485 = vector.extract_strided_slice %484 {offsets = [0, 0], sizes = [2, 128], strides = [1, 1]} : vector<2x192xf32> to vector<2x128xf32>
    %486 = vector.extract_strided_slice %484 {offsets = [0, 128], sizes = [2, 64], strides = [1, 1]} : vector<2x192xf32> to vector<2x64xf32>
    %cst_317 = arith.constant 0.000000e+00 : f32
    %487 = vector.broadcast %cst_317 : f32 to vector<2x64xf32>
    %488 = arith.maximumf %486, %487 : vector<2x64xf32>
    %c15_318 = arith.constant 15 : index
    %c0_319 = arith.constant 0 : index
    %c0_320 = arith.constant 0 : index
    %489 = vector.load %arg4[%c15_318, %c0_319, %c0_320] : memref<30x64x128xf32, #tpu.memory_space<vmem>>, vector<1x64x128xf32>
    %490 = vector.shape_cast %489 : vector<1x64x128xf32> to vector<64x128xf32>
    %cst_321 = arith.constant dense<0.000000e+00> : vector<2x128xf32>
    %491 = tpu.matmul %488, %490, %cst_321 {dimension_numbers = #tpu.dot_dimension_numbers<[1], [0], [0], [1], [0, 0, 1, 1], [], []>} : vector<2x64xf32>, vector<64x128xf32>, vector<2x128xf32> -> vector<2x128xf32>
    %c15_322 = arith.constant 15 : index
    %c0_323 = arith.constant 0 : index
    %c0_324 = arith.constant 0 : index
    %492 = vector.load %arg5[%c15_322, %c0_323, %c0_324] : memref<30x1x128xf32, #tpu.memory_space<vmem>>, vector<1x1x128xf32>
    %493 = vector.shape_cast %492 : vector<1x1x128xf32> to vector<1x128xf32>
    %494 = vector.broadcast %493 : vector<1x128xf32> to vector<2x128xf32>
    %495 = arith.addf %491, %494 : vector<2x128xf32>
    %cst_325 = arith.constant 0.000000e+00 : f32
    %496 = vector.broadcast %cst_325 : f32 to vector<2x128xf32>
    %497 = arith.maximumf %495, %496 : vector<2x128xf32>
    %498 = arith.negf %485 : vector<2x128xf32>
    %499 = math.exp %498 : vector<2x128xf32>
    %cst_326 = arith.constant 1.000000e+00 : f32
    %500 = vector.broadcast %cst_326 : f32 to vector<2x128xf32>
    %501 = arith.addf %500, %499 : vector<2x128xf32>
    %502 = arith.divf %500, %501 : vector<2x128xf32>
    %503 = arith.mulf %477, %502 : vector<2x128xf32>
    %504 = arith.addf %503, %497 : vector<2x128xf32>
    %c2_327 = arith.constant 2 : index
    %c0_328 = arith.constant 0 : index
    %c0_329 = arith.constant 0 : index
    %505 = vector.load %arg1[%c2_327, %c0_328, %c0_329] : memref<5x2x128xf32, #tpu.memory_space<vmem>>, vector<1x2x128xf32>
    %506 = vector.shape_cast %505 : vector<1x2x128xf32> to vector<2x128xf32>
    %507 = arith.addf %504, %506 : vector<2x128xf32>
    %c2_330 = arith.constant 2 : index
    %c0_331 = arith.constant 0 : index
    %c0_332 = arith.constant 0 : index
    %508 = vector.load %arg6[%c2_330, %c0_331, %c0_332] : memref<4x128x128xf32, #tpu.memory_space<vmem>>, vector<1x128x128xf32>
    %509 = vector.shape_cast %508 : vector<1x128x128xf32> to vector<128x128xf32>
    %cst_333 = arith.constant dense<0.000000e+00> : vector<2x128xf32>
    %510 = tpu.matmul %507, %509, %cst_333 {dimension_numbers = #tpu.dot_dimension_numbers<[1], [0], [0], [1], [0, 0, 1, 1], [], []>} : vector<2x128xf32>, vector<128x128xf32>, vector<2x128xf32> -> vector<2x128xf32>
    %c2_334 = arith.constant 2 : index
    %c0_335 = arith.constant 0 : index
    %c0_336 = arith.constant 0 : index
    %511 = vector.load %arg7[%c2_334, %c0_335, %c0_336] : memref<4x1x128xf32, #tpu.memory_space<vmem>>, vector<1x1x128xf32>
    %512 = vector.shape_cast %511 : vector<1x1x128xf32> to vector<1x128xf32>
    %513 = vector.broadcast %512 : vector<1x128xf32> to vector<2x128xf32>
    %514 = arith.addf %510, %513 : vector<2x128xf32>
    %cst_337 = arith.constant 0.000000e+00 : f32
    %515 = vector.broadcast %cst_337 : f32 to vector<2x128xf32>
    %516 = arith.maximumf %514, %515 : vector<2x128xf32>
    %c3_338 = arith.constant 3 : index
    %c0_339 = arith.constant 0 : index
    %c0_340 = arith.constant 0 : index
    %517 = vector.load %arg1[%c3_338, %c0_339, %c0_340] : memref<5x2x128xf32, #tpu.memory_space<vmem>>, vector<1x2x128xf32>
    %518 = vector.shape_cast %517 : vector<1x2x128xf32> to vector<2x128xf32>
    %519 = arith.addf %516, %518 : vector<2x128xf32>
    %c16 = arith.constant 16 : index
    %c0_341 = arith.constant 0 : index
    %c0_342 = arith.constant 0 : index
    %520 = vector.load %arg2[%c16, %c0_341, %c0_342] : memref<30x128x192xf32, #tpu.memory_space<vmem>>, vector<1x128x192xf32>
    %521 = vector.shape_cast %520 : vector<1x128x192xf32> to vector<128x192xf32>
    %cst_343 = arith.constant dense<0.000000e+00> : vector<2x192xf32>
    %522 = tpu.matmul %519, %521, %cst_343 {dimension_numbers = #tpu.dot_dimension_numbers<[1], [0], [0], [1], [0, 0, 1, 1], [], []>} : vector<2x128xf32>, vector<128x192xf32>, vector<2x192xf32> -> vector<2x192xf32>
    %c16_344 = arith.constant 16 : index
    %c0_345 = arith.constant 0 : index
    %c0_346 = arith.constant 0 : index
    %523 = vector.load %arg3[%c16_344, %c0_345, %c0_346] : memref<30x1x192xf32, #tpu.memory_space<vmem>>, vector<1x1x192xf32>
    %524 = vector.shape_cast %523 : vector<1x1x192xf32> to vector<1x192xf32>
    %525 = vector.broadcast %524 : vector<1x192xf32> to vector<2x192xf32>
    %526 = arith.addf %522, %525 : vector<2x192xf32>
    %527 = vector.extract_strided_slice %526 {offsets = [0, 0], sizes = [2, 128], strides = [1, 1]} : vector<2x192xf32> to vector<2x128xf32>
    %528 = vector.extract_strided_slice %526 {offsets = [0, 128], sizes = [2, 64], strides = [1, 1]} : vector<2x192xf32> to vector<2x64xf32>
    %cst_347 = arith.constant 0.000000e+00 : f32
    %529 = vector.broadcast %cst_347 : f32 to vector<2x64xf32>
    %530 = arith.maximumf %528, %529 : vector<2x64xf32>
    %c16_348 = arith.constant 16 : index
    %c0_349 = arith.constant 0 : index
    %c0_350 = arith.constant 0 : index
    %531 = vector.load %arg4[%c16_348, %c0_349, %c0_350] : memref<30x64x128xf32, #tpu.memory_space<vmem>>, vector<1x64x128xf32>
    %532 = vector.shape_cast %531 : vector<1x64x128xf32> to vector<64x128xf32>
    %cst_351 = arith.constant dense<0.000000e+00> : vector<2x128xf32>
    %533 = tpu.matmul %530, %532, %cst_351 {dimension_numbers = #tpu.dot_dimension_numbers<[1], [0], [0], [1], [0, 0, 1, 1], [], []>} : vector<2x64xf32>, vector<64x128xf32>, vector<2x128xf32> -> vector<2x128xf32>
    %c16_352 = arith.constant 16 : index
    %c0_353 = arith.constant 0 : index
    %c0_354 = arith.constant 0 : index
    %534 = vector.load %arg5[%c16_352, %c0_353, %c0_354] : memref<30x1x128xf32, #tpu.memory_space<vmem>>, vector<1x1x128xf32>
    %535 = vector.shape_cast %534 : vector<1x1x128xf32> to vector<1x128xf32>
    %536 = vector.broadcast %535 : vector<1x128xf32> to vector<2x128xf32>
    %537 = arith.addf %533, %536 : vector<2x128xf32>
    %cst_355 = arith.constant 0.000000e+00 : f32
    %538 = vector.broadcast %cst_355 : f32 to vector<2x128xf32>
    %539 = arith.maximumf %537, %538 : vector<2x128xf32>
    %540 = arith.negf %527 : vector<2x128xf32>
    %541 = math.exp %540 : vector<2x128xf32>
    %cst_356 = arith.constant 1.000000e+00 : f32
    %542 = vector.broadcast %cst_356 : f32 to vector<2x128xf32>
    %543 = arith.addf %542, %541 : vector<2x128xf32>
    %544 = arith.divf %542, %543 : vector<2x128xf32>
    %545 = arith.mulf %519, %544 : vector<2x128xf32>
    %546 = arith.addf %545, %539 : vector<2x128xf32>
    %c3_357 = arith.constant 3 : index
    %c0_358 = arith.constant 0 : index
    %c0_359 = arith.constant 0 : index
    %547 = vector.load %arg1[%c3_357, %c0_358, %c0_359] : memref<5x2x128xf32, #tpu.memory_space<vmem>>, vector<1x2x128xf32>
    %548 = vector.shape_cast %547 : vector<1x2x128xf32> to vector<2x128xf32>
    %549 = arith.addf %546, %548 : vector<2x128xf32>
    %c17 = arith.constant 17 : index
    %c0_360 = arith.constant 0 : index
    %c0_361 = arith.constant 0 : index
    %550 = vector.load %arg2[%c17, %c0_360, %c0_361] : memref<30x128x192xf32, #tpu.memory_space<vmem>>, vector<1x128x192xf32>
    %551 = vector.shape_cast %550 : vector<1x128x192xf32> to vector<128x192xf32>
    %cst_362 = arith.constant dense<0.000000e+00> : vector<2x192xf32>
    %552 = tpu.matmul %549, %551, %cst_362 {dimension_numbers = #tpu.dot_dimension_numbers<[1], [0], [0], [1], [0, 0, 1, 1], [], []>} : vector<2x128xf32>, vector<128x192xf32>, vector<2x192xf32> -> vector<2x192xf32>
    %c17_363 = arith.constant 17 : index
    %c0_364 = arith.constant 0 : index
    %c0_365 = arith.constant 0 : index
    %553 = vector.load %arg3[%c17_363, %c0_364, %c0_365] : memref<30x1x192xf32, #tpu.memory_space<vmem>>, vector<1x1x192xf32>
    %554 = vector.shape_cast %553 : vector<1x1x192xf32> to vector<1x192xf32>
    %555 = vector.broadcast %554 : vector<1x192xf32> to vector<2x192xf32>
    %556 = arith.addf %552, %555 : vector<2x192xf32>
    %557 = vector.extract_strided_slice %556 {offsets = [0, 0], sizes = [2, 128], strides = [1, 1]} : vector<2x192xf32> to vector<2x128xf32>
    %558 = vector.extract_strided_slice %556 {offsets = [0, 128], sizes = [2, 64], strides = [1, 1]} : vector<2x192xf32> to vector<2x64xf32>
    %cst_366 = arith.constant 0.000000e+00 : f32
    %559 = vector.broadcast %cst_366 : f32 to vector<2x64xf32>
    %560 = arith.maximumf %558, %559 : vector<2x64xf32>
    %c17_367 = arith.constant 17 : index
    %c0_368 = arith.constant 0 : index
    %c0_369 = arith.constant 0 : index
    %561 = vector.load %arg4[%c17_367, %c0_368, %c0_369] : memref<30x64x128xf32, #tpu.memory_space<vmem>>, vector<1x64x128xf32>
    %562 = vector.shape_cast %561 : vector<1x64x128xf32> to vector<64x128xf32>
    %cst_370 = arith.constant dense<0.000000e+00> : vector<2x128xf32>
    %563 = tpu.matmul %560, %562, %cst_370 {dimension_numbers = #tpu.dot_dimension_numbers<[1], [0], [0], [1], [0, 0, 1, 1], [], []>} : vector<2x64xf32>, vector<64x128xf32>, vector<2x128xf32> -> vector<2x128xf32>
    %c17_371 = arith.constant 17 : index
    %c0_372 = arith.constant 0 : index
    %c0_373 = arith.constant 0 : index
    %564 = vector.load %arg5[%c17_371, %c0_372, %c0_373] : memref<30x1x128xf32, #tpu.memory_space<vmem>>, vector<1x1x128xf32>
    %565 = vector.shape_cast %564 : vector<1x1x128xf32> to vector<1x128xf32>
    %566 = vector.broadcast %565 : vector<1x128xf32> to vector<2x128xf32>
    %567 = arith.addf %563, %566 : vector<2x128xf32>
    %cst_374 = arith.constant 0.000000e+00 : f32
    %568 = vector.broadcast %cst_374 : f32 to vector<2x128xf32>
    %569 = arith.maximumf %567, %568 : vector<2x128xf32>
    %570 = arith.negf %557 : vector<2x128xf32>
    %571 = math.exp %570 : vector<2x128xf32>
    %cst_375 = arith.constant 1.000000e+00 : f32
    %572 = vector.broadcast %cst_375 : f32 to vector<2x128xf32>
    %573 = arith.addf %572, %571 : vector<2x128xf32>
    %574 = arith.divf %572, %573 : vector<2x128xf32>
    %575 = arith.mulf %549, %574 : vector<2x128xf32>
    %576 = arith.addf %575, %569 : vector<2x128xf32>
    %c3_376 = arith.constant 3 : index
    %c0_377 = arith.constant 0 : index
    %c0_378 = arith.constant 0 : index
    %577 = vector.load %arg1[%c3_376, %c0_377, %c0_378] : memref<5x2x128xf32, #tpu.memory_space<vmem>>, vector<1x2x128xf32>
    %578 = vector.shape_cast %577 : vector<1x2x128xf32> to vector<2x128xf32>
    %579 = arith.addf %576, %578 : vector<2x128xf32>
    %c18 = arith.constant 18 : index
    %c0_379 = arith.constant 0 : index
    %c0_380 = arith.constant 0 : index
    %580 = vector.load %arg2[%c18, %c0_379, %c0_380] : memref<30x128x192xf32, #tpu.memory_space<vmem>>, vector<1x128x192xf32>
    %581 = vector.shape_cast %580 : vector<1x128x192xf32> to vector<128x192xf32>
    %cst_381 = arith.constant dense<0.000000e+00> : vector<2x192xf32>
    %582 = tpu.matmul %579, %581, %cst_381 {dimension_numbers = #tpu.dot_dimension_numbers<[1], [0], [0], [1], [0, 0, 1, 1], [], []>} : vector<2x128xf32>, vector<128x192xf32>, vector<2x192xf32> -> vector<2x192xf32>
    %c18_382 = arith.constant 18 : index
    %c0_383 = arith.constant 0 : index
    %c0_384 = arith.constant 0 : index
    %583 = vector.load %arg3[%c18_382, %c0_383, %c0_384] : memref<30x1x192xf32, #tpu.memory_space<vmem>>, vector<1x1x192xf32>
    %584 = vector.shape_cast %583 : vector<1x1x192xf32> to vector<1x192xf32>
    %585 = vector.broadcast %584 : vector<1x192xf32> to vector<2x192xf32>
    %586 = arith.addf %582, %585 : vector<2x192xf32>
    %587 = vector.extract_strided_slice %586 {offsets = [0, 0], sizes = [2, 128], strides = [1, 1]} : vector<2x192xf32> to vector<2x128xf32>
    %588 = vector.extract_strided_slice %586 {offsets = [0, 128], sizes = [2, 64], strides = [1, 1]} : vector<2x192xf32> to vector<2x64xf32>
    %cst_385 = arith.constant 0.000000e+00 : f32
    %589 = vector.broadcast %cst_385 : f32 to vector<2x64xf32>
    %590 = arith.maximumf %588, %589 : vector<2x64xf32>
    %c18_386 = arith.constant 18 : index
    %c0_387 = arith.constant 0 : index
    %c0_388 = arith.constant 0 : index
    %591 = vector.load %arg4[%c18_386, %c0_387, %c0_388] : memref<30x64x128xf32, #tpu.memory_space<vmem>>, vector<1x64x128xf32>
    %592 = vector.shape_cast %591 : vector<1x64x128xf32> to vector<64x128xf32>
    %cst_389 = arith.constant dense<0.000000e+00> : vector<2x128xf32>
    %593 = tpu.matmul %590, %592, %cst_389 {dimension_numbers = #tpu.dot_dimension_numbers<[1], [0], [0], [1], [0, 0, 1, 1], [], []>} : vector<2x64xf32>, vector<64x128xf32>, vector<2x128xf32> -> vector<2x128xf32>
    %c18_390 = arith.constant 18 : index
    %c0_391 = arith.constant 0 : index
    %c0_392 = arith.constant 0 : index
    %594 = vector.load %arg5[%c18_390, %c0_391, %c0_392] : memref<30x1x128xf32, #tpu.memory_space<vmem>>, vector<1x1x128xf32>
    %595 = vector.shape_cast %594 : vector<1x1x128xf32> to vector<1x128xf32>
    %596 = vector.broadcast %595 : vector<1x128xf32> to vector<2x128xf32>
    %597 = arith.addf %593, %596 : vector<2x128xf32>
    %cst_393 = arith.constant 0.000000e+00 : f32
    %598 = vector.broadcast %cst_393 : f32 to vector<2x128xf32>
    %599 = arith.maximumf %597, %598 : vector<2x128xf32>
    %600 = arith.negf %587 : vector<2x128xf32>
    %601 = math.exp %600 : vector<2x128xf32>
    %cst_394 = arith.constant 1.000000e+00 : f32
    %602 = vector.broadcast %cst_394 : f32 to vector<2x128xf32>
    %603 = arith.addf %602, %601 : vector<2x128xf32>
    %604 = arith.divf %602, %603 : vector<2x128xf32>
    %605 = arith.mulf %579, %604 : vector<2x128xf32>
    %606 = arith.addf %605, %599 : vector<2x128xf32>
    %c3_395 = arith.constant 3 : index
    %c0_396 = arith.constant 0 : index
    %c0_397 = arith.constant 0 : index
    %607 = vector.load %arg1[%c3_395, %c0_396, %c0_397] : memref<5x2x128xf32, #tpu.memory_space<vmem>>, vector<1x2x128xf32>
    %608 = vector.shape_cast %607 : vector<1x2x128xf32> to vector<2x128xf32>
    %609 = arith.addf %606, %608 : vector<2x128xf32>
    %c19 = arith.constant 19 : index
    %c0_398 = arith.constant 0 : index
    %c0_399 = arith.constant 0 : index
    %610 = vector.load %arg2[%c19, %c0_398, %c0_399] : memref<30x128x192xf32, #tpu.memory_space<vmem>>, vector<1x128x192xf32>
    %611 = vector.shape_cast %610 : vector<1x128x192xf32> to vector<128x192xf32>
    %cst_400 = arith.constant dense<0.000000e+00> : vector<2x192xf32>
    %612 = tpu.matmul %609, %611, %cst_400 {dimension_numbers = #tpu.dot_dimension_numbers<[1], [0], [0], [1], [0, 0, 1, 1], [], []>} : vector<2x128xf32>, vector<128x192xf32>, vector<2x192xf32> -> vector<2x192xf32>
    %c19_401 = arith.constant 19 : index
    %c0_402 = arith.constant 0 : index
    %c0_403 = arith.constant 0 : index
    %613 = vector.load %arg3[%c19_401, %c0_402, %c0_403] : memref<30x1x192xf32, #tpu.memory_space<vmem>>, vector<1x1x192xf32>
    %614 = vector.shape_cast %613 : vector<1x1x192xf32> to vector<1x192xf32>
    %615 = vector.broadcast %614 : vector<1x192xf32> to vector<2x192xf32>
    %616 = arith.addf %612, %615 : vector<2x192xf32>
    %617 = vector.extract_strided_slice %616 {offsets = [0, 0], sizes = [2, 128], strides = [1, 1]} : vector<2x192xf32> to vector<2x128xf32>
    %618 = vector.extract_strided_slice %616 {offsets = [0, 128], sizes = [2, 64], strides = [1, 1]} : vector<2x192xf32> to vector<2x64xf32>
    %cst_404 = arith.constant 0.000000e+00 : f32
    %619 = vector.broadcast %cst_404 : f32 to vector<2x64xf32>
    %620 = arith.maximumf %618, %619 : vector<2x64xf32>
    %c19_405 = arith.constant 19 : index
    %c0_406 = arith.constant 0 : index
    %c0_407 = arith.constant 0 : index
    %621 = vector.load %arg4[%c19_405, %c0_406, %c0_407] : memref<30x64x128xf32, #tpu.memory_space<vmem>>, vector<1x64x128xf32>
    %622 = vector.shape_cast %621 : vector<1x64x128xf32> to vector<64x128xf32>
    %cst_408 = arith.constant dense<0.000000e+00> : vector<2x128xf32>
    %623 = tpu.matmul %620, %622, %cst_408 {dimension_numbers = #tpu.dot_dimension_numbers<[1], [0], [0], [1], [0, 0, 1, 1], [], []>} : vector<2x64xf32>, vector<64x128xf32>, vector<2x128xf32> -> vector<2x128xf32>
    %c19_409 = arith.constant 19 : index
    %c0_410 = arith.constant 0 : index
    %c0_411 = arith.constant 0 : index
    %624 = vector.load %arg5[%c19_409, %c0_410, %c0_411] : memref<30x1x128xf32, #tpu.memory_space<vmem>>, vector<1x1x128xf32>
    %625 = vector.shape_cast %624 : vector<1x1x128xf32> to vector<1x128xf32>
    %626 = vector.broadcast %625 : vector<1x128xf32> to vector<2x128xf32>
    %627 = arith.addf %623, %626 : vector<2x128xf32>
    %cst_412 = arith.constant 0.000000e+00 : f32
    %628 = vector.broadcast %cst_412 : f32 to vector<2x128xf32>
    %629 = arith.maximumf %627, %628 : vector<2x128xf32>
    %630 = arith.negf %617 : vector<2x128xf32>
    %631 = math.exp %630 : vector<2x128xf32>
    %cst_413 = arith.constant 1.000000e+00 : f32
    %632 = vector.broadcast %cst_413 : f32 to vector<2x128xf32>
    %633 = arith.addf %632, %631 : vector<2x128xf32>
    %634 = arith.divf %632, %633 : vector<2x128xf32>
    %635 = arith.mulf %609, %634 : vector<2x128xf32>
    %636 = arith.addf %635, %629 : vector<2x128xf32>
    %c3_414 = arith.constant 3 : index
    %c0_415 = arith.constant 0 : index
    %c0_416 = arith.constant 0 : index
    %637 = vector.load %arg1[%c3_414, %c0_415, %c0_416] : memref<5x2x128xf32, #tpu.memory_space<vmem>>, vector<1x2x128xf32>
    %638 = vector.shape_cast %637 : vector<1x2x128xf32> to vector<2x128xf32>
    %639 = arith.addf %636, %638 : vector<2x128xf32>
    %c20 = arith.constant 20 : index
    %c0_417 = arith.constant 0 : index
    %c0_418 = arith.constant 0 : index
    %640 = vector.load %arg2[%c20, %c0_417, %c0_418] : memref<30x128x192xf32, #tpu.memory_space<vmem>>, vector<1x128x192xf32>
    %641 = vector.shape_cast %640 : vector<1x128x192xf32> to vector<128x192xf32>
    %cst_419 = arith.constant dense<0.000000e+00> : vector<2x192xf32>
    %642 = tpu.matmul %639, %641, %cst_419 {dimension_numbers = #tpu.dot_dimension_numbers<[1], [0], [0], [1], [0, 0, 1, 1], [], []>} : vector<2x128xf32>, vector<128x192xf32>, vector<2x192xf32> -> vector<2x192xf32>
    %c20_420 = arith.constant 20 : index
    %c0_421 = arith.constant 0 : index
    %c0_422 = arith.constant 0 : index
    %643 = vector.load %arg3[%c20_420, %c0_421, %c0_422] : memref<30x1x192xf32, #tpu.memory_space<vmem>>, vector<1x1x192xf32>
    %644 = vector.shape_cast %643 : vector<1x1x192xf32> to vector<1x192xf32>
    %645 = vector.broadcast %644 : vector<1x192xf32> to vector<2x192xf32>
    %646 = arith.addf %642, %645 : vector<2x192xf32>
    %647 = vector.extract_strided_slice %646 {offsets = [0, 0], sizes = [2, 128], strides = [1, 1]} : vector<2x192xf32> to vector<2x128xf32>
    %648 = vector.extract_strided_slice %646 {offsets = [0, 128], sizes = [2, 64], strides = [1, 1]} : vector<2x192xf32> to vector<2x64xf32>
    %cst_423 = arith.constant 0.000000e+00 : f32
    %649 = vector.broadcast %cst_423 : f32 to vector<2x64xf32>
    %650 = arith.maximumf %648, %649 : vector<2x64xf32>
    %c20_424 = arith.constant 20 : index
    %c0_425 = arith.constant 0 : index
    %c0_426 = arith.constant 0 : index
    %651 = vector.load %arg4[%c20_424, %c0_425, %c0_426] : memref<30x64x128xf32, #tpu.memory_space<vmem>>, vector<1x64x128xf32>
    %652 = vector.shape_cast %651 : vector<1x64x128xf32> to vector<64x128xf32>
    %cst_427 = arith.constant dense<0.000000e+00> : vector<2x128xf32>
    %653 = tpu.matmul %650, %652, %cst_427 {dimension_numbers = #tpu.dot_dimension_numbers<[1], [0], [0], [1], [0, 0, 1, 1], [], []>} : vector<2x64xf32>, vector<64x128xf32>, vector<2x128xf32> -> vector<2x128xf32>
    %c20_428 = arith.constant 20 : index
    %c0_429 = arith.constant 0 : index
    %c0_430 = arith.constant 0 : index
    %654 = vector.load %arg5[%c20_428, %c0_429, %c0_430] : memref<30x1x128xf32, #tpu.memory_space<vmem>>, vector<1x1x128xf32>
    %655 = vector.shape_cast %654 : vector<1x1x128xf32> to vector<1x128xf32>
    %656 = vector.broadcast %655 : vector<1x128xf32> to vector<2x128xf32>
    %657 = arith.addf %653, %656 : vector<2x128xf32>
    %cst_431 = arith.constant 0.000000e+00 : f32
    %658 = vector.broadcast %cst_431 : f32 to vector<2x128xf32>
    %659 = arith.maximumf %657, %658 : vector<2x128xf32>
    %660 = arith.negf %647 : vector<2x128xf32>
    %661 = math.exp %660 : vector<2x128xf32>
    %cst_432 = arith.constant 1.000000e+00 : f32
    %662 = vector.broadcast %cst_432 : f32 to vector<2x128xf32>
    %663 = arith.addf %662, %661 : vector<2x128xf32>
    %664 = arith.divf %662, %663 : vector<2x128xf32>
    %665 = arith.mulf %639, %664 : vector<2x128xf32>
    %666 = arith.addf %665, %659 : vector<2x128xf32>
    %c3_433 = arith.constant 3 : index
    %c0_434 = arith.constant 0 : index
    %c0_435 = arith.constant 0 : index
    %667 = vector.load %arg1[%c3_433, %c0_434, %c0_435] : memref<5x2x128xf32, #tpu.memory_space<vmem>>, vector<1x2x128xf32>
    %668 = vector.shape_cast %667 : vector<1x2x128xf32> to vector<2x128xf32>
    %669 = arith.addf %666, %668 : vector<2x128xf32>
    %c21 = arith.constant 21 : index
    %c0_436 = arith.constant 0 : index
    %c0_437 = arith.constant 0 : index
    %670 = vector.load %arg2[%c21, %c0_436, %c0_437] : memref<30x128x192xf32, #tpu.memory_space<vmem>>, vector<1x128x192xf32>
    %671 = vector.shape_cast %670 : vector<1x128x192xf32> to vector<128x192xf32>
    %cst_438 = arith.constant dense<0.000000e+00> : vector<2x192xf32>
    %672 = tpu.matmul %669, %671, %cst_438 {dimension_numbers = #tpu.dot_dimension_numbers<[1], [0], [0], [1], [0, 0, 1, 1], [], []>} : vector<2x128xf32>, vector<128x192xf32>, vector<2x192xf32> -> vector<2x192xf32>
    %c21_439 = arith.constant 21 : index
    %c0_440 = arith.constant 0 : index
    %c0_441 = arith.constant 0 : index
    %673 = vector.load %arg3[%c21_439, %c0_440, %c0_441] : memref<30x1x192xf32, #tpu.memory_space<vmem>>, vector<1x1x192xf32>
    %674 = vector.shape_cast %673 : vector<1x1x192xf32> to vector<1x192xf32>
    %675 = vector.broadcast %674 : vector<1x192xf32> to vector<2x192xf32>
    %676 = arith.addf %672, %675 : vector<2x192xf32>
    %677 = vector.extract_strided_slice %676 {offsets = [0, 0], sizes = [2, 128], strides = [1, 1]} : vector<2x192xf32> to vector<2x128xf32>
    %678 = vector.extract_strided_slice %676 {offsets = [0, 128], sizes = [2, 64], strides = [1, 1]} : vector<2x192xf32> to vector<2x64xf32>
    %cst_442 = arith.constant 0.000000e+00 : f32
    %679 = vector.broadcast %cst_442 : f32 to vector<2x64xf32>
    %680 = arith.maximumf %678, %679 : vector<2x64xf32>
    %c21_443 = arith.constant 21 : index
    %c0_444 = arith.constant 0 : index
    %c0_445 = arith.constant 0 : index
    %681 = vector.load %arg4[%c21_443, %c0_444, %c0_445] : memref<30x64x128xf32, #tpu.memory_space<vmem>>, vector<1x64x128xf32>
    %682 = vector.shape_cast %681 : vector<1x64x128xf32> to vector<64x128xf32>
    %cst_446 = arith.constant dense<0.000000e+00> : vector<2x128xf32>
    %683 = tpu.matmul %680, %682, %cst_446 {dimension_numbers = #tpu.dot_dimension_numbers<[1], [0], [0], [1], [0, 0, 1, 1], [], []>} : vector<2x64xf32>, vector<64x128xf32>, vector<2x128xf32> -> vector<2x128xf32>
    %c21_447 = arith.constant 21 : index
    %c0_448 = arith.constant 0 : index
    %c0_449 = arith.constant 0 : index
    %684 = vector.load %arg5[%c21_447, %c0_448, %c0_449] : memref<30x1x128xf32, #tpu.memory_space<vmem>>, vector<1x1x128xf32>
    %685 = vector.shape_cast %684 : vector<1x1x128xf32> to vector<1x128xf32>
    %686 = vector.broadcast %685 : vector<1x128xf32> to vector<2x128xf32>
    %687 = arith.addf %683, %686 : vector<2x128xf32>
    %cst_450 = arith.constant 0.000000e+00 : f32
    %688 = vector.broadcast %cst_450 : f32 to vector<2x128xf32>
    %689 = arith.maximumf %687, %688 : vector<2x128xf32>
    %690 = arith.negf %677 : vector<2x128xf32>
    %691 = math.exp %690 : vector<2x128xf32>
    %cst_451 = arith.constant 1.000000e+00 : f32
    %692 = vector.broadcast %cst_451 : f32 to vector<2x128xf32>
    %693 = arith.addf %692, %691 : vector<2x128xf32>
    %694 = arith.divf %692, %693 : vector<2x128xf32>
    %695 = arith.mulf %669, %694 : vector<2x128xf32>
    %696 = arith.addf %695, %689 : vector<2x128xf32>
    %c3_452 = arith.constant 3 : index
    %c0_453 = arith.constant 0 : index
    %c0_454 = arith.constant 0 : index
    %697 = vector.load %arg1[%c3_452, %c0_453, %c0_454] : memref<5x2x128xf32, #tpu.memory_space<vmem>>, vector<1x2x128xf32>
    %698 = vector.shape_cast %697 : vector<1x2x128xf32> to vector<2x128xf32>
    %699 = arith.addf %696, %698 : vector<2x128xf32>
    %c22 = arith.constant 22 : index
    %c0_455 = arith.constant 0 : index
    %c0_456 = arith.constant 0 : index
    %700 = vector.load %arg2[%c22, %c0_455, %c0_456] : memref<30x128x192xf32, #tpu.memory_space<vmem>>, vector<1x128x192xf32>
    %701 = vector.shape_cast %700 : vector<1x128x192xf32> to vector<128x192xf32>
    %cst_457 = arith.constant dense<0.000000e+00> : vector<2x192xf32>
    %702 = tpu.matmul %699, %701, %cst_457 {dimension_numbers = #tpu.dot_dimension_numbers<[1], [0], [0], [1], [0, 0, 1, 1], [], []>} : vector<2x128xf32>, vector<128x192xf32>, vector<2x192xf32> -> vector<2x192xf32>
    %c22_458 = arith.constant 22 : index
    %c0_459 = arith.constant 0 : index
    %c0_460 = arith.constant 0 : index
    %703 = vector.load %arg3[%c22_458, %c0_459, %c0_460] : memref<30x1x192xf32, #tpu.memory_space<vmem>>, vector<1x1x192xf32>
    %704 = vector.shape_cast %703 : vector<1x1x192xf32> to vector<1x192xf32>
    %705 = vector.broadcast %704 : vector<1x192xf32> to vector<2x192xf32>
    %706 = arith.addf %702, %705 : vector<2x192xf32>
    %707 = vector.extract_strided_slice %706 {offsets = [0, 0], sizes = [2, 128], strides = [1, 1]} : vector<2x192xf32> to vector<2x128xf32>
    %708 = vector.extract_strided_slice %706 {offsets = [0, 128], sizes = [2, 64], strides = [1, 1]} : vector<2x192xf32> to vector<2x64xf32>
    %cst_461 = arith.constant 0.000000e+00 : f32
    %709 = vector.broadcast %cst_461 : f32 to vector<2x64xf32>
    %710 = arith.maximumf %708, %709 : vector<2x64xf32>
    %c22_462 = arith.constant 22 : index
    %c0_463 = arith.constant 0 : index
    %c0_464 = arith.constant 0 : index
    %711 = vector.load %arg4[%c22_462, %c0_463, %c0_464] : memref<30x64x128xf32, #tpu.memory_space<vmem>>, vector<1x64x128xf32>
    %712 = vector.shape_cast %711 : vector<1x64x128xf32> to vector<64x128xf32>
    %cst_465 = arith.constant dense<0.000000e+00> : vector<2x128xf32>
    %713 = tpu.matmul %710, %712, %cst_465 {dimension_numbers = #tpu.dot_dimension_numbers<[1], [0], [0], [1], [0, 0, 1, 1], [], []>} : vector<2x64xf32>, vector<64x128xf32>, vector<2x128xf32> -> vector<2x128xf32>
    %c22_466 = arith.constant 22 : index
    %c0_467 = arith.constant 0 : index
    %c0_468 = arith.constant 0 : index
    %714 = vector.load %arg5[%c22_466, %c0_467, %c0_468] : memref<30x1x128xf32, #tpu.memory_space<vmem>>, vector<1x1x128xf32>
    %715 = vector.shape_cast %714 : vector<1x1x128xf32> to vector<1x128xf32>
    %716 = vector.broadcast %715 : vector<1x128xf32> to vector<2x128xf32>
    %717 = arith.addf %713, %716 : vector<2x128xf32>
    %cst_469 = arith.constant 0.000000e+00 : f32
    %718 = vector.broadcast %cst_469 : f32 to vector<2x128xf32>
    %719 = arith.maximumf %717, %718 : vector<2x128xf32>
    %720 = arith.negf %707 : vector<2x128xf32>
    %721 = math.exp %720 : vector<2x128xf32>
    %cst_470 = arith.constant 1.000000e+00 : f32
    %722 = vector.broadcast %cst_470 : f32 to vector<2x128xf32>
    %723 = arith.addf %722, %721 : vector<2x128xf32>
    %724 = arith.divf %722, %723 : vector<2x128xf32>
    %725 = arith.mulf %699, %724 : vector<2x128xf32>
    %726 = arith.addf %725, %719 : vector<2x128xf32>
    %c3_471 = arith.constant 3 : index
    %c0_472 = arith.constant 0 : index
    %c0_473 = arith.constant 0 : index
    %727 = vector.load %arg1[%c3_471, %c0_472, %c0_473] : memref<5x2x128xf32, #tpu.memory_space<vmem>>, vector<1x2x128xf32>
    %728 = vector.shape_cast %727 : vector<1x2x128xf32> to vector<2x128xf32>
    %729 = arith.addf %726, %728 : vector<2x128xf32>
    %c23 = arith.constant 23 : index
    %c0_474 = arith.constant 0 : index
    %c0_475 = arith.constant 0 : index
    %730 = vector.load %arg2[%c23, %c0_474, %c0_475] : memref<30x128x192xf32, #tpu.memory_space<vmem>>, vector<1x128x192xf32>
    %731 = vector.shape_cast %730 : vector<1x128x192xf32> to vector<128x192xf32>
    %cst_476 = arith.constant dense<0.000000e+00> : vector<2x192xf32>
    %732 = tpu.matmul %729, %731, %cst_476 {dimension_numbers = #tpu.dot_dimension_numbers<[1], [0], [0], [1], [0, 0, 1, 1], [], []>} : vector<2x128xf32>, vector<128x192xf32>, vector<2x192xf32> -> vector<2x192xf32>
    %c23_477 = arith.constant 23 : index
    %c0_478 = arith.constant 0 : index
    %c0_479 = arith.constant 0 : index
    %733 = vector.load %arg3[%c23_477, %c0_478, %c0_479] : memref<30x1x192xf32, #tpu.memory_space<vmem>>, vector<1x1x192xf32>
    %734 = vector.shape_cast %733 : vector<1x1x192xf32> to vector<1x192xf32>
    %735 = vector.broadcast %734 : vector<1x192xf32> to vector<2x192xf32>
    %736 = arith.addf %732, %735 : vector<2x192xf32>
    %737 = vector.extract_strided_slice %736 {offsets = [0, 0], sizes = [2, 128], strides = [1, 1]} : vector<2x192xf32> to vector<2x128xf32>
    %738 = vector.extract_strided_slice %736 {offsets = [0, 128], sizes = [2, 64], strides = [1, 1]} : vector<2x192xf32> to vector<2x64xf32>
    %cst_480 = arith.constant 0.000000e+00 : f32
    %739 = vector.broadcast %cst_480 : f32 to vector<2x64xf32>
    %740 = arith.maximumf %738, %739 : vector<2x64xf32>
    %c23_481 = arith.constant 23 : index
    %c0_482 = arith.constant 0 : index
    %c0_483 = arith.constant 0 : index
    %741 = vector.load %arg4[%c23_481, %c0_482, %c0_483] : memref<30x64x128xf32, #tpu.memory_space<vmem>>, vector<1x64x128xf32>
    %742 = vector.shape_cast %741 : vector<1x64x128xf32> to vector<64x128xf32>
    %cst_484 = arith.constant dense<0.000000e+00> : vector<2x128xf32>
    %743 = tpu.matmul %740, %742, %cst_484 {dimension_numbers = #tpu.dot_dimension_numbers<[1], [0], [0], [1], [0, 0, 1, 1], [], []>} : vector<2x64xf32>, vector<64x128xf32>, vector<2x128xf32> -> vector<2x128xf32>
    %c23_485 = arith.constant 23 : index
    %c0_486 = arith.constant 0 : index
    %c0_487 = arith.constant 0 : index
    %744 = vector.load %arg5[%c23_485, %c0_486, %c0_487] : memref<30x1x128xf32, #tpu.memory_space<vmem>>, vector<1x1x128xf32>
    %745 = vector.shape_cast %744 : vector<1x1x128xf32> to vector<1x128xf32>
    %746 = vector.broadcast %745 : vector<1x128xf32> to vector<2x128xf32>
    %747 = arith.addf %743, %746 : vector<2x128xf32>
    %cst_488 = arith.constant 0.000000e+00 : f32
    %748 = vector.broadcast %cst_488 : f32 to vector<2x128xf32>
    %749 = arith.maximumf %747, %748 : vector<2x128xf32>
    %750 = arith.negf %737 : vector<2x128xf32>
    %751 = math.exp %750 : vector<2x128xf32>
    %cst_489 = arith.constant 1.000000e+00 : f32
    %752 = vector.broadcast %cst_489 : f32 to vector<2x128xf32>
    %753 = arith.addf %752, %751 : vector<2x128xf32>
    %754 = arith.divf %752, %753 : vector<2x128xf32>
    %755 = arith.mulf %729, %754 : vector<2x128xf32>
    %756 = arith.addf %755, %749 : vector<2x128xf32>
    %c3_490 = arith.constant 3 : index
    %c0_491 = arith.constant 0 : index
    %c0_492 = arith.constant 0 : index
    %757 = vector.load %arg1[%c3_490, %c0_491, %c0_492] : memref<5x2x128xf32, #tpu.memory_space<vmem>>, vector<1x2x128xf32>
    %758 = vector.shape_cast %757 : vector<1x2x128xf32> to vector<2x128xf32>
    %759 = arith.addf %756, %758 : vector<2x128xf32>
    %c3_493 = arith.constant 3 : index
    %c0_494 = arith.constant 0 : index
    %c0_495 = arith.constant 0 : index
    %760 = vector.load %arg6[%c3_493, %c0_494, %c0_495] : memref<4x128x128xf32, #tpu.memory_space<vmem>>, vector<1x128x128xf32>
    %761 = vector.shape_cast %760 : vector<1x128x128xf32> to vector<128x128xf32>
    %cst_496 = arith.constant dense<0.000000e+00> : vector<2x128xf32>
    %762 = tpu.matmul %759, %761, %cst_496 {dimension_numbers = #tpu.dot_dimension_numbers<[1], [0], [0], [1], [0, 0, 1, 1], [], []>} : vector<2x128xf32>, vector<128x128xf32>, vector<2x128xf32> -> vector<2x128xf32>
    %c3_497 = arith.constant 3 : index
    %c0_498 = arith.constant 0 : index
    %c0_499 = arith.constant 0 : index
    %763 = vector.load %arg7[%c3_497, %c0_498, %c0_499] : memref<4x1x128xf32, #tpu.memory_space<vmem>>, vector<1x1x128xf32>
    %764 = vector.shape_cast %763 : vector<1x1x128xf32> to vector<1x128xf32>
    %765 = vector.broadcast %764 : vector<1x128xf32> to vector<2x128xf32>
    %766 = arith.addf %762, %765 : vector<2x128xf32>
    %cst_500 = arith.constant 0.000000e+00 : f32
    %767 = vector.broadcast %cst_500 : f32 to vector<2x128xf32>
    %768 = arith.maximumf %766, %767 : vector<2x128xf32>
    %c4_501 = arith.constant 4 : index
    %c0_502 = arith.constant 0 : index
    %c0_503 = arith.constant 0 : index
    %769 = vector.load %arg1[%c4_501, %c0_502, %c0_503] : memref<5x2x128xf32, #tpu.memory_space<vmem>>, vector<1x2x128xf32>
    %770 = vector.shape_cast %769 : vector<1x2x128xf32> to vector<2x128xf32>
    %771 = arith.addf %768, %770 : vector<2x128xf32>
    %c24 = arith.constant 24 : index
    %c0_504 = arith.constant 0 : index
    %c0_505 = arith.constant 0 : index
    %772 = vector.load %arg2[%c24, %c0_504, %c0_505] : memref<30x128x192xf32, #tpu.memory_space<vmem>>, vector<1x128x192xf32>
    %773 = vector.shape_cast %772 : vector<1x128x192xf32> to vector<128x192xf32>
    %cst_506 = arith.constant dense<0.000000e+00> : vector<2x192xf32>
    %774 = tpu.matmul %771, %773, %cst_506 {dimension_numbers = #tpu.dot_dimension_numbers<[1], [0], [0], [1], [0, 0, 1, 1], [], []>} : vector<2x128xf32>, vector<128x192xf32>, vector<2x192xf32> -> vector<2x192xf32>
    %c24_507 = arith.constant 24 : index
    %c0_508 = arith.constant 0 : index
    %c0_509 = arith.constant 0 : index
    %775 = vector.load %arg3[%c24_507, %c0_508, %c0_509] : memref<30x1x192xf32, #tpu.memory_space<vmem>>, vector<1x1x192xf32>
    %776 = vector.shape_cast %775 : vector<1x1x192xf32> to vector<1x192xf32>
    %777 = vector.broadcast %776 : vector<1x192xf32> to vector<2x192xf32>
    %778 = arith.addf %774, %777 : vector<2x192xf32>
    %779 = vector.extract_strided_slice %778 {offsets = [0, 0], sizes = [2, 128], strides = [1, 1]} : vector<2x192xf32> to vector<2x128xf32>
    %780 = vector.extract_strided_slice %778 {offsets = [0, 128], sizes = [2, 64], strides = [1, 1]} : vector<2x192xf32> to vector<2x64xf32>
    %cst_510 = arith.constant 0.000000e+00 : f32
    %781 = vector.broadcast %cst_510 : f32 to vector<2x64xf32>
    %782 = arith.maximumf %780, %781 : vector<2x64xf32>
    %c24_511 = arith.constant 24 : index
    %c0_512 = arith.constant 0 : index
    %c0_513 = arith.constant 0 : index
    %783 = vector.load %arg4[%c24_511, %c0_512, %c0_513] : memref<30x64x128xf32, #tpu.memory_space<vmem>>, vector<1x64x128xf32>
    %784 = vector.shape_cast %783 : vector<1x64x128xf32> to vector<64x128xf32>
    %cst_514 = arith.constant dense<0.000000e+00> : vector<2x128xf32>
    %785 = tpu.matmul %782, %784, %cst_514 {dimension_numbers = #tpu.dot_dimension_numbers<[1], [0], [0], [1], [0, 0, 1, 1], [], []>} : vector<2x64xf32>, vector<64x128xf32>, vector<2x128xf32> -> vector<2x128xf32>
    %c24_515 = arith.constant 24 : index
    %c0_516 = arith.constant 0 : index
    %c0_517 = arith.constant 0 : index
    %786 = vector.load %arg5[%c24_515, %c0_516, %c0_517] : memref<30x1x128xf32, #tpu.memory_space<vmem>>, vector<1x1x128xf32>
    %787 = vector.shape_cast %786 : vector<1x1x128xf32> to vector<1x128xf32>
    %788 = vector.broadcast %787 : vector<1x128xf32> to vector<2x128xf32>
    %789 = arith.addf %785, %788 : vector<2x128xf32>
    %cst_518 = arith.constant 0.000000e+00 : f32
    %790 = vector.broadcast %cst_518 : f32 to vector<2x128xf32>
    %791 = arith.maximumf %789, %790 : vector<2x128xf32>
    %792 = arith.negf %779 : vector<2x128xf32>
    %793 = math.exp %792 : vector<2x128xf32>
    %cst_519 = arith.constant 1.000000e+00 : f32
    %794 = vector.broadcast %cst_519 : f32 to vector<2x128xf32>
    %795 = arith.addf %794, %793 : vector<2x128xf32>
    %796 = arith.divf %794, %795 : vector<2x128xf32>
    %797 = arith.mulf %771, %796 : vector<2x128xf32>
    %798 = arith.addf %797, %791 : vector<2x128xf32>
    %c4_520 = arith.constant 4 : index
    %c0_521 = arith.constant 0 : index
    %c0_522 = arith.constant 0 : index
    %799 = vector.load %arg1[%c4_520, %c0_521, %c0_522] : memref<5x2x128xf32, #tpu.memory_space<vmem>>, vector<1x2x128xf32>
    %800 = vector.shape_cast %799 : vector<1x2x128xf32> to vector<2x128xf32>
    %801 = arith.addf %798, %800 : vector<2x128xf32>
    %c25 = arith.constant 25 : index
    %c0_523 = arith.constant 0 : index
    %c0_524 = arith.constant 0 : index
    %802 = vector.load %arg2[%c25, %c0_523, %c0_524] : memref<30x128x192xf32, #tpu.memory_space<vmem>>, vector<1x128x192xf32>
    %803 = vector.shape_cast %802 : vector<1x128x192xf32> to vector<128x192xf32>
    %cst_525 = arith.constant dense<0.000000e+00> : vector<2x192xf32>
    %804 = tpu.matmul %801, %803, %cst_525 {dimension_numbers = #tpu.dot_dimension_numbers<[1], [0], [0], [1], [0, 0, 1, 1], [], []>} : vector<2x128xf32>, vector<128x192xf32>, vector<2x192xf32> -> vector<2x192xf32>
    %c25_526 = arith.constant 25 : index
    %c0_527 = arith.constant 0 : index
    %c0_528 = arith.constant 0 : index
    %805 = vector.load %arg3[%c25_526, %c0_527, %c0_528] : memref<30x1x192xf32, #tpu.memory_space<vmem>>, vector<1x1x192xf32>
    %806 = vector.shape_cast %805 : vector<1x1x192xf32> to vector<1x192xf32>
    %807 = vector.broadcast %806 : vector<1x192xf32> to vector<2x192xf32>
    %808 = arith.addf %804, %807 : vector<2x192xf32>
    %809 = vector.extract_strided_slice %808 {offsets = [0, 0], sizes = [2, 128], strides = [1, 1]} : vector<2x192xf32> to vector<2x128xf32>
    %810 = vector.extract_strided_slice %808 {offsets = [0, 128], sizes = [2, 64], strides = [1, 1]} : vector<2x192xf32> to vector<2x64xf32>
    %cst_529 = arith.constant 0.000000e+00 : f32
    %811 = vector.broadcast %cst_529 : f32 to vector<2x64xf32>
    %812 = arith.maximumf %810, %811 : vector<2x64xf32>
    %c25_530 = arith.constant 25 : index
    %c0_531 = arith.constant 0 : index
    %c0_532 = arith.constant 0 : index
    %813 = vector.load %arg4[%c25_530, %c0_531, %c0_532] : memref<30x64x128xf32, #tpu.memory_space<vmem>>, vector<1x64x128xf32>
    %814 = vector.shape_cast %813 : vector<1x64x128xf32> to vector<64x128xf32>
    %cst_533 = arith.constant dense<0.000000e+00> : vector<2x128xf32>
    %815 = tpu.matmul %812, %814, %cst_533 {dimension_numbers = #tpu.dot_dimension_numbers<[1], [0], [0], [1], [0, 0, 1, 1], [], []>} : vector<2x64xf32>, vector<64x128xf32>, vector<2x128xf32> -> vector<2x128xf32>
    %c25_534 = arith.constant 25 : index
    %c0_535 = arith.constant 0 : index
    %c0_536 = arith.constant 0 : index
    %816 = vector.load %arg5[%c25_534, %c0_535, %c0_536] : memref<30x1x128xf32, #tpu.memory_space<vmem>>, vector<1x1x128xf32>
    %817 = vector.shape_cast %816 : vector<1x1x128xf32> to vector<1x128xf32>
    %818 = vector.broadcast %817 : vector<1x128xf32> to vector<2x128xf32>
    %819 = arith.addf %815, %818 : vector<2x128xf32>
    %cst_537 = arith.constant 0.000000e+00 : f32
    %820 = vector.broadcast %cst_537 : f32 to vector<2x128xf32>
    %821 = arith.maximumf %819, %820 : vector<2x128xf32>
    %822 = arith.negf %809 : vector<2x128xf32>
    %823 = math.exp %822 : vector<2x128xf32>
    %cst_538 = arith.constant 1.000000e+00 : f32
    %824 = vector.broadcast %cst_538 : f32 to vector<2x128xf32>
    %825 = arith.addf %824, %823 : vector<2x128xf32>
    %826 = arith.divf %824, %825 : vector<2x128xf32>
    %827 = arith.mulf %801, %826 : vector<2x128xf32>
    %828 = arith.addf %827, %821 : vector<2x128xf32>
    %c4_539 = arith.constant 4 : index
    %c0_540 = arith.constant 0 : index
    %c0_541 = arith.constant 0 : index
    %829 = vector.load %arg1[%c4_539, %c0_540, %c0_541] : memref<5x2x128xf32, #tpu.memory_space<vmem>>, vector<1x2x128xf32>
    %830 = vector.shape_cast %829 : vector<1x2x128xf32> to vector<2x128xf32>
    %831 = arith.addf %828, %830 : vector<2x128xf32>
    %c26 = arith.constant 26 : index
    %c0_542 = arith.constant 0 : index
    %c0_543 = arith.constant 0 : index
    %832 = vector.load %arg2[%c26, %c0_542, %c0_543] : memref<30x128x192xf32, #tpu.memory_space<vmem>>, vector<1x128x192xf32>
    %833 = vector.shape_cast %832 : vector<1x128x192xf32> to vector<128x192xf32>
    %cst_544 = arith.constant dense<0.000000e+00> : vector<2x192xf32>
    %834 = tpu.matmul %831, %833, %cst_544 {dimension_numbers = #tpu.dot_dimension_numbers<[1], [0], [0], [1], [0, 0, 1, 1], [], []>} : vector<2x128xf32>, vector<128x192xf32>, vector<2x192xf32> -> vector<2x192xf32>
    %c26_545 = arith.constant 26 : index
    %c0_546 = arith.constant 0 : index
    %c0_547 = arith.constant 0 : index
    %835 = vector.load %arg3[%c26_545, %c0_546, %c0_547] : memref<30x1x192xf32, #tpu.memory_space<vmem>>, vector<1x1x192xf32>
    %836 = vector.shape_cast %835 : vector<1x1x192xf32> to vector<1x192xf32>
    %837 = vector.broadcast %836 : vector<1x192xf32> to vector<2x192xf32>
    %838 = arith.addf %834, %837 : vector<2x192xf32>
    %839 = vector.extract_strided_slice %838 {offsets = [0, 0], sizes = [2, 128], strides = [1, 1]} : vector<2x192xf32> to vector<2x128xf32>
    %840 = vector.extract_strided_slice %838 {offsets = [0, 128], sizes = [2, 64], strides = [1, 1]} : vector<2x192xf32> to vector<2x64xf32>
    %cst_548 = arith.constant 0.000000e+00 : f32
    %841 = vector.broadcast %cst_548 : f32 to vector<2x64xf32>
    %842 = arith.maximumf %840, %841 : vector<2x64xf32>
    %c26_549 = arith.constant 26 : index
    %c0_550 = arith.constant 0 : index
    %c0_551 = arith.constant 0 : index
    %843 = vector.load %arg4[%c26_549, %c0_550, %c0_551] : memref<30x64x128xf32, #tpu.memory_space<vmem>>, vector<1x64x128xf32>
    %844 = vector.shape_cast %843 : vector<1x64x128xf32> to vector<64x128xf32>
    %cst_552 = arith.constant dense<0.000000e+00> : vector<2x128xf32>
    %845 = tpu.matmul %842, %844, %cst_552 {dimension_numbers = #tpu.dot_dimension_numbers<[1], [0], [0], [1], [0, 0, 1, 1], [], []>} : vector<2x64xf32>, vector<64x128xf32>, vector<2x128xf32> -> vector<2x128xf32>
    %c26_553 = arith.constant 26 : index
    %c0_554 = arith.constant 0 : index
    %c0_555 = arith.constant 0 : index
    %846 = vector.load %arg5[%c26_553, %c0_554, %c0_555] : memref<30x1x128xf32, #tpu.memory_space<vmem>>, vector<1x1x128xf32>
    %847 = vector.shape_cast %846 : vector<1x1x128xf32> to vector<1x128xf32>
    %848 = vector.broadcast %847 : vector<1x128xf32> to vector<2x128xf32>
    %849 = arith.addf %845, %848 : vector<2x128xf32>
    %cst_556 = arith.constant 0.000000e+00 : f32
    %850 = vector.broadcast %cst_556 : f32 to vector<2x128xf32>
    %851 = arith.maximumf %849, %850 : vector<2x128xf32>
    %852 = arith.negf %839 : vector<2x128xf32>
    %853 = math.exp %852 : vector<2x128xf32>
    %cst_557 = arith.constant 1.000000e+00 : f32
    %854 = vector.broadcast %cst_557 : f32 to vector<2x128xf32>
    %855 = arith.addf %854, %853 : vector<2x128xf32>
    %856 = arith.divf %854, %855 : vector<2x128xf32>
    %857 = arith.mulf %831, %856 : vector<2x128xf32>
    %858 = arith.addf %857, %851 : vector<2x128xf32>
    %c4_558 = arith.constant 4 : index
    %c0_559 = arith.constant 0 : index
    %c0_560 = arith.constant 0 : index
    %859 = vector.load %arg1[%c4_558, %c0_559, %c0_560] : memref<5x2x128xf32, #tpu.memory_space<vmem>>, vector<1x2x128xf32>
    %860 = vector.shape_cast %859 : vector<1x2x128xf32> to vector<2x128xf32>
    %861 = arith.addf %858, %860 : vector<2x128xf32>
    %c27 = arith.constant 27 : index
    %c0_561 = arith.constant 0 : index
    %c0_562 = arith.constant 0 : index
    %862 = vector.load %arg2[%c27, %c0_561, %c0_562] : memref<30x128x192xf32, #tpu.memory_space<vmem>>, vector<1x128x192xf32>
    %863 = vector.shape_cast %862 : vector<1x128x192xf32> to vector<128x192xf32>
    %cst_563 = arith.constant dense<0.000000e+00> : vector<2x192xf32>
    %864 = tpu.matmul %861, %863, %cst_563 {dimension_numbers = #tpu.dot_dimension_numbers<[1], [0], [0], [1], [0, 0, 1, 1], [], []>} : vector<2x128xf32>, vector<128x192xf32>, vector<2x192xf32> -> vector<2x192xf32>
    %c27_564 = arith.constant 27 : index
    %c0_565 = arith.constant 0 : index
    %c0_566 = arith.constant 0 : index
    %865 = vector.load %arg3[%c27_564, %c0_565, %c0_566] : memref<30x1x192xf32, #tpu.memory_space<vmem>>, vector<1x1x192xf32>
    %866 = vector.shape_cast %865 : vector<1x1x192xf32> to vector<1x192xf32>
    %867 = vector.broadcast %866 : vector<1x192xf32> to vector<2x192xf32>
    %868 = arith.addf %864, %867 : vector<2x192xf32>
    %869 = vector.extract_strided_slice %868 {offsets = [0, 0], sizes = [2, 128], strides = [1, 1]} : vector<2x192xf32> to vector<2x128xf32>
    %870 = vector.extract_strided_slice %868 {offsets = [0, 128], sizes = [2, 64], strides = [1, 1]} : vector<2x192xf32> to vector<2x64xf32>
    %cst_567 = arith.constant 0.000000e+00 : f32
    %871 = vector.broadcast %cst_567 : f32 to vector<2x64xf32>
    %872 = arith.maximumf %870, %871 : vector<2x64xf32>
    %c27_568 = arith.constant 27 : index
    %c0_569 = arith.constant 0 : index
    %c0_570 = arith.constant 0 : index
    %873 = vector.load %arg4[%c27_568, %c0_569, %c0_570] : memref<30x64x128xf32, #tpu.memory_space<vmem>>, vector<1x64x128xf32>
    %874 = vector.shape_cast %873 : vector<1x64x128xf32> to vector<64x128xf32>
    %cst_571 = arith.constant dense<0.000000e+00> : vector<2x128xf32>
    %875 = tpu.matmul %872, %874, %cst_571 {dimension_numbers = #tpu.dot_dimension_numbers<[1], [0], [0], [1], [0, 0, 1, 1], [], []>} : vector<2x64xf32>, vector<64x128xf32>, vector<2x128xf32> -> vector<2x128xf32>
    %c27_572 = arith.constant 27 : index
    %c0_573 = arith.constant 0 : index
    %c0_574 = arith.constant 0 : index
    %876 = vector.load %arg5[%c27_572, %c0_573, %c0_574] : memref<30x1x128xf32, #tpu.memory_space<vmem>>, vector<1x1x128xf32>
    %877 = vector.shape_cast %876 : vector<1x1x128xf32> to vector<1x128xf32>
    %878 = vector.broadcast %877 : vector<1x128xf32> to vector<2x128xf32>
    %879 = arith.addf %875, %878 : vector<2x128xf32>
    %cst_575 = arith.constant 0.000000e+00 : f32
    %880 = vector.broadcast %cst_575 : f32 to vector<2x128xf32>
    %881 = arith.maximumf %879, %880 : vector<2x128xf32>
    %882 = arith.negf %869 : vector<2x128xf32>
    %883 = math.exp %882 : vector<2x128xf32>
    %cst_576 = arith.constant 1.000000e+00 : f32
    %884 = vector.broadcast %cst_576 : f32 to vector<2x128xf32>
    %885 = arith.addf %884, %883 : vector<2x128xf32>
    %886 = arith.divf %884, %885 : vector<2x128xf32>
    %887 = arith.mulf %861, %886 : vector<2x128xf32>
    %888 = arith.addf %887, %881 : vector<2x128xf32>
    %c4_577 = arith.constant 4 : index
    %c0_578 = arith.constant 0 : index
    %c0_579 = arith.constant 0 : index
    %889 = vector.load %arg1[%c4_577, %c0_578, %c0_579] : memref<5x2x128xf32, #tpu.memory_space<vmem>>, vector<1x2x128xf32>
    %890 = vector.shape_cast %889 : vector<1x2x128xf32> to vector<2x128xf32>
    %891 = arith.addf %888, %890 : vector<2x128xf32>
    %c28 = arith.constant 28 : index
    %c0_580 = arith.constant 0 : index
    %c0_581 = arith.constant 0 : index
    %892 = vector.load %arg2[%c28, %c0_580, %c0_581] : memref<30x128x192xf32, #tpu.memory_space<vmem>>, vector<1x128x192xf32>
    %893 = vector.shape_cast %892 : vector<1x128x192xf32> to vector<128x192xf32>
    %cst_582 = arith.constant dense<0.000000e+00> : vector<2x192xf32>
    %894 = tpu.matmul %891, %893, %cst_582 {dimension_numbers = #tpu.dot_dimension_numbers<[1], [0], [0], [1], [0, 0, 1, 1], [], []>} : vector<2x128xf32>, vector<128x192xf32>, vector<2x192xf32> -> vector<2x192xf32>
    %c28_583 = arith.constant 28 : index
    %c0_584 = arith.constant 0 : index
    %c0_585 = arith.constant 0 : index
    %895 = vector.load %arg3[%c28_583, %c0_584, %c0_585] : memref<30x1x192xf32, #tpu.memory_space<vmem>>, vector<1x1x192xf32>
    %896 = vector.shape_cast %895 : vector<1x1x192xf32> to vector<1x192xf32>
    %897 = vector.broadcast %896 : vector<1x192xf32> to vector<2x192xf32>
    %898 = arith.addf %894, %897 : vector<2x192xf32>
    %899 = vector.extract_strided_slice %898 {offsets = [0, 0], sizes = [2, 128], strides = [1, 1]} : vector<2x192xf32> to vector<2x128xf32>
    %900 = vector.extract_strided_slice %898 {offsets = [0, 128], sizes = [2, 64], strides = [1, 1]} : vector<2x192xf32> to vector<2x64xf32>
    %cst_586 = arith.constant 0.000000e+00 : f32
    %901 = vector.broadcast %cst_586 : f32 to vector<2x64xf32>
    %902 = arith.maximumf %900, %901 : vector<2x64xf32>
    %c28_587 = arith.constant 28 : index
    %c0_588 = arith.constant 0 : index
    %c0_589 = arith.constant 0 : index
    %903 = vector.load %arg4[%c28_587, %c0_588, %c0_589] : memref<30x64x128xf32, #tpu.memory_space<vmem>>, vector<1x64x128xf32>
    %904 = vector.shape_cast %903 : vector<1x64x128xf32> to vector<64x128xf32>
    %cst_590 = arith.constant dense<0.000000e+00> : vector<2x128xf32>
    %905 = tpu.matmul %902, %904, %cst_590 {dimension_numbers = #tpu.dot_dimension_numbers<[1], [0], [0], [1], [0, 0, 1, 1], [], []>} : vector<2x64xf32>, vector<64x128xf32>, vector<2x128xf32> -> vector<2x128xf32>
    %c28_591 = arith.constant 28 : index
    %c0_592 = arith.constant 0 : index
    %c0_593 = arith.constant 0 : index
    %906 = vector.load %arg5[%c28_591, %c0_592, %c0_593] : memref<30x1x128xf32, #tpu.memory_space<vmem>>, vector<1x1x128xf32>
    %907 = vector.shape_cast %906 : vector<1x1x128xf32> to vector<1x128xf32>
    %908 = vector.broadcast %907 : vector<1x128xf32> to vector<2x128xf32>
    %909 = arith.addf %905, %908 : vector<2x128xf32>
    %cst_594 = arith.constant 0.000000e+00 : f32
    %910 = vector.broadcast %cst_594 : f32 to vector<2x128xf32>
    %911 = arith.maximumf %909, %910 : vector<2x128xf32>
    %912 = arith.negf %899 : vector<2x128xf32>
    %913 = math.exp %912 : vector<2x128xf32>
    %cst_595 = arith.constant 1.000000e+00 : f32
    %914 = vector.broadcast %cst_595 : f32 to vector<2x128xf32>
    %915 = arith.addf %914, %913 : vector<2x128xf32>
    %916 = arith.divf %914, %915 : vector<2x128xf32>
    %917 = arith.mulf %891, %916 : vector<2x128xf32>
    %918 = arith.addf %917, %911 : vector<2x128xf32>
    %c4_596 = arith.constant 4 : index
    %c0_597 = arith.constant 0 : index
    %c0_598 = arith.constant 0 : index
    %919 = vector.load %arg1[%c4_596, %c0_597, %c0_598] : memref<5x2x128xf32, #tpu.memory_space<vmem>>, vector<1x2x128xf32>
    %920 = vector.shape_cast %919 : vector<1x2x128xf32> to vector<2x128xf32>
    %921 = arith.addf %918, %920 : vector<2x128xf32>
    %c29 = arith.constant 29 : index
    %c0_599 = arith.constant 0 : index
    %c0_600 = arith.constant 0 : index
    %922 = vector.load %arg2[%c29, %c0_599, %c0_600] : memref<30x128x192xf32, #tpu.memory_space<vmem>>, vector<1x128x192xf32>
    %923 = vector.shape_cast %922 : vector<1x128x192xf32> to vector<128x192xf32>
    %cst_601 = arith.constant dense<0.000000e+00> : vector<2x192xf32>
    %924 = tpu.matmul %921, %923, %cst_601 {dimension_numbers = #tpu.dot_dimension_numbers<[1], [0], [0], [1], [0, 0, 1, 1], [], []>} : vector<2x128xf32>, vector<128x192xf32>, vector<2x192xf32> -> vector<2x192xf32>
    %c29_602 = arith.constant 29 : index
    %c0_603 = arith.constant 0 : index
    %c0_604 = arith.constant 0 : index
    %925 = vector.load %arg3[%c29_602, %c0_603, %c0_604] : memref<30x1x192xf32, #tpu.memory_space<vmem>>, vector<1x1x192xf32>
    %926 = vector.shape_cast %925 : vector<1x1x192xf32> to vector<1x192xf32>
    %927 = vector.broadcast %926 : vector<1x192xf32> to vector<2x192xf32>
    %928 = arith.addf %924, %927 : vector<2x192xf32>
    %929 = vector.extract_strided_slice %928 {offsets = [0, 0], sizes = [2, 128], strides = [1, 1]} : vector<2x192xf32> to vector<2x128xf32>
    %930 = vector.extract_strided_slice %928 {offsets = [0, 128], sizes = [2, 64], strides = [1, 1]} : vector<2x192xf32> to vector<2x64xf32>
    %cst_605 = arith.constant 0.000000e+00 : f32
    %931 = vector.broadcast %cst_605 : f32 to vector<2x64xf32>
    %932 = arith.maximumf %930, %931 : vector<2x64xf32>
    %c29_606 = arith.constant 29 : index
    %c0_607 = arith.constant 0 : index
    %c0_608 = arith.constant 0 : index
    %933 = vector.load %arg4[%c29_606, %c0_607, %c0_608] : memref<30x64x128xf32, #tpu.memory_space<vmem>>, vector<1x64x128xf32>
    %934 = vector.shape_cast %933 : vector<1x64x128xf32> to vector<64x128xf32>
    %cst_609 = arith.constant dense<0.000000e+00> : vector<2x128xf32>
    %935 = tpu.matmul %932, %934, %cst_609 {dimension_numbers = #tpu.dot_dimension_numbers<[1], [0], [0], [1], [0, 0, 1, 1], [], []>} : vector<2x64xf32>, vector<64x128xf32>, vector<2x128xf32> -> vector<2x128xf32>
    %c29_610 = arith.constant 29 : index
    %c0_611 = arith.constant 0 : index
    %c0_612 = arith.constant 0 : index
    %936 = vector.load %arg5[%c29_610, %c0_611, %c0_612] : memref<30x1x128xf32, #tpu.memory_space<vmem>>, vector<1x1x128xf32>
    %937 = vector.shape_cast %936 : vector<1x1x128xf32> to vector<1x128xf32>
    %938 = vector.broadcast %937 : vector<1x128xf32> to vector<2x128xf32>
    %939 = arith.addf %935, %938 : vector<2x128xf32>
    %cst_613 = arith.constant 0.000000e+00 : f32
    %940 = vector.broadcast %cst_613 : f32 to vector<2x128xf32>
    %941 = arith.maximumf %939, %940 : vector<2x128xf32>
    %942 = arith.negf %929 : vector<2x128xf32>
    %943 = math.exp %942 : vector<2x128xf32>
    %cst_614 = arith.constant 1.000000e+00 : f32
    %944 = vector.broadcast %cst_614 : f32 to vector<2x128xf32>
    %945 = arith.addf %944, %943 : vector<2x128xf32>
    %946 = arith.divf %944, %945 : vector<2x128xf32>
    %947 = arith.mulf %921, %946 : vector<2x128xf32>
    %948 = arith.addf %947, %941 : vector<2x128xf32>
    %c0_615 = arith.constant 0 : index
    %c0_616 = arith.constant 0 : index
    %949 = vector.load %arg8[%c0_615, %c0_616] : memref<128x128xf32, #tpu.memory_space<vmem>>, vector<128x128xf32>
    %cst_617 = arith.constant dense<0.000000e+00> : vector<2x128xf32>
    %950 = tpu.matmul %948, %949, %cst_617 {dimension_numbers = #tpu.dot_dimension_numbers<[1], [0], [0], [1], [0, 0, 1, 1], [], []>} : vector<2x128xf32>, vector<128x128xf32>, vector<2x128xf32> -> vector<2x128xf32>
    %c0_618 = arith.constant 0 : index
    %c0_619 = arith.constant 0 : index
    %951 = vector.load %arg9[%c0_618, %c0_619] : memref<1x128xf32, #tpu.memory_space<vmem>>, vector<1x128xf32>
    %952 = vector.broadcast %951 : vector<1x128xf32> to vector<2x128xf32>
    %953 = arith.addf %950, %952 : vector<2x128xf32>
    %c0_620 = arith.constant 0 : index
    %c0_621 = arith.constant 0 : index
    %954 = vector.load %arg10[%c0_620, %c0_621] : memref<2x128xf32, #tpu.memory_space<vmem>>, vector<2x128xf32>
    %955 = arith.mulf %953, %954 : vector<2x128xf32>
    %c0_622 = arith.constant 0 : index
    %c0_623 = arith.constant 0 : index
    %956 = vector.load %arg11[%c0_622, %c0_623] : memref<2x128xf32, #tpu.memory_space<vmem>>, vector<2x128xf32>
    %957 = arith.addf %955, %956 : vector<2x128xf32>
    %c0_624 = arith.constant 0 : index
    %c0_625 = arith.constant 0 : index
    %958 = vector.load %arg12[%c0_624, %c0_625] : memref<2x128xf32, #tpu.memory_space<vmem>>, vector<2x128xf32>
    tpu.vector_store %arg12[%c0_624, %c0_625], %957 {strides = array<i32>} : memref<2x128xf32, #tpu.memory_space<vmem>>, vector<2x128xf32>,
    return
  }
}

</mosaic_0001>

<bundles_post_ra>
// kernel: tile.64
= control target key start
LH: loop header
LB: loop body
LE: loop exit
PB: predicated region body
PF: predicated region fallthrough
CT: control target
= control target key end

     0   :  { %s30_s10 = smov 3  ;;  %s11_s11 = smov 3  ;;  %vm13_vm0 = vcmask 261120   ;;  %vm20_vm1 = vcmask 1048320   ;;  %vm27_vm2 = vcmask 785920   ;;  %vm34_vm3 = vcmask 523520   ;;  %s70_s0 = inlined_call_operand.vmem [shape: f32[2,4,32], index: 0, kind: input, shape index: {}]   ;;  %s71_s1 = inlined_call_operand.vmem [shape: f32[2,128], index: 1, kind: output, shape index: {}]  }
   0x1   :  { %v44_v0 = vld [vmem:[%s70_s0 + $0x4] sm:$0xf]  ;;  %v9_v1 = vld [vmem:[%s70_s0] sm:$0xf]  ;;  %s16_s0 = smov 3  ;;  %s23_s12 = smov 3 }
   0x2   :  { %8 = vst [vmem:[#allocation1 + $0x8] sm:$0xf] %v44_v0  ;;  %10 = vst [vmem:[#allocation1] sm:$0xf] %v9_v1  ;;  %s48_s13 = smov 96   ;;  %s49_s14 = smov 32  }
   0x3   :  { %s50_s15 = smov 64  }
   0x9   :  { %v17_v2 = vld [vmem:[#allocation1 + $0x3] ss:$8 sm:%s16_s0]   ;;  %v31_v3 = vld [vmem:[#allocation1 + $0x1] ss:$8 sm:%s30_s10]   ;;  %v12_v4 = vld [vmem:[#allocation1] ss:$8 sm:%s11_s11]  }
   0xa   :  { %18 = vrot.lane.b32.xlu0 %v17_v2, %s48_s13  ;;  %32 = vrot.lane.b32.xlu1 %v31_v3, %s49_s14  ;;  %v24_v5 = vld [vmem:[#allocation1 + $0x2] ss:$8 sm:%s23_s12]   ;;  %14 = vst.msk [vmem:[#allocation0] sm:$0x3] %vm13_vm0, %v12_v4  }
   0xe   :  { %25 = vrot.lane.b32.xlu0 %v24_v5, %s50_s15 }
  0x7c   :  { %v19_v6 = vpop.permute.xlu0 %18   ;;  %v33_v7 = vpop.permute.xlu1 %32  }
  0x7d   :  { %21 = vst.msk [vmem:[#allocation0] sm:$0x3] %vm20_vm1, %v19_v6  }
  0x80   :  { %v26_v8 = vpop.permute.xlu0 %25  }
  0x81   :  { %28 = vst.msk [vmem:[#allocation0] sm:$0x3] %vm27_vm2, %v26_v8  }
  0x82   :  { %35 = vst.msk [vmem:[#allocation0] sm:$0x3] %vm34_vm3, %v33_v7  }
  0x89   :  { %v40_v9 = vld [vmem:[#allocation0] sm:$0x3] }
  0x8a   :  { %43 = vst [vmem:[%s71_s1] sm:$0x3] %v40_v9 }

// kernel: _lambda_.1
= control target key start
LH: loop header
LB: loop body
LE: loop exit
PB: predicated region body
PF: predicated region fallthrough
CT: control target
= control target key end

     0   :  { %17 = vsyncpa [#allocation3], 0  ;;  %s9793_s0 = inlined_call_operand.vmem [shape: f32[2,128], index: 0, kind: input, shape index: {}]   ;;  %s9794_s1 = inlined_call_operand.vmem [shape: f32[5,2,128], index: 1, kind: input, shape index: {}]   ;;  %s9795_s2 = inlined_call_operand.hbm [shape: f32[30,128,192], index: 2, kind: input, shape index: {}]   ;;  %s9796_s3 = inlined_call_operand.vmem [shape: f32[30,1,192], index: 3, kind: input, shape index: {}]   ;;  %s9797_s4 = inlined_call_operand.hbm [shape: f32[30,64,128], index: 4, kind: input, shape index: {}]   ;;  %s9798_s5 = inlined_call_operand.vmem [shape: f32[30,1,128], index: 5, kind: input, shape index: {}]   ;;  %s9799_s6 = inlined_call_operand.hbm [shape: f32[4,128,128], index: 6, kind: input, shape index: {}]   ;;  %s9800_s7 = inlined_call_operand.vmem [shape: f32[4,1,128], index: 7, kind: input, shape index: {}]   ;;  %s9801_s8 = inlined_call_operand.hbm [shape: f32[128,128], index: 8, kind: input, shape index: {}]   ;;  %s9802_s9 = inlined_call_operand.vmem [shape: f32[1,128], index: 9, kind: input, shape index: {}]   ;;  %s9803_s10 = inlined_call_operand.vmem [shape: f32[2,128], index: 10, kind: input, shape index: {}]   ;;  %s9804_s11 = inlined_call_operand.vmem [shape: f32[2,128], index: 11, kind: input, shape index: {}]   ;;  %s9805_s12 = inlined_call_operand.vmem [shape: f32[2,128], index: 12, kind: output, shape index: {}]  }
   0x1   :  { %18 = vsyncpa [#allocation5], 0 }
   0x2   :  { %19 = vsyncpa [#allocation8], 0  ;;  %s8613_s21 = smov [#allocation4]  }
   0x3   :  { %s43_s22 = sshll.u32 %s8613_s21, 4  ;;  %s44_s22 = int_to_ptr.vmem [resolvable:$true] %s43_s22 }
   0x4   :  { %s8535_s23 = scalar_lea.vmem %s44_s22, 30720  ;;  %p8540_p1 = scmp.lt.s32.totalorder %s44_s22, %s44_s22 }
   0x5   :  { %p8536_p0 = scmp.ne.s32.totalorder %s44_s22, %s8535_s23  ;;  %p8541_p2 = scmp.lt.s32.totalorder %s8535_s23, %s8535_s23 }
   0x7   :  { %p8542_p3 = por %p8541_p2, %p8540_p1 }
   0x9   :  { %p8543_p4 = pnand %p8542_p3, %p8536_p0 }
   0xb   :  { %8546 = shalt.err (!%p8543_p4)
}
   0xc   :  { %s8614_s24 = smov 128   ;;  %s8615_s25 = smov 8  }
   0xd   :  { %49 = dma.hbm_to_vmem [thread:$0]  %s9797_s4, 30720, %s44_s22, [#allocation5], %s8614_s24, %s8614_s24, %s8615_s25  }
   0xe   :  { %s8616_s28 = smov [#allocation2]  }
   0xf   :  { %s29_s29 = sshll.u32 %s8616_s28, 4  ;;  %s30_s29 = int_to_ptr.vmem [resolvable:$true] %s29_s29 }
  0x10   :  { %s8555_s30 = scalar_lea.vmem %s30_s29, 122880  ;;  %p8560_p6 = scmp.lt.s32.totalorder %s30_s29, %s30_s29 }
  0x11   :  { %p8556_p5 = scmp.ne.s32.totalorder %s30_s29, %s8555_s30  ;;  %p8561_p7 = scmp.lt.s32.totalorder %s8555_s30, %s8555_s30 }
  0x13   :  { %p8562_p8 = por %p8561_p7, %p8560_p6 }
  0x15   :  { %p8563_p9 = pnand %p8562_p8, %p8556_p5 }
  0x17   :  { %8566 = shalt.err (!%p8563_p9)
}
  0x18   :  { %s8617_s13 = smov 256   ;;  %s8618_s14 = smov 16  }
  0x19   :  { %35 = dma.hbm_to_vmem [thread:$0]  %s9795_s2, 122880, %s30_s29, [#allocation3], %s8617_s13, %s8617_s13, %s8618_s14  }
  0x1a   :  { %s8619_s17 = smov [#allocation6]   ;;  %s8620_s19 = smov [#allocation7]  }
  0x1b   :  { %s57_s18 = sshll.u32 %s8619_s17, 4  ;;  %s71_s4 = sshll.u32 %s8620_s19, 4  ;;  %s58_s18 = int_to_ptr.vmem [resolvable:$true] %s57_s18  ;;  %s72_s4 = int_to_ptr.vmem [resolvable:$true] %s71_s4 }
  0x1c   :  { %s8575_s20 = scalar_lea.vmem %s58_s18, 8192  ;;  %p8580_p11 = scmp.lt.s32.totalorder %s58_s18, %s58_s18 }
  0x1d   :  { %p8576_p10 = scmp.ne.s32.totalorder %s58_s18, %s8575_s20  ;;  %p8581_p12 = scmp.lt.s32.totalorder %s8575_s20, %s8575_s20 }
  0x1f   :  { %p8582_p13 = por %p8581_p12, %p8580_p11 }
  0x21   :  { %p8583_p0 = pnand %p8582_p13, %p8576_p10 }
  0x23   :  { %8586 = shalt.err (!%p8583_p0)
}
  0x24   :  { %63 = dma.hbm_to_vmem [thread:$0]  %s9799_s6, 8192, %s58_s18, [#allocation5], %s8614_s24, %s8614_s24, %s8615_s25  }
  0x25   :  { %s8595_s2 = scalar_lea.vmem %s72_s4, 2048  ;;  %p8600_p2 = scmp.lt.s32.totalorder %s72_s4, %s72_s4 }
  0x26   :  { %p8596_p1 = scmp.ne.s32.totalorder %s72_s4, %s8595_s2  ;;  %p8601_p3 = scmp.lt.s32.totalorder %s8595_s2, %s8595_s2 }
  0x28   :  { %p8602_p4 = por %p8601_p3, %p8600_p2 }
  0x2a   :  { %p8603_p5 = pnand %p8602_p4, %p8596_p1 }
  0x2c   :  { %8606 = shalt.err (!%p8603_p5)
}
  0x2d   :  { %77 = dma.hbm_to_vmem [thread:$0]  %s9801_s8, 2048, %s72_s4, [#allocation8], %s8614_s24, %s8614_s24, %s8615_s25  }
  0x2e   :  { %8607 = dma.done.wait [#allocation3], 122880  }
  0x2f   :  { %8608 = vsyncadd [#allocation3], 4294844416 }
  0x30   :  { %8609 = dma.done.wait [#allocation5], 38912  }
  0x31   :  { %8610 = vsyncadd [#allocation5], 4294928384 }
  0x32   :  { %8611 = dma.done.wait [#allocation8], 2048  }
  0x33   :  { %8612 = vsyncadd [#allocation8], 4294965248  ;;  %v8621_v0 = vmov 0.0   ;;  %v130_v1 = vld [vmem:[#allocation2 + $0xf8] sm:$0xff]  ;;  %v129_v2 = vld [vmem:[#allocation2 + $0xf0] sm:$0xff]  ;;  %vm8622_vm0 = vmmov 0   ;;  %v133_v45 = vlaneseq }
  0x34   :  { %207 = vmatprep.mubr.f32.mxu0 %v8621_v0  ;;  %7649 = vmatprep.subr.mxu1 %v8621_v0  ;;  %v128_v3 = vld [vmem:[#allocation2 + $0xe8] sm:$0xff]  ;;  %v127_v4 = vld [vmem:[#allocation2 + $0xe0] sm:$0xff]  ;;  %v126_v5 = vld [vmem:[#allocation2 + $0xd8] sm:$0xff]  ;;  %vm230_vm1 = vcmask 523264  }
  0x35   :  { %143 = vmatprep.subr.mxu0 %v130_v1  ;;  %v125_v6 = vld [vmem:[#allocation2 + $0xd0] sm:$0xff]  ;;  %v124_v7 = vld [vmem:[#allocation2 + $0xc8] sm:$0xff]  ;;  %v123_v8 = vld [vmem:[#allocation2 + $0xc0] sm:$0xff]  ;;  %7665 = vmatprep.mubr.msk.f32.mxu1 %vm8622_vm0, %v8621_v0  ;;  %v8733_v46 = vshrl.u32 %v133_v45, 7 }
  0x36   :  { %144 = vmatpush1.msra.mxu0 %v129_v2  ;;  %v122_v9 = vld [vmem:[#allocation2 + $0xb8] sm:$0xff]  ;;  %v121_v10 = vld [vmem:[#allocation2 + $0xb0] sm:$0xff]  ;;  %v120_v11 = vld [vmem:[#allocation2 + $0xa8] sm:$0xff] }
  0x37   :  { %145 = vmatprep.subr.mxu0 %v128_v3  ;;  %v119_v12 = vld [vmem:[#allocation2 + $0xa0] sm:$0xff]  ;;  %v118_v13 = vld [vmem:[#allocation2 + $0x98] sm:$0xff]  ;;  %v117_v14 = vld [vmem:[#allocation2 + $0x90] sm:$0xff]  ;;  %v8736_v47 = vsub.s32 1, %v8733_v46 }
  0x38   :  { %146 = vmatpush1.msra.mxu0 %v127_v4  ;;  %v222_v15 = vld [vmem:[#allocation4 + $0x38] sm:$0xff]  ;;  %v221_v16 = vld [vmem:[#allocation4 + $0x30] sm:$0xff]  ;;  %v116_v17 = vld [vmem:[#allocation2 + $0x88] sm:$0xff] }
  0x39   :  { %147 = vmatprep.subr.mxu0 %v126_v5  ;;  %7650 = vmatpush3.msra.mxu1 %v222_v15  ;;  %v115_v18 = vld [vmem:[#allocation2 + $0x80] sm:$0xff]  ;;  %v220_v19 = vld [vmem:[#allocation4 + $0x28] sm:$0xff]  ;;  %v114_v20 = vld [vmem:[#allocation2 + $0x78] sm:$0xff] }
  0x3a   :  { %148 = vmatpush1.msra.mxu0 %v125_v6  ;;  %7651 = vmatprep.subr.mxu1 %v8621_v0  ;;  %v113_v21 = vld [vmem:[#allocation2 + $0x70] sm:$0xff]  ;;  %v219_v22 = vld [vmem:[#allocation4 + $0x20] sm:$0xff]  ;;  %v112_v23 = vld [vmem:[#allocation2 + $0x68] sm:$0xff] }
  0x3b   :  { %149 = vmatprep.subr.mxu0 %v124_v7  ;;  %7652 = vmatpush3.msra.mxu1 %v221_v16  ;;  %v111_v24 = vld [vmem:[#allocation2 + $0x60] sm:$0xff]  ;;  %v110_v25 = vld [vmem:[#allocation2 + $0x58] sm:$0xff]  ;;  %v109_v26 = vld [vmem:[#allocation2 + $0x50] sm:$0xff] }
  0x3c   :  { %150 = vmatpush1.msra.mxu0 %v123_v8  ;;  %7653 = vmatprep.subr.mxu1 %v8621_v0  ;;  %v108_v27 = vld [vmem:[#allocation2 + $0x48] sm:$0xff]  ;;  %v107_v28 = vld [vmem:[#allocation2 + $0x40] sm:$0xff]  ;;  %v106_v29 = vld [vmem:[#allocation2 + $0x38] sm:$0xff] }
  0x3d   :  { %151 = vmatprep.subr.mxu0 %v122_v9  ;;  %7654 = vmatpush3.msra.mxu1 %v220_v19  ;;  %v105_v30 = vld [vmem:[#allocation2 + $0x30] sm:$0xff]  ;;  %v104_v31 = vld [vmem:[#allocation2 + $0x28] sm:$0xff]  ;;  %v103_v32 = vld [vmem:[#allocation2 + $0x20] sm:$0xff] }
  0x3e   :  { %152 = vmatpush1.msra.mxu0 %v121_v10  ;;  %7655 = vmatprep.subr.mxu1 %v8621_v0  ;;  %v102_v33 = vld [vmem:[#allocation2 + $0x18] sm:$0xff]  ;;  %v96_v34 = vld [vmem:[%s9793_s0] sm:$0x3]  ;;  %v101_v36 = vld [vmem:[#allocation2 + $0x10] sm:$0xff] }
  0x3f   :  { %153 = vmatprep.subr.mxu0 %v120_v11  ;;  %7656 = vmatpush3.msra.mxu1 %v219_v22  ;;  %v8721_v35 = vld [vmem:[%s9794_s1] sm:$0x3]  ;;  %v100_v37 = vld [vmem:[#allocation2 + $0x8] sm:$0xff]  ;;  %v218_v40 = vld [vmem:[#allocation4 + $0x18] sm:$0xff]  ;;  %v8751_v22 = vsub.s32 0, %v8733_v46 }
  0x40   :  { %154 = vmatpush1.msra.mxu0 %v119_v12  ;;  %7657 = vmatprep.subr.mxu1 %v8621_v0  ;;  %v99_v38 = vld [vmem:[#allocation2] sm:$0xff]  ;;  %v8724_v39 = vadd.f32 %v8721_v35, %v96_v34  ;;  %v217_v41 = vld [vmem:[#allocation4 + $0x10] sm:$0xff]  ;;  %v216_v42 = vld [vmem:[#allocation4 + $0x8] sm:$0xff] }
  0x41   :  { %155 = vmatprep.subr.mxu0 %v118_v13  ;;  %7658 = vmatpush3.msra.mxu1 %v218_v40  ;;  %v215_v43 = vld [vmem:[#allocation4] sm:$0xff]  ;;  %v346_v44 = vld [vmem:[#allocation2 + $0x1f8] sm:$0xff]  ;;  %v345_v54 = vld [vmem:[#allocation2 + $0x1f0] sm:$0xff] }
  0x42   :  { %156 = vmatpush1.msra.mxu0 %v117_v14  ;;  %7659 = vmatprep.subr.mxu1 %v8621_v0  ;;  %v8741_v48 = vld [vmem:[%s9796_s3] sm:$0x3]  ;;  %v344_v55 = vld [vmem:[#allocation2 + $0x1e8] sm:$0xff]  ;;  %v342_v57 = vld [vmem:[#allocation2 + $0x1d8] sm:$0xff] }
  0x43   :  { %157 = vmatprep.subr.mxu0 %v116_v17  ;;  %7660 = vmatpush3.msra.mxu1 %v217_v41  ;;  %v140_v49 = vrot.slane %v8741_v48, %v8736_v47  ;;  %v343_v56 = vld [vmem:[#allocation2 + $0x1e0] sm:$0xff]  ;;  %v341_v58 = vld [vmem:[#allocation2 + $0x1d0] sm:$0xff]  ;;  %v340_v59 = vld [vmem:[#allocation2 + $0x1c8] sm:$0xff] }
  0x44   :  { %158 = vmatpush1.msra.mxu0 %v115_v18  ;;  %7661 = vmatprep.subr.mxu1 %v8621_v0  ;;  %v339_v60 = vld [vmem:[#allocation2 + $0x1c0] sm:$0xff]  ;;  %v338_v61 = vld [vmem:[#allocation2 + $0x1b8] sm:$0xff]  ;;  %v337_v62 = vld [vmem:[#allocation2 + $0x1b0] sm:$0xff] }
  0x45   :  { %159 = vmatprep.subr.mxu0 %v114_v20  ;;  %7662 = vmatpush3.msra.mxu1 %v216_v42  ;;  %v336_v63 = vld [vmem:[#allocation2 + $0x1a8] sm:$0xff]  ;;  %v335_v1 = vld [vmem:[#allocation2 + $0x1a0] sm:$0xff]  ;;  %v334_v2 = vld [vmem:[#allocation2 + $0x198] sm:$0xff] }
  0x46   :  { %160 = vmatpush1.msra.mxu0 %v113_v21  ;;  %7663 = vmatprep.subr.mxu1 %v8621_v0  ;;  %v333_v3 = vld [vmem:[#allocation2 + $0x190] sm:$0xff]  ;;  %v332_v4 = vld [vmem:[#allocation2 + $0x188] sm:$0xff]  ;;  %v331_v5 = vld [vmem:[#allocation2 + $0x180] sm:$0xff] }
  0x47   :  { %161 = vmatprep.subr.mxu0 %v112_v23  ;;  %7664 = vmatpush3.msra.mxu1 %v215_v43  ;;  %v330_v6 = vld [vmem:[#allocation2 + $0x178] sm:$0xff]  ;;  %v329_v7 = vld [vmem:[#allocation2 + $0x170] sm:$0xff]  ;;  %v328_v8 = vld [vmem:[#allocation2 + $0x168] sm:$0xff]  ;;  %v136_v23 = vrot.slane %v8741_v48, %v8751_v22 }
  0x48   :  { %162 = vmatpush1.msra.mxu0 %v111_v24  ;;  %360 = vmatprep.subr.mxu1 %v346_v44  ;;  %v327_v9 = vld [vmem:[#allocation2 + $0x160] sm:$0xff]  ;;  %v326_v10 = vld [vmem:[#allocation2 + $0x158] sm:$0xff]  ;;  %v325_v11 = vld [vmem:[#allocation2 + $0x150] sm:$0xff] }
  0x49   :  { %163 = vmatprep.subr.mxu0 %v110_v25  ;;  %v324_v12 = vld [vmem:[#allocation2 + $0x148] sm:$0xff]  ;;  %v323_v13 = vld [vmem:[#allocation2 + $0x140] sm:$0xff]  ;;  %v322_v14 = vld [vmem:[#allocation2 + $0x138] sm:$0xff] }
  0x4a   :  { %164 = vmatpush1.msra.mxu0 %v109_v26  ;;  %v321_v15 = vld [vmem:[#allocation2 + $0x130] sm:$0xff]  ;;  %v320_v16 = vld [vmem:[#allocation2 + $0x128] sm:$0xff]  ;;  %v319_v17 = vld [vmem:[#allocation2 + $0x120] sm:$0xff] }
  0x4b   :  { %165 = vmatprep.subr.mxu0 %v108_v27  ;;  %v318_v18 = vld [vmem:[#allocation2 + $0x118] sm:$0xff]  ;;  %v317_v19 = vld [vmem:[#allocation2 + $0x110] sm:$0xff]  ;;  %v316_v20 = vld [vmem:[#allocation2 + $0x108] sm:$0xff] }
  0x4c   :  { %166 = vmatpush1.msra.mxu0 %v107_v28  ;;  %v315_v21 = vld [vmem:[#allocation2 + $0x100] sm:$0xff]  ;;  %v439_v40 = vld [vmem:[#allocation4 + $0x70] sm:$0xff]  ;;  %v438_v41 = vld [vmem:[#allocation4 + $0x68] sm:$0xff] }
  0x4d   :  { %167 = vmatprep.subr.mxu0 %v106_v29  ;;  %v7134_v28 = vld [vmem:[%s9798_s5] ss:$0 sm:$0xff]  ;;  %v435_v43 = vld [vmem:[#allocation4 + $0x50] sm:$0xff]  ;;  %v434_v44 = vld [vmem:[#allocation4 + $0x48] sm:$0xff] }
  0x4e   :  { %168 = vmatpush1.msra.mxu0 %v105_v30  ;;  %v437_v42 = vld [vmem:[#allocation4 + $0x60] sm:$0xff]  ;;  %v564_v46 = vld [vmem:[#allocation2 + $0x2f8] sm:$0xff]  ;;  %v563_v48 = vld [vmem:[#allocation2 + $0x2f0] sm:$0xff] }
  0x4f   :  { %169 = vmatprep.subr.mxu0 %v104_v31  ;;  %v433_v45 = vld [vmem:[#allocation4 + $0x40] sm:$0xff] }
  0x50   :  { %170 = vmatpush1.msra.mxu0 %v103_v32 }
  0x51   :  { %171 = vmatprep.subr.mxu0 %v102_v33 }
  0x52   :  { %172 = vmatpush1.msra.mxu0 %v101_v36 }
  0x53   :  { %173 = vmatprep.subr.mxu0 %v100_v37 }
  0x54   :  { %174 = vmatpush1.msra.mxu0 %v99_v38  ;;  %v440_v38 = vld [vmem:[#allocation4 + $0x78] sm:$0xff] }
  0x55   :  { %208 = vmatmul.mubr.f32.vlgmr.msra.gmra.mxu0 %v8724_v39  ;;  %578 = vmatprep.subr.mxu0 %v564_v46  ;;  %v782_v46 = vld [vmem:[#allocation2 + $0x3f8] sm:$0xff] }
  0x56   :  { %642 = vmatprep.mubr.f32.mxu0 %v8621_v0  ;;  %579 = vmatpush1.msra.mxu0 %v563_v48  ;;  %v8803_v48 = vld [vmem:[%s9796_s3 + $0x4] sm:$0x3] }
 0x115   :  { %v8745_v50 = vpop.f32.mrf.mxu0 }
 0x116   :  { %v210_v24 = vadd.f32 %v8745_v50, %v136_v23  ;;  %v561_v50 = vld [vmem:[#allocation2 + $0x2e0] sm:$0xff]  ;;  %v658_v23 = vld [vmem:[#allocation4 + $0xb8] sm:$0xff] }
 0x117   :  { %v211_v51 = vpop.f32.mrf.mxu0 }
 0x118   :  { %v212_v52 = vadd.f32 %v211_v51, %v140_v49  ;;  %v7136_v25 = vmul.f32 -1.442695, %v210_v24  ;;  %v562_v49 = vld [vmem:[#allocation2 + $0x2e8] sm:$0xff]  ;;  %v560_v51 = vld [vmem:[#allocation2 + $0x2d8] sm:$0xff]  ;;  %v657_v24 = vld [vmem:[#allocation4 + $0xb0] sm:$0xff] }
 0x119   :  { %580 = vmatprep.subr.mxu0 %v562_v49  ;;  %v575_v49 = vrot.slane %v8803_v48, %v8736_v47 }
 0x11a   :  { %v214_v53 = vmax.f32 %v212_v52, 0.0  ;;  %8404 = vpow2.f32 %v7136_v25  ;;  %v559_v52 = vld [vmem:[#allocation2 + $0x2d0] sm:$0xff]  ;;  %581 = vmatpush1.msra.mxu0 %v561_v50  ;;  %v656_v25 = vld [vmem:[#allocation4 + $0xa8] sm:$0xff] }
 0x11b   :  { %582 = vmatprep.subr.mxu0 %v560_v51 }
 0x11c   :  { %7666 = vmatmul.mubr.msk.f32.vlgmr.msra.gmra.mxu1 %vm230_vm1, %v214_v53  ;;  %v558_v53 = vld [vmem:[#allocation2 + $0x2c8] sm:$0xff]  ;;  %583 = vmatpush1.msra.mxu0 %v559_v52 }
 0x11d   :  { %361 = vmatpush1.msra.mxu1 %v345_v54  ;;  %424 = vmatprep.mubr.f32.mxu1 %v8621_v0  ;;  %v557_v54 = vld [vmem:[#allocation2 + $0x2c0] sm:$0xff] }
 0x11e   :  { %362 = vmatprep.subr.mxu1 %v344_v55  ;;  %v556_v55 = vld [vmem:[#allocation2 + $0x2b8] sm:$0xff]  ;;  %584 = vmatprep.subr.mxu0 %v558_v53 }
 0x11f   :  { %363 = vmatpush1.msra.mxu1 %v343_v56  ;;  %v555_v56 = vld [vmem:[#allocation2 + $0x2b0] sm:$0xff]  ;;  %585 = vmatpush1.msra.mxu0 %v557_v54 }
 0x120   :  { %364 = vmatprep.subr.mxu1 %v342_v57  ;;  %v554_v57 = vld [vmem:[#allocation2 + $0x2a8] sm:$0xff]  ;;  %586 = vmatprep.subr.mxu0 %v556_v55  ;;  %v781_v54 = vld [vmem:[#allocation2 + $0x3f0] sm:$0xff] }
 0x121   :  { %365 = vmatpush1.msra.mxu1 %v341_v58  ;;  %v553_v58 = vld [vmem:[#allocation2 + $0x2a0] sm:$0xff]  ;;  %587 = vmatpush1.msra.mxu0 %v555_v56  ;;  %v780_v55 = vld [vmem:[#allocation2 + $0x3e8] sm:$0xff] }
 0x122   :  { %366 = vmatprep.subr.mxu1 %v340_v59  ;;  %v552_v59 = vld [vmem:[#allocation2 + $0x298] sm:$0xff]  ;;  %588 = vmatprep.subr.mxu0 %v554_v57  ;;  %v779_v56 = vld [vmem:[#allocation2 + $0x3e0] sm:$0xff] }
 0x123   :  { %367 = vmatpush1.msra.mxu1 %v339_v60  ;;  %v551_v60 = vld [vmem:[#allocation2 + $0x290] sm:$0xff]  ;;  %589 = vmatpush1.msra.mxu0 %v553_v58  ;;  %v778_v57 = vld [vmem:[#allocation2 + $0x3d8] sm:$0xff] }
 0x124   :  { %368 = vmatprep.subr.mxu1 %v338_v61  ;;  %v550_v61 = vld [vmem:[#allocation2 + $0x288] sm:$0xff]  ;;  %590 = vmatprep.subr.mxu0 %v552_v59  ;;  %v777_v58 = vld [vmem:[#allocation2 + $0x3d0] sm:$0xff] }
 0x125   :  { %369 = vmatpush1.msra.mxu1 %v337_v62  ;;  %v549_v62 = vld [vmem:[#allocation2 + $0x280] sm:$0xff]  ;;  %591 = vmatpush1.msra.mxu0 %v551_v60  ;;  %v776_v59 = vld [vmem:[#allocation2 + $0x3c8] sm:$0xff] }
 0x126   :  { %370 = vmatprep.subr.mxu1 %v336_v63  ;;  %v548_v63 = vld [vmem:[#allocation2 + $0x278] sm:$0xff]  ;;  %592 = vmatprep.subr.mxu0 %v550_v61  ;;  %v775_v60 = vld [vmem:[#allocation2 + $0x3c0] sm:$0xff] }
 0x127   :  { %371 = vmatpush1.msra.mxu1 %v335_v1  ;;  %v8405_v26 = vpop.eup %8404  ;;  %v547_v1 = vld [vmem:[#allocation2 + $0x270] sm:$0xff]  ;;  %593 = vmatpush1.msra.mxu0 %v549_v62  ;;  %v774_v61 = vld [vmem:[#allocation2 + $0x3b8] sm:$0xff] }
 0x128   :  { %372 = vmatprep.subr.mxu1 %v334_v2  ;;  %v308_v27 = vadd.f32 1.0, %v8405_v26  ;;  %v546_v2 = vld [vmem:[#allocation2 + $0x268] sm:$0xff]  ;;  %594 = vmatprep.subr.mxu0 %v548_v63  ;;  %v655_v26 = vld [vmem:[#allocation4 + $0xa0] sm:$0xff]  ;;  %v773_v62 = vld [vmem:[#allocation2 + $0x3b0] sm:$0xff] }
 0x129   :  { %373 = vmatpush1.msra.mxu1 %v333_v3  ;;  %v545_v3 = vld [vmem:[#allocation2 + $0x260] sm:$0xff]  ;;  %595 = vmatpush1.msra.mxu0 %v547_v1  ;;  %v772_v63 = vld [vmem:[#allocation2 + $0x3a8] sm:$0xff] }
 0x12a   :  { %374 = vmatprep.subr.mxu1 %v332_v4  ;;  %8406 = vrcp.f32 %v308_v27  ;;  %v544_v4 = vld [vmem:[#allocation2 + $0x258] sm:$0xff]  ;;  %596 = vmatprep.subr.mxu0 %v546_v2  ;;  %v771_v1 = vld [vmem:[#allocation2 + $0x3a0] sm:$0xff] }
 0x12b   :  { %375 = vmatpush1.msra.mxu1 %v331_v5  ;;  %v543_v5 = vld [vmem:[#allocation2 + $0x250] sm:$0xff]  ;;  %597 = vmatpush1.msra.mxu0 %v545_v3  ;;  %v770_v2 = vld [vmem:[#allocation2 + $0x398] sm:$0xff] }
 0x12c   :  { %376 = vmatprep.subr.mxu1 %v330_v6  ;;  %v542_v6 = vld [vmem:[#allocation2 + $0x248] sm:$0xff]  ;;  %598 = vmatprep.subr.mxu0 %v544_v4  ;;  %v769_v3 = vld [vmem:[#allocation2 + $0x390] sm:$0xff] }
 0x12d   :  { %377 = vmatpush1.msra.mxu1 %v329_v7  ;;  %599 = vmatpush1.msra.mxu0 %v543_v5  ;;  %v7137_v7 = vld [vmem:[%s9796_s3 + $0x2] sm:$0x3]  ;;  %v768_v4 = vld [vmem:[#allocation2 + $0x388] sm:$0xff] }
 0x12e   :  { %378 = vmatprep.subr.mxu1 %v328_v8  ;;  %600 = vmatprep.subr.mxu0 %v542_v6  ;;  %v357_v8 = vrot.slane %v7137_v7, %v8736_v47  ;;  %v353_v27 = vrot.slane %v7137_v7, %v8751_v22  ;;  %v767_v5 = vld [vmem:[#allocation2 + $0x380] sm:$0xff]  ;;  %v766_v6 = vld [vmem:[#allocation2 + $0x378] sm:$0xff]  ;;  %v765_v7 = vld [vmem:[#allocation2 + $0x370] sm:$0xff] }
 0x12f   :  { %379 = vmatpush1.msra.mxu1 %v327_v9 }
 0x130   :  { %380 = vmatprep.subr.mxu1 %v326_v10 }
 0x131   :  { %381 = vmatpush1.msra.mxu1 %v325_v11 }
 0x132   :  { %382 = vmatprep.subr.mxu1 %v324_v12 }
 0x133   :  { %383 = vmatpush1.msra.mxu1 %v323_v13  ;;  %v541_v13 = vld [vmem:[#allocation2 + $0x240] sm:$0xff] }
 0x134   :  { %384 = vmatprep.subr.mxu1 %v322_v14  ;;  %601 = vmatpush1.msra.mxu0 %v541_v13  ;;  %v540_v14 = vld [vmem:[#allocation2 + $0x238] sm:$0xff]  ;;  %v759_v13 = vld [vmem:[#allocation2 + $0x340] sm:$0xff] }
 0x135   :  { %385 = vmatpush1.msra.mxu1 %v321_v15  ;;  %602 = vmatprep.subr.mxu0 %v540_v14  ;;  %v539_v15 = vld [vmem:[#allocation2 + $0x230] sm:$0xff]  ;;  %v758_v14 = vld [vmem:[#allocation2 + $0x338] sm:$0xff] }
 0x136   :  { %386 = vmatprep.subr.mxu1 %v320_v16  ;;  %603 = vmatpush1.msra.mxu0 %v539_v15  ;;  %v538_v16 = vld [vmem:[#allocation2 + $0x228] sm:$0xff]  ;;  %v757_v15 = vld [vmem:[#allocation2 + $0x330] sm:$0xff] }
 0x137   :  { %387 = vmatpush1.msra.mxu1 %v319_v17  ;;  %v8407_v29 = vpop.eup %8406  ;;  %604 = vmatprep.subr.mxu0 %v538_v16  ;;  %v537_v17 = vld [vmem:[#allocation2 + $0x220] sm:$0xff]  ;;  %v756_v16 = vld [vmem:[#allocation2 + $0x328] sm:$0xff] }
 0x138   :  { %388 = vmatprep.subr.mxu1 %v318_v18  ;;  %v311_v34 = vmul.f32 %v8407_v29, %v8724_v39  ;;  %v436_v39 = vld [vmem:[#allocation4 + $0x58] sm:$0xff]  ;;  %605 = vmatpush1.msra.mxu0 %v537_v17  ;;  %v755_v17 = vld [vmem:[#allocation2 + $0x320] sm:$0xff] }
 0x139   :  { %389 = vmatpush1.msra.mxu1 %v317_v19  ;;  %v536_v18 = vld [vmem:[#allocation2 + $0x218] sm:$0xff]  ;;  %v535_v19 = vld [vmem:[#allocation2 + $0x210] sm:$0xff] }
 0x13a   :  { %390 = vmatprep.subr.mxu1 %v316_v20  ;;  %606 = vmatprep.subr.mxu0 %v536_v18  ;;  %v534_v20 = vld [vmem:[#allocation2 + $0x208] sm:$0xff]  ;;  %v754_v18 = vld [vmem:[#allocation2 + $0x318] sm:$0xff] }
 0x13b   :  { %391 = vmatpush1.msra.mxu1 %v315_v21  ;;  %607 = vmatpush1.msra.mxu0 %v535_v19  ;;  %v533_v21 = vld [vmem:[#allocation2 + $0x200] sm:$0xff]  ;;  %v753_v19 = vld [vmem:[#allocation2 + $0x310] sm:$0xff] }
 0x13c   :  { %7668 = vmatprep.subr.mxu1 %v8621_v0  ;;  %608 = vmatprep.subr.mxu0 %v534_v20  ;;  %v752_v20 = vld [vmem:[#allocation2 + $0x308] sm:$0xff] }
 0x13d   :  { %609 = vmatpush1.msra.mxu0 %v533_v21  ;;  %v751_v21 = vld [vmem:[#allocation2 + $0x300] sm:$0xff] }
 0x13e   :  { %7706 = vmatprep.subr.mxu0 %v8621_v0 }
 0x1dc   :  { %v300_v30 = vpop.f32.mrf.mxu1 }
 0x1dd   :  { %v301_v31 = vadd.f32 %v7134_v28, %v300_v30 }
 0x1de   :  { %v7667_v32 = vpop.f32.mrf.mxu1 }
 0x1df   :  { %v304_v33 = vmax.f32 %v301_v31, 0.0  ;;  %v7139_v32 = vld [vmem:[%s9798_s5 + $0x1] ss:$0 sm:$0xff] }
 0x1e1   :  { %v312_v36 = vadd.f32 %v311_v34, %v304_v33 }
 0x1e3   :  { %v8761_v37 = vadd.f32 %v312_v36, %v8721_v35 }
 0x1e5   :  { %425 = vmatmul.mubr.f32.vlgmr.msra.gmra.mxu1 %v8761_v37 }
 0x1e6   :  { %7669 = vmatpush3.msra.mxu1 %v440_v38  ;;  %7684 = vmatprep.mubr.msk.f32.mxu1 %vm8622_vm0, %v8621_v0 }
 0x1e7   :  { %7670 = vmatprep.subr.mxu1 %v8621_v0 }
 0x1e8   :  { %7671 = vmatpush3.msra.mxu1 %v439_v40 }
 0x1e9   :  { %7672 = vmatprep.subr.mxu1 %v8621_v0 }
 0x1ea   :  { %7673 = vmatpush3.msra.mxu1 %v438_v41 }
 0x1eb   :  { %7674 = vmatprep.subr.mxu1 %v8621_v0 }
 0x1ec   :  { %7675 = vmatpush3.msra.mxu1 %v437_v42 }
 0x1ed   :  { %7676 = vmatprep.subr.mxu1 %v8621_v0 }
 0x1ee   :  { %7677 = vmatpush3.msra.mxu1 %v436_v39 }
 0x1ef   :  { %7678 = vmatprep.subr.mxu1 %v8621_v0 }
 0x1f0   :  { %7679 = vmatpush3.msra.mxu1 %v435_v43  ;;  %v654_v43 = vld [vmem:[#allocation4 + $0x98] sm:$0xff] }
 0x1f1   :  { %7680 = vmatprep.subr.mxu1 %v8621_v0 }
 0x1f2   :  { %7681 = vmatpush3.msra.mxu1 %v434_v44  ;;  %v653_v44 = vld [vmem:[#allocation4 + $0x90] sm:$0xff] }
 0x1f3   :  { %7682 = vmatprep.subr.mxu1 %v8621_v0 }
 0x1f4   :  { %7683 = vmatpush3.msra.mxu1 %v433_v45  ;;  %v652_v45 = vld [vmem:[#allocation4 + $0x88] sm:$0xff] }
 0x1f5   :  { %7687 = vmatprep.subr.mxu1 %v8621_v0 }
 0x2a5   :  { %v426_v9 = vpop.f32.mrf.mxu1 }
 0x2a6   :  { %v427_v28 = vadd.f32 %v426_v9, %v353_v27  ;;  %v763_v9 = vld [vmem:[#allocation2 + $0x360] sm:$0xff]  ;;  %v571_v27 = vrot.slane %v8803_v48, %v8751_v22 }
 0x2a7   :  { %v428_v10 = vpop.f32.mrf.mxu1 }
 0x2a8   :  { %v429_v11 = vadd.f32 %v428_v10, %v357_v8  ;;  %v7141_v29 = vmul.f32 -1.442695, %v427_v28  ;;  %v764_v8 = vld [vmem:[#allocation2 + $0x368] sm:$0xff]  ;;  %v762_v10 = vld [vmem:[#allocation2 + $0x358] sm:$0xff] }
 0x2aa   :  { %v431_v12 = vmax.f32 %v429_v11, 0.0  ;;  %8408 = vpow2.f32 %v7141_v29  ;;  %v761_v11 = vld [vmem:[#allocation2 + $0x350] sm:$0xff] }
 0x2ac   :  { %7685 = vmatmul.mubr.msk.f32.vlgmr.msra.gmra.mxu1 %vm230_vm1, %v431_v12  ;;  %v760_v12 = vld [vmem:[#allocation2 + $0x348] sm:$0xff] }
 0x2ad   :  { %7703 = vmatprep.mubr.msk.f32.mxu1 %vm8622_vm0, %v8621_v0  ;;  %7688 = vmatpush3.msra.mxu1 %v658_v23  ;;  %v876_v23 = vld [vmem:[#allocation4 + $0xf8] sm:$0xff] }
 0x2ae   :  { %7689 = vmatprep.subr.mxu1 %v8621_v0 }
 0x2af   :  { %7690 = vmatpush3.msra.mxu1 %v657_v24  ;;  %v875_v24 = vld [vmem:[#allocation4 + $0xf0] sm:$0xff] }
 0x2b0   :  { %7691 = vmatprep.subr.mxu1 %v8621_v0 }
 0x2b1   :  { %7692 = vmatpush3.msra.mxu1 %v656_v25  ;;  %v874_v25 = vld [vmem:[#allocation4 + $0xe8] sm:$0xff] }
 0x2b2   :  { %7693 = vmatprep.subr.mxu1 %v8621_v0 }
 0x2b3   :  { %7694 = vmatpush3.msra.mxu1 %v655_v26  ;;  %v873_v26 = vld [vmem:[#allocation4 + $0xe0] sm:$0xff] }
 0x2b4   :  { %7695 = vmatprep.subr.mxu1 %v8621_v0 }
 0x2b5   :  { %7696 = vmatpush3.msra.mxu1 %v654_v43 }
 0x2b6   :  { %7697 = vmatprep.subr.mxu1 %v8621_v0 }
 0x2b7   :  { %v8409_v30 = vpop.eup %8408  ;;  %7698 = vmatpush3.msra.mxu1 %v653_v44  ;;  %v872_v44 = vld [vmem:[#allocation4 + $0xd8] sm:$0xff] }
 0x2b8   :  { %v526_v31 = vadd.f32 1.0, %v8409_v30  ;;  %7699 = vmatprep.subr.mxu1 %v8621_v0 }
 0x2b9   :  { %7700 = vmatpush3.msra.mxu1 %v652_v45  ;;  %v871_v45 = vld [vmem:[#allocation4 + $0xd0] sm:$0xff] }
 0x2ba   :  { %8410 = vrcp.f32 %v526_v31  ;;  %7701 = vmatprep.subr.mxu1 %v8621_v0 }
 0x2c7   :  { %v8411_v33 = vpop.eup %8410 }
 0x2c8   :  { %v529_v41 = vmul.f32 %v8411_v33, %v8761_v37  ;;  %v651_v37 = vld [vmem:[#allocation4 + $0x80] sm:$0xff] }
 0x2c9   :  { %7702 = vmatpush3.msra.mxu1 %v651_v37  ;;  %v870_v37 = vld [vmem:[#allocation4 + $0xc8] sm:$0xff] }
 0x2ca   :  { %796 = vmatprep.subr.mxu1 %v782_v46  ;;  %v8834_v46 = vld [vmem:[%s9796_s3 + $0x6] sm:$0x3] }
 0x2cb   :  { %v793_v48 = vrot.slane %v8834_v46, %v8736_v47 }
 0x36c   :  { %v518_v34 = vpop.f32.mrf.mxu1 }
 0x36d   :  { %v519_v36 = vadd.f32 %v7139_v32, %v518_v34  ;;  %v7144_v32 = vld [vmem:[%s9798_s5 + $0x2] ss:$0 sm:$0xff] }
 0x36e   :  { %v7686_v38 = vpop.f32.mrf.mxu1 }
 0x36f   :  { %v522_v40 = vmax.f32 %v519_v36, 0.0 }
 0x371   :  { %v530_v42 = vadd.f32 %v529_v41, %v522_v40 }
 0x373   :  { %v8792_v39 = vadd.f32 %v530_v42, %v8721_v35 }
 0x375   :  { %643 = vmatmul.mubr.f32.vlgmr.msra.gmra.mxu0 %v8792_v39 }
 0x376   :  { %7722 = vmatprep.mubr.msk.f32.mxu0 %vm8622_vm0, %v8621_v0  ;;  %7707 = vmatpush3.msra.mxu0 %v876_v23  ;;  %v1081_v23 = vld [vmem:[#allocation2 + $0x478] sm:$0xff] }
 0x377   :  { %7708 = vmatprep.subr.mxu0 %v8621_v0 }
 0x378   :  { %7709 = vmatpush3.msra.mxu0 %v875_v24  ;;  %v1080_v24 = vld [vmem:[#allocation2 + $0x470] sm:$0xff] }
 0x379   :  { %7710 = vmatprep.subr.mxu0 %v8621_v0 }
 0x37a   :  { %7711 = vmatpush3.msra.mxu0 %v874_v25  ;;  %v1079_v25 = vld [vmem:[#allocation2 + $0x468] sm:$0xff] }
 0x37b   :  { %7712 = vmatprep.subr.mxu0 %v8621_v0 }
 0x37c   :  { %7713 = vmatpush3.msra.mxu0 %v873_v26  ;;  %v1078_v26 = vld [vmem:[#allocation2 + $0x460] sm:$0xff] }
 0x37d   :  { %7714 = vmatprep.subr.mxu0 %v8621_v0 }
 0x37e   :  { %7715 = vmatpush3.msra.mxu0 %v872_v44 }
 0x37f   :  { %7716 = vmatprep.subr.mxu0 %v8621_v0 }
 0x380   :  { %7717 = vmatpush3.msra.mxu0 %v871_v45 }
 0x381   :  { %7718 = vmatprep.subr.mxu0 %v8621_v0 }
 0x382   :  { %7719 = vmatpush3.msra.mxu0 %v870_v37 }
 0x383   :  { %7720 = vmatprep.subr.mxu0 %v8621_v0 }
 0x435   :  { %v8807_v50 = vpop.f32.mrf.mxu0 }
 0x436   :  { %v645_v28 = vadd.f32 %v8807_v50, %v571_v27  ;;  %v1077_v27 = vld [vmem:[#allocation2 + $0x458] sm:$0xff] }
 0x437   :  { %v646_v51 = vpop.f32.mrf.mxu0 }
 0x438   :  { %v647_v52 = vadd.f32 %v646_v51, %v575_v49  ;;  %v7146_v29 = vmul.f32 -1.442695, %v645_v28  ;;  %v1076_v28 = vld [vmem:[#allocation2 + $0x450] sm:$0xff] }
 0x43a   :  { %v649_v53 = vmax.f32 %v647_v52, 0.0  ;;  %8412 = vpow2.f32 %v7146_v29  ;;  %v1075_v29 = vld [vmem:[#allocation2 + $0x448] sm:$0xff] }
 0x43c   :  { %7704 = vmatmul.mubr.msk.f32.vlgmr.msra.gmra.mxu1 %vm230_vm1, %v649_v53  ;;  %v983_v53 = vld [vmem:[#allocation6 + $0x78] sm:$0xff] }
 0x43d   :  { %797 = vmatpush1.msra.mxu1 %v781_v54  ;;  %860 = vmatprep.mubr.f32.mxu1 %v8621_v0  ;;  %v982_v54 = vld [vmem:[#allocation6 + $0x70] sm:$0xff] }
 0x43e   :  { %798 = vmatprep.subr.mxu1 %v780_v55  ;;  %v981_v55 = vld [vmem:[#allocation6 + $0x68] sm:$0xff] }
 0x43f   :  { %799 = vmatpush1.msra.mxu1 %v779_v56  ;;  %v980_v56 = vld [vmem:[#allocation6 + $0x60] sm:$0xff] }
 0x440   :  { %800 = vmatprep.subr.mxu1 %v778_v57  ;;  %v979_v57 = vld [vmem:[#allocation6 + $0x58] sm:$0xff] }
 0x441   :  { %801 = vmatpush1.msra.mxu1 %v777_v58  ;;  %v978_v58 = vld [vmem:[#allocation6 + $0x50] sm:$0xff] }
 0x442   :  { %802 = vmatprep.subr.mxu1 %v776_v59  ;;  %v977_v59 = vld [vmem:[#allocation6 + $0x48] sm:$0xff] }
 0x443   :  { %803 = vmatpush1.msra.mxu1 %v775_v60  ;;  %v976_v60 = vld [vmem:[#allocation6 + $0x40] sm:$0xff] }
 0x444   :  { %804 = vmatprep.subr.mxu1 %v774_v61  ;;  %v975_v61 = vld [vmem:[#allocation6 + $0x38] sm:$0xff] }
 0x445   :  { %805 = vmatpush1.msra.mxu1 %v773_v62  ;;  %v974_v62 = vld [vmem:[#allocation6 + $0x30] sm:$0xff] }
 0x446   :  { %806 = vmatprep.subr.mxu1 %v772_v63  ;;  %v973_v63 = vld [vmem:[#allocation6 + $0x28] sm:$0xff] }
 0x447   :  { %807 = vmatpush1.msra.mxu1 %v771_v1  ;;  %v8413_v30 = vpop.eup %8412  ;;  %v972_v1 = vld [vmem:[#allocation6 + $0x20] sm:$0xff] }
 0x448   :  { %808 = vmatprep.subr.mxu1 %v770_v2  ;;  %v744_v31 = vadd.f32 1.0, %v8413_v30  ;;  %v971_v2 = vld [vmem:[#allocation6 + $0x18] sm:$0xff]  ;;  %v1074_v30 = vld [vmem:[#allocation2 + $0x440] sm:$0xff] }
 0x449   :  { %809 = vmatpush1.msra.mxu1 %v769_v3  ;;  %v970_v3 = vld [vmem:[#allocation6 + $0x10] sm:$0xff] }
 0x44a   :  { %810 = vmatprep.subr.mxu1 %v768_v4  ;;  %8414 = vrcp.f32 %v744_v31  ;;  %v969_v4 = vld [vmem:[#allocation6 + $0x8] sm:$0xff]  ;;  %v1073_v31 = vld [vmem:[#allocation2 + $0x438] sm:$0xff] }
 0x44b   :  { %811 = vmatpush1.msra.mxu1 %v767_v5  ;;  %v968_v5 = vld [vmem:[#allocation6] sm:$0xff] }
 0x44c   :  { %812 = vmatprep.subr.mxu1 %v766_v6  ;;  %v1097_v6 = vld [vmem:[#allocation2 + $0x4f8] sm:$0xff] }
 0x44d   :  { %813 = vmatpush1.msra.mxu1 %v765_v7  ;;  %v1096_v7 = vld [vmem:[#allocation2 + $0x4f0] sm:$0xff] }
 0x44e   :  { %814 = vmatprep.subr.mxu1 %v764_v8  ;;  %v1095_v8 = vld [vmem:[#allocation2 + $0x4e8] sm:$0xff] }
 0x44f   :  { %815 = vmatpush1.msra.mxu1 %v763_v9  ;;  %v1094_v9 = vld [vmem:[#allocation2 + $0x4e0] sm:$0xff] }
 0x450   :  { %816 = vmatprep.subr.mxu1 %v762_v10  ;;  %v1093_v10 = vld [vmem:[#allocation2 + $0x4d8] sm:$0xff] }
 0x451   :  { %817 = vmatpush1.msra.mxu1 %v761_v11  ;;  %v1092_v11 = vld [vmem:[#allocation2 + $0x4d0] sm:$0xff] }
 0x452   :  { %818 = vmatprep.subr.mxu1 %v760_v12  ;;  %v1091_v12 = vld [vmem:[#allocation2 + $0x4c8] sm:$0xff] }
 0x453   :  { %819 = vmatpush1.msra.mxu1 %v759_v13  ;;  %v1090_v13 = vld [vmem:[#allocation2 + $0x4c0] sm:$0xff] }
 0x454   :  { %820 = vmatprep.subr.mxu1 %v758_v14  ;;  %v1089_v14 = vld [vmem:[#allocation2 + $0x4b8] sm:$0xff] }
 0x455   :  { %821 = vmatpush1.msra.mxu1 %v757_v15  ;;  %v1088_v15 = vld [vmem:[#allocation2 + $0x4b0] sm:$0xff] }
 0x456   :  { %822 = vmatprep.subr.mxu1 %v756_v16  ;;  %v1087_v16 = vld [vmem:[#allocation2 + $0x4a8] sm:$0xff] }
 0x457   :  { %823 = vmatpush1.msra.mxu1 %v755_v17  ;;  %v8415_v33 = vpop.eup %8414  ;;  %v1086_v17 = vld [vmem:[#allocation2 + $0x4a0] sm:$0xff] }
 0x458   :  { %824 = vmatprep.subr.mxu1 %v754_v18  ;;  %v747_v41 = vmul.f32 %v8415_v33, %v8792_v39  ;;  %v869_v39 = vld [vmem:[#allocation4 + $0xc0] sm:$0xff]  ;;  %v1085_v18 = vld [vmem:[#allocation2 + $0x498] sm:$0xff] }
 0x459   :  { %825 = vmatpush1.msra.mxu1 %v753_v19  ;;  %7721 = vmatpush3.msra.mxu0 %v869_v39  ;;  %v1084_v19 = vld [vmem:[#allocation2 + $0x490] sm:$0xff] }
 0x45a   :  { %826 = vmatprep.subr.mxu1 %v752_v20  ;;  %7725 = vmatprep.subr.mxu0 %v8621_v0  ;;  %v1083_v20 = vld [vmem:[#allocation2 + $0x488] sm:$0xff] }
 0x45b   :  { %827 = vmatpush1.msra.mxu1 %v751_v21  ;;  %v1082_v21 = vld [vmem:[#allocation2 + $0x480] sm:$0xff] }
 0x45c   :  { %1111 = vmatprep.subr.mxu1 %v1097_v6  ;;  %v1315_v6 = vld [vmem:[#allocation2 + $0x5f8] sm:$0xff] }
 0x4fc   :  { %v736_v34 = vpop.f32.mrf.mxu1 }
 0x4fd   :  { %v737_v36 = vadd.f32 %v7144_v32, %v736_v34  ;;  %v789_v32 = vrot.slane %v8834_v46, %v8751_v22 }
 0x4fe   :  { %v7705_v38 = vpop.f32.mrf.mxu1 }
 0x4ff   :  { %v740_v40 = vmax.f32 %v737_v36, 0.0 }
 0x501   :  { %v748_v42 = vadd.f32 %v747_v41, %v740_v40  ;;  %v7149_v40 = vld [vmem:[%s9798_s5 + $0x3] ss:$0 sm:$0xff] }
 0x503   :  { %v8823_v43 = vadd.f32 %v748_v42, %v8721_v35 }
 0x505   :  { %861 = vmatmul.mubr.f32.vlgmr.msra.gmra.mxu1 %v8823_v43 }
 0x506   :  { %1175 = vmatprep.mubr.f32.mxu1 %v8621_v0  ;;  %1112 = vmatpush1.msra.mxu1 %v1096_v7  ;;  %v1314_v7 = vld [vmem:[#allocation2 + $0x5f0] sm:$0xff] }
 0x507   :  { %1113 = vmatprep.subr.mxu1 %v1095_v8  ;;  %v1313_v8 = vld [vmem:[#allocation2 + $0x5e8] sm:$0xff] }
 0x508   :  { %1114 = vmatpush1.msra.mxu1 %v1094_v9  ;;  %v1312_v9 = vld [vmem:[#allocation2 + $0x5e0] sm:$0xff] }
 0x509   :  { %1115 = vmatprep.subr.mxu1 %v1093_v10  ;;  %v1311_v10 = vld [vmem:[#allocation2 + $0x5d8] sm:$0xff] }
 0x50a   :  { %1116 = vmatpush1.msra.mxu1 %v1092_v11  ;;  %v1310_v11 = vld [vmem:[#allocation2 + $0x5d0] sm:$0xff] }
 0x50b   :  { %1117 = vmatprep.subr.mxu1 %v1091_v12  ;;  %v1309_v12 = vld [vmem:[#allocation2 + $0x5c8] sm:$0xff] }
 0x50c   :  { %1118 = vmatpush1.msra.mxu1 %v1090_v13  ;;  %v1308_v13 = vld [vmem:[#allocation2 + $0x5c0] sm:$0xff] }
 0x50d   :  { %1119 = vmatprep.subr.mxu1 %v1089_v14  ;;  %v1307_v14 = vld [vmem:[#allocation2 + $0x5b8] sm:$0xff] }
 0x50e   :  { %1120 = vmatpush1.msra.mxu1 %v1088_v15  ;;  %v1306_v15 = vld [vmem:[#allocation2 + $0x5b0] sm:$0xff] }
 0x50f   :  { %1121 = vmatprep.subr.mxu1 %v1087_v16  ;;  %v1305_v16 = vld [vmem:[#allocation2 + $0x5a8] sm:$0xff] }
 0x510   :  { %1122 = vmatpush1.msra.mxu1 %v1086_v17  ;;  %v1304_v17 = vld [vmem:[#allocation2 + $0x5a0] sm:$0xff] }
 0x511   :  { %1123 = vmatprep.subr.mxu1 %v1085_v18  ;;  %v1303_v18 = vld [vmem:[#allocation2 + $0x598] sm:$0xff] }
 0x512   :  { %1124 = vmatpush1.msra.mxu1 %v1084_v19  ;;  %v1302_v19 = vld [vmem:[#allocation2 + $0x590] sm:$0xff] }
 0x513   :  { %1125 = vmatprep.subr.mxu1 %v1083_v20  ;;  %v1301_v20 = vld [vmem:[#allocation2 + $0x588] sm:$0xff] }
 0x514   :  { %1126 = vmatpush1.msra.mxu1 %v1082_v21  ;;  %v1300_v21 = vld [vmem:[#allocation2 + $0x580] sm:$0xff] }
 0x515   :  { %1127 = vmatprep.subr.mxu1 %v1081_v23  ;;  %v1299_v23 = vld [vmem:[#allocation2 + $0x578] sm:$0xff] }
 0x516   :  { %1128 = vmatpush1.msra.mxu1 %v1080_v24  ;;  %v1298_v24 = vld [vmem:[#allocation2 + $0x570] sm:$0xff] }
 0x517   :  { %1129 = vmatprep.subr.mxu1 %v1079_v25  ;;  %v1297_v25 = vld [vmem:[#allocation2 + $0x568] sm:$0xff] }
 0x518   :  { %1130 = vmatpush1.msra.mxu1 %v1078_v26  ;;  %v1296_v26 = vld [vmem:[#allocation2 + $0x560] sm:$0xff] }
 0x519   :  { %1131 = vmatprep.subr.mxu1 %v1077_v27  ;;  %v1295_v27 = vld [vmem:[#allocation2 + $0x558] sm:$0xff] }
 0x51a   :  { %1132 = vmatpush1.msra.mxu1 %v1076_v28  ;;  %v1294_v28 = vld [vmem:[#allocation2 + $0x550] sm:$0xff] }
 0x51b   :  { %1133 = vmatprep.subr.mxu1 %v1075_v29  ;;  %v1293_v29 = vld [vmem:[#allocation2 + $0x548] sm:$0xff] }
 0x51c   :  { %1134 = vmatpush1.msra.mxu1 %v1074_v30  ;;  %v7154_v30 = vld [vmem:[%s9796_s3 + $0x8] sm:$0x3] }
 0x51d   :  { %1135 = vmatprep.subr.mxu1 %v1073_v31  ;;  %v1108_v31 = vrot.slane %v7154_v30, %v8736_v47 }
 0x5c5   :  { %v8838_v49 = vpop.f32.mrf.mxu1 }
 0x5c6   :  { %v863_v33 = vadd.f32 %v8838_v49, %v789_v32  ;;  %v1072_v49 = vld [vmem:[#allocation2 + $0x430] sm:$0xff] }
 0x5c7   :  { %v864_v50 = vpop.f32.mrf.mxu1  ;;  %1136 = vmatpush1.msra.mxu1 %v1072_v49  ;;  %v1408_v49 = vld [vmem:[#allocation4 + $0x170] sm:$0xff] }
 0x5c8   :  { %v865_v51 = vadd.f32 %v864_v50, %v793_v48  ;;  %v7151_v34 = vmul.f32 -1.442695, %v863_v33  ;;  %v1071_v50 = vld [vmem:[#allocation2 + $0x428] sm:$0xff] }
 0x5c9   :  { %1137 = vmatprep.subr.mxu1 %v1071_v50  ;;  %v1407_v50 = vld [vmem:[#allocation4 + $0x168] sm:$0xff] }
 0x5ca   :  { %v867_v52 = vmax.f32 %v865_v51, 0.0  ;;  %8416 = vpow2.f32 %v7151_v34  ;;  %v1070_v51 = vld [vmem:[#allocation2 + $0x420] sm:$0xff] }
 0x5cb   :  { %1138 = vmatpush1.msra.mxu1 %v1070_v51  ;;  %v1406_v51 = vld [vmem:[#allocation4 + $0x160] sm:$0xff] }
 0x5cc   :  { %7723 = vmatmul.mubr.msk.f32.vlgmr.msra.gmra.mxu0 %vm230_vm1, %v867_v52  ;;  %v1069_v52 = vld [vmem:[#allocation2 + $0x418] sm:$0xff] }
 0x5cd   :  { %7726 = vmatpush3.msra.mxu0 %v983_v53  ;;  %7757 = vmatprep.mubr.msk.f32.mxu0 %vm8622_vm0, %v8621_v0  ;;  %v1068_v53 = vld [vmem:[#allocation2 + $0x410] sm:$0xff] }
 0x5ce   :  { %7727 = vmatprep.subr.mxu0 %v8621_v0  ;;  %1139 = vmatprep.subr.mxu1 %v1069_v52  ;;  %v1104_v52 = vrot.slane %v7154_v30, %v8751_v22  ;;  %v1516_v30 = vld [vmem:[#allocation2 + $0x670] sm:$0xff] }
 0x5cf   :  { %7728 = vmatpush3.msra.mxu0 %v982_v54  ;;  %1140 = vmatpush1.msra.mxu1 %v1068_v53  ;;  %v1067_v54 = vld [vmem:[#allocation2 + $0x408] sm:$0xff] }
 0x5d0   :  { %7729 = vmatprep.subr.mxu0 %v8621_v0  ;;  %1141 = vmatprep.subr.mxu1 %v1067_v54 }
 0x5d1   :  { %7730 = vmatpush3.msra.mxu0 %v981_v55  ;;  %v1191_v55 = vld [vmem:[#allocation4 + $0x138] sm:$0xff] }
 0x5d2   :  { %7731 = vmatprep.subr.mxu0 %v8621_v0 }
 0x5d3   :  { %7732 = vmatpush3.msra.mxu0 %v980_v56  ;;  %v1189_v56 = vld [vmem:[#allocation4 + $0x128] sm:$0xff] }
 0x5d4   :  { %7733 = vmatprep.subr.mxu0 %v8621_v0 }
 0x5d5   :  { %7734 = vmatpush3.msra.mxu0 %v979_v57  ;;  %v1188_v57 = vld [vmem:[#allocation4 + $0x120] sm:$0xff] }
 0x5d6   :  { %7735 = vmatprep.subr.mxu0 %v8621_v0 }
 0x5d7   :  { %7736 = vmatpush3.msra.mxu0 %v978_v58  ;;  %v8417_v36 = vpop.eup %8416  ;;  %v7152_v58 = vld [vmem:[%s9800_s7] ss:$0 sm:$0xff] }
 0x5d8   :  { %7737 = vmatprep.subr.mxu0 %v8621_v0  ;;  %v962_v38 = vadd.f32 1.0, %v8417_v36 }
 0x5d9   :  { %7738 = vmatpush3.msra.mxu0 %v977_v59 }
 0x5da   :  { %7739 = vmatprep.subr.mxu0 %v8621_v0  ;;  %8418 = vrcp.f32 %v962_v38  ;;  %v1292_v38 = vld [vmem:[#allocation2 + $0x540] sm:$0xff] }
 0x5db   :  { %7740 = vmatpush3.msra.mxu0 %v976_v60 }
 0x5dc   :  { %7741 = vmatprep.subr.mxu0 %v8621_v0 }
 0x5dd   :  { %7742 = vmatpush3.msra.mxu0 %v975_v61  ;;  %v8879_v61 = vld [vmem:[%s9794_s1 + $0x2] sm:$0x3] }
 0x5de   :  { %7743 = vmatprep.subr.mxu0 %v8621_v0 }
 0x5df   :  { %7744 = vmatpush3.msra.mxu0 %v974_v62 }
 0x5e0   :  { %7745 = vmatprep.subr.mxu0 %v8621_v0 }
 0x5e1   :  { %7746 = vmatpush3.msra.mxu0 %v973_v63 }
 0x5e2   :  { %7747 = vmatprep.subr.mxu0 %v8621_v0 }
 0x5e3   :  { %7748 = vmatpush3.msra.mxu0 %v972_v1 }
 0x5e4   :  { %7749 = vmatprep.subr.mxu0 %v8621_v0 }
 0x5e5   :  { %7750 = vmatpush3.msra.mxu0 %v971_v2  ;;  %v1187_v2 = vld [vmem:[#allocation4 + $0x118] sm:$0xff] }
 0x5e6   :  { %7751 = vmatprep.subr.mxu0 %v8621_v0 }
 0x5e7   :  { %7752 = vmatpush3.msra.mxu0 %v970_v3  ;;  %v8419_v41 = vpop.eup %8418  ;;  %v1186_v3 = vld [vmem:[#allocation4 + $0x110] sm:$0xff] }
 0x5e8   :  { %7753 = vmatprep.subr.mxu0 %v8621_v0  ;;  %v965_v39 = vmul.f32 %v8419_v41, %v8823_v43  ;;  %v1066_v43 = vld [vmem:[#allocation2 + $0x400] sm:$0xff]  ;;  %v1290_v41 = vld [vmem:[#allocation2 + $0x530] sm:$0xff] }
 0x5e9   :  { %7754 = vmatpush3.msra.mxu0 %v969_v4  ;;  %1142 = vmatpush1.msra.mxu1 %v1066_v43  ;;  %v1185_v4 = vld [vmem:[#allocation4 + $0x108] sm:$0xff] }
 0x5ea   :  { %7755 = vmatprep.subr.mxu0 %v8621_v0  ;;  %1329 = vmatprep.subr.mxu1 %v1315_v6  ;;  %v1533_v6 = vld [vmem:[#allocation2 + $0x6f8] sm:$0xff] }
 0x5eb   :  { %7756 = vmatpush3.msra.mxu0 %v968_v5  ;;  %v1184_v5 = vld [vmem:[#allocation4 + $0x100] sm:$0xff] }
 0x5ec   :  { %7760 = vmatprep.subr.mxu0 %v8621_v0 }
 0x68c   :  { %v954_v42 = vpop.f32.mrf.mxu0 }
 0x68d   :  { %v955_v44 = vadd.f32 %v7149_v40, %v954_v42  ;;  %v1291_v40 = vld [vmem:[#allocation2 + $0x538] sm:$0xff]  ;;  %v1289_v42 = vld [vmem:[#allocation2 + $0x528] sm:$0xff] }
 0x68e   :  { %v7724_v45 = vpop.f32.mrf.mxu0 }
 0x68f   :  { %v958_v37 = vmax.f32 %v955_v44, 0.0  ;;  %v1288_v44 = vld [vmem:[#allocation2 + $0x520] sm:$0xff]  ;;  %v1287_v45 = vld [vmem:[#allocation2 + $0x518] sm:$0xff] }
 0x691   :  { %v966_v48 = vadd.f32 %v965_v39, %v958_v37  ;;  %v1286_v37 = vld [vmem:[#allocation2 + $0x510] sm:$0xff]  ;;  %v1285_v39 = vld [vmem:[#allocation2 + $0x508] sm:$0xff] }
 0x693   :  { %v967_v46 = vadd.f32 %v966_v48, %v8721_v35  ;;  %v1190_v35 = vld [vmem:[#allocation4 + $0x130] sm:$0xff]  ;;  %v1284_v48 = vld [vmem:[#allocation2 + $0x500] sm:$0xff] }
 0x695   :  { %7758 = vmatmul.mubr.f32.vlgmr.msra.gmra.mxu0 %v967_v46  ;;  %v1409_v46 = vld [vmem:[#allocation4 + $0x178] sm:$0xff] }
 0x696   :  { %7776 = vmatprep.mubr.msk.f32.mxu0 %vm8622_vm0, %v8621_v0  ;;  %7761 = vmatpush3.msra.mxu0 %v1191_v55 }
 0x697   :  { %7762 = vmatprep.subr.mxu0 %v8621_v0 }
 0x698   :  { %7763 = vmatpush3.msra.mxu0 %v1190_v35  ;;  %v7156_v35 = vld [vmem:[%s9798_s5 + $0x4] ss:$0 sm:$0xff] }
 0x699   :  { %7764 = vmatprep.subr.mxu0 %v8621_v0 }
 0x69a   :  { %7765 = vmatpush3.msra.mxu0 %v1189_v56 }
 0x69b   :  { %7766 = vmatprep.subr.mxu0 %v8621_v0 }
 0x69c   :  { %7767 = vmatpush3.msra.mxu0 %v1188_v57 }
 0x69d   :  { %7768 = vmatprep.subr.mxu0 %v8621_v0 }
 0x69e   :  { %7769 = vmatpush3.msra.mxu0 %v1187_v2 }
 0x69f   :  { %7770 = vmatprep.subr.mxu0 %v8621_v0 }
 0x6a0   :  { %7771 = vmatpush3.msra.mxu0 %v1186_v3  ;;  %v1405_v3 = vld [vmem:[#allocation4 + $0x158] sm:$0xff] }
 0x6a1   :  { %7772 = vmatprep.subr.mxu0 %v8621_v0 }
 0x6a2   :  { %7773 = vmatpush3.msra.mxu0 %v1185_v4  ;;  %v1404_v4 = vld [vmem:[#allocation4 + $0x150] sm:$0xff] }
 0x6a3   :  { %7774 = vmatprep.subr.mxu0 %v8621_v0 }
 0x6a4   :  { %7775 = vmatpush3.msra.mxu0 %v1184_v5  ;;  %v1403_v5 = vld [vmem:[#allocation4 + $0x148] sm:$0xff] }
 0x6a5   :  { %7779 = vmatprep.subr.mxu0 %v8621_v0 }
 0x755   :  { %v1057_v59 = vpop.f32.mrf.mxu0 }
 0x756   :  { %v1058_v60 = vadd.f32 %v7152_v58, %v1057_v59 }
 0x757   :  { %v7759_v62 = vpop.f32.mrf.mxu0 }
 0x758   :  { %v1061_v63 = vmax.f32 %v1058_v60, 0.0 }
 0x75a   :  { %v8882_v1 = vadd.f32 %v8879_v61, %v1061_v63 }
 0x75c   :  { %1176 = vmatmul.mubr.f32.vlgmr.msra.gmra.mxu1 %v8882_v1 }
 0x75d   :  { %1393 = vmatprep.mubr.f32.mxu1 %v8621_v0  ;;  %1330 = vmatpush1.msra.mxu1 %v1314_v7  ;;  %v8919_v7 = vld [vmem:[%s9796_s3 + $0xa] sm:$0x3] }
 0x75e   :  { %1331 = vmatprep.subr.mxu1 %v1313_v8  ;;  %v1326_v8 = vrot.slane %v8919_v7, %v8736_v47 }
 0x75f   :  { %1332 = vmatpush1.msra.mxu1 %v1312_v9 }
 0x760   :  { %1333 = vmatprep.subr.mxu1 %v1311_v10 }
 0x761   :  { %1334 = vmatpush1.msra.mxu1 %v1310_v11 }
 0x762   :  { %1335 = vmatprep.subr.mxu1 %v1309_v12 }
 0x763   :  { %1336 = vmatpush1.msra.mxu1 %v1308_v13  ;;  %v1532_v13 = vld [vmem:[#allocation2 + $0x6f0] sm:$0xff] }
 0x764   :  { %1337 = vmatprep.subr.mxu1 %v1307_v14  ;;  %v1531_v14 = vld [vmem:[#allocation2 + $0x6e8] sm:$0xff] }
 0x765   :  { %1338 = vmatpush1.msra.mxu1 %v1306_v15  ;;  %v1530_v15 = vld [vmem:[#allocation2 + $0x6e0] sm:$0xff] }
 0x766   :  { %1339 = vmatprep.subr.mxu1 %v1305_v16  ;;  %v1529_v16 = vld [vmem:[#allocation2 + $0x6d8] sm:$0xff] }
 0x767   :  { %1340 = vmatpush1.msra.mxu1 %v1304_v17  ;;  %v1528_v17 = vld [vmem:[#allocation2 + $0x6d0] sm:$0xff] }
 0x768   :  { %1341 = vmatprep.subr.mxu1 %v1303_v18  ;;  %v1527_v18 = vld [vmem:[#allocation2 + $0x6c8] sm:$0xff] }
 0x769   :  { %1342 = vmatpush1.msra.mxu1 %v1302_v19  ;;  %v1526_v19 = vld [vmem:[#allocation2 + $0x6c0] sm:$0xff] }
 0x76a   :  { %1343 = vmatprep.subr.mxu1 %v1301_v20  ;;  %v1525_v20 = vld [vmem:[#allocation2 + $0x6b8] sm:$0xff] }
 0x76b   :  { %1344 = vmatpush1.msra.mxu1 %v1300_v21  ;;  %v1524_v21 = vld [vmem:[#allocation2 + $0x6b0] sm:$0xff] }
 0x76c   :  { %1345 = vmatprep.subr.mxu1 %v1299_v23  ;;  %v1523_v23 = vld [vmem:[#allocation2 + $0x6a8] sm:$0xff] }
 0x76d   :  { %1346 = vmatpush1.msra.mxu1 %v1298_v24  ;;  %v1522_v24 = vld [vmem:[#allocation2 + $0x6a0] sm:$0xff] }
 0x76e   :  { %1347 = vmatprep.subr.mxu1 %v1297_v25  ;;  %v1521_v25 = vld [vmem:[#allocation2 + $0x698] sm:$0xff] }
 0x76f   :  { %1348 = vmatpush1.msra.mxu1 %v1296_v26  ;;  %v1520_v26 = vld [vmem:[#allocation2 + $0x690] sm:$0xff] }
 0x770   :  { %1349 = vmatprep.subr.mxu1 %v1295_v27  ;;  %v1519_v27 = vld [vmem:[#allocation2 + $0x688] sm:$0xff] }
 0x771   :  { %1350 = vmatpush1.msra.mxu1 %v1294_v28  ;;  %v1518_v28 = vld [vmem:[#allocation2 + $0x680] sm:$0xff] }
 0x772   :  { %1351 = vmatprep.subr.mxu1 %v1293_v29  ;;  %v1517_v29 = vld [vmem:[#allocation2 + $0x678] sm:$0xff] }
 0x773   :  { %1352 = vmatpush1.msra.mxu1 %v1292_v38  ;;  %v1510_v38 = vld [vmem:[#allocation2 + $0x640] sm:$0xff] }
 0x774   :  { %1353 = vmatprep.subr.mxu1 %v1291_v40  ;;  %v1509_v40 = vld [vmem:[#allocation2 + $0x638] sm:$0xff] }
 0x775   :  { %1354 = vmatpush1.msra.mxu1 %v1290_v41  ;;  %v1508_v41 = vld [vmem:[#allocation2 + $0x630] sm:$0xff] }
 0x776   :  { %1355 = vmatprep.subr.mxu1 %v1289_v42  ;;  %v1507_v42 = vld [vmem:[#allocation2 + $0x628] sm:$0xff] }
 0x777   :  { %1356 = vmatpush1.msra.mxu1 %v1288_v44  ;;  %v1506_v44 = vld [vmem:[#allocation2 + $0x620] sm:$0xff] }
 0x778   :  { %1357 = vmatprep.subr.mxu1 %v1287_v45  ;;  %v1505_v45 = vld [vmem:[#allocation2 + $0x618] sm:$0xff] }
 0x779   :  { %1358 = vmatpush1.msra.mxu1 %v1286_v37  ;;  %v1504_v37 = vld [vmem:[#allocation2 + $0x610] sm:$0xff] }
 0x77a   :  { %1359 = vmatprep.subr.mxu1 %v1285_v39  ;;  %v1503_v39 = vld [vmem:[#allocation2 + $0x608] sm:$0xff] }
 0x77b   :  { %1360 = vmatpush1.msra.mxu1 %v1284_v48  ;;  %v1502_v48 = vld [vmem:[#allocation2 + $0x600] sm:$0xff] }
 0x77c   :  { %7798 = vmatprep.subr.mxu1 %v8621_v0 }
 0x81c   :  { %v1177_v32 = vpop.f32.mrf.mxu1 }
 0x81d   :  { %v1178_v53 = vadd.f32 %v1177_v32, %v1104_v52  ;;  %v1514_v32 = vld [vmem:[#allocation2 + $0x660] sm:$0xff]  ;;  %v1322_v52 = vrot.slane %v8919_v7, %v8751_v22  ;;  %v8951_v7 = vld [vmem:[%s9796_s3 + $0xc] sm:$0x3] }
 0x81e   :  { %v1179_v33 = vpop.f32.mrf.mxu1 }
 0x81f   :  { %v1180_v34 = vadd.f32 %v1179_v33, %v1108_v31  ;;  %v7158_v54 = vmul.f32 -1.442695, %v1178_v53  ;;  %v1515_v31 = vld [vmem:[#allocation2 + $0x668] sm:$0xff]  ;;  %v1513_v33 = vld [vmem:[#allocation2 + $0x658] sm:$0xff] }
 0x821   :  { %v1182_v36 = vmax.f32 %v1180_v34, 0.0  ;;  %8420 = vpow2.f32 %v7158_v54  ;;  %v1512_v34 = vld [vmem:[#allocation2 + $0x650] sm:$0xff] }
 0x823   :  { %7777 = vmatmul.mubr.msk.f32.vlgmr.msra.gmra.mxu0 %vm230_vm1, %v1182_v36  ;;  %v1511_v36 = vld [vmem:[#allocation2 + $0x648] sm:$0xff] }
 0x824   :  { %7795 = vmatprep.mubr.msk.f32.mxu0 %vm8622_vm0, %v8621_v0  ;;  %7780 = vmatpush3.msra.mxu0 %v1409_v46  ;;  %v1627_v46 = vld [vmem:[#allocation4 + $0x1b8] sm:$0xff] }
 0x825   :  { %7781 = vmatprep.subr.mxu0 %v8621_v0 }
 0x826   :  { %7782 = vmatpush3.msra.mxu0 %v1408_v49  ;;  %v1626_v49 = vld [vmem:[#allocation4 + $0x1b0] sm:$0xff] }
 0x827   :  { %7783 = vmatprep.subr.mxu0 %v8621_v0 }
 0x828   :  { %7784 = vmatpush3.msra.mxu0 %v1407_v50  ;;  %v1625_v50 = vld [vmem:[#allocation4 + $0x1a8] sm:$0xff] }
 0x829   :  { %7785 = vmatprep.subr.mxu0 %v8621_v0 }
 0x82a   :  { %7786 = vmatpush3.msra.mxu0 %v1406_v51  ;;  %v1624_v51 = vld [vmem:[#allocation4 + $0x1a0] sm:$0xff] }
 0x82b   :  { %7787 = vmatprep.subr.mxu0 %v8621_v0 }
 0x82c   :  { %7788 = vmatpush3.msra.mxu0 %v1405_v3 }
 0x82d   :  { %7789 = vmatprep.subr.mxu0 %v8621_v0 }
 0x82e   :  { %v8421_v43 = vpop.eup %8420  ;;  %7790 = vmatpush3.msra.mxu0 %v1404_v4  ;;  %v1623_v4 = vld [vmem:[#allocation4 + $0x198] sm:$0xff] }
 0x82f   :  { %v1277_v55 = vadd.f32 1.0, %v8421_v43  ;;  %7791 = vmatprep.subr.mxu0 %v8621_v0 }
 0x830   :  { %7792 = vmatpush3.msra.mxu0 %v1403_v5  ;;  %v1622_v5 = vld [vmem:[#allocation4 + $0x190] sm:$0xff] }
 0x831   :  { %8422 = vrcp.f32 %v1277_v55  ;;  %7793 = vmatprep.subr.mxu0 %v8621_v0 }
 0x83e   :  { %v8423_v56 = vpop.eup %8422 }
 0x83f   :  { %v1280_v62 = vmul.f32 %v8423_v56, %v8882_v1  ;;  %v1402_v1 = vld [vmem:[#allocation4 + $0x140] sm:$0xff] }
 0x840   :  { %7794 = vmatpush3.msra.mxu0 %v1402_v1  ;;  %v1621_v1 = vld [vmem:[#allocation4 + $0x188] sm:$0xff] }
 0x841   :  { %1547 = vmatprep.subr.mxu0 %v1533_v6  ;;  %v1751_v6 = vld [vmem:[#allocation2 + $0x7f8] sm:$0xff] }
 0x8e3   :  { %v1269_v57 = vpop.f32.mrf.mxu0 }
 0x8e4   :  { %v1270_v58 = vadd.f32 %v7156_v35, %v1269_v57  ;;  %v7161_v35 = vld [vmem:[%s9798_s5 + $0x5] ss:$0 sm:$0xff] }
 0x8e5   :  { %v7778_v59 = vpop.f32.mrf.mxu0 }
 0x8e6   :  { %v1273_v60 = vmax.f32 %v1270_v58, 0.0 }
 0x8e8   :  { %v1281_v63 = vadd.f32 %v1280_v62, %v1273_v60 }
 0x8ea   :  { %v8908_v2 = vadd.f32 %v8879_v61, %v1281_v63 }
 0x8ec   :  { %1394 = vmatmul.mubr.f32.vlgmr.msra.gmra.mxu1 %v8908_v2 }
 0x8ed   :  { %7814 = vmatprep.mubr.msk.f32.mxu1 %vm8622_vm0, %v8621_v0  ;;  %7799 = vmatpush3.msra.mxu1 %v1627_v46  ;;  %v1845_v46 = vld [vmem:[#allocation4 + $0x1f8] sm:$0xff] }
 0x8ee   :  { %7800 = vmatprep.subr.mxu1 %v8621_v0 }
 0x8ef   :  { %7801 = vmatpush3.msra.mxu1 %v1626_v49  ;;  %v1844_v49 = vld [vmem:[#allocation4 + $0x1f0] sm:$0xff] }
 0x8f0   :  { %7802 = vmatprep.subr.mxu1 %v8621_v0 }
 0x8f1   :  { %7803 = vmatpush3.msra.mxu1 %v1625_v50  ;;  %v1843_v50 = vld [vmem:[#allocation4 + $0x1e8] sm:$0xff] }
 0x8f2   :  { %7804 = vmatprep.subr.mxu1 %v8621_v0 }
 0x8f3   :  { %7805 = vmatpush3.msra.mxu1 %v1624_v51  ;;  %v1842_v51 = vld [vmem:[#allocation4 + $0x1e0] sm:$0xff] }
 0x8f4   :  { %7806 = vmatprep.subr.mxu1 %v8621_v0 }
 0x8f5   :  { %7807 = vmatpush3.msra.mxu1 %v1623_v4 }
 0x8f6   :  { %7808 = vmatprep.subr.mxu1 %v8621_v0 }
 0x8f7   :  { %7809 = vmatpush3.msra.mxu1 %v1622_v5  ;;  %v1841_v5 = vld [vmem:[#allocation4 + $0x1d8] sm:$0xff] }
 0x8f8   :  { %7810 = vmatprep.subr.mxu1 %v8621_v0 }
 0x8f9   :  { %7811 = vmatpush3.msra.mxu1 %v1621_v1  ;;  %v1840_v1 = vld [vmem:[#allocation4 + $0x1d0] sm:$0xff] }
 0x8fa   :  { %7812 = vmatprep.subr.mxu1 %v8621_v0 }
 0x9ac   :  { %v8923_v9 = vpop.f32.mrf.mxu1 }
 0x9ad   :  { %v1396_v53 = vadd.f32 %v8923_v9, %v1322_v52  ;;  %v1540_v52 = vrot.slane %v8951_v7, %v8751_v22 }
 0x9ae   :  { %v1397_v10 = vpop.f32.mrf.mxu1 }
 0x9af   :  { %v1398_v11 = vadd.f32 %v1397_v10, %v1326_v8  ;;  %v7163_v54 = vmul.f32 -1.442695, %v1396_v53  ;;  %v1544_v8 = vrot.slane %v8951_v7, %v8736_v47 }
 0x9b1   :  { %v1400_v12 = vmax.f32 %v1398_v11, 0.0  ;;  %8424 = vpow2.f32 %v7163_v54 }
 0x9b3   :  { %7796 = vmatmul.mubr.msk.f32.vlgmr.msra.gmra.mxu0 %vm230_vm1, %v1400_v12 }
 0x9b4   :  { %1548 = vmatpush1.msra.mxu0 %v1532_v13  ;;  %1611 = vmatprep.mubr.f32.mxu0 %v8621_v0  ;;  %v1750_v13 = vld [vmem:[#allocation2 + $0x7f0] sm:$0xff] }
 0x9b5   :  { %1549 = vmatprep.subr.mxu0 %v1531_v14  ;;  %v1749_v14 = vld [vmem:[#allocation2 + $0x7e8] sm:$0xff] }
 0x9b6   :  { %1550 = vmatpush1.msra.mxu0 %v1530_v15  ;;  %v1748_v15 = vld [vmem:[#allocation2 + $0x7e0] sm:$0xff] }
 0x9b7   :  { %1551 = vmatprep.subr.mxu0 %v1529_v16  ;;  %v1747_v16 = vld [vmem:[#allocation2 + $0x7d8] sm:$0xff] }
 0x9b8   :  { %1552 = vmatpush1.msra.mxu0 %v1528_v17  ;;  %v1746_v17 = vld [vmem:[#allocation2 + $0x7d0] sm:$0xff] }
 0x9b9   :  { %1553 = vmatprep.subr.mxu0 %v1527_v18  ;;  %v1745_v18 = vld [vmem:[#allocation2 + $0x7c8] sm:$0xff] }
 0x9ba   :  { %1554 = vmatpush1.msra.mxu0 %v1526_v19  ;;  %v1744_v19 = vld [vmem:[#allocation2 + $0x7c0] sm:$0xff] }
 0x9bb   :  { %1555 = vmatprep.subr.mxu0 %v1525_v20  ;;  %v1743_v20 = vld [vmem:[#allocation2 + $0x7b8] sm:$0xff] }
 0x9bc   :  { %1556 = vmatpush1.msra.mxu0 %v1524_v21  ;;  %v1742_v21 = vld [vmem:[#allocation2 + $0x7b0] sm:$0xff] }
 0x9bd   :  { %1557 = vmatprep.subr.mxu0 %v1523_v23  ;;  %v1741_v23 = vld [vmem:[#allocation2 + $0x7a8] sm:$0xff] }
 0x9be   :  { %1558 = vmatpush1.msra.mxu0 %v1522_v24  ;;  %v8425_v43 = vpop.eup %8424  ;;  %v1740_v24 = vld [vmem:[#allocation2 + $0x7a0] sm:$0xff] }
 0x9bf   :  { %1559 = vmatprep.subr.mxu0 %v1521_v25  ;;  %v1495_v55 = vadd.f32 1.0, %v8425_v43  ;;  %v1739_v25 = vld [vmem:[#allocation2 + $0x798] sm:$0xff] }
 0x9c0   :  { %1560 = vmatpush1.msra.mxu0 %v1520_v26  ;;  %v1738_v26 = vld [vmem:[#allocation2 + $0x790] sm:$0xff] }
 0x9c1   :  { %1561 = vmatprep.subr.mxu0 %v1519_v27  ;;  %8426 = vrcp.f32 %v1495_v55  ;;  %v1737_v27 = vld [vmem:[#allocation2 + $0x788] sm:$0xff] }
 0x9c2   :  { %1562 = vmatpush1.msra.mxu0 %v1518_v28  ;;  %v1736_v28 = vld [vmem:[#allocation2 + $0x780] sm:$0xff] }
 0x9c3   :  { %1563 = vmatprep.subr.mxu0 %v1517_v29  ;;  %v1735_v29 = vld [vmem:[#allocation2 + $0x778] sm:$0xff] }
 0x9c4   :  { %1564 = vmatpush1.msra.mxu0 %v1516_v30  ;;  %v1734_v30 = vld [vmem:[#allocation2 + $0x770] sm:$0xff] }
 0x9c5   :  { %1565 = vmatprep.subr.mxu0 %v1515_v31  ;;  %v1733_v31 = vld [vmem:[#allocation2 + $0x768] sm:$0xff] }
 0x9c6   :  { %1566 = vmatpush1.msra.mxu0 %v1514_v32  ;;  %v1732_v32 = vld [vmem:[#allocation2 + $0x760] sm:$0xff] }
 0x9c7   :  { %1567 = vmatprep.subr.mxu0 %v1513_v33  ;;  %v1731_v33 = vld [vmem:[#allocation2 + $0x758] sm:$0xff] }
 0x9c8   :  { %1568 = vmatpush1.msra.mxu0 %v1512_v34  ;;  %v1730_v34 = vld [vmem:[#allocation2 + $0x750] sm:$0xff] }
 0x9c9   :  { %1569 = vmatprep.subr.mxu0 %v1511_v36  ;;  %v1729_v36 = vld [vmem:[#allocation2 + $0x748] sm:$0xff] }
 0x9ca   :  { %1570 = vmatpush1.msra.mxu0 %v1510_v38  ;;  %v1728_v38 = vld [vmem:[#allocation2 + $0x740] sm:$0xff] }
 0x9cb   :  { %1571 = vmatprep.subr.mxu0 %v1509_v40  ;;  %v1727_v40 = vld [vmem:[#allocation2 + $0x738] sm:$0xff] }
 0x9cc   :  { %1572 = vmatpush1.msra.mxu0 %v1508_v41  ;;  %v1726_v41 = vld [vmem:[#allocation2 + $0x730] sm:$0xff] }
 0x9cd   :  { %1573 = vmatprep.subr.mxu0 %v1507_v42  ;;  %v1725_v42 = vld [vmem:[#allocation2 + $0x728] sm:$0xff] }
 0x9ce   :  { %1574 = vmatpush1.msra.mxu0 %v1506_v44  ;;  %v8427_v56 = vpop.eup %8426  ;;  %v1724_v44 = vld [vmem:[#allocation2 + $0x720] sm:$0xff] }
 0x9cf   :  { %1575 = vmatprep.subr.mxu0 %v1505_v45  ;;  %v1498_v62 = vmul.f32 %v8427_v56, %v8908_v2  ;;  %v1620_v2 = vld [vmem:[#allocation4 + $0x180] sm:$0xff]  ;;  %v1723_v45 = vld [vmem:[#allocation2 + $0x718] sm:$0xff] }
 0x9d0   :  { %1576 = vmatpush1.msra.mxu0 %v1504_v37  ;;  %7813 = vmatpush3.msra.mxu1 %v1620_v2  ;;  %v1722_v37 = vld [vmem:[#allocation2 + $0x710] sm:$0xff]  ;;  %v1839_v2 = vld [vmem:[#allocation4 + $0x1c8] sm:$0xff] }
 0x9d1   :  { %1577 = vmatprep.subr.mxu0 %v1503_v39  ;;  %1765 = vmatprep.subr.mxu1 %v1751_v6  ;;  %v1721_v39 = vld [vmem:[#allocation2 + $0x708] sm:$0xff] }
 0x9d2   :  { %1578 = vmatpush1.msra.mxu0 %v1502_v48  ;;  %v1720_v48 = vld [vmem:[#allocation2 + $0x700] sm:$0xff]  ;;  %v8982_v6 = vld [vmem:[%s9796_s3 + $0xe] sm:$0x3] }
 0x9d3   :  { %7817 = vmatprep.subr.mxu0 %v8621_v0  ;;  %v1762_v7 = vrot.slane %v8982_v6, %v8736_v47 }
 0xa73   :  { %v1487_v57 = vpop.f32.mrf.mxu0 }
 0xa74   :  { %v1488_v58 = vadd.f32 %v7161_v35, %v1487_v57  ;;  %v7166_v35 = vld [vmem:[%s9798_s5 + $0x6] ss:$0 sm:$0xff] }
 0xa75   :  { %v7797_v59 = vpop.f32.mrf.mxu0 }
 0xa76   :  { %v1491_v60 = vmax.f32 %v1488_v58, 0.0 }
 0xa78   :  { %v1499_v63 = vadd.f32 %v1498_v62, %v1491_v60 }
 0xa7a   :  { %v8940_v3 = vadd.f32 %v8879_v61, %v1499_v63 }
 0xa7c   :  { %1612 = vmatmul.mubr.f32.vlgmr.msra.gmra.mxu0 %v8940_v3 }
 0xa7d   :  { %7833 = vmatprep.mubr.msk.f32.mxu0 %vm8622_vm0, %v8621_v0  ;;  %7818 = vmatpush3.msra.mxu0 %v1845_v46  ;;  %v2052_v46 = vld [vmem:[#allocation2 + $0x878] sm:$0xff] }
 0xa7e   :  { %7819 = vmatprep.subr.mxu0 %v8621_v0 }
 0xa7f   :  { %7820 = vmatpush3.msra.mxu0 %v1844_v49  ;;  %v2051_v49 = vld [vmem:[#allocation2 + $0x870] sm:$0xff] }
 0xa80   :  { %7821 = vmatprep.subr.mxu0 %v8621_v0 }
 0xa81   :  { %7822 = vmatpush3.msra.mxu0 %v1843_v50  ;;  %v2050_v50 = vld [vmem:[#allocation2 + $0x868] sm:$0xff] }
 0xa82   :  { %7823 = vmatprep.subr.mxu0 %v8621_v0 }
 0xa83   :  { %7824 = vmatpush3.msra.mxu0 %v1842_v51  ;;  %v2049_v51 = vld [vmem:[#allocation2 + $0x860] sm:$0xff] }
 0xa84   :  { %7825 = vmatprep.subr.mxu0 %v8621_v0 }
 0xa85   :  { %7826 = vmatpush3.msra.mxu0 %v1841_v5 }
 0xa86   :  { %7827 = vmatprep.subr.mxu0 %v8621_v0 }
 0xa87   :  { %7828 = vmatpush3.msra.mxu0 %v1840_v1 }
 0xa88   :  { %7829 = vmatprep.subr.mxu0 %v8621_v0 }
 0xa89   :  { %7830 = vmatpush3.msra.mxu0 %v1839_v2 }
 0xa8a   :  { %7831 = vmatprep.subr.mxu0 %v8621_v0 }
 0xb3c   :  { %v8955_v9 = vpop.f32.mrf.mxu0 }
 0xb3d   :  { %v1614_v53 = vadd.f32 %v8955_v9, %v1540_v52  ;;  %v2048_v52 = vld [vmem:[#allocation2 + $0x858] sm:$0xff] }
 0xb3e   :  { %v1615_v10 = vpop.f32.mrf.mxu0 }
 0xb3f   :  { %v1616_v11 = vadd.f32 %v1615_v10, %v1544_v8  ;;  %v7168_v54 = vmul.f32 -1.442695, %v1614_v53  ;;  %v2047_v53 = vld [vmem:[#allocation2 + $0x850] sm:$0xff] }
 0xb41   :  { %v1618_v12 = vmax.f32 %v1616_v11, 0.0  ;;  %8428 = vpow2.f32 %v7168_v54  ;;  %v2046_v54 = vld [vmem:[#allocation2 + $0x848] sm:$0xff] }
 0xb43   :  { %7815 = vmatmul.mubr.msk.f32.vlgmr.msra.gmra.mxu1 %vm230_vm1, %v1618_v12  ;;  %v1953_v12 = vld [vmem:[#allocation6 + $0xf8] sm:$0xff] }
 0xb44   :  { %1766 = vmatpush1.msra.mxu1 %v1750_v13  ;;  %1829 = vmatprep.mubr.f32.mxu1 %v8621_v0  ;;  %v1952_v13 = vld [vmem:[#allocation6 + $0xf0] sm:$0xff] }
 0xb45   :  { %1767 = vmatprep.subr.mxu1 %v1749_v14  ;;  %v1951_v14 = vld [vmem:[#allocation6 + $0xe8] sm:$0xff] }
 0xb46   :  { %1768 = vmatpush1.msra.mxu1 %v1748_v15  ;;  %v1950_v15 = vld [vmem:[#allocation6 + $0xe0] sm:$0xff] }
 0xb47   :  { %1769 = vmatprep.subr.mxu1 %v1747_v16  ;;  %v1949_v16 = vld [vmem:[#allocation6 + $0xd8] sm:$0xff] }
 0xb48   :  { %1770 = vmatpush1.msra.mxu1 %v1746_v17  ;;  %v1948_v17 = vld [vmem:[#allocation6 + $0xd0] sm:$0xff] }
 0xb49   :  { %1771 = vmatprep.subr.mxu1 %v1745_v18  ;;  %v1947_v18 = vld [vmem:[#allocation6 + $0xc8] sm:$0xff] }
 0xb4a   :  { %1772 = vmatpush1.msra.mxu1 %v1744_v19  ;;  %v1946_v19 = vld [vmem:[#allocation6 + $0xc0] sm:$0xff] }
 0xb4b   :  { %1773 = vmatprep.subr.mxu1 %v1743_v20  ;;  %v1945_v20 = vld [vmem:[#allocation6 + $0xb8] sm:$0xff] }
 0xb4c   :  { %1774 = vmatpush1.msra.mxu1 %v1742_v21  ;;  %v1944_v21 = vld [vmem:[#allocation6 + $0xb0] sm:$0xff] }
 0xb4d   :  { %1775 = vmatprep.subr.mxu1 %v1741_v23  ;;  %v1943_v23 = vld [vmem:[#allocation6 + $0xa8] sm:$0xff] }
 0xb4e   :  { %1776 = vmatpush1.msra.mxu1 %v1740_v24  ;;  %v8429_v43 = vpop.eup %8428  ;;  %v1942_v24 = vld [vmem:[#allocation6 + $0xa0] sm:$0xff] }
 0xb4f   :  { %1777 = vmatprep.subr.mxu1 %v1739_v25  ;;  %v1713_v55 = vadd.f32 1.0, %v8429_v43  ;;  %v1941_v25 = vld [vmem:[#allocation6 + $0x98] sm:$0xff]  ;;  %v2045_v43 = vld [vmem:[#allocation2 + $0x840] sm:$0xff] }
 0xb50   :  { %1778 = vmatpush1.msra.mxu1 %v1738_v26  ;;  %v1940_v26 = vld [vmem:[#allocation6 + $0x90] sm:$0xff] }
 0xb51   :  { %1779 = vmatprep.subr.mxu1 %v1737_v27  ;;  %8430 = vrcp.f32 %v1713_v55  ;;  %v1939_v27 = vld [vmem:[#allocation6 + $0x88] sm:$0xff]  ;;  %v2044_v55 = vld [vmem:[#allocation2 + $0x838] sm:$0xff] }
 0xb52   :  { %1780 = vmatpush1.msra.mxu1 %v1736_v28  ;;  %v1938_v28 = vld [vmem:[#allocation6 + $0x80] sm:$0xff] }
 0xb53   :  { %1781 = vmatprep.subr.mxu1 %v1735_v29  ;;  %v2068_v29 = vld [vmem:[#allocation2 + $0x8f8] sm:$0xff] }
 0xb54   :  { %1782 = vmatpush1.msra.mxu1 %v1734_v30  ;;  %v2067_v30 = vld [vmem:[#allocation2 + $0x8f0] sm:$0xff] }
 0xb55   :  { %1783 = vmatprep.subr.mxu1 %v1733_v31  ;;  %v2066_v31 = vld [vmem:[#allocation2 + $0x8e8] sm:$0xff] }
 0xb56   :  { %1784 = vmatpush1.msra.mxu1 %v1732_v32  ;;  %v2065_v32 = vld [vmem:[#allocation2 + $0x8e0] sm:$0xff] }
 0xb57   :  { %1785 = vmatprep.subr.mxu1 %v1731_v33  ;;  %v2064_v33 = vld [vmem:[#allocation2 + $0x8d8] sm:$0xff] }
 0xb58   :  { %1786 = vmatpush1.msra.mxu1 %v1730_v34  ;;  %v2063_v34 = vld [vmem:[#allocation2 + $0x8d0] sm:$0xff] }
 0xb59   :  { %1787 = vmatprep.subr.mxu1 %v1729_v36  ;;  %v2062_v36 = vld [vmem:[#allocation2 + $0x8c8] sm:$0xff] }
 0xb5a   :  { %1788 = vmatpush1.msra.mxu1 %v1728_v38  ;;  %v2061_v38 = vld [vmem:[#allocation2 + $0x8c0] sm:$0xff] }
 0xb5b   :  { %1789 = vmatprep.subr.mxu1 %v1727_v40  ;;  %v2060_v40 = vld [vmem:[#allocation2 + $0x8b8] sm:$0xff] }
 0xb5c   :  { %1790 = vmatpush1.msra.mxu1 %v1726_v41  ;;  %v2059_v41 = vld [vmem:[#allocation2 + $0x8b0] sm:$0xff] }
 0xb5d   :  { %1791 = vmatprep.subr.mxu1 %v1725_v42  ;;  %v2058_v42 = vld [vmem:[#allocation2 + $0x8a8] sm:$0xff] }
 0xb5e   :  { %1792 = vmatpush1.msra.mxu1 %v1724_v44  ;;  %v8431_v56 = vpop.eup %8430  ;;  %v2057_v44 = vld [vmem:[#allocation2 + $0x8a0] sm:$0xff] }
 0xb5f   :  { %1793 = vmatprep.subr.mxu1 %v1723_v45  ;;  %v1716_v62 = vmul.f32 %v8431_v56, %v8940_v3  ;;  %v1838_v3 = vld [vmem:[#allocation4 + $0x1c0] sm:$0xff]  ;;  %v2056_v45 = vld [vmem:[#allocation2 + $0x898] sm:$0xff] }
 0xb60   :  { %1794 = vmatpush1.msra.mxu1 %v1722_v37  ;;  %7832 = vmatpush3.msra.mxu0 %v1838_v3  ;;  %v2055_v37 = vld [vmem:[#allocation2 + $0x890] sm:$0xff] }
 0xb61   :  { %1795 = vmatprep.subr.mxu1 %v1721_v39  ;;  %7836 = vmatprep.subr.mxu0 %v8621_v0  ;;  %v2054_v39 = vld [vmem:[#allocation2 + $0x888] sm:$0xff] }
 0xb62   :  { %1796 = vmatpush1.msra.mxu1 %v1720_v48  ;;  %v2053_v48 = vld [vmem:[#allocation2 + $0x880] sm:$0xff] }
 0xb63   :  { %2082 = vmatprep.subr.mxu1 %v2068_v29  ;;  %v2286_v29 = vld [vmem:[#allocation2 + $0x9f8] sm:$0xff] }
 0xc03   :  { %v1705_v57 = vpop.f32.mrf.mxu1 }
 0xc04   :  { %v1706_v58 = vadd.f32 %v7166_v35, %v1705_v57  ;;  %v1758_v35 = vrot.slane %v8982_v6, %v8751_v22 }
 0xc05   :  { %v7816_v59 = vpop.f32.mrf.mxu1 }
 0xc06   :  { %v1709_v60 = vmax.f32 %v1706_v58, 0.0 }
 0xc08   :  { %v1717_v63 = vadd.f32 %v1716_v62, %v1709_v60  ;;  %v7171_v60 = vld [vmem:[%s9798_s5 + $0x7] ss:$0 sm:$0xff] }
 0xc0a   :  { %v8971_v4 = vadd.f32 %v8879_v61, %v1717_v63 }
 0xc0c   :  { %1830 = vmatmul.mubr.f32.vlgmr.msra.gmra.mxu1 %v8971_v4 }
 0xc0d   :  { %2146 = vmatprep.mubr.f32.mxu1 %v8621_v0  ;;  %2083 = vmatpush1.msra.mxu1 %v2067_v30  ;;  %v2285_v30 = vld [vmem:[#allocation2 + $0x9f0] sm:$0xff] }
 0xc0e   :  { %2084 = vmatprep.subr.mxu1 %v2066_v31  ;;  %v2284_v31 = vld [vmem:[#allocation2 + $0x9e8] sm:$0xff] }
 0xc0f   :  { %2085 = vmatpush1.msra.mxu1 %v2065_v32  ;;  %v2283_v32 = vld [vmem:[#allocation2 + $0x9e0] sm:$0xff] }
 0xc10   :  { %2086 = vmatprep.subr.mxu1 %v2064_v33  ;;  %v2282_v33 = vld [vmem:[#allocation2 + $0x9d8] sm:$0xff] }
 0xc11   :  { %2087 = vmatpush1.msra.mxu1 %v2063_v34  ;;  %v2281_v34 = vld [vmem:[#allocation2 + $0x9d0] sm:$0xff] }
 0xc12   :  { %2088 = vmatprep.subr.mxu1 %v2062_v36  ;;  %v2280_v36 = vld [vmem:[#allocation2 + $0x9c8] sm:$0xff] }
 0xc13   :  { %2089 = vmatpush1.msra.mxu1 %v2061_v38  ;;  %v2279_v38 = vld [vmem:[#allocation2 + $0x9c0] sm:$0xff] }
 0xc14   :  { %2090 = vmatprep.subr.mxu1 %v2060_v40  ;;  %v2278_v40 = vld [vmem:[#allocation2 + $0x9b8] sm:$0xff] }
 0xc15   :  { %2091 = vmatpush1.msra.mxu1 %v2059_v41  ;;  %v2277_v41 = vld [vmem:[#allocation2 + $0x9b0] sm:$0xff] }
 0xc16   :  { %2092 = vmatprep.subr.mxu1 %v2058_v42  ;;  %v2276_v42 = vld [vmem:[#allocation2 + $0x9a8] sm:$0xff] }
 0xc17   :  { %2093 = vmatpush1.msra.mxu1 %v2057_v44  ;;  %v2275_v44 = vld [vmem:[#allocation2 + $0x9a0] sm:$0xff] }
 0xc18   :  { %2094 = vmatprep.subr.mxu1 %v2056_v45  ;;  %v2274_v45 = vld [vmem:[#allocation2 + $0x998] sm:$0xff] }
 0xc19   :  { %2095 = vmatpush1.msra.mxu1 %v2055_v37  ;;  %v2273_v37 = vld [vmem:[#allocation2 + $0x990] sm:$0xff] }
 0xc1a   :  { %2096 = vmatprep.subr.mxu1 %v2054_v39  ;;  %v2272_v39 = vld [vmem:[#allocation2 + $0x988] sm:$0xff] }
 0xc1b   :  { %2097 = vmatpush1.msra.mxu1 %v2053_v48  ;;  %v2271_v48 = vld [vmem:[#allocation2 + $0x980] sm:$0xff] }
 0xc1c   :  { %2098 = vmatprep.subr.mxu1 %v2052_v46  ;;  %v2270_v46 = vld [vmem:[#allocation2 + $0x978] sm:$0xff] }
 0xc1d   :  { %2099 = vmatpush1.msra.mxu1 %v2051_v49  ;;  %v2269_v49 = vld [vmem:[#allocation2 + $0x970] sm:$0xff] }
 0xc1e   :  { %2100 = vmatprep.subr.mxu1 %v2050_v50  ;;  %v2268_v50 = vld [vmem:[#allocation2 + $0x968] sm:$0xff] }
 0xc1f   :  { %2101 = vmatpush1.msra.mxu1 %v2049_v51  ;;  %v2267_v51 = vld [vmem:[#allocation2 + $0x960] sm:$0xff] }
 0xc20   :  { %2102 = vmatprep.subr.mxu1 %v2048_v52  ;;  %v2266_v52 = vld [vmem:[#allocation2 + $0x958] sm:$0xff] }
 0xc21   :  { %2103 = vmatpush1.msra.mxu1 %v2047_v53  ;;  %v2265_v53 = vld [vmem:[#allocation2 + $0x950] sm:$0xff] }
 0xc22   :  { %2104 = vmatprep.subr.mxu1 %v2046_v54  ;;  %v2264_v54 = vld [vmem:[#allocation2 + $0x948] sm:$0xff] }
 0xc23   :  { %2105 = vmatpush1.msra.mxu1 %v2045_v43  ;;  %v7177_v43 = vld [vmem:[%s9796_s3 + $0x10] sm:$0x3] }
 0xc24   :  { %2106 = vmatprep.subr.mxu1 %v2044_v55  ;;  %v2079_v55 = vrot.slane %v7177_v43, %v8736_v47 }
 0xccc   :  { %v8986_v8 = vpop.f32.mrf.mxu1 }
 0xccd   :  { %v1832_v56 = vadd.f32 %v8986_v8, %v1758_v35  ;;  %v2043_v8 = vld [vmem:[#allocation2 + $0x830] sm:$0xff] }
 0xcce   :  { %v1833_v9 = vpop.f32.mrf.mxu1  ;;  %2107 = vmatpush1.msra.mxu1 %v2043_v8  ;;  %v2379_v8 = vld [vmem:[#allocation4 + $0x270] sm:$0xff] }
 0xccf   :  { %v1834_v10 = vadd.f32 %v1833_v9, %v1762_v7  ;;  %v7173_v57 = vmul.f32 -1.442695, %v1832_v56  ;;  %v2042_v9 = vld [vmem:[#allocation2 + $0x828] sm:$0xff] }
 0xcd0   :  { %2108 = vmatprep.subr.mxu1 %v2042_v9  ;;  %v2378_v9 = vld [vmem:[#allocation4 + $0x268] sm:$0xff] }
 0xcd1   :  { %v1836_v11 = vmax.f32 %v1834_v10, 0.0  ;;  %8432 = vpow2.f32 %v7173_v57  ;;  %v2041_v10 = vld [vmem:[#allocation2 + $0x820] sm:$0xff] }
 0xcd2   :  { %2109 = vmatpush1.msra.mxu1 %v2041_v10  ;;  %v2377_v10 = vld [vmem:[#allocation4 + $0x260] sm:$0xff] }
 0xcd3   :  { %7834 = vmatmul.mubr.msk.f32.vlgmr.msra.gmra.mxu0 %vm230_vm1, %v1836_v11  ;;  %v2040_v11 = vld [vmem:[#allocation2 + $0x818] sm:$0xff] }
 0xcd4   :  { %7837 = vmatpush3.msra.mxu0 %v1953_v12  ;;  %7868 = vmatprep.mubr.msk.f32.mxu0 %vm8622_vm0, %v8621_v0  ;;  %v2039_v12 = vld [vmem:[#allocation2 + $0x810] sm:$0xff] }
 0xcd5   :  { %7838 = vmatprep.subr.mxu0 %v8621_v0  ;;  %2110 = vmatprep.subr.mxu1 %v2040_v11  ;;  %v2075_v11 = vrot.slane %v7177_v43, %v8751_v22  ;;  %v2487_v43 = vld [vmem:[#allocation2 + $0xa70] sm:$0xff] }
 0xcd6   :  { %7839 = vmatpush3.msra.mxu0 %v1952_v13  ;;  %2111 = vmatpush1.msra.mxu1 %v2039_v12  ;;  %v2038_v13 = vld [vmem:[#allocation2 + $0x808] sm:$0xff] }
 0xcd7   :  { %7840 = vmatprep.subr.mxu0 %v8621_v0  ;;  %2112 = vmatprep.subr.mxu1 %v2038_v13 }
 0xcd8   :  { %7841 = vmatpush3.msra.mxu0 %v1951_v14  ;;  %v2162_v14 = vld [vmem:[#allocation4 + $0x238] sm:$0xff] }
 0xcd9   :  { %7842 = vmatprep.subr.mxu0 %v8621_v0 }
 0xcda   :  { %7843 = vmatpush3.msra.mxu0 %v1950_v15  ;;  %v2160_v15 = vld [vmem:[#allocation4 + $0x228] sm:$0xff] }
 0xcdb   :  { %7844 = vmatprep.subr.mxu0 %v8621_v0 }
 0xcdc   :  { %7845 = vmatpush3.msra.mxu0 %v1949_v16  ;;  %v2159_v16 = vld [vmem:[#allocation4 + $0x220] sm:$0xff] }
 0xcdd   :  { %7846 = vmatprep.subr.mxu0 %v8621_v0 }
 0xcde   :  { %7847 = vmatpush3.msra.mxu0 %v1948_v17  ;;  %v8433_v58 = vpop.eup %8432  ;;  %v7175_v17 = vld [vmem:[%s9800_s7 + $0x1] ss:$0 sm:$0xff] }
 0xcdf   :  { %7848 = vmatprep.subr.mxu0 %v8621_v0  ;;  %v1931_v59 = vadd.f32 1.0, %v8433_v58 }
 0xce0   :  { %7849 = vmatpush3.msra.mxu0 %v1947_v18 }
 0xce1   :  { %7850 = vmatprep.subr.mxu0 %v8621_v0  ;;  %8434 = vrcp.f32 %v1931_v59  ;;  %v2263_v59 = vld [vmem:[#allocation2 + $0x940] sm:$0xff] }
 0xce2   :  { %7851 = vmatpush3.msra.mxu0 %v1946_v19 }
 0xce3   :  { %7852 = vmatprep.subr.mxu0 %v8621_v0 }
 0xce4   :  { %7853 = vmatpush3.msra.mxu0 %v1945_v20  ;;  %v9027_v20 = vld [vmem:[%s9794_s1 + $0x4] sm:$0x3] }
 0xce5   :  { %7854 = vmatprep.subr.mxu0 %v8621_v0 }
 0xce6   :  { %7855 = vmatpush3.msra.mxu0 %v1944_v21 }
 0xce7   :  { %7856 = vmatprep.subr.mxu0 %v8621_v0 }
 0xce8   :  { %7857 = vmatpush3.msra.mxu0 %v1943_v23 }
 0xce9   :  { %7858 = vmatprep.subr.mxu0 %v8621_v0 }
 0xcea   :  { %7859 = vmatpush3.msra.mxu0 %v1942_v24 }
 0xceb   :  { %7860 = vmatprep.subr.mxu0 %v8621_v0 }
 0xcec   :  { %7861 = vmatpush3.msra.mxu0 %v1941_v25  ;;  %v2158_v25 = vld [vmem:[#allocation4 + $0x218] sm:$0xff] }
 0xced   :  { %7862 = vmatprep.subr.mxu0 %v8621_v0 }
 0xcee   :  { %7863 = vmatpush3.msra.mxu0 %v1940_v26  ;;  %v8435_v62 = vpop.eup %8434  ;;  %v2157_v26 = vld [vmem:[#allocation4 + $0x210] sm:$0xff] }
 0xcef   :  { %7864 = vmatprep.subr.mxu0 %v8621_v0  ;;  %v1934_v3 = vmul.f32 %v8435_v62, %v8971_v4  ;;  %v2037_v4 = vld [vmem:[#allocation2 + $0x800] sm:$0xff]  ;;  %v2261_v62 = vld [vmem:[#allocation2 + $0x930] sm:$0xff] }
 0xcf0   :  { %7865 = vmatpush3.msra.mxu0 %v1939_v27  ;;  %2113 = vmatpush1.msra.mxu1 %v2037_v4  ;;  %v2156_v27 = vld [vmem:[#allocation4 + $0x208] sm:$0xff] }
 0xcf1   :  { %7866 = vmatprep.subr.mxu0 %v8621_v0  ;;  %2300 = vmatprep.subr.mxu1 %v2286_v29  ;;  %v2504_v29 = vld [vmem:[#allocation2 + $0xaf8] sm:$0xff] }
 0xcf2   :  { %7867 = vmatpush3.msra.mxu0 %v1938_v28  ;;  %v2155_v28 = vld [vmem:[#allocation4 + $0x200] sm:$0xff] }
 0xcf3   :  { %7871 = vmatprep.subr.mxu0 %v8621_v0 }
 0xd93   :  { %v1923_v63 = vpop.f32.mrf.mxu0 }
 0xd94   :  { %v1924_v5 = vadd.f32 %v7171_v60, %v1923_v63  ;;  %v2262_v60 = vld [vmem:[#allocation2 + $0x938] sm:$0xff]  ;;  %v2260_v63 = vld [vmem:[#allocation2 + $0x928] sm:$0xff] }
 0xd95   :  { %v7835_v1 = vpop.f32.mrf.mxu0 }
 0xd96   :  { %v1927_v2 = vmax.f32 %v1924_v5, 0.0  ;;  %v2259_v5 = vld [vmem:[#allocation2 + $0x920] sm:$0xff]  ;;  %v2258_v1 = vld [vmem:[#allocation2 + $0x918] sm:$0xff] }
 0xd98   :  { %v1935_v7 = vadd.f32 %v1934_v3, %v1927_v2  ;;  %v2257_v2 = vld [vmem:[#allocation2 + $0x910] sm:$0xff]  ;;  %v2256_v3 = vld [vmem:[#allocation2 + $0x908] sm:$0xff] }
 0xd9a   :  { %v1936_v6 = vadd.f32 %v8879_v61, %v1935_v7  ;;  %v2161_v61 = vld [vmem:[#allocation4 + $0x230] sm:$0xff]  ;;  %v2255_v7 = vld [vmem:[#allocation2 + $0x900] sm:$0xff] }
 0xd9c   :  { %7869 = vmatmul.mubr.f32.vlgmr.msra.gmra.mxu0 %v1936_v6  ;;  %v2380_v6 = vld [vmem:[#allocation4 + $0x278] sm:$0xff] }
 0xd9d   :  { %7887 = vmatprep.mubr.msk.f32.mxu0 %vm8622_vm0, %v8621_v0  ;;  %7872 = vmatpush3.msra.mxu0 %v2162_v14 }
 0xd9e   :  { %7873 = vmatprep.subr.mxu0 %v8621_v0 }
 0xd9f   :  { %7874 = vmatpush3.msra.mxu0 %v2161_v61  ;;  %v7179_v61 = vld [vmem:[%s9798_s5 + $0x8] ss:$0 sm:$0xff] }
 0xda0   :  { %7875 = vmatprep.subr.mxu0 %v8621_v0 }
 0xda1   :  { %7876 = vmatpush3.msra.mxu0 %v2160_v15 }
 0xda2   :  { %7877 = vmatprep.subr.mxu0 %v8621_v0 }
 0xda3   :  { %7878 = vmatpush3.msra.mxu0 %v2159_v16 }
 0xda4   :  { %7879 = vmatprep.subr.mxu0 %v8621_v0 }
 0xda5   :  { %7880 = vmatpush3.msra.mxu0 %v2158_v25 }
 0xda6   :  { %7881 = vmatprep.subr.mxu0 %v8621_v0 }
 0xda7   :  { %7882 = vmatpush3.msra.mxu0 %v2157_v26  ;;  %v2376_v26 = vld [vmem:[#allocation4 + $0x258] sm:$0xff] }
 0xda8   :  { %7883 = vmatprep.subr.mxu0 %v8621_v0 }
 0xda9   :  { %7884 = vmatpush3.msra.mxu0 %v2156_v27  ;;  %v2375_v27 = vld [vmem:[#allocation4 + $0x250] sm:$0xff] }
 0xdaa   :  { %7885 = vmatprep.subr.mxu0 %v8621_v0 }
 0xdab   :  { %7886 = vmatpush3.msra.mxu0 %v2155_v28  ;;  %v2374_v28 = vld [vmem:[#allocation4 + $0x248] sm:$0xff] }
 0xdac   :  { %7890 = vmatprep.subr.mxu0 %v8621_v0 }
 0xe5c   :  { %v2028_v18 = vpop.f32.mrf.mxu0 }
 0xe5d   :  { %v2029_v19 = vadd.f32 %v7175_v17, %v2028_v18 }
 0xe5e   :  { %v7870_v21 = vpop.f32.mrf.mxu0 }
 0xe5f   :  { %v2032_v23 = vmax.f32 %v2029_v19, 0.0 }
 0xe61   :  { %v9030_v24 = vadd.f32 %v9027_v20, %v2032_v23 }
 0xe63   :  { %2147 = vmatmul.mubr.f32.vlgmr.msra.gmra.mxu1 %v9030_v24 }
 0xe64   :  { %2364 = vmatprep.mubr.f32.mxu1 %v8621_v0  ;;  %2301 = vmatpush1.msra.mxu1 %v2285_v30  ;;  %v9067_v30 = vld [vmem:[%s9796_s3 + $0x12] sm:$0x3] }
 0xe65   :  { %2302 = vmatprep.subr.mxu1 %v2284_v31  ;;  %v2297_v31 = vrot.slane %v9067_v30, %v8736_v47 }
 0xe66   :  { %2303 = vmatpush1.msra.mxu1 %v2283_v32 }
 0xe67   :  { %2304 = vmatprep.subr.mxu1 %v2282_v33 }
 0xe68   :  { %2305 = vmatpush1.msra.mxu1 %v2281_v34 }
 0xe69   :  { %2306 = vmatprep.subr.mxu1 %v2280_v36 }
 0xe6a   :  { %2307 = vmatpush1.msra.mxu1 %v2279_v38  ;;  %v2503_v38 = vld [vmem:[#allocation2 + $0xaf0] sm:$0xff] }
 0xe6b   :  { %2308 = vmatprep.subr.mxu1 %v2278_v40  ;;  %v2502_v40 = vld [vmem:[#allocation2 + $0xae8] sm:$0xff] }
 0xe6c   :  { %2309 = vmatpush1.msra.mxu1 %v2277_v41  ;;  %v2501_v41 = vld [vmem:[#allocation2 + $0xae0] sm:$0xff] }
 0xe6d   :  { %2310 = vmatprep.subr.mxu1 %v2276_v42  ;;  %v2500_v42 = vld [vmem:[#allocation2 + $0xad8] sm:$0xff] }
 0xe6e   :  { %2311 = vmatpush1.msra.mxu1 %v2275_v44  ;;  %v2499_v44 = vld [vmem:[#allocation2 + $0xad0] sm:$0xff] }
 0xe6f   :  { %2312 = vmatprep.subr.mxu1 %v2274_v45  ;;  %v2498_v45 = vld [vmem:[#allocation2 + $0xac8] sm:$0xff] }
 0xe70   :  { %2313 = vmatpush1.msra.mxu1 %v2273_v37  ;;  %v2497_v37 = vld [vmem:[#allocation2 + $0xac0] sm:$0xff] }
 0xe71   :  { %2314 = vmatprep.subr.mxu1 %v2272_v39  ;;  %v2496_v39 = vld [vmem:[#allocation2 + $0xab8] sm:$0xff] }
 0xe72   :  { %2315 = vmatpush1.msra.mxu1 %v2271_v48  ;;  %v2495_v48 = vld [vmem:[#allocation2 + $0xab0] sm:$0xff] }
 0xe73   :  { %2316 = vmatprep.subr.mxu1 %v2270_v46  ;;  %v2494_v46 = vld [vmem:[#allocation2 + $0xaa8] sm:$0xff] }
 0xe74   :  { %2317 = vmatpush1.msra.mxu1 %v2269_v49  ;;  %v2493_v49 = vld [vmem:[#allocation2 + $0xaa0] sm:$0xff] }
 0xe75   :  { %2318 = vmatprep.subr.mxu1 %v2268_v50  ;;  %v2492_v50 = vld [vmem:[#allocation2 + $0xa98] sm:$0xff] }
 0xe76   :  { %2319 = vmatpush1.msra.mxu1 %v2267_v51  ;;  %v2491_v51 = vld [vmem:[#allocation2 + $0xa90] sm:$0xff] }
 0xe77   :  { %2320 = vmatprep.subr.mxu1 %v2266_v52  ;;  %v2490_v52 = vld [vmem:[#allocation2 + $0xa88] sm:$0xff] }
 0xe78   :  { %2321 = vmatpush1.msra.mxu1 %v2265_v53  ;;  %v2489_v53 = vld [vmem:[#allocation2 + $0xa80] sm:$0xff] }
 0xe79   :  { %2322 = vmatprep.subr.mxu1 %v2264_v54  ;;  %v2488_v54 = vld [vmem:[#allocation2 + $0xa78] sm:$0xff] }
 0xe7a   :  { %2323 = vmatpush1.msra.mxu1 %v2263_v59  ;;  %v2481_v59 = vld [vmem:[#allocation2 + $0xa40] sm:$0xff] }
 0xe7b   :  { %2324 = vmatprep.subr.mxu1 %v2262_v60  ;;  %v2480_v60 = vld [vmem:[#allocation2 + $0xa38] sm:$0xff] }
 0xe7c   :  { %2325 = vmatpush1.msra.mxu1 %v2261_v62  ;;  %v2479_v62 = vld [vmem:[#allocation2 + $0xa30] sm:$0xff] }
 0xe7d   :  { %2326 = vmatprep.subr.mxu1 %v2260_v63  ;;  %v2478_v63 = vld [vmem:[#allocation2 + $0xa28] sm:$0xff] }
 0xe7e   :  { %2327 = vmatpush1.msra.mxu1 %v2259_v5  ;;  %v2477_v5 = vld [vmem:[#allocation2 + $0xa20] sm:$0xff] }
 0xe7f   :  { %2328 = vmatprep.subr.mxu1 %v2258_v1  ;;  %v2476_v1 = vld [vmem:[#allocation2 + $0xa18] sm:$0xff] }
 0xe80   :  { %2329 = vmatpush1.msra.mxu1 %v2257_v2  ;;  %v2475_v2 = vld [vmem:[#allocation2 + $0xa10] sm:$0xff] }
 0xe81   :  { %2330 = vmatprep.subr.mxu1 %v2256_v3  ;;  %v2474_v3 = vld [vmem:[#allocation2 + $0xa08] sm:$0xff] }
 0xe82   :  { %2331 = vmatpush1.msra.mxu1 %v2255_v7  ;;  %v2473_v7 = vld [vmem:[#allocation2 + $0xa00] sm:$0xff] }
 0xe83   :  { %7909 = vmatprep.subr.mxu1 %v8621_v0 }
 0xf23   :  { %v2148_v35 = vpop.f32.mrf.mxu1 }
 0xf24   :  { %v2149_v12 = vadd.f32 %v2148_v35, %v2075_v11  ;;  %v2485_v35 = vld [vmem:[#allocation2 + $0xa60] sm:$0xff]  ;;  %v2293_v11 = vrot.slane %v9067_v30, %v8751_v22  ;;  %v9099_v30 = vld [vmem:[%s9796_s3 + $0x14] sm:$0x3] }
 0xf25   :  { %v2150_v56 = vpop.f32.mrf.mxu1 }
 0xf26   :  { %v2151_v57 = vadd.f32 %v2150_v56, %v2079_v55  ;;  %v7181_v13 = vmul.f32 -1.442695, %v2149_v12  ;;  %v2486_v55 = vld [vmem:[#allocation2 + $0xa68] sm:$0xff]  ;;  %v2484_v56 = vld [vmem:[#allocation2 + $0xa58] sm:$0xff] }
 0xf28   :  { %v2153_v58 = vmax.f32 %v2151_v57, 0.0  ;;  %8436 = vpow2.f32 %v7181_v13  ;;  %v2483_v57 = vld [vmem:[#allocation2 + $0xa50] sm:$0xff] }
 0xf2a   :  { %7888 = vmatmul.mubr.msk.f32.vlgmr.msra.gmra.mxu0 %vm230_vm1, %v2153_v58  ;;  %v2482_v58 = vld [vmem:[#allocation2 + $0xa48] sm:$0xff] }
 0xf2b   :  { %7906 = vmatprep.mubr.msk.f32.mxu0 %vm8622_vm0, %v8621_v0  ;;  %7891 = vmatpush3.msra.mxu0 %v2380_v6  ;;  %v2598_v6 = vld [vmem:[#allocation4 + $0x2b8] sm:$0xff] }
 0xf2c   :  { %7892 = vmatprep.subr.mxu0 %v8621_v0 }
 0xf2d   :  { %7893 = vmatpush3.msra.mxu0 %v2379_v8  ;;  %v2597_v8 = vld [vmem:[#allocation4 + $0x2b0] sm:$0xff] }
 0xf2e   :  { %7894 = vmatprep.subr.mxu0 %v8621_v0 }
 0xf2f   :  { %7895 = vmatpush3.msra.mxu0 %v2378_v9  ;;  %v2596_v9 = vld [vmem:[#allocation4 + $0x2a8] sm:$0xff] }
 0xf30   :  { %7896 = vmatprep.subr.mxu0 %v8621_v0 }
 0xf31   :  { %7897 = vmatpush3.msra.mxu0 %v2377_v10  ;;  %v2595_v10 = vld [vmem:[#allocation4 + $0x2a0] sm:$0xff] }
 0xf32   :  { %7898 = vmatprep.subr.mxu0 %v8621_v0 }
 0xf33   :  { %7899 = vmatpush3.msra.mxu0 %v2376_v26 }
 0xf34   :  { %7900 = vmatprep.subr.mxu0 %v8621_v0 }
 0xf35   :  { %v8437_v4 = vpop.eup %8436  ;;  %7901 = vmatpush3.msra.mxu0 %v2375_v27  ;;  %v2594_v27 = vld [vmem:[#allocation4 + $0x298] sm:$0xff] }
 0xf36   :  { %v2248_v14 = vadd.f32 1.0, %v8437_v4  ;;  %7902 = vmatprep.subr.mxu0 %v8621_v0 }
 0xf37   :  { %7903 = vmatpush3.msra.mxu0 %v2374_v28  ;;  %v2593_v28 = vld [vmem:[#allocation4 + $0x290] sm:$0xff] }
 0xf38   :  { %8438 = vrcp.f32 %v2248_v14  ;;  %7904 = vmatprep.subr.mxu0 %v8621_v0 }
 0xf45   :  { %v8439_v15 = vpop.eup %8438 }
 0xf46   :  { %v2251_v21 = vmul.f32 %v8439_v15, %v9030_v24  ;;  %v2373_v24 = vld [vmem:[#allocation4 + $0x240] sm:$0xff] }
 0xf47   :  { %7905 = vmatpush3.msra.mxu0 %v2373_v24  ;;  %v2592_v24 = vld [vmem:[#allocation4 + $0x288] sm:$0xff] }
 0xf48   :  { %2518 = vmatprep.subr.mxu0 %v2504_v29  ;;  %v2722_v29 = vld [vmem:[#allocation2 + $0xbf8] sm:$0xff] }
 0xfea   :  { %v2240_v16 = vpop.f32.mrf.mxu0 }
 0xfeb   :  { %v2241_v17 = vadd.f32 %v7179_v61, %v2240_v16  ;;  %v7184_v61 = vld [vmem:[%s9798_s5 + $0x9] ss:$0 sm:$0xff] }
 0xfec   :  { %v7889_v18 = vpop.f32.mrf.mxu0 }
 0xfed   :  { %v2244_v19 = vmax.f32 %v2241_v17, 0.0 }
 0xfef   :  { %v2252_v23 = vadd.f32 %v2251_v21, %v2244_v19 }
 0xff1   :  { %v9056_v25 = vadd.f32 %v9027_v20, %v2252_v23 }
 0xff3   :  { %2365 = vmatmul.mubr.f32.vlgmr.msra.gmra.mxu1 %v9056_v25 }
 0xff4   :  { %7925 = vmatprep.mubr.msk.f32.mxu1 %vm8622_vm0, %v8621_v0  ;;  %7910 = vmatpush3.msra.mxu1 %v2598_v6  ;;  %v2816_v6 = vld [vmem:[#allocation4 + $0x2f8] sm:$0xff] }
 0xff5   :  { %7911 = vmatprep.subr.mxu1 %v8621_v0 }
 0xff6   :  { %7912 = vmatpush3.msra.mxu1 %v2597_v8  ;;  %v2815_v8 = vld [vmem:[#allocation4 + $0x2f0] sm:$0xff] }
 0xff7   :  { %7913 = vmatprep.subr.mxu1 %v8621_v0 }
 0xff8   :  { %7914 = vmatpush3.msra.mxu1 %v2596_v9  ;;  %v2814_v9 = vld [vmem:[#allocation4 + $0x2e8] sm:$0xff] }
 0xff9   :  { %7915 = vmatprep.subr.mxu1 %v8621_v0 }
 0xffa   :  { %7916 = vmatpush3.msra.mxu1 %v2595_v10  ;;  %v2813_v10 = vld [vmem:[#allocation4 + $0x2e0] sm:$0xff] }
 0xffb   :  { %7917 = vmatprep.subr.mxu1 %v8621_v0 }
 0xffc   :  { %7918 = vmatpush3.msra.mxu1 %v2594_v27 }
 0xffd   :  { %7919 = vmatprep.subr.mxu1 %v8621_v0 }
 0xffe   :  { %7920 = vmatpush3.msra.mxu1 %v2593_v28  ;;  %v2812_v28 = vld [vmem:[#allocation4 + $0x2d8] sm:$0xff] }
 0xfff   :  { %7921 = vmatprep.subr.mxu1 %v8621_v0 }
0x1000   :  { %7922 = vmatpush3.msra.mxu1 %v2592_v24  ;;  %v2811_v24 = vld [vmem:[#allocation4 + $0x2d0] sm:$0xff] }
0x1001   :  { %7923 = vmatprep.subr.mxu1 %v8621_v0 }
0x10b3   :  { %v9071_v32 = vpop.f32.mrf.mxu1 }
0x10b4   :  { %v2367_v12 = vadd.f32 %v9071_v32, %v2293_v11  ;;  %v2511_v11 = vrot.slane %v9099_v30, %v8751_v22 }
0x10b5   :  { %v2368_v33 = vpop.f32.mrf.mxu1 }
0x10b6   :  { %v2369_v34 = vadd.f32 %v2368_v33, %v2297_v31  ;;  %v7186_v13 = vmul.f32 -1.442695, %v2367_v12  ;;  %v2515_v31 = vrot.slane %v9099_v30, %v8736_v47  ;;  %v9131_v30 = vld [vmem:[%s9796_s3 + $0x16] sm:$0x3] }
0x10b8   :  { %v2371_v36 = vmax.f32 %v2369_v34, 0.0  ;;  %8440 = vpow2.f32 %v7186_v13 }
0x10ba   :  { %7907 = vmatmul.mubr.msk.f32.vlgmr.msra.gmra.mxu0 %vm230_vm1, %v2371_v36 }
0x10bb   :  { %2519 = vmatpush1.msra.mxu0 %v2503_v38  ;;  %2582 = vmatprep.mubr.f32.mxu0 %v8621_v0  ;;  %v2721_v38 = vld [vmem:[#allocation2 + $0xbf0] sm:$0xff] }
0x10bc   :  { %2520 = vmatprep.subr.mxu0 %v2502_v40  ;;  %v2720_v40 = vld [vmem:[#allocation2 + $0xbe8] sm:$0xff] }
0x10bd   :  { %2521 = vmatpush1.msra.mxu0 %v2501_v41  ;;  %v2719_v41 = vld [vmem:[#allocation2 + $0xbe0] sm:$0xff] }
0x10be   :  { %2522 = vmatprep.subr.mxu0 %v2500_v42  ;;  %v2718_v42 = vld [vmem:[#allocation2 + $0xbd8] sm:$0xff] }
0x10bf   :  { %2523 = vmatpush1.msra.mxu0 %v2499_v44  ;;  %v2717_v44 = vld [vmem:[#allocation2 + $0xbd0] sm:$0xff] }
0x10c0   :  { %2524 = vmatprep.subr.mxu0 %v2498_v45  ;;  %v2716_v45 = vld [vmem:[#allocation2 + $0xbc8] sm:$0xff] }
0x10c1   :  { %2525 = vmatpush1.msra.mxu0 %v2497_v37  ;;  %v2715_v37 = vld [vmem:[#allocation2 + $0xbc0] sm:$0xff] }
0x10c2   :  { %2526 = vmatprep.subr.mxu0 %v2496_v39  ;;  %v2714_v39 = vld [vmem:[#allocation2 + $0xbb8] sm:$0xff] }
0x10c3   :  { %2527 = vmatpush1.msra.mxu0 %v2495_v48  ;;  %v2713_v48 = vld [vmem:[#allocation2 + $0xbb0] sm:$0xff] }
0x10c4   :  { %2528 = vmatprep.subr.mxu0 %v2494_v46  ;;  %v2712_v46 = vld [vmem:[#allocation2 + $0xba8] sm:$0xff] }
0x10c5   :  { %2529 = vmatpush1.msra.mxu0 %v2493_v49  ;;  %v8441_v4 = vpop.eup %8440  ;;  %v2711_v49 = vld [vmem:[#allocation2 + $0xba0] sm:$0xff] }
0x10c6   :  { %2530 = vmatprep.subr.mxu0 %v2492_v50  ;;  %v2466_v14 = vadd.f32 1.0, %v8441_v4  ;;  %v2710_v50 = vld [vmem:[#allocation2 + $0xb98] sm:$0xff] }
0x10c7   :  { %2531 = vmatpush1.msra.mxu0 %v2491_v51  ;;  %v2709_v51 = vld [vmem:[#allocation2 + $0xb90] sm:$0xff] }
0x10c8   :  { %2532 = vmatprep.subr.mxu0 %v2490_v52  ;;  %8442 = vrcp.f32 %v2466_v14  ;;  %v2708_v52 = vld [vmem:[#allocation2 + $0xb88] sm:$0xff] }
0x10c9   :  { %2533 = vmatpush1.msra.mxu0 %v2489_v53  ;;  %v2707_v53 = vld [vmem:[#allocation2 + $0xb80] sm:$0xff] }
0x10ca   :  { %2534 = vmatprep.subr.mxu0 %v2488_v54  ;;  %v2706_v54 = vld [vmem:[#allocation2 + $0xb78] sm:$0xff] }
0x10cb   :  { %2535 = vmatpush1.msra.mxu0 %v2487_v43  ;;  %v2705_v43 = vld [vmem:[#allocation2 + $0xb70] sm:$0xff] }
0x10cc   :  { %2536 = vmatprep.subr.mxu0 %v2486_v55  ;;  %v2704_v55 = vld [vmem:[#allocation2 + $0xb68] sm:$0xff] }
0x10cd   :  { %2537 = vmatpush1.msra.mxu0 %v2485_v35  ;;  %v2703_v35 = vld [vmem:[#allocation2 + $0xb60] sm:$0xff] }
0x10ce   :  { %2538 = vmatprep.subr.mxu0 %v2484_v56  ;;  %v2702_v56 = vld [vmem:[#allocation2 + $0xb58] sm:$0xff] }
0x10cf   :  { %2539 = vmatpush1.msra.mxu0 %v2483_v57  ;;  %v2701_v57 = vld [vmem:[#allocation2 + $0xb50] sm:$0xff] }
0x10d0   :  { %2540 = vmatprep.subr.mxu0 %v2482_v58  ;;  %v2700_v58 = vld [vmem:[#allocation2 + $0xb48] sm:$0xff] }
0x10d1   :  { %2541 = vmatpush1.msra.mxu0 %v2481_v59  ;;  %v2699_v59 = vld [vmem:[#allocation2 + $0xb40] sm:$0xff] }
0x10d2   :  { %2542 = vmatprep.subr.mxu0 %v2480_v60  ;;  %v2698_v60 = vld [vmem:[#allocation2 + $0xb38] sm:$0xff] }
0x10d3   :  { %2543 = vmatpush1.msra.mxu0 %v2479_v62  ;;  %v2697_v62 = vld [vmem:[#allocation2 + $0xb30] sm:$0xff] }
0x10d4   :  { %2544 = vmatprep.subr.mxu0 %v2478_v63  ;;  %v2696_v63 = vld [vmem:[#allocation2 + $0xb28] sm:$0xff] }
0x10d5   :  { %2545 = vmatpush1.msra.mxu0 %v2477_v5  ;;  %v8443_v15 = vpop.eup %8442  ;;  %v2695_v5 = vld [vmem:[#allocation2 + $0xb20] sm:$0xff] }
0x10d6   :  { %2546 = vmatprep.subr.mxu0 %v2476_v1  ;;  %v2469_v21 = vmul.f32 %v8443_v15, %v9056_v25  ;;  %v2591_v25 = vld [vmem:[#allocation4 + $0x280] sm:$0xff]  ;;  %v2694_v1 = vld [vmem:[#allocation2 + $0xb18] sm:$0xff] }
0x10d7   :  { %2547 = vmatpush1.msra.mxu0 %v2475_v2  ;;  %7924 = vmatpush3.msra.mxu1 %v2591_v25  ;;  %v2693_v2 = vld [vmem:[#allocation2 + $0xb10] sm:$0xff]  ;;  %v2810_v25 = vld [vmem:[#allocation4 + $0x2c8] sm:$0xff] }
0x10d8   :  { %2548 = vmatprep.subr.mxu0 %v2474_v3  ;;  %2736 = vmatprep.subr.mxu1 %v2722_v29  ;;  %v2692_v3 = vld [vmem:[#allocation2 + $0xb08] sm:$0xff]  ;;  %v2940_v29 = vld [vmem:[#allocation2 + $0xcf8] sm:$0xff] }
0x10d9   :  { %2549 = vmatpush1.msra.mxu0 %v2473_v7  ;;  %v2691_v7 = vld [vmem:[#allocation2 + $0xb00] sm:$0xff] }
0x10da   :  { %7928 = vmatprep.subr.mxu0 %v8621_v0 }
0x117a   :  { %v2458_v16 = vpop.f32.mrf.mxu0 }
0x117b   :  { %v2459_v17 = vadd.f32 %v7184_v61, %v2458_v16  ;;  %v7189_v61 = vld [vmem:[%s9798_s5 + $0xa] ss:$0 sm:$0xff] }
0x117c   :  { %v7908_v18 = vpop.f32.mrf.mxu0 }
0x117d   :  { %v2462_v19 = vmax.f32 %v2459_v17, 0.0 }
0x117f   :  { %v2470_v23 = vadd.f32 %v2469_v21, %v2462_v19 }
0x1181   :  { %v9088_v26 = vadd.f32 %v9027_v20, %v2470_v23 }
0x1183   :  { %2583 = vmatmul.mubr.f32.vlgmr.msra.gmra.mxu0 %v9088_v26 }
0x1184   :  { %7944 = vmatprep.mubr.msk.f32.mxu0 %vm8622_vm0, %v8621_v0  ;;  %7929 = vmatpush3.msra.mxu0 %v2816_v6  ;;  %v3034_v6 = vld [vmem:[#allocation4 + $0x338] sm:$0xff] }
0x1185   :  { %7930 = vmatprep.subr.mxu0 %v8621_v0 }
0x1186   :  { %7931 = vmatpush3.msra.mxu0 %v2815_v8  ;;  %v3033_v8 = vld [vmem:[#allocation4 + $0x330] sm:$0xff] }
0x1187   :  { %7932 = vmatprep.subr.mxu0 %v8621_v0 }
0x1188   :  { %7933 = vmatpush3.msra.mxu0 %v2814_v9  ;;  %v3032_v9 = vld [vmem:[#allocation4 + $0x328] sm:$0xff] }
0x1189   :  { %7934 = vmatprep.subr.mxu0 %v8621_v0 }
0x118a   :  { %7935 = vmatpush3.msra.mxu0 %v2813_v10  ;;  %v3031_v10 = vld [vmem:[#allocation4 + $0x320] sm:$0xff] }
0x118b   :  { %7936 = vmatprep.subr.mxu0 %v8621_v0 }
0x118c   :  { %7937 = vmatpush3.msra.mxu0 %v2812_v28 }
0x118d   :  { %7938 = vmatprep.subr.mxu0 %v8621_v0 }
0x118e   :  { %7939 = vmatpush3.msra.mxu0 %v2811_v24  ;;  %v3030_v24 = vld [vmem:[#allocation4 + $0x318] sm:$0xff] }
0x118f   :  { %7940 = vmatprep.subr.mxu0 %v8621_v0 }
0x1190   :  { %7941 = vmatpush3.msra.mxu0 %v2810_v25  ;;  %v3029_v25 = vld [vmem:[#allocation4 + $0x310] sm:$0xff] }
0x1191   :  { %7942 = vmatprep.subr.mxu0 %v8621_v0 }
0x1243   :  { %v9103_v32 = vpop.f32.mrf.mxu0 }
0x1244   :  { %v2585_v12 = vadd.f32 %v9103_v32, %v2511_v11  ;;  %v2729_v11 = vrot.slane %v9131_v30, %v8751_v22 }
0x1245   :  { %v2586_v33 = vpop.f32.mrf.mxu0 }
0x1246   :  { %v2587_v34 = vadd.f32 %v2586_v33, %v2515_v31  ;;  %v7191_v13 = vmul.f32 -1.442695, %v2585_v12  ;;  %v2733_v31 = vrot.slane %v9131_v30, %v8736_v47 }
0x1248   :  { %v2589_v36 = vmax.f32 %v2587_v34, 0.0  ;;  %8444 = vpow2.f32 %v7191_v13 }
0x124a   :  { %7926 = vmatmul.mubr.msk.f32.vlgmr.msra.gmra.mxu1 %vm230_vm1, %v2589_v36 }
0x124b   :  { %2737 = vmatpush1.msra.mxu1 %v2721_v38  ;;  %2800 = vmatprep.mubr.f32.mxu1 %v8621_v0  ;;  %v2939_v38 = vld [vmem:[#allocation2 + $0xcf0] sm:$0xff] }
0x124c   :  { %2738 = vmatprep.subr.mxu1 %v2720_v40  ;;  %v2938_v40 = vld [vmem:[#allocation2 + $0xce8] sm:$0xff] }
0x124d   :  { %2739 = vmatpush1.msra.mxu1 %v2719_v41  ;;  %v2937_v41 = vld [vmem:[#allocation2 + $0xce0] sm:$0xff] }
0x124e   :  { %2740 = vmatprep.subr.mxu1 %v2718_v42  ;;  %v2936_v42 = vld [vmem:[#allocation2 + $0xcd8] sm:$0xff] }
0x124f   :  { %2741 = vmatpush1.msra.mxu1 %v2717_v44  ;;  %v2935_v44 = vld [vmem:[#allocation2 + $0xcd0] sm:$0xff] }
0x1250   :  { %2742 = vmatprep.subr.mxu1 %v2716_v45  ;;  %v2934_v45 = vld [vmem:[#allocation2 + $0xcc8] sm:$0xff] }
0x1251   :  { %2743 = vmatpush1.msra.mxu1 %v2715_v37  ;;  %v2933_v37 = vld [vmem:[#allocation2 + $0xcc0] sm:$0xff] }
0x1252   :  { %2744 = vmatprep.subr.mxu1 %v2714_v39  ;;  %v2932_v39 = vld [vmem:[#allocation2 + $0xcb8] sm:$0xff] }
0x1253   :  { %2745 = vmatpush1.msra.mxu1 %v2713_v48  ;;  %v2931_v48 = vld [vmem:[#allocation2 + $0xcb0] sm:$0xff] }
0x1254   :  { %2746 = vmatprep.subr.mxu1 %v2712_v46  ;;  %v2930_v46 = vld [vmem:[#allocation2 + $0xca8] sm:$0xff] }
0x1255   :  { %2747 = vmatpush1.msra.mxu1 %v2711_v49  ;;  %v8445_v4 = vpop.eup %8444  ;;  %v2929_v49 = vld [vmem:[#allocation2 + $0xca0] sm:$0xff] }
0x1256   :  { %2748 = vmatprep.subr.mxu1 %v2710_v50  ;;  %v2684_v14 = vadd.f32 1.0, %v8445_v4  ;;  %v2928_v50 = vld [vmem:[#allocation2 + $0xc98] sm:$0xff] }
0x1257   :  { %2749 = vmatpush1.msra.mxu1 %v2709_v51  ;;  %v2927_v51 = vld [vmem:[#allocation2 + $0xc90] sm:$0xff] }
0x1258   :  { %2750 = vmatprep.subr.mxu1 %v2708_v52  ;;  %8446 = vrcp.f32 %v2684_v14  ;;  %v2926_v52 = vld [vmem:[#allocation2 + $0xc88] sm:$0xff] }
0x1259   :  { %2751 = vmatpush1.msra.mxu1 %v2707_v53  ;;  %v2925_v53 = vld [vmem:[#allocation2 + $0xc80] sm:$0xff] }
0x125a   :  { %2752 = vmatprep.subr.mxu1 %v2706_v54  ;;  %v2924_v54 = vld [vmem:[#allocation2 + $0xc78] sm:$0xff] }
0x125b   :  { %2753 = vmatpush1.msra.mxu1 %v2705_v43  ;;  %v2923_v43 = vld [vmem:[#allocation2 + $0xc70] sm:$0xff] }
0x125c   :  { %2754 = vmatprep.subr.mxu1 %v2704_v55  ;;  %v2922_v55 = vld [vmem:[#allocation2 + $0xc68] sm:$0xff] }
0x125d   :  { %2755 = vmatpush1.msra.mxu1 %v2703_v35  ;;  %v2921_v35 = vld [vmem:[#allocation2 + $0xc60] sm:$0xff] }
0x125e   :  { %2756 = vmatprep.subr.mxu1 %v2702_v56  ;;  %v2920_v56 = vld [vmem:[#allocation2 + $0xc58] sm:$0xff] }
0x125f   :  { %2757 = vmatpush1.msra.mxu1 %v2701_v57  ;;  %v2919_v57 = vld [vmem:[#allocation2 + $0xc50] sm:$0xff] }
0x1260   :  { %2758 = vmatprep.subr.mxu1 %v2700_v58  ;;  %v2918_v58 = vld [vmem:[#allocation2 + $0xc48] sm:$0xff] }
0x1261   :  { %2759 = vmatpush1.msra.mxu1 %v2699_v59  ;;  %v2917_v59 = vld [vmem:[#allocation2 + $0xc40] sm:$0xff] }
0x1262   :  { %2760 = vmatprep.subr.mxu1 %v2698_v60  ;;  %v2916_v60 = vld [vmem:[#allocation2 + $0xc38] sm:$0xff] }
0x1263   :  { %2761 = vmatpush1.msra.mxu1 %v2697_v62  ;;  %v2915_v62 = vld [vmem:[#allocation2 + $0xc30] sm:$0xff] }
0x1264   :  { %2762 = vmatprep.subr.mxu1 %v2696_v63  ;;  %v2914_v63 = vld [vmem:[#allocation2 + $0xc28] sm:$0xff] }
0x1265   :  { %2763 = vmatpush1.msra.mxu1 %v2695_v5  ;;  %v8447_v15 = vpop.eup %8446  ;;  %v2913_v5 = vld [vmem:[#allocation2 + $0xc20] sm:$0xff] }
0x1266   :  { %2764 = vmatprep.subr.mxu1 %v2694_v1  ;;  %v2687_v21 = vmul.f32 %v8447_v15, %v9088_v26  ;;  %v2809_v26 = vld [vmem:[#allocation4 + $0x2c0] sm:$0xff]  ;;  %v2912_v1 = vld [vmem:[#allocation2 + $0xc18] sm:$0xff] }
0x1267   :  { %2765 = vmatpush1.msra.mxu1 %v2693_v2  ;;  %7943 = vmatpush3.msra.mxu0 %v2809_v26  ;;  %v2911_v2 = vld [vmem:[#allocation2 + $0xc10] sm:$0xff]  ;;  %v3028_v26 = vld [vmem:[#allocation4 + $0x308] sm:$0xff] }
0x1268   :  { %2766 = vmatprep.subr.mxu1 %v2692_v3  ;;  %2954 = vmatprep.subr.mxu0 %v2940_v29  ;;  %v2910_v3 = vld [vmem:[#allocation2 + $0xc08] sm:$0xff]  ;;  %v9163_v29 = vld [vmem:[%s9796_s3 + $0x18] sm:$0x3] }
0x1269   :  { %2767 = vmatpush1.msra.mxu1 %v2691_v7  ;;  %v2909_v7 = vld [vmem:[#allocation2 + $0xc00] sm:$0xff]  ;;  %v2951_v30 = vrot.slane %v9163_v29, %v8736_v47 }
0x126a   :  { %7947 = vmatprep.subr.mxu1 %v8621_v0 }
0x130a   :  { %v2676_v16 = vpop.f32.mrf.mxu1 }
0x130b   :  { %v2677_v17 = vadd.f32 %v7189_v61, %v2676_v16  ;;  %v7194_v61 = vld [vmem:[%s9798_s5 + $0xb] ss:$0 sm:$0xff] }
0x130c   :  { %v7927_v18 = vpop.f32.mrf.mxu1 }
0x130d   :  { %v2680_v19 = vmax.f32 %v2677_v17, 0.0 }
0x130f   :  { %v2688_v23 = vadd.f32 %v2687_v21, %v2680_v19 }
0x1311   :  { %v9120_v27 = vadd.f32 %v9027_v20, %v2688_v23 }
0x1313   :  { %2801 = vmatmul.mubr.f32.vlgmr.msra.gmra.mxu1 %v9120_v27 }
0x1314   :  { %7963 = vmatprep.mubr.msk.f32.mxu1 %vm8622_vm0, %v8621_v0  ;;  %7948 = vmatpush3.msra.mxu1 %v3034_v6  ;;  %v3251_v6 = vld [vmem:[#allocation4 + $0x370] sm:$0xff] }
0x1315   :  { %7949 = vmatprep.subr.mxu1 %v8621_v0 }
0x1316   :  { %7950 = vmatpush3.msra.mxu1 %v3033_v8  ;;  %v3250_v8 = vld [vmem:[#allocation4 + $0x368] sm:$0xff] }
0x1317   :  { %7951 = vmatprep.subr.mxu1 %v8621_v0 }
0x1318   :  { %7952 = vmatpush3.msra.mxu1 %v3032_v9  ;;  %v3249_v9 = vld [vmem:[#allocation4 + $0x360] sm:$0xff] }
0x1319   :  { %7953 = vmatprep.subr.mxu1 %v8621_v0 }
0x131a   :  { %7954 = vmatpush3.msra.mxu1 %v3031_v10  ;;  %v2947_v10 = vrot.slane %v9163_v29, %v8751_v22  ;;  %v9200_v29 = vld [vmem:[%s9796_s3 + $0x1a] sm:$0x3] }
0x131b   :  { %7955 = vmatprep.subr.mxu1 %v8621_v0 }
0x131c   :  { %7956 = vmatpush3.msra.mxu1 %v3030_v24 }
0x131d   :  { %7957 = vmatprep.subr.mxu1 %v8621_v0 }
0x131e   :  { %7958 = vmatpush3.msra.mxu1 %v3029_v25  ;;  %v3248_v25 = vld [vmem:[#allocation4 + $0x358] sm:$0xff] }
0x131f   :  { %7959 = vmatprep.subr.mxu1 %v8621_v0 }
0x1320   :  { %7960 = vmatpush3.msra.mxu1 %v3028_v26  ;;  %v3247_v26 = vld [vmem:[#allocation4 + $0x350] sm:$0xff] }
0x1321   :  { %7961 = vmatprep.subr.mxu1 %v8621_v0 }
0x13d3   :  { %v9135_v32 = vpop.f32.mrf.mxu1 }
0x13d4   :  { %v2803_v12 = vadd.f32 %v9135_v32, %v2729_v11 }
0x13d5   :  { %v2804_v33 = vpop.f32.mrf.mxu1 }
0x13d6   :  { %v2805_v34 = vadd.f32 %v2804_v33, %v2733_v31  ;;  %v7196_v13 = vmul.f32 -1.442695, %v2803_v12 }
0x13d8   :  { %v2807_v36 = vmax.f32 %v2805_v34, 0.0  ;;  %8448 = vpow2.f32 %v7196_v13 }
0x13da   :  { %7945 = vmatmul.mubr.msk.f32.vlgmr.msra.gmra.mxu0 %vm230_vm1, %v2807_v36  ;;  %v3157_v36 = vld [vmem:[#allocation2 + $0xdf0] sm:$0xff] }
0x13db   :  { %2955 = vmatpush1.msra.mxu0 %v2939_v38  ;;  %3018 = vmatprep.mubr.f32.mxu0 %v8621_v0  ;;  %v3156_v38 = vld [vmem:[#allocation2 + $0xde8] sm:$0xff] }
0x13dc   :  { %2956 = vmatprep.subr.mxu0 %v2938_v40  ;;  %v3155_v40 = vld [vmem:[#allocation2 + $0xde0] sm:$0xff] }
0x13dd   :  { %2957 = vmatpush1.msra.mxu0 %v2937_v41  ;;  %v3154_v41 = vld [vmem:[#allocation2 + $0xdd8] sm:$0xff] }
0x13de   :  { %2958 = vmatprep.subr.mxu0 %v2936_v42  ;;  %v3153_v42 = vld [vmem:[#allocation2 + $0xdd0] sm:$0xff] }
0x13df   :  { %2959 = vmatpush1.msra.mxu0 %v2935_v44  ;;  %v3152_v44 = vld [vmem:[#allocation2 + $0xdc8] sm:$0xff] }
0x13e0   :  { %2960 = vmatprep.subr.mxu0 %v2934_v45  ;;  %v3151_v45 = vld [vmem:[#allocation2 + $0xdc0] sm:$0xff] }
0x13e1   :  { %2961 = vmatpush1.msra.mxu0 %v2933_v37  ;;  %v3150_v37 = vld [vmem:[#allocation2 + $0xdb8] sm:$0xff] }
0x13e2   :  { %2962 = vmatprep.subr.mxu0 %v2932_v39  ;;  %v3149_v39 = vld [vmem:[#allocation2 + $0xdb0] sm:$0xff] }
0x13e3   :  { %2963 = vmatpush1.msra.mxu0 %v2931_v48  ;;  %v3148_v48 = vld [vmem:[#allocation2 + $0xda8] sm:$0xff] }
0x13e4   :  { %2964 = vmatprep.subr.mxu0 %v2930_v46  ;;  %v3147_v46 = vld [vmem:[#allocation2 + $0xda0] sm:$0xff] }
0x13e5   :  { %2965 = vmatpush1.msra.mxu0 %v2929_v49  ;;  %v8449_v4 = vpop.eup %8448  ;;  %v3146_v49 = vld [vmem:[#allocation2 + $0xd98] sm:$0xff] }
0x13e6   :  { %2966 = vmatprep.subr.mxu0 %v2928_v50  ;;  %v2902_v14 = vadd.f32 1.0, %v8449_v4  ;;  %v3145_v50 = vld [vmem:[#allocation2 + $0xd90] sm:$0xff] }
0x13e7   :  { %2967 = vmatpush1.msra.mxu0 %v2927_v51  ;;  %v3144_v51 = vld [vmem:[#allocation2 + $0xd88] sm:$0xff] }
0x13e8   :  { %2968 = vmatprep.subr.mxu0 %v2926_v52  ;;  %8450 = vrcp.f32 %v2902_v14  ;;  %v3143_v52 = vld [vmem:[#allocation2 + $0xd80] sm:$0xff]  ;;  %v7199_v14 = vld [vmem:[%s9798_s5 + $0xc] ss:$0 sm:$0xff] }
0x13e9   :  { %2969 = vmatpush1.msra.mxu0 %v2925_v53  ;;  %v3142_v53 = vld [vmem:[#allocation2 + $0xd78] sm:$0xff] }
0x13ea   :  { %2970 = vmatprep.subr.mxu0 %v2924_v54  ;;  %v3141_v54 = vld [vmem:[#allocation2 + $0xd70] sm:$0xff] }
0x13eb   :  { %2971 = vmatpush1.msra.mxu0 %v2923_v43  ;;  %v3140_v43 = vld [vmem:[#allocation2 + $0xd68] sm:$0xff] }
0x13ec   :  { %2972 = vmatprep.subr.mxu0 %v2922_v55  ;;  %v3139_v55 = vld [vmem:[#allocation2 + $0xd60] sm:$0xff] }
0x13ed   :  { %2973 = vmatpush1.msra.mxu0 %v2921_v35  ;;  %v3138_v35 = vld [vmem:[#allocation2 + $0xd58] sm:$0xff] }
0x13ee   :  { %2974 = vmatprep.subr.mxu0 %v2920_v56  ;;  %v3137_v56 = vld [vmem:[#allocation2 + $0xd50] sm:$0xff] }
0x13ef   :  { %2975 = vmatpush1.msra.mxu0 %v2919_v57  ;;  %v3136_v57 = vld [vmem:[#allocation2 + $0xd48] sm:$0xff] }
0x13f0   :  { %2976 = vmatprep.subr.mxu0 %v2918_v58  ;;  %v3135_v58 = vld [vmem:[#allocation2 + $0xd40] sm:$0xff] }
0x13f1   :  { %2977 = vmatpush1.msra.mxu0 %v2917_v59  ;;  %v3134_v59 = vld [vmem:[#allocation2 + $0xd38] sm:$0xff] }
0x13f2   :  { %2978 = vmatprep.subr.mxu0 %v2916_v60  ;;  %v3133_v60 = vld [vmem:[#allocation2 + $0xd30] sm:$0xff] }
0x13f3   :  { %2979 = vmatpush1.msra.mxu0 %v2915_v62  ;;  %v3132_v62 = vld [vmem:[#allocation2 + $0xd28] sm:$0xff] }
0x13f4   :  { %2980 = vmatprep.subr.mxu0 %v2914_v63  ;;  %v3131_v63 = vld [vmem:[#allocation2 + $0xd20] sm:$0xff] }
0x13f5   :  { %2981 = vmatpush1.msra.mxu0 %v2913_v5  ;;  %v8451_v15 = vpop.eup %8450  ;;  %v3130_v5 = vld [vmem:[#allocation2 + $0xd18] sm:$0xff] }
0x13f6   :  { %2982 = vmatprep.subr.mxu0 %v2912_v1  ;;  %v2905_v21 = vmul.f32 %v8451_v15, %v9120_v27  ;;  %v3027_v27 = vld [vmem:[#allocation4 + $0x300] sm:$0xff]  ;;  %v3129_v1 = vld [vmem:[#allocation2 + $0xd10] sm:$0xff] }
0x13f7   :  { %2983 = vmatpush1.msra.mxu0 %v2911_v2  ;;  %7962 = vmatpush3.msra.mxu1 %v3027_v27  ;;  %v3128_v2 = vld [vmem:[#allocation2 + $0xd08] sm:$0xff]  ;;  %v3245_v27 = vld [vmem:[#allocation4 + $0x340] sm:$0xff] }
0x13f8   :  { %2984 = vmatprep.subr.mxu0 %v2910_v3  ;;  %v3127_v3 = vld [vmem:[#allocation2 + $0xd00] sm:$0xff] }
0x13f9   :  { %2985 = vmatpush1.msra.mxu0 %v2909_v7  ;;  %v3252_v7 = vld [vmem:[#allocation4 + $0x378] sm:$0xff] }
0x13fa   :  { %7966 = vmatprep.subr.mxu0 %v8621_v0 }
0x149a   :  { %v2894_v16 = vpop.f32.mrf.mxu0 }
0x149b   :  { %v2895_v17 = vadd.f32 %v7194_v61, %v2894_v16 }
0x149c   :  { %v7946_v18 = vpop.f32.mrf.mxu0 }
0x149d   :  { %v2898_v19 = vmax.f32 %v2895_v17, 0.0 }
0x149f   :  { %v2906_v23 = vadd.f32 %v2905_v21, %v2898_v19 }
0x14a1   :  { %v9152_v28 = vadd.f32 %v9027_v20, %v2906_v23  ;;  %v3158_v20 = vld [vmem:[#allocation2 + $0xdf8] sm:$0xff]  ;;  %v9186_v23 = vld [vmem:[%s9794_s1 + $0x4] sm:$0x3] }
0x14a2   :  { %3172 = vmatprep.subr.mxu1 %v3158_v20  ;;  %v3376_v20 = vld [vmem:[#allocation2 + $0xef8] sm:$0xff] }
0x14a3   :  { %3019 = vmatmul.mubr.f32.vlgmr.msra.gmra.mxu0 %v9152_v28 }
0x14a4   :  { %7982 = vmatprep.mubr.msk.f32.mxu0 %vm8622_vm0, %v8621_v0  ;;  %7967 = vmatpush3.msra.mxu0 %v3252_v7  ;;  %v3470_v7 = vld [vmem:[#allocation4 + $0x3b8] sm:$0xff] }
0x14a5   :  { %7968 = vmatprep.subr.mxu0 %v8621_v0 }
0x14a6   :  { %7969 = vmatpush3.msra.mxu0 %v3251_v6  ;;  %v3469_v6 = vld [vmem:[#allocation4 + $0x3b0] sm:$0xff] }
0x14a7   :  { %7970 = vmatprep.subr.mxu0 %v8621_v0 }
0x14a8   :  { %7971 = vmatpush3.msra.mxu0 %v3250_v8  ;;  %v3468_v8 = vld [vmem:[#allocation4 + $0x3a8] sm:$0xff] }
0x14a9   :  { %7972 = vmatprep.subr.mxu0 %v8621_v0 }
0x14aa   :  { %7973 = vmatpush3.msra.mxu0 %v3249_v9  ;;  %v3467_v9 = vld [vmem:[#allocation4 + $0x3a0] sm:$0xff] }
0x14ab   :  { %7974 = vmatprep.subr.mxu0 %v8621_v0 }
0x14ac   :  { %7975 = vmatpush3.msra.mxu0 %v3248_v25 }
0x14ad   :  { %7976 = vmatprep.subr.mxu0 %v8621_v0 }
0x14ae   :  { %7977 = vmatpush3.msra.mxu0 %v3247_v26  ;;  %v3466_v26 = vld [vmem:[#allocation4 + $0x398] sm:$0xff] }
0x14af   :  { %7978 = vmatprep.subr.mxu0 %v8621_v0 }
0x1563   :  { %v9167_v31 = vpop.f32.mrf.mxu0 }
0x1564   :  { %v3021_v11 = vadd.f32 %v9167_v31, %v2947_v10  ;;  %v3165_v10 = vrot.slane %v9200_v29, %v8751_v22 }
0x1565   :  { %v3022_v32 = vpop.f32.mrf.mxu0 }
0x1566   :  { %v3023_v33 = vadd.f32 %v3022_v32, %v2951_v30  ;;  %v7201_v12 = vmul.f32 -1.442695, %v3021_v11  ;;  %v3169_v30 = vrot.slane %v9200_v29, %v8736_v47  ;;  %v9232_v29 = vld [vmem:[%s9796_s3 + $0x1c] sm:$0x3] }
0x1568   :  { %v3025_v34 = vmax.f32 %v3023_v33, 0.0  ;;  %8452 = vpow2.f32 %v7201_v12 }
0x156a   :  { %7964 = vmatmul.mubr.msk.f32.vlgmr.msra.gmra.mxu1 %vm230_vm1, %v3025_v34 }
0x156b   :  { %3173 = vmatpush1.msra.mxu1 %v3157_v36  ;;  %3236 = vmatprep.mubr.f32.mxu1 %v8621_v0  ;;  %v3375_v36 = vld [vmem:[#allocation2 + $0xef0] sm:$0xff] }
0x156c   :  { %3174 = vmatprep.subr.mxu1 %v3156_v38  ;;  %v3374_v38 = vld [vmem:[#allocation2 + $0xee8] sm:$0xff] }
0x156d   :  { %3175 = vmatpush1.msra.mxu1 %v3155_v40  ;;  %v3373_v40 = vld [vmem:[#allocation2 + $0xee0] sm:$0xff] }
0x156e   :  { %3176 = vmatprep.subr.mxu1 %v3154_v41  ;;  %v3372_v41 = vld [vmem:[#allocation2 + $0xed8] sm:$0xff] }
0x156f   :  { %3177 = vmatpush1.msra.mxu1 %v3153_v42  ;;  %v3371_v42 = vld [vmem:[#allocation2 + $0xed0] sm:$0xff] }
0x1570   :  { %3178 = vmatprep.subr.mxu1 %v3152_v44  ;;  %v3370_v44 = vld [vmem:[#allocation2 + $0xec8] sm:$0xff] }
0x1571   :  { %3179 = vmatpush1.msra.mxu1 %v3151_v45  ;;  %v3369_v45 = vld [vmem:[#allocation2 + $0xec0] sm:$0xff] }
0x1572   :  { %3180 = vmatprep.subr.mxu1 %v3150_v37  ;;  %v3368_v37 = vld [vmem:[#allocation2 + $0xeb8] sm:$0xff] }
0x1573   :  { %3181 = vmatpush1.msra.mxu1 %v3149_v39  ;;  %v3367_v39 = vld [vmem:[#allocation2 + $0xeb0] sm:$0xff] }
0x1574   :  { %3182 = vmatprep.subr.mxu1 %v3148_v48  ;;  %v3366_v48 = vld [vmem:[#allocation2 + $0xea8] sm:$0xff] }
0x1575   :  { %3183 = vmatpush1.msra.mxu1 %v3147_v46  ;;  %v8453_v13 = vpop.eup %8452  ;;  %v3365_v46 = vld [vmem:[#allocation2 + $0xea0] sm:$0xff] }
0x1576   :  { %3184 = vmatprep.subr.mxu1 %v3146_v49  ;;  %v3120_v4 = vadd.f32 1.0, %v8453_v13  ;;  %v3364_v49 = vld [vmem:[#allocation2 + $0xe98] sm:$0xff] }
0x1577   :  { %3185 = vmatpush1.msra.mxu1 %v3145_v50  ;;  %v3363_v50 = vld [vmem:[#allocation2 + $0xe90] sm:$0xff] }
0x1578   :  { %3186 = vmatprep.subr.mxu1 %v3144_v51  ;;  %8454 = vrcp.f32 %v3120_v4  ;;  %v3362_v51 = vld [vmem:[#allocation2 + $0xe88] sm:$0xff] }
0x1579   :  { %3187 = vmatpush1.msra.mxu1 %v3143_v52  ;;  %v3361_v52 = vld [vmem:[#allocation2 + $0xe80] sm:$0xff] }
0x157a   :  { %3188 = vmatprep.subr.mxu1 %v3142_v53  ;;  %v3360_v53 = vld [vmem:[#allocation2 + $0xe78] sm:$0xff] }
0x157b   :  { %3189 = vmatpush1.msra.mxu1 %v3141_v54  ;;  %v3359_v54 = vld [vmem:[#allocation2 + $0xe70] sm:$0xff] }
0x157c   :  { %3190 = vmatprep.subr.mxu1 %v3140_v43  ;;  %v3358_v43 = vld [vmem:[#allocation2 + $0xe68] sm:$0xff] }
0x157d   :  { %3191 = vmatpush1.msra.mxu1 %v3139_v55  ;;  %v3357_v55 = vld [vmem:[#allocation2 + $0xe60] sm:$0xff] }
0x157e   :  { %3192 = vmatprep.subr.mxu1 %v3138_v35  ;;  %v3356_v35 = vld [vmem:[#allocation2 + $0xe58] sm:$0xff] }
0x157f   :  { %3193 = vmatpush1.msra.mxu1 %v3137_v56  ;;  %v3355_v56 = vld [vmem:[#allocation2 + $0xe50] sm:$0xff] }
0x1580   :  { %3194 = vmatprep.subr.mxu1 %v3136_v57  ;;  %v3354_v57 = vld [vmem:[#allocation2 + $0xe48] sm:$0xff] }
0x1581   :  { %3195 = vmatpush1.msra.mxu1 %v3135_v58  ;;  %v3353_v58 = vld [vmem:[#allocation2 + $0xe40] sm:$0xff] }
0x1582   :  { %3196 = vmatprep.subr.mxu1 %v3134_v59  ;;  %v3352_v59 = vld [vmem:[#allocation2 + $0xe38] sm:$0xff] }
0x1583   :  { %3197 = vmatpush1.msra.mxu1 %v3133_v60  ;;  %v3351_v60 = vld [vmem:[#allocation2 + $0xe30] sm:$0xff] }
0x1584   :  { %3198 = vmatprep.subr.mxu1 %v3132_v62  ;;  %v3350_v62 = vld [vmem:[#allocation2 + $0xe28] sm:$0xff] }
0x1585   :  { %3199 = vmatpush1.msra.mxu1 %v3131_v63  ;;  %v8455_v61 = vpop.eup %8454  ;;  %v3349_v63 = vld [vmem:[#allocation2 + $0xe20] sm:$0xff] }
0x1586   :  { %3200 = vmatprep.subr.mxu1 %v3130_v5  ;;  %v3123_v19 = vmul.f32 %v8455_v61, %v9152_v28  ;;  %v3246_v28 = vld [vmem:[#allocation4 + $0x348] sm:$0xff]  ;;  %v3348_v5 = vld [vmem:[#allocation2 + $0xe18] sm:$0xff] }
0x1587   :  { %3201 = vmatpush1.msra.mxu1 %v3129_v1  ;;  %7979 = vmatpush3.msra.mxu0 %v3246_v28  ;;  %v3347_v1 = vld [vmem:[#allocation2 + $0xe10] sm:$0xff] }
0x1588   :  { %3202 = vmatprep.subr.mxu1 %v3128_v2  ;;  %7980 = vmatprep.subr.mxu0 %v8621_v0  ;;  %v3346_v2 = vld [vmem:[#allocation2 + $0xe08] sm:$0xff]  ;;  %v3465_v28 = vld [vmem:[#allocation4 + $0x390] sm:$0xff] }
0x1589   :  { %3203 = vmatpush1.msra.mxu1 %v3127_v3  ;;  %7981 = vmatpush3.msra.mxu0 %v3245_v27  ;;  %v3345_v3 = vld [vmem:[#allocation2 + $0xe00] sm:$0xff]  ;;  %v3464_v27 = vld [vmem:[#allocation4 + $0x388] sm:$0xff] }
0x158a   :  { %7985 = vmatprep.subr.mxu1 %v8621_v0  ;;  %3390 = vmatprep.subr.mxu0 %v3376_v20  ;;  %v3594_v20 = vld [vmem:[#allocation2 + $0xff8] sm:$0xff] }
0x162a   :  { %v3112_v15 = vpop.f32.mrf.mxu1 }
0x162b   :  { %v3113_v16 = vadd.f32 %v7199_v14, %v3112_v15  ;;  %v7204_v14 = vld [vmem:[%s9798_s5 + $0xd] ss:$0 sm:$0xff] }
0x162c   :  { %v7965_v17 = vpop.f32.mrf.mxu1 }
0x162d   :  { %v3116_v18 = vmax.f32 %v3113_v16, 0.0 }
0x162f   :  { %v3124_v21 = vadd.f32 %v3123_v19, %v3116_v18 }
0x1631   :  { %v9189_v24 = vadd.f32 %v9186_v23, %v3124_v21 }
0x1633   :  { %3237 = vmatmul.mubr.f32.vlgmr.msra.gmra.mxu1 %v9189_v24 }
0x1634   :  { %8001 = vmatprep.mubr.msk.f32.mxu1 %vm8622_vm0, %v8621_v0  ;;  %7986 = vmatpush3.msra.mxu1 %v3470_v7  ;;  %v3688_v7 = vld [vmem:[#allocation4 + $0x3f8] sm:$0xff] }
0x1635   :  { %7987 = vmatprep.subr.mxu1 %v8621_v0 }
0x1636   :  { %7988 = vmatpush3.msra.mxu1 %v3469_v6  ;;  %v3687_v6 = vld [vmem:[#allocation4 + $0x3f0] sm:$0xff] }
0x1637   :  { %7989 = vmatprep.subr.mxu1 %v8621_v0 }
0x1638   :  { %7990 = vmatpush3.msra.mxu1 %v3468_v8  ;;  %v3686_v8 = vld [vmem:[#allocation4 + $0x3e8] sm:$0xff] }
0x1639   :  { %7991 = vmatprep.subr.mxu1 %v8621_v0 }
0x163a   :  { %7992 = vmatpush3.msra.mxu1 %v3467_v9  ;;  %v3685_v9 = vld [vmem:[#allocation4 + $0x3e0] sm:$0xff] }
0x163b   :  { %7993 = vmatprep.subr.mxu1 %v8621_v0 }
0x163c   :  { %7994 = vmatpush3.msra.mxu1 %v3466_v26 }
0x163d   :  { %7995 = vmatprep.subr.mxu1 %v8621_v0 }
0x163e   :  { %7996 = vmatpush3.msra.mxu1 %v3465_v28  ;;  %v3684_v28 = vld [vmem:[#allocation4 + $0x3d8] sm:$0xff] }
0x163f   :  { %7997 = vmatprep.subr.mxu1 %v8621_v0 }
0x1640   :  { %7998 = vmatpush3.msra.mxu1 %v3464_v27  ;;  %v3683_v27 = vld [vmem:[#allocation4 + $0x3d0] sm:$0xff] }
0x1641   :  { %7999 = vmatprep.subr.mxu1 %v8621_v0 }
0x16f3   :  { %v9204_v31 = vpop.f32.mrf.mxu1 }
0x16f4   :  { %v3239_v11 = vadd.f32 %v9204_v31, %v3165_v10  ;;  %v3383_v10 = vrot.slane %v9232_v29, %v8751_v22 }
0x16f5   :  { %v3240_v32 = vpop.f32.mrf.mxu1 }
0x16f6   :  { %v3241_v33 = vadd.f32 %v3240_v32, %v3169_v30  ;;  %v7206_v12 = vmul.f32 -1.442695, %v3239_v11  ;;  %v3387_v30 = vrot.slane %v9232_v29, %v8736_v47 }
0x16f8   :  { %v3243_v34 = vmax.f32 %v3241_v33, 0.0  ;;  %8456 = vpow2.f32 %v7206_v12 }
0x16fa   :  { %7983 = vmatmul.mubr.msk.f32.vlgmr.msra.gmra.mxu0 %vm230_vm1, %v3243_v34 }
0x16fb   :  { %3391 = vmatpush1.msra.mxu0 %v3375_v36  ;;  %3454 = vmatprep.mubr.f32.mxu0 %v8621_v0  ;;  %v3593_v36 = vld [vmem:[#allocation2 + $0xff0] sm:$0xff] }
0x16fc   :  { %3392 = vmatprep.subr.mxu0 %v3374_v38  ;;  %v3592_v38 = vld [vmem:[#allocation2 + $0xfe8] sm:$0xff] }
0x16fd   :  { %3393 = vmatpush1.msra.mxu0 %v3373_v40  ;;  %v3591_v40 = vld [vmem:[#allocation2 + $0xfe0] sm:$0xff] }
0x16fe   :  { %3394 = vmatprep.subr.mxu0 %v3372_v41  ;;  %v3590_v41 = vld [vmem:[#allocation2 + $0xfd8] sm:$0xff] }
0x16ff   :  { %3395 = vmatpush1.msra.mxu0 %v3371_v42  ;;  %v3589_v42 = vld [vmem:[#allocation2 + $0xfd0] sm:$0xff] }
0x1700   :  { %3396 = vmatprep.subr.mxu0 %v3370_v44  ;;  %v3588_v44 = vld [vmem:[#allocation2 + $0xfc8] sm:$0xff] }
0x1701   :  { %3397 = vmatpush1.msra.mxu0 %v3369_v45  ;;  %v3587_v45 = vld [vmem:[#allocation2 + $0xfc0] sm:$0xff] }
0x1702   :  { %3398 = vmatprep.subr.mxu0 %v3368_v37  ;;  %v3586_v37 = vld [vmem:[#allocation2 + $0xfb8] sm:$0xff] }
0x1703   :  { %3399 = vmatpush1.msra.mxu0 %v3367_v39  ;;  %v3585_v39 = vld [vmem:[#allocation2 + $0xfb0] sm:$0xff] }
0x1704   :  { %3400 = vmatprep.subr.mxu0 %v3366_v48  ;;  %v3584_v48 = vld [vmem:[#allocation2 + $0xfa8] sm:$0xff] }
0x1705   :  { %3401 = vmatpush1.msra.mxu0 %v3365_v46  ;;  %v8457_v13 = vpop.eup %8456  ;;  %v3583_v46 = vld [vmem:[#allocation2 + $0xfa0] sm:$0xff] }
0x1706   :  { %3402 = vmatprep.subr.mxu0 %v3364_v49  ;;  %v3338_v4 = vadd.f32 1.0, %v8457_v13  ;;  %v3582_v49 = vld [vmem:[#allocation2 + $0xf98] sm:$0xff] }
0x1707   :  { %3403 = vmatpush1.msra.mxu0 %v3363_v50  ;;  %v3581_v50 = vld [vmem:[#allocation2 + $0xf90] sm:$0xff] }
0x1708   :  { %3404 = vmatprep.subr.mxu0 %v3362_v51  ;;  %8458 = vrcp.f32 %v3338_v4  ;;  %v3580_v51 = vld [vmem:[#allocation2 + $0xf88] sm:$0xff] }
0x1709   :  { %3405 = vmatpush1.msra.mxu0 %v3361_v52  ;;  %v3579_v52 = vld [vmem:[#allocation2 + $0xf80] sm:$0xff] }
0x170a   :  { %3406 = vmatprep.subr.mxu0 %v3360_v53  ;;  %v3578_v53 = vld [vmem:[#allocation2 + $0xf78] sm:$0xff] }
0x170b   :  { %3407 = vmatpush1.msra.mxu0 %v3359_v54  ;;  %v3577_v54 = vld [vmem:[#allocation2 + $0xf70] sm:$0xff] }
0x170c   :  { %3408 = vmatprep.subr.mxu0 %v3358_v43  ;;  %v3576_v43 = vld [vmem:[#allocation2 + $0xf68] sm:$0xff] }
0x170d   :  { %3409 = vmatpush1.msra.mxu0 %v3357_v55  ;;  %v3575_v55 = vld [vmem:[#allocation2 + $0xf60] sm:$0xff] }
0x170e   :  { %3410 = vmatprep.subr.mxu0 %v3356_v35  ;;  %v3574_v35 = vld [vmem:[#allocation2 + $0xf58] sm:$0xff] }
0x170f   :  { %3411 = vmatpush1.msra.mxu0 %v3355_v56  ;;  %v3573_v56 = vld [vmem:[#allocation2 + $0xf50] sm:$0xff] }
0x1710   :  { %3412 = vmatprep.subr.mxu0 %v3354_v57  ;;  %v3572_v57 = vld [vmem:[#allocation2 + $0xf48] sm:$0xff] }
0x1711   :  { %3413 = vmatpush1.msra.mxu0 %v3353_v58  ;;  %v3571_v58 = vld [vmem:[#allocation2 + $0xf40] sm:$0xff] }
0x1712   :  { %3414 = vmatprep.subr.mxu0 %v3352_v59  ;;  %v3570_v59 = vld [vmem:[#allocation2 + $0xf38] sm:$0xff] }
0x1713   :  { %3415 = vmatpush1.msra.mxu0 %v3351_v60  ;;  %v3569_v60 = vld [vmem:[#allocation2 + $0xf30] sm:$0xff] }
0x1714   :  { %3416 = vmatprep.subr.mxu0 %v3350_v62  ;;  %v3568_v62 = vld [vmem:[#allocation2 + $0xf28] sm:$0xff] }
0x1715   :  { %3417 = vmatpush1.msra.mxu0 %v3349_v63  ;;  %v8459_v61 = vpop.eup %8458  ;;  %v3567_v63 = vld [vmem:[#allocation2 + $0xf20] sm:$0xff] }
0x1716   :  { %3418 = vmatprep.subr.mxu0 %v3348_v5  ;;  %v3341_v19 = vmul.f32 %v8459_v61, %v9189_v24  ;;  %v3463_v24 = vld [vmem:[#allocation4 + $0x380] sm:$0xff]  ;;  %v3566_v5 = vld [vmem:[#allocation2 + $0xf18] sm:$0xff] }
0x1717   :  { %3419 = vmatpush1.msra.mxu0 %v3347_v1  ;;  %8000 = vmatpush3.msra.mxu1 %v3463_v24  ;;  %v3565_v1 = vld [vmem:[#allocation2 + $0xf10] sm:$0xff]  ;;  %v3682_v24 = vld [vmem:[#allocation4 + $0x3c8] sm:$0xff] }
0x1718   :  { %3420 = vmatprep.subr.mxu0 %v3346_v2  ;;  %3608 = vmatprep.subr.mxu1 %v3594_v20  ;;  %v3564_v2 = vld [vmem:[#allocation2 + $0xf08] sm:$0xff]  ;;  %v9263_v20 = vld [vmem:[%s9796_s3 + $0x1e] sm:$0x3] }
0x1719   :  { %3421 = vmatpush1.msra.mxu0 %v3345_v3  ;;  %v3563_v3 = vld [vmem:[#allocation2 + $0xf00] sm:$0xff]  ;;  %v3605_v29 = vrot.slane %v9263_v20, %v8736_v47 }
0x171a   :  { %8004 = vmatprep.subr.mxu0 %v8621_v0 }
0x17ba   :  { %v3330_v15 = vpop.f32.mrf.mxu0 }
0x17bb   :  { %v3331_v16 = vadd.f32 %v7204_v14, %v3330_v15  ;;  %v7209_v14 = vld [vmem:[%s9798_s5 + $0xe] ss:$0 sm:$0xff] }
0x17bc   :  { %v7984_v17 = vpop.f32.mrf.mxu0 }
0x17bd   :  { %v3334_v18 = vmax.f32 %v3331_v16, 0.0 }
0x17bf   :  { %v3342_v21 = vadd.f32 %v3341_v19, %v3334_v18 }
0x17c1   :  { %v9221_v25 = vadd.f32 %v9186_v23, %v3342_v21 }
0x17c3   :  { %3455 = vmatmul.mubr.f32.vlgmr.msra.gmra.mxu0 %v9221_v25 }
0x17c4   :  { %8020 = vmatprep.mubr.msk.f32.mxu0 %vm8622_vm0, %v8621_v0  ;;  %8005 = vmatpush3.msra.mxu0 %v3688_v7  ;;  %v3895_v7 = vld [vmem:[#allocation2 + $0x1078] sm:$0xff] }
0x17c5   :  { %8006 = vmatprep.subr.mxu0 %v8621_v0 }
0x17c6   :  { %8007 = vmatpush3.msra.mxu0 %v3687_v6  ;;  %v3894_v6 = vld [vmem:[#allocation2 + $0x1070] sm:$0xff] }
0x17c7   :  { %8008 = vmatprep.subr.mxu0 %v8621_v0 }
0x17c8   :  { %8009 = vmatpush3.msra.mxu0 %v3686_v8  ;;  %v3893_v8 = vld [vmem:[#allocation2 + $0x1068] sm:$0xff] }
0x17c9   :  { %8010 = vmatprep.subr.mxu0 %v8621_v0 }
0x17ca   :  { %8011 = vmatpush3.msra.mxu0 %v3685_v9  ;;  %v3892_v9 = vld [vmem:[#allocation2 + $0x1060] sm:$0xff] }
0x17cb   :  { %8012 = vmatprep.subr.mxu0 %v8621_v0 }
0x17cc   :  { %8013 = vmatpush3.msra.mxu0 %v3684_v28 }
0x17cd   :  { %8014 = vmatprep.subr.mxu0 %v8621_v0 }
0x17ce   :  { %8015 = vmatpush3.msra.mxu0 %v3683_v27 }
0x17cf   :  { %8016 = vmatprep.subr.mxu0 %v8621_v0 }
0x17d0   :  { %8017 = vmatpush3.msra.mxu0 %v3682_v24 }
0x17d1   :  { %8018 = vmatprep.subr.mxu0 %v8621_v0 }
0x1883   :  { %v9236_v31 = vpop.f32.mrf.mxu0 }
0x1884   :  { %v3457_v11 = vadd.f32 %v9236_v31, %v3383_v10  ;;  %v3891_v10 = vld [vmem:[#allocation2 + $0x1058] sm:$0xff] }
0x1885   :  { %v3458_v32 = vpop.f32.mrf.mxu0 }
0x1886   :  { %v3459_v33 = vadd.f32 %v3458_v32, %v3387_v30  ;;  %v7211_v12 = vmul.f32 -1.442695, %v3457_v11  ;;  %v3890_v11 = vld [vmem:[#allocation2 + $0x1050] sm:$0xff] }
0x1888   :  { %v3461_v34 = vmax.f32 %v3459_v33, 0.0  ;;  %8460 = vpow2.f32 %v7211_v12  ;;  %v3889_v12 = vld [vmem:[#allocation2 + $0x1048] sm:$0xff] }
0x188a   :  { %8002 = vmatmul.mubr.msk.f32.vlgmr.msra.gmra.mxu1 %vm230_vm1, %v3461_v34  ;;  %v3796_v34 = vld [vmem:[#allocation6 + $0x178] sm:$0xff] }
0x188b   :  { %3609 = vmatpush1.msra.mxu1 %v3593_v36  ;;  %3672 = vmatprep.mubr.f32.mxu1 %v8621_v0  ;;  %v3795_v36 = vld [vmem:[#allocation6 + $0x170] sm:$0xff] }
0x188c   :  { %3610 = vmatprep.subr.mxu1 %v3592_v38  ;;  %v3794_v38 = vld [vmem:[#allocation6 + $0x168] sm:$0xff] }
0x188d   :  { %3611 = vmatpush1.msra.mxu1 %v3591_v40  ;;  %v3793_v40 = vld [vmem:[#allocation6 + $0x160] sm:$0xff] }
0x188e   :  { %3612 = vmatprep.subr.mxu1 %v3590_v41  ;;  %v3792_v41 = vld [vmem:[#allocation6 + $0x158] sm:$0xff] }
0x188f   :  { %3613 = vmatpush1.msra.mxu1 %v3589_v42  ;;  %v3791_v42 = vld [vmem:[#allocation6 + $0x150] sm:$0xff] }
0x1890   :  { %3614 = vmatprep.subr.mxu1 %v3588_v44  ;;  %v3790_v44 = vld [vmem:[#allocation6 + $0x148] sm:$0xff] }
0x1891   :  { %3615 = vmatpush1.msra.mxu1 %v3587_v45  ;;  %v3789_v45 = vld [vmem:[#allocation6 + $0x140] sm:$0xff] }
0x1892   :  { %3616 = vmatprep.subr.mxu1 %v3586_v37  ;;  %v3788_v37 = vld [vmem:[#allocation6 + $0x138] sm:$0xff] }
0x1893   :  { %3617 = vmatpush1.msra.mxu1 %v3585_v39  ;;  %v3787_v39 = vld [vmem:[#allocation6 + $0x130] sm:$0xff] }
0x1894   :  { %3618 = vmatprep.subr.mxu1 %v3584_v48  ;;  %v3786_v48 = vld [vmem:[#allocation6 + $0x128] sm:$0xff] }
0x1895   :  { %3619 = vmatpush1.msra.mxu1 %v3583_v46  ;;  %v8461_v13 = vpop.eup %8460  ;;  %v3785_v46 = vld [vmem:[#allocation6 + $0x120] sm:$0xff] }
0x1896   :  { %3620 = vmatprep.subr.mxu1 %v3582_v49  ;;  %v3556_v4 = vadd.f32 1.0, %v8461_v13  ;;  %v3784_v49 = vld [vmem:[#allocation6 + $0x118] sm:$0xff]  ;;  %v3888_v13 = vld [vmem:[#allocation2 + $0x1040] sm:$0xff] }
0x1897   :  { %3621 = vmatpush1.msra.mxu1 %v3581_v50  ;;  %v3783_v50 = vld [vmem:[#allocation6 + $0x110] sm:$0xff] }
0x1898   :  { %3622 = vmatprep.subr.mxu1 %v3580_v51  ;;  %8462 = vrcp.f32 %v3556_v4  ;;  %v3782_v51 = vld [vmem:[#allocation6 + $0x108] sm:$0xff]  ;;  %v3887_v4 = vld [vmem:[#allocation2 + $0x1038] sm:$0xff] }
0x1899   :  { %3623 = vmatpush1.msra.mxu1 %v3579_v52  ;;  %v3781_v52 = vld [vmem:[#allocation6 + $0x100] sm:$0xff] }
0x189a   :  { %3624 = vmatprep.subr.mxu1 %v3578_v53  ;;  %v3911_v53 = vld [vmem:[#allocation2 + $0x10f8] sm:$0xff] }
0x189b   :  { %3625 = vmatpush1.msra.mxu1 %v3577_v54  ;;  %v3910_v54 = vld [vmem:[#allocation2 + $0x10f0] sm:$0xff] }
0x189c   :  { %3626 = vmatprep.subr.mxu1 %v3576_v43  ;;  %v3909_v43 = vld [vmem:[#allocation2 + $0x10e8] sm:$0xff] }
0x189d   :  { %3627 = vmatpush1.msra.mxu1 %v3575_v55  ;;  %v3908_v55 = vld [vmem:[#allocation2 + $0x10e0] sm:$0xff] }
0x189e   :  { %3628 = vmatprep.subr.mxu1 %v3574_v35  ;;  %v3907_v35 = vld [vmem:[#allocation2 + $0x10d8] sm:$0xff] }
0x189f   :  { %3629 = vmatpush1.msra.mxu1 %v3573_v56  ;;  %v3906_v56 = vld [vmem:[#allocation2 + $0x10d0] sm:$0xff] }
0x18a0   :  { %3630 = vmatprep.subr.mxu1 %v3572_v57  ;;  %v3905_v57 = vld [vmem:[#allocation2 + $0x10c8] sm:$0xff] }
0x18a1   :  { %3631 = vmatpush1.msra.mxu1 %v3571_v58  ;;  %v3904_v58 = vld [vmem:[#allocation2 + $0x10c0] sm:$0xff] }
0x18a2   :  { %3632 = vmatprep.subr.mxu1 %v3570_v59  ;;  %v3903_v59 = vld [vmem:[#allocation2 + $0x10b8] sm:$0xff] }
0x18a3   :  { %3633 = vmatpush1.msra.mxu1 %v3569_v60  ;;  %v3902_v60 = vld [vmem:[#allocation2 + $0x10b0] sm:$0xff] }
0x18a4   :  { %3634 = vmatprep.subr.mxu1 %v3568_v62  ;;  %v3901_v62 = vld [vmem:[#allocation2 + $0x10a8] sm:$0xff] }
0x18a5   :  { %3635 = vmatpush1.msra.mxu1 %v3567_v63  ;;  %v8463_v61 = vpop.eup %8462  ;;  %v3900_v63 = vld [vmem:[#allocation2 + $0x10a0] sm:$0xff] }
0x18a6   :  { %3636 = vmatprep.subr.mxu1 %v3566_v5  ;;  %v3559_v19 = vmul.f32 %v8463_v61, %v9221_v25  ;;  %v3681_v25 = vld [vmem:[#allocation4 + $0x3c0] sm:$0xff]  ;;  %v3899_v5 = vld [vmem:[#allocation2 + $0x1098] sm:$0xff] }
0x18a7   :  { %3637 = vmatpush1.msra.mxu1 %v3565_v1  ;;  %8019 = vmatpush3.msra.mxu0 %v3681_v25  ;;  %v3898_v1 = vld [vmem:[#allocation2 + $0x1090] sm:$0xff] }
0x18a8   :  { %3638 = vmatprep.subr.mxu1 %v3564_v2  ;;  %8023 = vmatprep.subr.mxu0 %v8621_v0  ;;  %v3897_v2 = vld [vmem:[#allocation2 + $0x1088] sm:$0xff] }
0x18a9   :  { %3639 = vmatpush1.msra.mxu1 %v3563_v3  ;;  %v3896_v3 = vld [vmem:[#allocation2 + $0x1080] sm:$0xff] }
0x18aa   :  { %3925 = vmatprep.subr.mxu1 %v3911_v53  ;;  %v4129_v53 = vld [vmem:[#allocation2 + $0x11f8] sm:$0xff] }
0x194a   :  { %v3548_v15 = vpop.f32.mrf.mxu1 }
0x194b   :  { %v3549_v16 = vadd.f32 %v7209_v14, %v3548_v15  ;;  %v3601_v14 = vrot.slane %v9263_v20, %v8751_v22 }
0x194c   :  { %v8003_v17 = vpop.f32.mrf.mxu1 }
0x194d   :  { %v3552_v18 = vmax.f32 %v3549_v16, 0.0 }
0x194f   :  { %v3560_v21 = vadd.f32 %v3559_v19, %v3552_v18  ;;  %v7214_v18 = vld [vmem:[%s9798_s5 + $0xf] ss:$0 sm:$0xff] }
0x1951   :  { %v9252_v26 = vadd.f32 %v9186_v23, %v3560_v21 }
0x1953   :  { %3673 = vmatmul.mubr.f32.vlgmr.msra.gmra.mxu1 %v9252_v26 }
0x1954   :  { %3989 = vmatprep.mubr.f32.mxu1 %v8621_v0  ;;  %3926 = vmatpush1.msra.mxu1 %v3910_v54  ;;  %v4128_v54 = vld [vmem:[#allocation2 + $0x11f0] sm:$0xff] }
0x1955   :  { %3927 = vmatprep.subr.mxu1 %v3909_v43  ;;  %v4127_v43 = vld [vmem:[#allocation2 + $0x11e8] sm:$0xff] }
0x1956   :  { %3928 = vmatpush1.msra.mxu1 %v3908_v55  ;;  %v4126_v55 = vld [vmem:[#allocation2 + $0x11e0] sm:$0xff] }
0x1957   :  { %3929 = vmatprep.subr.mxu1 %v3907_v35  ;;  %v4125_v35 = vld [vmem:[#allocation2 + $0x11d8] sm:$0xff] }
0x1958   :  { %3930 = vmatpush1.msra.mxu1 %v3906_v56  ;;  %v4124_v56 = vld [vmem:[#allocation2 + $0x11d0] sm:$0xff] }
0x1959   :  { %3931 = vmatprep.subr.mxu1 %v3905_v57  ;;  %v4123_v57 = vld [vmem:[#allocation2 + $0x11c8] sm:$0xff] }
0x195a   :  { %3932 = vmatpush1.msra.mxu1 %v3904_v58  ;;  %v4122_v58 = vld [vmem:[#allocation2 + $0x11c0] sm:$0xff] }
0x195b   :  { %3933 = vmatprep.subr.mxu1 %v3903_v59  ;;  %v4121_v59 = vld [vmem:[#allocation2 + $0x11b8] sm:$0xff] }
0x195c   :  { %3934 = vmatpush1.msra.mxu1 %v3902_v60  ;;  %v4120_v60 = vld [vmem:[#allocation2 + $0x11b0] sm:$0xff] }
0x195d   :  { %3935 = vmatprep.subr.mxu1 %v3901_v62  ;;  %v4119_v62 = vld [vmem:[#allocation2 + $0x11a8] sm:$0xff] }
0x195e   :  { %3936 = vmatpush1.msra.mxu1 %v3900_v63  ;;  %v4118_v63 = vld [vmem:[#allocation2 + $0x11a0] sm:$0xff] }
0x195f   :  { %3937 = vmatprep.subr.mxu1 %v3899_v5  ;;  %v4117_v5 = vld [vmem:[#allocation2 + $0x1198] sm:$0xff] }
0x1960   :  { %3938 = vmatpush1.msra.mxu1 %v3898_v1  ;;  %v4116_v1 = vld [vmem:[#allocation2 + $0x1190] sm:$0xff] }
0x1961   :  { %3939 = vmatprep.subr.mxu1 %v3897_v2  ;;  %v4115_v2 = vld [vmem:[#allocation2 + $0x1188] sm:$0xff] }
0x1962   :  { %3940 = vmatpush1.msra.mxu1 %v3896_v3  ;;  %v4114_v3 = vld [vmem:[#allocation2 + $0x1180] sm:$0xff] }
0x1963   :  { %3941 = vmatprep.subr.mxu1 %v3895_v7  ;;  %v4113_v7 = vld [vmem:[#allocation2 + $0x1178] sm:$0xff] }
0x1964   :  { %3942 = vmatpush1.msra.mxu1 %v3894_v6  ;;  %v4112_v6 = vld [vmem:[#allocation2 + $0x1170] sm:$0xff] }
0x1965   :  { %3943 = vmatprep.subr.mxu1 %v3893_v8  ;;  %v4111_v8 = vld [vmem:[#allocation2 + $0x1168] sm:$0xff] }
0x1966   :  { %3944 = vmatpush1.msra.mxu1 %v3892_v9  ;;  %v4110_v9 = vld [vmem:[#allocation2 + $0x1160] sm:$0xff] }
0x1967   :  { %3945 = vmatprep.subr.mxu1 %v3891_v10  ;;  %v4109_v10 = vld [vmem:[#allocation2 + $0x1158] sm:$0xff] }
0x1968   :  { %3946 = vmatpush1.msra.mxu1 %v3890_v11  ;;  %v4108_v11 = vld [vmem:[#allocation2 + $0x1150] sm:$0xff] }
0x1969   :  { %3947 = vmatprep.subr.mxu1 %v3889_v12  ;;  %v4107_v12 = vld [vmem:[#allocation2 + $0x1148] sm:$0xff] }
0x196a   :  { %3948 = vmatpush1.msra.mxu1 %v3888_v13  ;;  %v7220_v13 = vld [vmem:[%s9796_s3 + $0x20] sm:$0x3] }
0x196b   :  { %3949 = vmatprep.subr.mxu1 %v3887_v4  ;;  %v3922_v4 = vrot.slane %v7220_v13, %v8736_v47 }
0x1a13   :  { %v9267_v30 = vpop.f32.mrf.mxu1 }
0x1a14   :  { %v3675_v61 = vadd.f32 %v9267_v30, %v3601_v14  ;;  %v3886_v30 = vld [vmem:[#allocation2 + $0x1030] sm:$0xff] }
0x1a15   :  { %v3676_v31 = vpop.f32.mrf.mxu1  ;;  %3950 = vmatpush1.msra.mxu1 %v3886_v30  ;;  %v4222_v30 = vld [vmem:[#allocation4 + $0x470] sm:$0xff] }
0x1a16   :  { %v3677_v32 = vadd.f32 %v3676_v31, %v3605_v29  ;;  %v7216_v15 = vmul.f32 -1.442695, %v3675_v61  ;;  %v3885_v31 = vld [vmem:[#allocation2 + $0x1028] sm:$0xff] }
0x1a17   :  { %3951 = vmatprep.subr.mxu1 %v3885_v31  ;;  %v4221_v31 = vld [vmem:[#allocation4 + $0x468] sm:$0xff] }
0x1a18   :  { %v3679_v33 = vmax.f32 %v3677_v32, 0.0  ;;  %8464 = vpow2.f32 %v7216_v15  ;;  %v3884_v32 = vld [vmem:[#allocation2 + $0x1020] sm:$0xff] }
0x1a19   :  { %3952 = vmatpush1.msra.mxu1 %v3884_v32  ;;  %v4220_v32 = vld [vmem:[#allocation4 + $0x460] sm:$0xff] }
0x1a1a   :  { %8021 = vmatmul.mubr.msk.f32.vlgmr.msra.gmra.mxu0 %vm230_vm1, %v3679_v33  ;;  %v3883_v33 = vld [vmem:[#allocation2 + $0x1018] sm:$0xff] }
0x1a1b   :  { %8024 = vmatpush3.msra.mxu0 %v3796_v34  ;;  %8055 = vmatprep.mubr.msk.f32.mxu0 %vm8622_vm0, %v8621_v0  ;;  %v3882_v34 = vld [vmem:[#allocation2 + $0x1010] sm:$0xff] }
0x1a1c   :  { %8025 = vmatprep.subr.mxu0 %v8621_v0  ;;  %3953 = vmatprep.subr.mxu1 %v3883_v33  ;;  %v3918_v33 = vrot.slane %v7220_v13, %v8751_v22  ;;  %v4330_v13 = vld [vmem:[#allocation2 + $0x1270] sm:$0xff] }
0x1a1d   :  { %8026 = vmatpush3.msra.mxu0 %v3795_v36  ;;  %3954 = vmatpush1.msra.mxu1 %v3882_v34  ;;  %v3881_v36 = vld [vmem:[#allocation2 + $0x1008] sm:$0xff] }
0x1a1e   :  { %8027 = vmatprep.subr.mxu0 %v8621_v0  ;;  %3955 = vmatprep.subr.mxu1 %v3881_v36 }
0x1a1f   :  { %8028 = vmatpush3.msra.mxu0 %v3794_v38  ;;  %v4005_v38 = vld [vmem:[#allocation4 + $0x438] sm:$0xff] }
0x1a20   :  { %8029 = vmatprep.subr.mxu0 %v8621_v0 }
0x1a21   :  { %8030 = vmatpush3.msra.mxu0 %v3793_v40  ;;  %v4003_v40 = vld [vmem:[#allocation4 + $0x428] sm:$0xff] }
0x1a22   :  { %8031 = vmatprep.subr.mxu0 %v8621_v0 }
0x1a23   :  { %8032 = vmatpush3.msra.mxu0 %v3792_v41  ;;  %v4002_v41 = vld [vmem:[#allocation4 + $0x420] sm:$0xff] }
0x1a24   :  { %8033 = vmatprep.subr.mxu0 %v8621_v0 }
0x1a25   :  { %8034 = vmatpush3.msra.mxu0 %v3791_v42  ;;  %v8465_v16 = vpop.eup %8464  ;;  %v7218_v42 = vld [vmem:[%s9800_s7 + $0x2] ss:$0 sm:$0xff] }
0x1a26   :  { %8035 = vmatprep.subr.mxu0 %v8621_v0  ;;  %v3774_v17 = vadd.f32 1.0, %v8465_v16 }
0x1a27   :  { %8036 = vmatpush3.msra.mxu0 %v3790_v44 }
0x1a28   :  { %8037 = vmatprep.subr.mxu0 %v8621_v0  ;;  %8466 = vrcp.f32 %v3774_v17  ;;  %v4106_v17 = vld [vmem:[#allocation2 + $0x1140] sm:$0xff] }
0x1a29   :  { %8038 = vmatpush3.msra.mxu0 %v3789_v45 }
0x1a2a   :  { %8039 = vmatprep.subr.mxu0 %v8621_v0 }
0x1a2b   :  { %8040 = vmatpush3.msra.mxu0 %v3788_v37  ;;  %v9308_v37 = vld [vmem:[%s9794_s1 + $0x6] sm:$0x3] }
0x1a2c   :  { %8041 = vmatprep.subr.mxu0 %v8621_v0 }
0x1a2d   :  { %8042 = vmatpush3.msra.mxu0 %v3787_v39 }
0x1a2e   :  { %8043 = vmatprep.subr.mxu0 %v8621_v0 }
0x1a2f   :  { %8044 = vmatpush3.msra.mxu0 %v3786_v48 }
0x1a30   :  { %8045 = vmatprep.subr.mxu0 %v8621_v0 }
0x1a31   :  { %8046 = vmatpush3.msra.mxu0 %v3785_v46 }
0x1a32   :  { %8047 = vmatprep.subr.mxu0 %v8621_v0 }
0x1a33   :  { %8048 = vmatpush3.msra.mxu0 %v3784_v49  ;;  %v4001_v49 = vld [vmem:[#allocation4 + $0x418] sm:$0xff] }
0x1a34   :  { %8049 = vmatprep.subr.mxu0 %v8621_v0 }
0x1a35   :  { %8050 = vmatpush3.msra.mxu0 %v3783_v50  ;;  %v8467_v19 = vpop.eup %8466  ;;  %v4000_v50 = vld [vmem:[#allocation4 + $0x410] sm:$0xff] }
0x1a36   :  { %8051 = vmatprep.subr.mxu0 %v8621_v0  ;;  %v3777_v25 = vmul.f32 %v8467_v19, %v9252_v26  ;;  %v3880_v26 = vld [vmem:[#allocation2 + $0x1000] sm:$0xff]  ;;  %v4104_v19 = vld [vmem:[#allocation2 + $0x1130] sm:$0xff] }
0x1a37   :  { %8052 = vmatpush3.msra.mxu0 %v3782_v51  ;;  %3956 = vmatpush1.msra.mxu1 %v3880_v26  ;;  %v3999_v51 = vld [vmem:[#allocation4 + $0x408] sm:$0xff] }
0x1a38   :  { %8053 = vmatprep.subr.mxu0 %v8621_v0  ;;  %4143 = vmatprep.subr.mxu1 %v4129_v53  ;;  %v4347_v53 = vld [vmem:[#allocation2 + $0x12f8] sm:$0xff] }
0x1a39   :  { %8054 = vmatpush3.msra.mxu0 %v3781_v52  ;;  %v3998_v52 = vld [vmem:[#allocation4 + $0x400] sm:$0xff] }
0x1a3a   :  { %8058 = vmatprep.subr.mxu0 %v8621_v0 }
0x1ada   :  { %v3766_v21 = vpop.f32.mrf.mxu0 }
0x1adb   :  { %v3767_v28 = vadd.f32 %v7214_v18, %v3766_v21  ;;  %v4105_v18 = vld [vmem:[#allocation2 + $0x1138] sm:$0xff]  ;;  %v4103_v21 = vld [vmem:[#allocation2 + $0x1128] sm:$0xff] }
0x1adc   :  { %v8022_v27 = vpop.f32.mrf.mxu0 }
0x1add   :  { %v3770_v24 = vmax.f32 %v3767_v28, 0.0  ;;  %v4102_v28 = vld [vmem:[#allocation2 + $0x1120] sm:$0xff]  ;;  %v4101_v27 = vld [vmem:[#allocation2 + $0x1118] sm:$0xff] }
0x1adf   :  { %v3778_v29 = vadd.f32 %v3777_v25, %v3770_v24  ;;  %v4100_v24 = vld [vmem:[#allocation2 + $0x1110] sm:$0xff]  ;;  %v4099_v25 = vld [vmem:[#allocation2 + $0x1108] sm:$0xff] }
0x1ae1   :  { %v3779_v20 = vadd.f32 %v9186_v23, %v3778_v29  ;;  %v4004_v23 = vld [vmem:[#allocation4 + $0x430] sm:$0xff]  ;;  %v4098_v29 = vld [vmem:[#allocation2 + $0x1100] sm:$0xff] }
0x1ae3   :  { %8056 = vmatmul.mubr.f32.vlgmr.msra.gmra.mxu0 %v3779_v20  ;;  %v4223_v20 = vld [vmem:[#allocation4 + $0x478] sm:$0xff] }
0x1ae4   :  { %8074 = vmatprep.mubr.msk.f32.mxu0 %vm8622_vm0, %v8621_v0  ;;  %8059 = vmatpush3.msra.mxu0 %v4005_v38 }
0x1ae5   :  { %8060 = vmatprep.subr.mxu0 %v8621_v0 }
0x1ae6   :  { %8061 = vmatpush3.msra.mxu0 %v4004_v23  ;;  %v7222_v23 = vld [vmem:[%s9798_s5 + $0x10] ss:$0 sm:$0xff] }
0x1ae7   :  { %8062 = vmatprep.subr.mxu0 %v8621_v0 }
0x1ae8   :  { %8063 = vmatpush3.msra.mxu0 %v4003_v40 }
0x1ae9   :  { %8064 = vmatprep.subr.mxu0 %v8621_v0 }
0x1aea   :  { %8065 = vmatpush3.msra.mxu0 %v4002_v41 }
0x1aeb   :  { %8066 = vmatprep.subr.mxu0 %v8621_v0 }
0x1aec   :  { %8067 = vmatpush3.msra.mxu0 %v4001_v49 }
0x1aed   :  { %8068 = vmatprep.subr.mxu0 %v8621_v0 }
0x1aee   :  { %8069 = vmatpush3.msra.mxu0 %v4000_v50  ;;  %v4219_v50 = vld [vmem:[#allocation4 + $0x458] sm:$0xff] }
0x1aef   :  { %8070 = vmatprep.subr.mxu0 %v8621_v0 }
0x1af0   :  { %8071 = vmatpush3.msra.mxu0 %v3999_v51  ;;  %v4218_v51 = vld [vmem:[#allocation4 + $0x450] sm:$0xff] }
0x1af1   :  { %8072 = vmatprep.subr.mxu0 %v8621_v0 }
0x1af2   :  { %8073 = vmatpush3.msra.mxu0 %v3998_v52  ;;  %v4217_v52 = vld [vmem:[#allocation4 + $0x448] sm:$0xff] }
0x1af3   :  { %8077 = vmatprep.subr.mxu0 %v8621_v0 }
0x1ba3   :  { %v3871_v44 = vpop.f32.mrf.mxu0 }
0x1ba4   :  { %v3872_v45 = vadd.f32 %v7218_v42, %v3871_v44 }
0x1ba5   :  { %v8057_v39 = vpop.f32.mrf.mxu0 }
0x1ba6   :  { %v3875_v48 = vmax.f32 %v3872_v45, 0.0 }
0x1ba8   :  { %v9311_v46 = vadd.f32 %v9308_v37, %v3875_v48 }
0x1baa   :  { %3990 = vmatmul.mubr.f32.vlgmr.msra.gmra.mxu1 %v9311_v46 }
0x1bab   :  { %4207 = vmatprep.mubr.f32.mxu1 %v8621_v0  ;;  %4144 = vmatpush1.msra.mxu1 %v4128_v54  ;;  %v9348_v54 = vld [vmem:[%s9796_s3 + $0x22] sm:$0x3] }
0x1bac   :  { %4145 = vmatprep.subr.mxu1 %v4127_v43  ;;  %v4140_v43 = vrot.slane %v9348_v54, %v8736_v47 }
0x1bad   :  { %4146 = vmatpush1.msra.mxu1 %v4126_v55 }
0x1bae   :  { %4147 = vmatprep.subr.mxu1 %v4125_v35 }
0x1baf   :  { %4148 = vmatpush1.msra.mxu1 %v4124_v56 }
0x1bb0   :  { %4149 = vmatprep.subr.mxu1 %v4123_v57 }
0x1bb1   :  { %4150 = vmatpush1.msra.mxu1 %v4122_v58  ;;  %v4346_v58 = vld [vmem:[#allocation2 + $0x12f0] sm:$0xff] }
0x1bb2   :  { %4151 = vmatprep.subr.mxu1 %v4121_v59  ;;  %v4345_v59 = vld [vmem:[#allocation2 + $0x12e8] sm:$0xff] }
0x1bb3   :  { %4152 = vmatpush1.msra.mxu1 %v4120_v60  ;;  %v4344_v60 = vld [vmem:[#allocation2 + $0x12e0] sm:$0xff] }
0x1bb4   :  { %4153 = vmatprep.subr.mxu1 %v4119_v62  ;;  %v4343_v62 = vld [vmem:[#allocation2 + $0x12d8] sm:$0xff] }
0x1bb5   :  { %4154 = vmatpush1.msra.mxu1 %v4118_v63  ;;  %v4342_v63 = vld [vmem:[#allocation2 + $0x12d0] sm:$0xff] }
0x1bb6   :  { %4155 = vmatprep.subr.mxu1 %v4117_v5  ;;  %v4341_v5 = vld [vmem:[#allocation2 + $0x12c8] sm:$0xff] }
0x1bb7   :  { %4156 = vmatpush1.msra.mxu1 %v4116_v1  ;;  %v4340_v1 = vld [vmem:[#allocation2 + $0x12c0] sm:$0xff] }
0x1bb8   :  { %4157 = vmatprep.subr.mxu1 %v4115_v2  ;;  %v4339_v2 = vld [vmem:[#allocation2 + $0x12b8] sm:$0xff] }
0x1bb9   :  { %4158 = vmatpush1.msra.mxu1 %v4114_v3  ;;  %v4338_v3 = vld [vmem:[#allocation2 + $0x12b0] sm:$0xff] }
0x1bba   :  { %4159 = vmatprep.subr.mxu1 %v4113_v7  ;;  %v4337_v7 = vld [vmem:[#allocation2 + $0x12a8] sm:$0xff] }
0x1bbb   :  { %4160 = vmatpush1.msra.mxu1 %v4112_v6  ;;  %v4336_v6 = vld [vmem:[#allocation2 + $0x12a0] sm:$0xff] }
0x1bbc   :  { %4161 = vmatprep.subr.mxu1 %v4111_v8  ;;  %v4335_v8 = vld [vmem:[#allocation2 + $0x1298] sm:$0xff] }
0x1bbd   :  { %4162 = vmatpush1.msra.mxu1 %v4110_v9  ;;  %v4334_v9 = vld [vmem:[#allocation2 + $0x1290] sm:$0xff] }
0x1bbe   :  { %4163 = vmatprep.subr.mxu1 %v4109_v10  ;;  %v4333_v10 = vld [vmem:[#allocation2 + $0x1288] sm:$0xff] }
0x1bbf   :  { %4164 = vmatpush1.msra.mxu1 %v4108_v11  ;;  %v4332_v11 = vld [vmem:[#allocation2 + $0x1280] sm:$0xff] }
0x1bc0   :  { %4165 = vmatprep.subr.mxu1 %v4107_v12  ;;  %v4331_v12 = vld [vmem:[#allocation2 + $0x1278] sm:$0xff] }
0x1bc1   :  { %4166 = vmatpush1.msra.mxu1 %v4106_v17  ;;  %v4324_v17 = vld [vmem:[#allocation2 + $0x1240] sm:$0xff] }
0x1bc2   :  { %4167 = vmatprep.subr.mxu1 %v4105_v18  ;;  %v4323_v18 = vld [vmem:[#allocation2 + $0x1238] sm:$0xff] }
0x1bc3   :  { %4168 = vmatpush1.msra.mxu1 %v4104_v19  ;;  %v4322_v19 = vld [vmem:[#allocation2 + $0x1230] sm:$0xff] }
0x1bc4   :  { %4169 = vmatprep.subr.mxu1 %v4103_v21  ;;  %v4321_v21 = vld [vmem:[#allocation2 + $0x1228] sm:$0xff] }
0x1bc5   :  { %4170 = vmatpush1.msra.mxu1 %v4102_v28  ;;  %v4320_v28 = vld [vmem:[#allocation2 + $0x1220] sm:$0xff] }
0x1bc6   :  { %4171 = vmatprep.subr.mxu1 %v4101_v27  ;;  %v4319_v27 = vld [vmem:[#allocation2 + $0x1218] sm:$0xff] }
0x1bc7   :  { %4172 = vmatpush1.msra.mxu1 %v4100_v24  ;;  %v4318_v24 = vld [vmem:[#allocation2 + $0x1210] sm:$0xff] }
0x1bc8   :  { %4173 = vmatprep.subr.mxu1 %v4099_v25  ;;  %v4317_v25 = vld [vmem:[#allocation2 + $0x1208] sm:$0xff] }
0x1bc9   :  { %4174 = vmatpush1.msra.mxu1 %v4098_v29  ;;  %v4316_v29 = vld [vmem:[#allocation2 + $0x1200] sm:$0xff] }
0x1bca   :  { %8096 = vmatprep.subr.mxu1 %v8621_v0 }
0x1c6a   :  { %v3991_v14 = vpop.f32.mrf.mxu1 }
0x1c6b   :  { %v3992_v34 = vadd.f32 %v3991_v14, %v3918_v33  ;;  %v4328_v14 = vld [vmem:[#allocation2 + $0x1260] sm:$0xff]  ;;  %v4136_v33 = vrot.slane %v9348_v54, %v8751_v22 }
0x1c6c   :  { %v3993_v61 = vpop.f32.mrf.mxu1  ;;  %v9380_v54 = vld [vmem:[%s9796_s3 + $0x24] sm:$0x3] }
0x1c6d   :  { %v3994_v15 = vadd.f32 %v3993_v61, %v3922_v4  ;;  %v7224_v36 = vmul.f32 -1.442695, %v3992_v34  ;;  %v4329_v4 = vld [vmem:[#allocation2 + $0x1268] sm:$0xff]  ;;  %v4327_v61 = vld [vmem:[#allocation2 + $0x1258] sm:$0xff] }
0x1c6f   :  { %v3996_v16 = vmax.f32 %v3994_v15, 0.0  ;;  %8468 = vpow2.f32 %v7224_v36  ;;  %v4326_v15 = vld [vmem:[#allocation2 + $0x1250] sm:$0xff] }
0x1c71   :  { %8075 = vmatmul.mubr.msk.f32.vlgmr.msra.gmra.mxu0 %vm230_vm1, %v3996_v16  ;;  %v4325_v16 = vld [vmem:[#allocation2 + $0x1248] sm:$0xff] }
0x1c72   :  { %8093 = vmatprep.mubr.msk.f32.mxu0 %vm8622_vm0, %v8621_v0  ;;  %8078 = vmatpush3.msra.mxu0 %v4223_v20  ;;  %v4441_v20 = vld [vmem:[#allocation4 + $0x4b8] sm:$0xff] }
0x1c73   :  { %8079 = vmatprep.subr.mxu0 %v8621_v0 }
0x1c74   :  { %8080 = vmatpush3.msra.mxu0 %v4222_v30  ;;  %v4440_v30 = vld [vmem:[#allocation4 + $0x4b0] sm:$0xff] }
0x1c75   :  { %8081 = vmatprep.subr.mxu0 %v8621_v0 }
0x1c76   :  { %8082 = vmatpush3.msra.mxu0 %v4221_v31  ;;  %v4439_v31 = vld [vmem:[#allocation4 + $0x4a8] sm:$0xff] }
0x1c77   :  { %8083 = vmatprep.subr.mxu0 %v8621_v0 }
0x1c78   :  { %8084 = vmatpush3.msra.mxu0 %v4220_v32  ;;  %v4438_v32 = vld [vmem:[#allocation4 + $0x4a0] sm:$0xff] }
0x1c79   :  { %8085 = vmatprep.subr.mxu0 %v8621_v0 }
0x1c7a   :  { %8086 = vmatpush3.msra.mxu0 %v4219_v50 }
0x1c7b   :  { %8087 = vmatprep.subr.mxu0 %v8621_v0 }
0x1c7c   :  { %v8469_v26 = vpop.eup %8468  ;;  %8088 = vmatpush3.msra.mxu0 %v4218_v51  ;;  %v4437_v51 = vld [vmem:[#allocation4 + $0x498] sm:$0xff] }
0x1c7d   :  { %v4091_v38 = vadd.f32 1.0, %v8469_v26  ;;  %8089 = vmatprep.subr.mxu0 %v8621_v0 }
0x1c7e   :  { %8090 = vmatpush3.msra.mxu0 %v4217_v52  ;;  %v4436_v52 = vld [vmem:[#allocation4 + $0x490] sm:$0xff] }
0x1c7f   :  { %8470 = vrcp.f32 %v4091_v38  ;;  %8091 = vmatprep.subr.mxu0 %v8621_v0 }
0x1c8c   :  { %v8471_v40 = vpop.eup %8470 }
0x1c8d   :  { %v4094_v39 = vmul.f32 %v8471_v40, %v9311_v46  ;;  %v4216_v46 = vld [vmem:[#allocation4 + $0x440] sm:$0xff] }
0x1c8e   :  { %8092 = vmatpush3.msra.mxu0 %v4216_v46  ;;  %v4435_v46 = vld [vmem:[#allocation4 + $0x488] sm:$0xff] }
0x1c8f   :  { %4361 = vmatprep.subr.mxu0 %v4347_v53  ;;  %v4565_v53 = vld [vmem:[#allocation2 + $0x13f8] sm:$0xff] }
0x1d31   :  { %v4083_v41 = vpop.f32.mrf.mxu0 }
0x1d32   :  { %v4084_v42 = vadd.f32 %v7222_v23, %v4083_v41  ;;  %v7227_v23 = vld [vmem:[%s9798_s5 + $0x11] ss:$0 sm:$0xff] }
0x1d33   :  { %v8076_v44 = vpop.f32.mrf.mxu0 }
0x1d34   :  { %v4087_v45 = vmax.f32 %v4084_v42, 0.0 }
0x1d36   :  { %v4095_v48 = vadd.f32 %v4094_v39, %v4087_v45 }
0x1d38   :  { %v9337_v49 = vadd.f32 %v9308_v37, %v4095_v48 }
0x1d3a   :  { %4208 = vmatmul.mubr.f32.vlgmr.msra.gmra.mxu1 %v9337_v49 }
0x1d3b   :  { %8112 = vmatprep.mubr.msk.f32.mxu1 %vm8622_vm0, %v8621_v0  ;;  %8097 = vmatpush3.msra.mxu1 %v4441_v20  ;;  %v4659_v20 = vld [vmem:[#allocation4 + $0x4f8] sm:$0xff] }
0x1d3c   :  { %8098 = vmatprep.subr.mxu1 %v8621_v0 }
0x1d3d   :  { %8099 = vmatpush3.msra.mxu1 %v4440_v30  ;;  %v4658_v30 = vld [vmem:[#allocation4 + $0x4f0] sm:$0xff] }
0x1d3e   :  { %8100 = vmatprep.subr.mxu1 %v8621_v0 }
0x1d3f   :  { %8101 = vmatpush3.msra.mxu1 %v4439_v31  ;;  %v4657_v31 = vld [vmem:[#allocation4 + $0x4e8] sm:$0xff] }
0x1d40   :  { %8102 = vmatprep.subr.mxu1 %v8621_v0 }
0x1d41   :  { %8103 = vmatpush3.msra.mxu1 %v4438_v32  ;;  %v4656_v32 = vld [vmem:[#allocation4 + $0x4e0] sm:$0xff] }
0x1d42   :  { %8104 = vmatprep.subr.mxu1 %v8621_v0 }
0x1d43   :  { %8105 = vmatpush3.msra.mxu1 %v4437_v51 }
0x1d44   :  { %8106 = vmatprep.subr.mxu1 %v8621_v0 }
0x1d45   :  { %8107 = vmatpush3.msra.mxu1 %v4436_v52  ;;  %v4655_v52 = vld [vmem:[#allocation4 + $0x4d8] sm:$0xff] }
0x1d46   :  { %8108 = vmatprep.subr.mxu1 %v8621_v0 }
0x1d47   :  { %8109 = vmatpush3.msra.mxu1 %v4435_v46  ;;  %v4654_v46 = vld [vmem:[#allocation4 + $0x4d0] sm:$0xff] }
0x1d48   :  { %8110 = vmatprep.subr.mxu1 %v8621_v0 }
0x1dfa   :  { %v9352_v55 = vpop.f32.mrf.mxu1 }
0x1dfb   :  { %v4210_v34 = vadd.f32 %v9352_v55, %v4136_v33  ;;  %v4354_v33 = vrot.slane %v9380_v54, %v8751_v22 }
0x1dfc   :  { %v4211_v35 = vpop.f32.mrf.mxu1 }
0x1dfd   :  { %v4212_v56 = vadd.f32 %v4211_v35, %v4140_v43  ;;  %v7229_v36 = vmul.f32 -1.442695, %v4210_v34  ;;  %v4358_v43 = vrot.slane %v9380_v54, %v8736_v47  ;;  %v9412_v54 = vld [vmem:[%s9796_s3 + $0x26] sm:$0x3] }
0x1dff   :  { %v4214_v57 = vmax.f32 %v4212_v56, 0.0  ;;  %8472 = vpow2.f32 %v7229_v36 }
0x1e01   :  { %8094 = vmatmul.mubr.msk.f32.vlgmr.msra.gmra.mxu0 %vm230_vm1, %v4214_v57 }
0x1e02   :  { %4362 = vmatpush1.msra.mxu0 %v4346_v58  ;;  %4425 = vmatprep.mubr.f32.mxu0 %v8621_v0  ;;  %v4564_v58 = vld [vmem:[#allocation2 + $0x13f0] sm:$0xff] }
0x1e03   :  { %4363 = vmatprep.subr.mxu0 %v4345_v59  ;;  %v4563_v59 = vld [vmem:[#allocation2 + $0x13e8] sm:$0xff] }
0x1e04   :  { %4364 = vmatpush1.msra.mxu0 %v4344_v60  ;;  %v4562_v60 = vld [vmem:[#allocation2 + $0x13e0] sm:$0xff] }
0x1e05   :  { %4365 = vmatprep.subr.mxu0 %v4343_v62  ;;  %v4561_v62 = vld [vmem:[#allocation2 + $0x13d8] sm:$0xff] }
0x1e06   :  { %4366 = vmatpush1.msra.mxu0 %v4342_v63  ;;  %v4560_v63 = vld [vmem:[#allocation2 + $0x13d0] sm:$0xff] }
0x1e07   :  { %4367 = vmatprep.subr.mxu0 %v4341_v5  ;;  %v4559_v5 = vld [vmem:[#allocation2 + $0x13c8] sm:$0xff] }
0x1e08   :  { %4368 = vmatpush1.msra.mxu0 %v4340_v1  ;;  %v4558_v1 = vld [vmem:[#allocation2 + $0x13c0] sm:$0xff] }
0x1e09   :  { %4369 = vmatprep.subr.mxu0 %v4339_v2  ;;  %v4557_v2 = vld [vmem:[#allocation2 + $0x13b8] sm:$0xff] }
0x1e0a   :  { %4370 = vmatpush1.msra.mxu0 %v4338_v3  ;;  %v4556_v3 = vld [vmem:[#allocation2 + $0x13b0] sm:$0xff] }
0x1e0b   :  { %4371 = vmatprep.subr.mxu0 %v4337_v7  ;;  %v4555_v7 = vld [vmem:[#allocation2 + $0x13a8] sm:$0xff] }
0x1e0c   :  { %4372 = vmatpush1.msra.mxu0 %v4336_v6  ;;  %v8473_v26 = vpop.eup %8472  ;;  %v4554_v6 = vld [vmem:[#allocation2 + $0x13a0] sm:$0xff] }
0x1e0d   :  { %4373 = vmatprep.subr.mxu0 %v4335_v8  ;;  %v4309_v38 = vadd.f32 1.0, %v8473_v26  ;;  %v4553_v8 = vld [vmem:[#allocation2 + $0x1398] sm:$0xff] }
0x1e0e   :  { %4374 = vmatpush1.msra.mxu0 %v4334_v9  ;;  %v4552_v9 = vld [vmem:[#allocation2 + $0x1390] sm:$0xff] }
0x1e0f   :  { %4375 = vmatprep.subr.mxu0 %v4333_v10  ;;  %8474 = vrcp.f32 %v4309_v38  ;;  %v4551_v10 = vld [vmem:[#allocation2 + $0x1388] sm:$0xff] }
0x1e10   :  { %4376 = vmatpush1.msra.mxu0 %v4332_v11  ;;  %v4550_v11 = vld [vmem:[#allocation2 + $0x1380] sm:$0xff] }
0x1e11   :  { %4377 = vmatprep.subr.mxu0 %v4331_v12  ;;  %v4549_v12 = vld [vmem:[#allocation2 + $0x1378] sm:$0xff] }
0x1e12   :  { %4378 = vmatpush1.msra.mxu0 %v4330_v13  ;;  %v4548_v13 = vld [vmem:[#allocation2 + $0x1370] sm:$0xff] }
0x1e13   :  { %4379 = vmatprep.subr.mxu0 %v4329_v4  ;;  %v4547_v4 = vld [vmem:[#allocation2 + $0x1368] sm:$0xff] }
0x1e14   :  { %4380 = vmatpush1.msra.mxu0 %v4328_v14  ;;  %v4546_v14 = vld [vmem:[#allocation2 + $0x1360] sm:$0xff] }
0x1e15   :  { %4381 = vmatprep.subr.mxu0 %v4327_v61  ;;  %v4545_v61 = vld [vmem:[#allocation2 + $0x1358] sm:$0xff] }
0x1e16   :  { %4382 = vmatpush1.msra.mxu0 %v4326_v15  ;;  %v4544_v15 = vld [vmem:[#allocation2 + $0x1350] sm:$0xff] }
0x1e17   :  { %4383 = vmatprep.subr.mxu0 %v4325_v16  ;;  %v4543_v16 = vld [vmem:[#allocation2 + $0x1348] sm:$0xff] }
0x1e18   :  { %4384 = vmatpush1.msra.mxu0 %v4324_v17  ;;  %v4542_v17 = vld [vmem:[#allocation2 + $0x1340] sm:$0xff] }
0x1e19   :  { %4385 = vmatprep.subr.mxu0 %v4323_v18  ;;  %v4541_v18 = vld [vmem:[#allocation2 + $0x1338] sm:$0xff] }
0x1e1a   :  { %4386 = vmatpush1.msra.mxu0 %v4322_v19  ;;  %v4540_v19 = vld [vmem:[#allocation2 + $0x1330] sm:$0xff] }
0x1e1b   :  { %4387 = vmatprep.subr.mxu0 %v4321_v21  ;;  %v4539_v21 = vld [vmem:[#allocation2 + $0x1328] sm:$0xff] }
0x1e1c   :  { %4388 = vmatpush1.msra.mxu0 %v4320_v28  ;;  %v8475_v40 = vpop.eup %8474  ;;  %v4538_v28 = vld [vmem:[#allocation2 + $0x1320] sm:$0xff] }
0x1e1d   :  { %4389 = vmatprep.subr.mxu0 %v4319_v27  ;;  %v4312_v39 = vmul.f32 %v8475_v40, %v9337_v49  ;;  %v4434_v49 = vld [vmem:[#allocation4 + $0x480] sm:$0xff]  ;;  %v4537_v27 = vld [vmem:[#allocation2 + $0x1318] sm:$0xff] }
0x1e1e   :  { %4390 = vmatpush1.msra.mxu0 %v4318_v24  ;;  %8111 = vmatpush3.msra.mxu1 %v4434_v49  ;;  %v4536_v24 = vld [vmem:[#allocation2 + $0x1310] sm:$0xff]  ;;  %v4653_v49 = vld [vmem:[#allocation4 + $0x4c8] sm:$0xff] }
0x1e1f   :  { %4391 = vmatprep.subr.mxu0 %v4317_v25  ;;  %4579 = vmatprep.subr.mxu1 %v4565_v53  ;;  %v4535_v25 = vld [vmem:[#allocation2 + $0x1308] sm:$0xff]  ;;  %v4783_v53 = vld [vmem:[#allocation2 + $0x14f8] sm:$0xff] }
0x1e20   :  { %4392 = vmatpush1.msra.mxu0 %v4316_v29  ;;  %v4534_v29 = vld [vmem:[#allocation2 + $0x1300] sm:$0xff] }
0x1e21   :  { %8115 = vmatprep.subr.mxu0 %v8621_v0 }
0x1ec1   :  { %v4301_v41 = vpop.f32.mrf.mxu0 }
0x1ec2   :  { %v4302_v42 = vadd.f32 %v7227_v23, %v4301_v41  ;;  %v7232_v23 = vld [vmem:[%s9798_s5 + $0x12] ss:$0 sm:$0xff] }
0x1ec3   :  { %v8095_v44 = vpop.f32.mrf.mxu0 }
0x1ec4   :  { %v4305_v45 = vmax.f32 %v4302_v42, 0.0 }
0x1ec6   :  { %v4313_v48 = vadd.f32 %v4312_v39, %v4305_v45 }
0x1ec8   :  { %v9369_v50 = vadd.f32 %v9308_v37, %v4313_v48 }
0x1eca   :  { %4426 = vmatmul.mubr.f32.vlgmr.msra.gmra.mxu0 %v9369_v50 }
0x1ecb   :  { %8131 = vmatprep.mubr.msk.f32.mxu0 %vm8622_vm0, %v8621_v0  ;;  %8116 = vmatpush3.msra.mxu0 %v4659_v20  ;;  %v4877_v20 = vld [vmem:[#allocation4 + $0x538] sm:$0xff] }
0x1ecc   :  { %8117 = vmatprep.subr.mxu0 %v8621_v0 }
0x1ecd   :  { %8118 = vmatpush3.msra.mxu0 %v4658_v30  ;;  %v4876_v30 = vld [vmem:[#allocation4 + $0x530] sm:$0xff] }
0x1ece   :  { %8119 = vmatprep.subr.mxu0 %v8621_v0 }
0x1ecf   :  { %8120 = vmatpush3.msra.mxu0 %v4657_v31  ;;  %v4875_v31 = vld [vmem:[#allocation4 + $0x528] sm:$0xff] }
0x1ed0   :  { %8121 = vmatprep.subr.mxu0 %v8621_v0 }
0x1ed1   :  { %8122 = vmatpush3.msra.mxu0 %v4656_v32  ;;  %v4874_v32 = vld [vmem:[#allocation4 + $0x520] sm:$0xff] }
0x1ed2   :  { %8123 = vmatprep.subr.mxu0 %v8621_v0 }
0x1ed3   :  { %8124 = vmatpush3.msra.mxu0 %v4655_v52 }
0x1ed4   :  { %8125 = vmatprep.subr.mxu0 %v8621_v0 }
0x1ed5   :  { %8126 = vmatpush3.msra.mxu0 %v4654_v46  ;;  %v4873_v46 = vld [vmem:[#allocation4 + $0x518] sm:$0xff] }
0x1ed6   :  { %8127 = vmatprep.subr.mxu0 %v8621_v0 }
0x1ed7   :  { %8128 = vmatpush3.msra.mxu0 %v4653_v49  ;;  %v4872_v49 = vld [vmem:[#allocation4 + $0x510] sm:$0xff] }
0x1ed8   :  { %8129 = vmatprep.subr.mxu0 %v8621_v0 }
0x1f8a   :  { %v9384_v55 = vpop.f32.mrf.mxu0 }
0x1f8b   :  { %v4428_v34 = vadd.f32 %v9384_v55, %v4354_v33  ;;  %v4572_v33 = vrot.slane %v9412_v54, %v8751_v22 }
0x1f8c   :  { %v4429_v35 = vpop.f32.mrf.mxu0 }
0x1f8d   :  { %v4430_v56 = vadd.f32 %v4429_v35, %v4358_v43  ;;  %v7234_v36 = vmul.f32 -1.442695, %v4428_v34  ;;  %v4576_v43 = vrot.slane %v9412_v54, %v8736_v47 }
0x1f8f   :  { %v4432_v57 = vmax.f32 %v4430_v56, 0.0  ;;  %8476 = vpow2.f32 %v7234_v36 }
0x1f91   :  { %8113 = vmatmul.mubr.msk.f32.vlgmr.msra.gmra.mxu1 %vm230_vm1, %v4432_v57 }
0x1f92   :  { %4580 = vmatpush1.msra.mxu1 %v4564_v58  ;;  %4643 = vmatprep.mubr.f32.mxu1 %v8621_v0  ;;  %v4782_v58 = vld [vmem:[#allocation2 + $0x14f0] sm:$0xff] }
0x1f93   :  { %4581 = vmatprep.subr.mxu1 %v4563_v59  ;;  %v4781_v59 = vld [vmem:[#allocation2 + $0x14e8] sm:$0xff] }
0x1f94   :  { %4582 = vmatpush1.msra.mxu1 %v4562_v60  ;;  %v4780_v60 = vld [vmem:[#allocation2 + $0x14e0] sm:$0xff] }
0x1f95   :  { %4583 = vmatprep.subr.mxu1 %v4561_v62  ;;  %v4779_v62 = vld [vmem:[#allocation2 + $0x14d8] sm:$0xff] }
0x1f96   :  { %4584 = vmatpush1.msra.mxu1 %v4560_v63  ;;  %v4778_v63 = vld [vmem:[#allocation2 + $0x14d0] sm:$0xff] }
0x1f97   :  { %4585 = vmatprep.subr.mxu1 %v4559_v5  ;;  %v4777_v5 = vld [vmem:[#allocation2 + $0x14c8] sm:$0xff] }
0x1f98   :  { %4586 = vmatpush1.msra.mxu1 %v4558_v1  ;;  %v4776_v1 = vld [vmem:[#allocation2 + $0x14c0] sm:$0xff] }
0x1f99   :  { %4587 = vmatprep.subr.mxu1 %v4557_v2  ;;  %v4775_v2 = vld [vmem:[#allocation2 + $0x14b8] sm:$0xff] }
0x1f9a   :  { %4588 = vmatpush1.msra.mxu1 %v4556_v3  ;;  %v4774_v3 = vld [vmem:[#allocation2 + $0x14b0] sm:$0xff] }
0x1f9b   :  { %4589 = vmatprep.subr.mxu1 %v4555_v7  ;;  %v4773_v7 = vld [vmem:[#allocation2 + $0x14a8] sm:$0xff] }
0x1f9c   :  { %4590 = vmatpush1.msra.mxu1 %v4554_v6  ;;  %v8477_v26 = vpop.eup %8476  ;;  %v4772_v6 = vld [vmem:[#allocation2 + $0x14a0] sm:$0xff] }
0x1f9d   :  { %4591 = vmatprep.subr.mxu1 %v4553_v8  ;;  %v4527_v38 = vadd.f32 1.0, %v8477_v26  ;;  %v4771_v8 = vld [vmem:[#allocation2 + $0x1498] sm:$0xff] }
0x1f9e   :  { %4592 = vmatpush1.msra.mxu1 %v4552_v9  ;;  %v4770_v9 = vld [vmem:[#allocation2 + $0x1490] sm:$0xff] }
0x1f9f   :  { %4593 = vmatprep.subr.mxu1 %v4551_v10  ;;  %8478 = vrcp.f32 %v4527_v38  ;;  %v4769_v10 = vld [vmem:[#allocation2 + $0x1488] sm:$0xff] }
0x1fa0   :  { %4594 = vmatpush1.msra.mxu1 %v4550_v11  ;;  %v4768_v11 = vld [vmem:[#allocation2 + $0x1480] sm:$0xff] }
0x1fa1   :  { %4595 = vmatprep.subr.mxu1 %v4549_v12  ;;  %v4767_v12 = vld [vmem:[#allocation2 + $0x1478] sm:$0xff] }
0x1fa2   :  { %4596 = vmatpush1.msra.mxu1 %v4548_v13  ;;  %v4766_v13 = vld [vmem:[#allocation2 + $0x1470] sm:$0xff] }
0x1fa3   :  { %4597 = vmatprep.subr.mxu1 %v4547_v4  ;;  %v4765_v4 = vld [vmem:[#allocation2 + $0x1468] sm:$0xff] }
0x1fa4   :  { %4598 = vmatpush1.msra.mxu1 %v4546_v14  ;;  %v4764_v14 = vld [vmem:[#allocation2 + $0x1460] sm:$0xff] }
0x1fa5   :  { %4599 = vmatprep.subr.mxu1 %v4545_v61  ;;  %v4763_v61 = vld [vmem:[#allocation2 + $0x1458] sm:$0xff] }
0x1fa6   :  { %4600 = vmatpush1.msra.mxu1 %v4544_v15  ;;  %v4762_v15 = vld [vmem:[#allocation2 + $0x1450] sm:$0xff] }
0x1fa7   :  { %4601 = vmatprep.subr.mxu1 %v4543_v16  ;;  %v4761_v16 = vld [vmem:[#allocation2 + $0x1448] sm:$0xff] }
0x1fa8   :  { %4602 = vmatpush1.msra.mxu1 %v4542_v17  ;;  %v4760_v17 = vld [vmem:[#allocation2 + $0x1440] sm:$0xff] }
0x1fa9   :  { %4603 = vmatprep.subr.mxu1 %v4541_v18  ;;  %v4759_v18 = vld [vmem:[#allocation2 + $0x1438] sm:$0xff] }
0x1faa   :  { %4604 = vmatpush1.msra.mxu1 %v4540_v19  ;;  %v4758_v19 = vld [vmem:[#allocation2 + $0x1430] sm:$0xff] }
0x1fab   :  { %4605 = vmatprep.subr.mxu1 %v4539_v21  ;;  %v4757_v21 = vld [vmem:[#allocation2 + $0x1428] sm:$0xff] }
0x1fac   :  { %4606 = vmatpush1.msra.mxu1 %v4538_v28  ;;  %v8479_v40 = vpop.eup %8478  ;;  %v4756_v28 = vld [vmem:[#allocation2 + $0x1420] sm:$0xff] }
0x1fad   :  { %4607 = vmatprep.subr.mxu1 %v4537_v27  ;;  %v4530_v39 = vmul.f32 %v8479_v40, %v9369_v50  ;;  %v4652_v50 = vld [vmem:[#allocation4 + $0x4c0] sm:$0xff]  ;;  %v4755_v27 = vld [vmem:[#allocation2 + $0x1418] sm:$0xff] }
0x1fae   :  { %4608 = vmatpush1.msra.mxu1 %v4536_v24  ;;  %8130 = vmatpush3.msra.mxu0 %v4652_v50  ;;  %v4754_v24 = vld [vmem:[#allocation2 + $0x1410] sm:$0xff]  ;;  %v4871_v50 = vld [vmem:[#allocation4 + $0x508] sm:$0xff] }
0x1faf   :  { %4609 = vmatprep.subr.mxu1 %v4535_v25  ;;  %4797 = vmatprep.subr.mxu0 %v4783_v53  ;;  %v4753_v25 = vld [vmem:[#allocation2 + $0x1408] sm:$0xff] }
0x1fb0   :  { %4610 = vmatpush1.msra.mxu1 %v4534_v29  ;;  %v4752_v29 = vld [vmem:[#allocation2 + $0x1400] sm:$0xff]  ;;  %v9444_v53 = vld [vmem:[%s9796_s3 + $0x28] sm:$0x3] }
0x1fb1   :  { %8134 = vmatprep.subr.mxu1 %v8621_v0  ;;  %v4794_v54 = vrot.slane %v9444_v53, %v8736_v47 }
0x2051   :  { %v4519_v41 = vpop.f32.mrf.mxu1 }
0x2052   :  { %v4520_v42 = vadd.f32 %v7232_v23, %v4519_v41  ;;  %v7237_v23 = vld [vmem:[%s9798_s5 + $0x13] ss:$0 sm:$0xff] }
0x2053   :  { %v8114_v44 = vpop.f32.mrf.mxu1 }
0x2054   :  { %v4523_v45 = vmax.f32 %v4520_v42, 0.0 }
0x2056   :  { %v4531_v48 = vadd.f32 %v4530_v39, %v4523_v45 }
0x2058   :  { %v9401_v51 = vadd.f32 %v9308_v37, %v4531_v48 }
0x205a   :  { %4644 = vmatmul.mubr.f32.vlgmr.msra.gmra.mxu1 %v9401_v51 }
0x205b   :  { %8150 = vmatprep.mubr.msk.f32.mxu1 %vm8622_vm0, %v8621_v0  ;;  %8135 = vmatpush3.msra.mxu1 %v4877_v20  ;;  %v5094_v20 = vld [vmem:[#allocation4 + $0x570] sm:$0xff] }
0x205c   :  { %8136 = vmatprep.subr.mxu1 %v8621_v0 }
0x205d   :  { %8137 = vmatpush3.msra.mxu1 %v4876_v30  ;;  %v5093_v30 = vld [vmem:[#allocation4 + $0x568] sm:$0xff] }
0x205e   :  { %8138 = vmatprep.subr.mxu1 %v8621_v0 }
0x205f   :  { %8139 = vmatpush3.msra.mxu1 %v4875_v31  ;;  %v5092_v31 = vld [vmem:[#allocation4 + $0x560] sm:$0xff] }
0x2060   :  { %8140 = vmatprep.subr.mxu1 %v8621_v0 }
0x2061   :  { %8141 = vmatpush3.msra.mxu1 %v4874_v32  ;;  %v4790_v32 = vrot.slane %v9444_v53, %v8751_v22  ;;  %v9481_v53 = vld [vmem:[%s9796_s3 + $0x2a] sm:$0x3] }
0x2062   :  { %8142 = vmatprep.subr.mxu1 %v8621_v0 }
0x2063   :  { %8143 = vmatpush3.msra.mxu1 %v4873_v46 }
0x2064   :  { %8144 = vmatprep.subr.mxu1 %v8621_v0 }
0x2065   :  { %8145 = vmatpush3.msra.mxu1 %v4872_v49  ;;  %v5091_v49 = vld [vmem:[#allocation4 + $0x558] sm:$0xff] }
0x2066   :  { %8146 = vmatprep.subr.mxu1 %v8621_v0 }
0x2067   :  { %8147 = vmatpush3.msra.mxu1 %v4871_v50  ;;  %v5090_v50 = vld [vmem:[#allocation4 + $0x550] sm:$0xff] }
0x2068   :  { %8148 = vmatprep.subr.mxu1 %v8621_v0 }
0x211a   :  { %v9416_v55 = vpop.f32.mrf.mxu1 }
0x211b   :  { %v4646_v34 = vadd.f32 %v9416_v55, %v4572_v33 }
0x211c   :  { %v4647_v35 = vpop.f32.mrf.mxu1 }
0x211d   :  { %v4648_v56 = vadd.f32 %v4647_v35, %v4576_v43  ;;  %v7239_v36 = vmul.f32 -1.442695, %v4646_v34 }
0x211f   :  { %v4650_v57 = vmax.f32 %v4648_v56, 0.0  ;;  %8480 = vpow2.f32 %v7239_v36 }
0x2121   :  { %8132 = vmatmul.mubr.msk.f32.vlgmr.msra.gmra.mxu0 %vm230_vm1, %v4650_v57  ;;  %v5000_v57 = vld [vmem:[#allocation2 + $0x15f0] sm:$0xff] }
0x2122   :  { %4798 = vmatpush1.msra.mxu0 %v4782_v58  ;;  %4861 = vmatprep.mubr.f32.mxu0 %v8621_v0  ;;  %v4999_v58 = vld [vmem:[#allocation2 + $0x15e8] sm:$0xff] }
0x2123   :  { %4799 = vmatprep.subr.mxu0 %v4781_v59  ;;  %v4998_v59 = vld [vmem:[#allocation2 + $0x15e0] sm:$0xff] }
0x2124   :  { %4800 = vmatpush1.msra.mxu0 %v4780_v60  ;;  %v4997_v60 = vld [vmem:[#allocation2 + $0x15d8] sm:$0xff] }
0x2125   :  { %4801 = vmatprep.subr.mxu0 %v4779_v62  ;;  %v4996_v62 = vld [vmem:[#allocation2 + $0x15d0] sm:$0xff] }
0x2126   :  { %4802 = vmatpush1.msra.mxu0 %v4778_v63  ;;  %v4995_v63 = vld [vmem:[#allocation2 + $0x15c8] sm:$0xff] }
0x2127   :  { %4803 = vmatprep.subr.mxu0 %v4777_v5  ;;  %v4994_v5 = vld [vmem:[#allocation2 + $0x15c0] sm:$0xff] }
0x2128   :  { %4804 = vmatpush1.msra.mxu0 %v4776_v1  ;;  %v4993_v1 = vld [vmem:[#allocation2 + $0x15b8] sm:$0xff] }
0x2129   :  { %4805 = vmatprep.subr.mxu0 %v4775_v2  ;;  %v4992_v2 = vld [vmem:[#allocation2 + $0x15b0] sm:$0xff] }
0x212a   :  { %4806 = vmatpush1.msra.mxu0 %v4774_v3  ;;  %v4991_v3 = vld [vmem:[#allocation2 + $0x15a8] sm:$0xff] }
0x212b   :  { %4807 = vmatprep.subr.mxu0 %v4773_v7  ;;  %v4990_v7 = vld [vmem:[#allocation2 + $0x15a0] sm:$0xff] }
0x212c   :  { %4808 = vmatpush1.msra.mxu0 %v4772_v6  ;;  %v8481_v26 = vpop.eup %8480  ;;  %v4989_v6 = vld [vmem:[#allocation2 + $0x1598] sm:$0xff] }
0x212d   :  { %4809 = vmatprep.subr.mxu0 %v4771_v8  ;;  %v4745_v38 = vadd.f32 1.0, %v8481_v26  ;;  %v4988_v8 = vld [vmem:[#allocation2 + $0x1590] sm:$0xff] }
0x212e   :  { %4810 = vmatpush1.msra.mxu0 %v4770_v9  ;;  %v4987_v9 = vld [vmem:[#allocation2 + $0x1588] sm:$0xff] }
0x212f   :  { %4811 = vmatprep.subr.mxu0 %v4769_v10  ;;  %8482 = vrcp.f32 %v4745_v38  ;;  %v4986_v10 = vld [vmem:[#allocation2 + $0x1580] sm:$0xff]  ;;  %v7242_v38 = vld [vmem:[%s9798_s5 + $0x14] ss:$0 sm:$0xff] }
0x2130   :  { %4812 = vmatpush1.msra.mxu0 %v4768_v11  ;;  %v4985_v11 = vld [vmem:[#allocation2 + $0x1578] sm:$0xff] }
0x2131   :  { %4813 = vmatprep.subr.mxu0 %v4767_v12  ;;  %v4984_v12 = vld [vmem:[#allocation2 + $0x1570] sm:$0xff] }
0x2132   :  { %4814 = vmatpush1.msra.mxu0 %v4766_v13  ;;  %v4983_v13 = vld [vmem:[#allocation2 + $0x1568] sm:$0xff] }
0x2133   :  { %4815 = vmatprep.subr.mxu0 %v4765_v4  ;;  %v4982_v4 = vld [vmem:[#allocation2 + $0x1560] sm:$0xff] }
0x2134   :  { %4816 = vmatpush1.msra.mxu0 %v4764_v14  ;;  %v4981_v14 = vld [vmem:[#allocation2 + $0x1558] sm:$0xff] }
0x2135   :  { %4817 = vmatprep.subr.mxu0 %v4763_v61  ;;  %v4980_v61 = vld [vmem:[#allocation2 + $0x1550] sm:$0xff] }
0x2136   :  { %4818 = vmatpush1.msra.mxu0 %v4762_v15  ;;  %v4979_v15 = vld [vmem:[#allocation2 + $0x1548] sm:$0xff] }
0x2137   :  { %4819 = vmatprep.subr.mxu0 %v4761_v16  ;;  %v4978_v16 = vld [vmem:[#allocation2 + $0x1540] sm:$0xff] }
0x2138   :  { %4820 = vmatpush1.msra.mxu0 %v4760_v17  ;;  %v4977_v17 = vld [vmem:[#allocation2 + $0x1538] sm:$0xff] }
0x2139   :  { %4821 = vmatprep.subr.mxu0 %v4759_v18  ;;  %v4976_v18 = vld [vmem:[#allocation2 + $0x1530] sm:$0xff] }
0x213a   :  { %4822 = vmatpush1.msra.mxu0 %v4758_v19  ;;  %v4975_v19 = vld [vmem:[#allocation2 + $0x1528] sm:$0xff] }
0x213b   :  { %4823 = vmatprep.subr.mxu0 %v4757_v21  ;;  %v4974_v21 = vld [vmem:[#allocation2 + $0x1520] sm:$0xff] }
0x213c   :  { %4824 = vmatpush1.msra.mxu0 %v4756_v28  ;;  %v8483_v40 = vpop.eup %8482  ;;  %v4973_v28 = vld [vmem:[#allocation2 + $0x1518] sm:$0xff] }
0x213d   :  { %4825 = vmatprep.subr.mxu0 %v4755_v27  ;;  %v4748_v39 = vmul.f32 %v8483_v40, %v9401_v51  ;;  %v4870_v51 = vld [vmem:[#allocation4 + $0x500] sm:$0xff]  ;;  %v4972_v27 = vld [vmem:[#allocation2 + $0x1510] sm:$0xff] }
0x213e   :  { %4826 = vmatpush1.msra.mxu0 %v4754_v24  ;;  %8149 = vmatpush3.msra.mxu1 %v4870_v51  ;;  %v4971_v24 = vld [vmem:[#allocation2 + $0x1508] sm:$0xff]  ;;  %v5088_v51 = vld [vmem:[#allocation4 + $0x540] sm:$0xff] }
0x213f   :  { %4827 = vmatprep.subr.mxu0 %v4753_v25  ;;  %v4970_v25 = vld [vmem:[#allocation2 + $0x1500] sm:$0xff] }
0x2140   :  { %4828 = vmatpush1.msra.mxu0 %v4752_v29  ;;  %v5095_v29 = vld [vmem:[#allocation4 + $0x578] sm:$0xff] }
0x2141   :  { %8153 = vmatprep.subr.mxu0 %v8621_v0 }
0x21e1   :  { %v4737_v41 = vpop.f32.mrf.mxu0 }
0x21e2   :  { %v4738_v42 = vadd.f32 %v7237_v23, %v4737_v41 }
0x21e3   :  { %v8133_v44 = vpop.f32.mrf.mxu0 }
0x21e4   :  { %v4741_v45 = vmax.f32 %v4738_v42, 0.0 }
0x21e6   :  { %v4749_v48 = vadd.f32 %v4748_v39, %v4741_v45 }
0x21e8   :  { %v9433_v52 = vadd.f32 %v9308_v37, %v4749_v48  ;;  %v5001_v37 = vld [vmem:[#allocation2 + $0x15f8] sm:$0xff]  ;;  %v9467_v48 = vld [vmem:[%s9794_s1 + $0x6] sm:$0x3] }
0x21e9   :  { %5015 = vmatprep.subr.mxu1 %v5001_v37  ;;  %v5219_v37 = vld [vmem:[#allocation2 + $0x16f8] sm:$0xff] }
0x21ea   :  { %4862 = vmatmul.mubr.f32.vlgmr.msra.gmra.mxu0 %v9433_v52 }
0x21eb   :  { %8169 = vmatprep.mubr.msk.f32.mxu0 %vm8622_vm0, %v8621_v0  ;;  %8154 = vmatpush3.msra.mxu0 %v5095_v29  ;;  %v5313_v29 = vld [vmem:[#allocation4 + $0x5b8] sm:$0xff] }
0x21ec   :  { %8155 = vmatprep.subr.mxu0 %v8621_v0 }
0x21ed   :  { %8156 = vmatpush3.msra.mxu0 %v5094_v20  ;;  %v5312_v20 = vld [vmem:[#allocation4 + $0x5b0] sm:$0xff] }
0x21ee   :  { %8157 = vmatprep.subr.mxu0 %v8621_v0 }
0x21ef   :  { %8158 = vmatpush3.msra.mxu0 %v5093_v30  ;;  %v5311_v30 = vld [vmem:[#allocation4 + $0x5a8] sm:$0xff] }
0x21f0   :  { %8159 = vmatprep.subr.mxu0 %v8621_v0 }
0x21f1   :  { %8160 = vmatpush3.msra.mxu0 %v5092_v31  ;;  %v5310_v31 = vld [vmem:[#allocation4 + $0x5a0] sm:$0xff] }
0x21f2   :  { %8161 = vmatprep.subr.mxu0 %v8621_v0 }
0x21f3   :  { %8162 = vmatpush3.msra.mxu0 %v5091_v49 }
0x21f4   :  { %8163 = vmatprep.subr.mxu0 %v8621_v0 }
0x21f5   :  { %8164 = vmatpush3.msra.mxu0 %v5090_v50  ;;  %v5309_v50 = vld [vmem:[#allocation4 + $0x598] sm:$0xff] }
0x21f6   :  { %8165 = vmatprep.subr.mxu0 %v8621_v0 }
0x22aa   :  { %v9448_v43 = vpop.f32.mrf.mxu0 }
0x22ab   :  { %v4864_v33 = vadd.f32 %v9448_v43, %v4790_v32  ;;  %v5008_v32 = vrot.slane %v9481_v53, %v8751_v22 }
0x22ac   :  { %v4865_v55 = vpop.f32.mrf.mxu0 }
0x22ad   :  { %v4866_v35 = vadd.f32 %v4865_v55, %v4794_v54  ;;  %v7244_v34 = vmul.f32 -1.442695, %v4864_v33  ;;  %v5012_v54 = vrot.slane %v9481_v53, %v8736_v47  ;;  %v9513_v53 = vld [vmem:[%s9796_s3 + $0x2c] sm:$0x3] }
0x22af   :  { %v4868_v56 = vmax.f32 %v4866_v35, 0.0  ;;  %8484 = vpow2.f32 %v7244_v34 }
0x22b1   :  { %8151 = vmatmul.mubr.msk.f32.vlgmr.msra.gmra.mxu1 %vm230_vm1, %v4868_v56 }
0x22b2   :  { %5016 = vmatpush1.msra.mxu1 %v5000_v57  ;;  %5079 = vmatprep.mubr.f32.mxu1 %v8621_v0  ;;  %v5218_v57 = vld [vmem:[#allocation2 + $0x16f0] sm:$0xff] }
0x22b3   :  { %5017 = vmatprep.subr.mxu1 %v4999_v58  ;;  %v5217_v58 = vld [vmem:[#allocation2 + $0x16e8] sm:$0xff] }
0x22b4   :  { %5018 = vmatpush1.msra.mxu1 %v4998_v59  ;;  %v5216_v59 = vld [vmem:[#allocation2 + $0x16e0] sm:$0xff] }
0x22b5   :  { %5019 = vmatprep.subr.mxu1 %v4997_v60  ;;  %v5215_v60 = vld [vmem:[#allocation2 + $0x16d8] sm:$0xff] }
0x22b6   :  { %5020 = vmatpush1.msra.mxu1 %v4996_v62  ;;  %v5214_v62 = vld [vmem:[#allocation2 + $0x16d0] sm:$0xff] }
0x22b7   :  { %5021 = vmatprep.subr.mxu1 %v4995_v63  ;;  %v5213_v63 = vld [vmem:[#allocation2 + $0x16c8] sm:$0xff] }
0x22b8   :  { %5022 = vmatpush1.msra.mxu1 %v4994_v5  ;;  %v5212_v5 = vld [vmem:[#allocation2 + $0x16c0] sm:$0xff] }
0x22b9   :  { %5023 = vmatprep.subr.mxu1 %v4993_v1  ;;  %v5211_v1 = vld [vmem:[#allocation2 + $0x16b8] sm:$0xff] }
0x22ba   :  { %5024 = vmatpush1.msra.mxu1 %v4992_v2  ;;  %v5210_v2 = vld [vmem:[#allocation2 + $0x16b0] sm:$0xff] }
0x22bb   :  { %5025 = vmatprep.subr.mxu1 %v4991_v3  ;;  %v5209_v3 = vld [vmem:[#allocation2 + $0x16a8] sm:$0xff] }
0x22bc   :  { %5026 = vmatpush1.msra.mxu1 %v4990_v7  ;;  %v8485_v36 = vpop.eup %8484  ;;  %v5208_v7 = vld [vmem:[#allocation2 + $0x16a0] sm:$0xff] }
0x22bd   :  { %5027 = vmatprep.subr.mxu1 %v4989_v6  ;;  %v4963_v26 = vadd.f32 1.0, %v8485_v36  ;;  %v5207_v6 = vld [vmem:[#allocation2 + $0x1698] sm:$0xff] }
0x22be   :  { %5028 = vmatpush1.msra.mxu1 %v4988_v8  ;;  %v5206_v8 = vld [vmem:[#allocation2 + $0x1690] sm:$0xff] }
0x22bf   :  { %5029 = vmatprep.subr.mxu1 %v4987_v9  ;;  %8486 = vrcp.f32 %v4963_v26  ;;  %v5205_v9 = vld [vmem:[#allocation2 + $0x1688] sm:$0xff] }
0x22c0   :  { %5030 = vmatpush1.msra.mxu1 %v4986_v10  ;;  %v5204_v10 = vld [vmem:[#allocation2 + $0x1680] sm:$0xff] }
0x22c1   :  { %5031 = vmatprep.subr.mxu1 %v4985_v11  ;;  %v5203_v11 = vld [vmem:[#allocation2 + $0x1678] sm:$0xff] }
0x22c2   :  { %5032 = vmatpush1.msra.mxu1 %v4984_v12  ;;  %v5202_v12 = vld [vmem:[#allocation2 + $0x1670] sm:$0xff] }
0x22c3   :  { %5033 = vmatprep.subr.mxu1 %v4983_v13  ;;  %v5201_v13 = vld [vmem:[#allocation2 + $0x1668] sm:$0xff] }
0x22c4   :  { %5034 = vmatpush1.msra.mxu1 %v4982_v4  ;;  %v5200_v4 = vld [vmem:[#allocation2 + $0x1660] sm:$0xff] }
0x22c5   :  { %5035 = vmatprep.subr.mxu1 %v4981_v14  ;;  %v5199_v14 = vld [vmem:[#allocation2 + $0x1658] sm:$0xff] }
0x22c6   :  { %5036 = vmatpush1.msra.mxu1 %v4980_v61  ;;  %v5198_v61 = vld [vmem:[#allocation2 + $0x1650] sm:$0xff] }
0x22c7   :  { %5037 = vmatprep.subr.mxu1 %v4979_v15  ;;  %v5197_v15 = vld [vmem:[#allocation2 + $0x1648] sm:$0xff] }
0x22c8   :  { %5038 = vmatpush1.msra.mxu1 %v4978_v16  ;;  %v5196_v16 = vld [vmem:[#allocation2 + $0x1640] sm:$0xff] }
0x22c9   :  { %5039 = vmatprep.subr.mxu1 %v4977_v17  ;;  %v5195_v17 = vld [vmem:[#allocation2 + $0x1638] sm:$0xff] }
0x22ca   :  { %5040 = vmatpush1.msra.mxu1 %v4976_v18  ;;  %v5194_v18 = vld [vmem:[#allocation2 + $0x1630] sm:$0xff] }
0x22cb   :  { %5041 = vmatprep.subr.mxu1 %v4975_v19  ;;  %v5193_v19 = vld [vmem:[#allocation2 + $0x1628] sm:$0xff] }
0x22cc   :  { %5042 = vmatpush1.msra.mxu1 %v4974_v21  ;;  %v8487_v23 = vpop.eup %8486  ;;  %v5192_v21 = vld [vmem:[#allocation2 + $0x1620] sm:$0xff] }
0x22cd   :  { %5043 = vmatprep.subr.mxu1 %v4973_v28  ;;  %v4966_v45 = vmul.f32 %v8487_v23, %v9433_v52  ;;  %v5089_v52 = vld [vmem:[#allocation4 + $0x548] sm:$0xff]  ;;  %v5191_v28 = vld [vmem:[#allocation2 + $0x1618] sm:$0xff] }
0x22ce   :  { %5044 = vmatpush1.msra.mxu1 %v4972_v27  ;;  %8166 = vmatpush3.msra.mxu0 %v5089_v52  ;;  %v5190_v27 = vld [vmem:[#allocation2 + $0x1610] sm:$0xff] }
0x22cf   :  { %5045 = vmatprep.subr.mxu1 %v4971_v24  ;;  %8167 = vmatprep.subr.mxu0 %v8621_v0  ;;  %v5189_v24 = vld [vmem:[#allocation2 + $0x1608] sm:$0xff]  ;;  %v5308_v52 = vld [vmem:[#allocation4 + $0x590] sm:$0xff] }
0x22d0   :  { %5046 = vmatpush1.msra.mxu1 %v4970_v25  ;;  %8168 = vmatpush3.msra.mxu0 %v5088_v51  ;;  %v5188_v25 = vld [vmem:[#allocation2 + $0x1600] sm:$0xff]  ;;  %v5307_v51 = vld [vmem:[#allocation4 + $0x588] sm:$0xff] }
0x22d1   :  { %8172 = vmatprep.subr.mxu1 %v8621_v0  ;;  %5233 = vmatprep.subr.mxu0 %v5219_v37  ;;  %v5437_v37 = vld [vmem:[#allocation2 + $0x17f8] sm:$0xff] }
0x2371   :  { %v4955_v40 = vpop.f32.mrf.mxu1 }
0x2372   :  { %v4956_v41 = vadd.f32 %v7242_v38, %v4955_v40  ;;  %v7247_v38 = vld [vmem:[%s9798_s5 + $0x15] ss:$0 sm:$0xff] }
0x2373   :  { %v8152_v42 = vpop.f32.mrf.mxu1 }
0x2374   :  { %v4959_v44 = vmax.f32 %v4956_v41, 0.0 }
0x2376   :  { %v4967_v39 = vadd.f32 %v4966_v45, %v4959_v44 }
0x2378   :  { %v9470_v46 = vadd.f32 %v9467_v48, %v4967_v39 }
0x237a   :  { %5080 = vmatmul.mubr.f32.vlgmr.msra.gmra.mxu1 %v9470_v46 }
0x237b   :  { %8188 = vmatprep.mubr.msk.f32.mxu1 %vm8622_vm0, %v8621_v0  ;;  %8173 = vmatpush3.msra.mxu1 %v5313_v29  ;;  %v5531_v29 = vld [vmem:[#allocation4 + $0x5f8] sm:$0xff] }
0x237c   :  { %8174 = vmatprep.subr.mxu1 %v8621_v0 }
0x237d   :  { %8175 = vmatpush3.msra.mxu1 %v5312_v20  ;;  %v5530_v20 = vld [vmem:[#allocation4 + $0x5f0] sm:$0xff] }
0x237e   :  { %8176 = vmatprep.subr.mxu1 %v8621_v0 }
0x237f   :  { %8177 = vmatpush3.msra.mxu1 %v5311_v30  ;;  %v5529_v30 = vld [vmem:[#allocation4 + $0x5e8] sm:$0xff] }
0x2380   :  { %8178 = vmatprep.subr.mxu1 %v8621_v0 }
0x2381   :  { %8179 = vmatpush3.msra.mxu1 %v5310_v31  ;;  %v5528_v31 = vld [vmem:[#allocation4 + $0x5e0] sm:$0xff] }
0x2382   :  { %8180 = vmatprep.subr.mxu1 %v8621_v0 }
0x2383   :  { %8181 = vmatpush3.msra.mxu1 %v5309_v50 }
0x2384   :  { %8182 = vmatprep.subr.mxu1 %v8621_v0 }
0x2385   :  { %8183 = vmatpush3.msra.mxu1 %v5308_v52  ;;  %v5527_v52 = vld [vmem:[#allocation4 + $0x5d8] sm:$0xff] }
0x2386   :  { %8184 = vmatprep.subr.mxu1 %v8621_v0 }
0x2387   :  { %8185 = vmatpush3.msra.mxu1 %v5307_v51  ;;  %v5526_v51 = vld [vmem:[#allocation4 + $0x5d0] sm:$0xff] }
0x2388   :  { %8186 = vmatprep.subr.mxu1 %v8621_v0 }
0x243a   :  { %v9485_v43 = vpop.f32.mrf.mxu1 }
0x243b   :  { %v5082_v33 = vadd.f32 %v9485_v43, %v5008_v32  ;;  %v5226_v32 = vrot.slane %v9513_v53, %v8751_v22 }
0x243c   :  { %v5083_v55 = vpop.f32.mrf.mxu1 }
0x243d   :  { %v5084_v35 = vadd.f32 %v5083_v55, %v5012_v54  ;;  %v7249_v34 = vmul.f32 -1.442695, %v5082_v33  ;;  %v5230_v54 = vrot.slane %v9513_v53, %v8736_v47 }
0x243f   :  { %v5086_v56 = vmax.f32 %v5084_v35, 0.0  ;;  %8488 = vpow2.f32 %v7249_v34 }
0x2441   :  { %8170 = vmatmul.mubr.msk.f32.vlgmr.msra.gmra.mxu0 %vm230_vm1, %v5086_v56 }
0x2442   :  { %5234 = vmatpush1.msra.mxu0 %v5218_v57  ;;  %5297 = vmatprep.mubr.f32.mxu0 %v8621_v0  ;;  %v5436_v57 = vld [vmem:[#allocation2 + $0x17f0] sm:$0xff] }
0x2443   :  { %5235 = vmatprep.subr.mxu0 %v5217_v58  ;;  %v5435_v58 = vld [vmem:[#allocation2 + $0x17e8] sm:$0xff] }
0x2444   :  { %5236 = vmatpush1.msra.mxu0 %v5216_v59  ;;  %v5434_v59 = vld [vmem:[#allocation2 + $0x17e0] sm:$0xff] }
0x2445   :  { %5237 = vmatprep.subr.mxu0 %v5215_v60  ;;  %v5433_v60 = vld [vmem:[#allocation2 + $0x17d8] sm:$0xff] }
0x2446   :  { %5238 = vmatpush1.msra.mxu0 %v5214_v62  ;;  %v5432_v62 = vld [vmem:[#allocation2 + $0x17d0] sm:$0xff] }
0x2447   :  { %5239 = vmatprep.subr.mxu0 %v5213_v63  ;;  %v5431_v63 = vld [vmem:[#allocation2 + $0x17c8] sm:$0xff] }
0x2448   :  { %5240 = vmatpush1.msra.mxu0 %v5212_v5  ;;  %v5430_v5 = vld [vmem:[#allocation2 + $0x17c0] sm:$0xff] }
0x2449   :  { %5241 = vmatprep.subr.mxu0 %v5211_v1  ;;  %v5429_v1 = vld [vmem:[#allocation2 + $0x17b8] sm:$0xff] }
0x244a   :  { %5242 = vmatpush1.msra.mxu0 %v5210_v2  ;;  %v5428_v2 = vld [vmem:[#allocation2 + $0x17b0] sm:$0xff] }
0x244b   :  { %5243 = vmatprep.subr.mxu0 %v5209_v3  ;;  %v5427_v3 = vld [vmem:[#allocation2 + $0x17a8] sm:$0xff] }
0x244c   :  { %5244 = vmatpush1.msra.mxu0 %v5208_v7  ;;  %v8489_v36 = vpop.eup %8488  ;;  %v5426_v7 = vld [vmem:[#allocation2 + $0x17a0] sm:$0xff] }
0x244d   :  { %5245 = vmatprep.subr.mxu0 %v5207_v6  ;;  %v5181_v26 = vadd.f32 1.0, %v8489_v36  ;;  %v5425_v6 = vld [vmem:[#allocation2 + $0x1798] sm:$0xff] }
0x244e   :  { %5246 = vmatpush1.msra.mxu0 %v5206_v8  ;;  %v5424_v8 = vld [vmem:[#allocation2 + $0x1790] sm:$0xff] }
0x244f   :  { %5247 = vmatprep.subr.mxu0 %v5205_v9  ;;  %8490 = vrcp.f32 %v5181_v26  ;;  %v5423_v9 = vld [vmem:[#allocation2 + $0x1788] sm:$0xff] }
0x2450   :  { %5248 = vmatpush1.msra.mxu0 %v5204_v10  ;;  %v5422_v10 = vld [vmem:[#allocation2 + $0x1780] sm:$0xff] }
0x2451   :  { %5249 = vmatprep.subr.mxu0 %v5203_v11  ;;  %v5421_v11 = vld [vmem:[#allocation2 + $0x1778] sm:$0xff] }
0x2452   :  { %5250 = vmatpush1.msra.mxu0 %v5202_v12  ;;  %v5420_v12 = vld [vmem:[#allocation2 + $0x1770] sm:$0xff] }
0x2453   :  { %5251 = vmatprep.subr.mxu0 %v5201_v13  ;;  %v5419_v13 = vld [vmem:[#allocation2 + $0x1768] sm:$0xff] }
0x2454   :  { %5252 = vmatpush1.msra.mxu0 %v5200_v4  ;;  %v5418_v4 = vld [vmem:[#allocation2 + $0x1760] sm:$0xff] }
0x2455   :  { %5253 = vmatprep.subr.mxu0 %v5199_v14  ;;  %v5417_v14 = vld [vmem:[#allocation2 + $0x1758] sm:$0xff] }
0x2456   :  { %5254 = vmatpush1.msra.mxu0 %v5198_v61  ;;  %v5416_v61 = vld [vmem:[#allocation2 + $0x1750] sm:$0xff] }
0x2457   :  { %5255 = vmatprep.subr.mxu0 %v5197_v15  ;;  %v5415_v15 = vld [vmem:[#allocation2 + $0x1748] sm:$0xff] }
0x2458   :  { %5256 = vmatpush1.msra.mxu0 %v5196_v16  ;;  %v5414_v16 = vld [vmem:[#allocation2 + $0x1740] sm:$0xff] }
0x2459   :  { %5257 = vmatprep.subr.mxu0 %v5195_v17  ;;  %v5413_v17 = vld [vmem:[#allocation2 + $0x1738] sm:$0xff] }
0x245a   :  { %5258 = vmatpush1.msra.mxu0 %v5194_v18  ;;  %v5412_v18 = vld [vmem:[#allocation2 + $0x1730] sm:$0xff] }
0x245b   :  { %5259 = vmatprep.subr.mxu0 %v5193_v19  ;;  %v5411_v19 = vld [vmem:[#allocation2 + $0x1728] sm:$0xff] }
0x245c   :  { %5260 = vmatpush1.msra.mxu0 %v5192_v21  ;;  %v8491_v23 = vpop.eup %8490  ;;  %v5410_v21 = vld [vmem:[#allocation2 + $0x1720] sm:$0xff] }
0x245d   :  { %5261 = vmatprep.subr.mxu0 %v5191_v28  ;;  %v5184_v45 = vmul.f32 %v8491_v23, %v9470_v46  ;;  %v5306_v46 = vld [vmem:[#allocation4 + $0x580] sm:$0xff]  ;;  %v5409_v28 = vld [vmem:[#allocation2 + $0x1718] sm:$0xff] }
0x245e   :  { %5262 = vmatpush1.msra.mxu0 %v5190_v27  ;;  %8187 = vmatpush3.msra.mxu1 %v5306_v46  ;;  %v5408_v27 = vld [vmem:[#allocation2 + $0x1710] sm:$0xff]  ;;  %v5525_v46 = vld [vmem:[#allocation4 + $0x5c8] sm:$0xff] }
0x245f   :  { %5263 = vmatprep.subr.mxu0 %v5189_v24  ;;  %5451 = vmatprep.subr.mxu1 %v5437_v37  ;;  %v5407_v24 = vld [vmem:[#allocation2 + $0x1708] sm:$0xff] }
0x2460   :  { %5264 = vmatpush1.msra.mxu0 %v5188_v25  ;;  %v5406_v25 = vld [vmem:[#allocation2 + $0x1700] sm:$0xff]  ;;  %v9544_v37 = vld [vmem:[%s9796_s3 + $0x2e] sm:$0x3] }
0x2461   :  { %8191 = vmatprep.subr.mxu0 %v8621_v0  ;;  %v5448_v53 = vrot.slane %v9544_v37, %v8736_v47 }
0x2501   :  { %v5173_v40 = vpop.f32.mrf.mxu0 }
0x2502   :  { %v5174_v41 = vadd.f32 %v7247_v38, %v5173_v40  ;;  %v7252_v38 = vld [vmem:[%s9798_s5 + $0x16] ss:$0 sm:$0xff] }
0x2503   :  { %v8171_v42 = vpop.f32.mrf.mxu0 }
0x2504   :  { %v5177_v44 = vmax.f32 %v5174_v41, 0.0 }
0x2506   :  { %v5185_v39 = vadd.f32 %v5184_v45, %v5177_v44 }
0x2508   :  { %v9502_v49 = vadd.f32 %v9467_v48, %v5185_v39 }
0x250a   :  { %5298 = vmatmul.mubr.f32.vlgmr.msra.gmra.mxu0 %v9502_v49 }
0x250b   :  { %8207 = vmatprep.mubr.msk.f32.mxu0 %vm8622_vm0, %v8621_v0  ;;  %8192 = vmatpush3.msra.mxu0 %v5531_v29  ;;  %v5738_v29 = vld [vmem:[#allocation2 + $0x1878] sm:$0xff] }
0x250c   :  { %8193 = vmatprep.subr.mxu0 %v8621_v0 }
0x250d   :  { %8194 = vmatpush3.msra.mxu0 %v5530_v20  ;;  %v5737_v20 = vld [vmem:[#allocation2 + $0x1870] sm:$0xff] }
0x250e   :  { %8195 = vmatprep.subr.mxu0 %v8621_v0 }
0x250f   :  { %8196 = vmatpush3.msra.mxu0 %v5529_v30  ;;  %v5736_v30 = vld [vmem:[#allocation2 + $0x1868] sm:$0xff] }
0x2510   :  { %8197 = vmatprep.subr.mxu0 %v8621_v0 }
0x2511   :  { %8198 = vmatpush3.msra.mxu0 %v5528_v31  ;;  %v5735_v31 = vld [vmem:[#allocation2 + $0x1860] sm:$0xff] }
0x2512   :  { %8199 = vmatprep.subr.mxu0 %v8621_v0 }
0x2513   :  { %8200 = vmatpush3.msra.mxu0 %v5527_v52 }
0x2514   :  { %8201 = vmatprep.subr.mxu0 %v8621_v0 }
0x2515   :  { %8202 = vmatpush3.msra.mxu0 %v5526_v51 }
0x2516   :  { %8203 = vmatprep.subr.mxu0 %v8621_v0 }
0x2517   :  { %8204 = vmatpush3.msra.mxu0 %v5525_v46 }
0x2518   :  { %8205 = vmatprep.subr.mxu0 %v8621_v0 }
0x25ca   :  { %v9517_v43 = vpop.f32.mrf.mxu0 }
0x25cb   :  { %v5300_v33 = vadd.f32 %v9517_v43, %v5226_v32  ;;  %v5734_v32 = vld [vmem:[#allocation2 + $0x1858] sm:$0xff] }
0x25cc   :  { %v5301_v55 = vpop.f32.mrf.mxu0 }
0x25cd   :  { %v5302_v35 = vadd.f32 %v5301_v55, %v5230_v54  ;;  %v7254_v34 = vmul.f32 -1.442695, %v5300_v33  ;;  %v5733_v33 = vld [vmem:[#allocation2 + $0x1850] sm:$0xff] }
0x25cf   :  { %v5304_v56 = vmax.f32 %v5302_v35, 0.0  ;;  %8492 = vpow2.f32 %v7254_v34  ;;  %v5732_v34 = vld [vmem:[#allocation2 + $0x1848] sm:$0xff] }
0x25d1   :  { %8189 = vmatmul.mubr.msk.f32.vlgmr.msra.gmra.mxu1 %vm230_vm1, %v5304_v56  ;;  %v5639_v56 = vld [vmem:[#allocation6 + $0x1f8] sm:$0xff] }
0x25d2   :  { %5452 = vmatpush1.msra.mxu1 %v5436_v57  ;;  %5515 = vmatprep.mubr.f32.mxu1 %v8621_v0  ;;  %v5638_v57 = vld [vmem:[#allocation6 + $0x1f0] sm:$0xff] }
0x25d3   :  { %5453 = vmatprep.subr.mxu1 %v5435_v58  ;;  %v5637_v58 = vld [vmem:[#allocation6 + $0x1e8] sm:$0xff] }
0x25d4   :  { %5454 = vmatpush1.msra.mxu1 %v5434_v59  ;;  %v5636_v59 = vld [vmem:[#allocation6 + $0x1e0] sm:$0xff] }
0x25d5   :  { %5455 = vmatprep.subr.mxu1 %v5433_v60  ;;  %v5635_v60 = vld [vmem:[#allocation6 + $0x1d8] sm:$0xff] }
0x25d6   :  { %5456 = vmatpush1.msra.mxu1 %v5432_v62  ;;  %v5634_v62 = vld [vmem:[#allocation6 + $0x1d0] sm:$0xff] }
0x25d7   :  { %5457 = vmatprep.subr.mxu1 %v5431_v63  ;;  %v5633_v63 = vld [vmem:[#allocation6 + $0x1c8] sm:$0xff] }
0x25d8   :  { %5458 = vmatpush1.msra.mxu1 %v5430_v5  ;;  %v5632_v5 = vld [vmem:[#allocation6 + $0x1c0] sm:$0xff] }
0x25d9   :  { %5459 = vmatprep.subr.mxu1 %v5429_v1  ;;  %v5631_v1 = vld [vmem:[#allocation6 + $0x1b8] sm:$0xff] }
0x25da   :  { %5460 = vmatpush1.msra.mxu1 %v5428_v2  ;;  %v5630_v2 = vld [vmem:[#allocation6 + $0x1b0] sm:$0xff] }
0x25db   :  { %5461 = vmatprep.subr.mxu1 %v5427_v3  ;;  %v5629_v3 = vld [vmem:[#allocation6 + $0x1a8] sm:$0xff] }
0x25dc   :  { %5462 = vmatpush1.msra.mxu1 %v5426_v7  ;;  %v8493_v36 = vpop.eup %8492  ;;  %v5628_v7 = vld [vmem:[#allocation6 + $0x1a0] sm:$0xff] }
0x25dd   :  { %5463 = vmatprep.subr.mxu1 %v5425_v6  ;;  %v5399_v26 = vadd.f32 1.0, %v8493_v36  ;;  %v5627_v6 = vld [vmem:[#allocation6 + $0x198] sm:$0xff]  ;;  %v5731_v36 = vld [vmem:[#allocation2 + $0x1840] sm:$0xff] }
0x25de   :  { %5464 = vmatpush1.msra.mxu1 %v5424_v8  ;;  %v5626_v8 = vld [vmem:[#allocation6 + $0x190] sm:$0xff] }
0x25df   :  { %5465 = vmatprep.subr.mxu1 %v5423_v9  ;;  %8494 = vrcp.f32 %v5399_v26  ;;  %v5625_v9 = vld [vmem:[#allocation6 + $0x188] sm:$0xff]  ;;  %v5730_v26 = vld [vmem:[#allocation2 + $0x1838] sm:$0xff] }
0x25e0   :  { %5466 = vmatpush1.msra.mxu1 %v5422_v10  ;;  %v5624_v10 = vld [vmem:[#allocation6 + $0x180] sm:$0xff] }
0x25e1   :  { %5467 = vmatprep.subr.mxu1 %v5421_v11  ;;  %v5754_v11 = vld [vmem:[#allocation2 + $0x18f8] sm:$0xff] }
0x25e2   :  { %5468 = vmatpush1.msra.mxu1 %v5420_v12  ;;  %v5753_v12 = vld [vmem:[#allocation2 + $0x18f0] sm:$0xff] }
0x25e3   :  { %5469 = vmatprep.subr.mxu1 %v5419_v13  ;;  %v5752_v13 = vld [vmem:[#allocation2 + $0x18e8] sm:$0xff] }
0x25e4   :  { %5470 = vmatpush1.msra.mxu1 %v5418_v4  ;;  %v5751_v4 = vld [vmem:[#allocation2 + $0x18e0] sm:$0xff] }
0x25e5   :  { %5471 = vmatprep.subr.mxu1 %v5417_v14  ;;  %v5750_v14 = vld [vmem:[#allocation2 + $0x18d8] sm:$0xff] }
0x25e6   :  { %5472 = vmatpush1.msra.mxu1 %v5416_v61  ;;  %v5749_v61 = vld [vmem:[#allocation2 + $0x18d0] sm:$0xff] }
0x25e7   :  { %5473 = vmatprep.subr.mxu1 %v5415_v15  ;;  %v5748_v15 = vld [vmem:[#allocation2 + $0x18c8] sm:$0xff] }
0x25e8   :  { %5474 = vmatpush1.msra.mxu1 %v5414_v16  ;;  %v5747_v16 = vld [vmem:[#allocation2 + $0x18c0] sm:$0xff] }
0x25e9   :  { %5475 = vmatprep.subr.mxu1 %v5413_v17  ;;  %v5746_v17 = vld [vmem:[#allocation2 + $0x18b8] sm:$0xff] }
0x25ea   :  { %5476 = vmatpush1.msra.mxu1 %v5412_v18  ;;  %v5745_v18 = vld [vmem:[#allocation2 + $0x18b0] sm:$0xff] }
0x25eb   :  { %5477 = vmatprep.subr.mxu1 %v5411_v19  ;;  %v5744_v19 = vld [vmem:[#allocation2 + $0x18a8] sm:$0xff] }
0x25ec   :  { %5478 = vmatpush1.msra.mxu1 %v5410_v21  ;;  %v8495_v23 = vpop.eup %8494  ;;  %v5743_v21 = vld [vmem:[#allocation2 + $0x18a0] sm:$0xff] }
0x25ed   :  { %5479 = vmatprep.subr.mxu1 %v5409_v28  ;;  %v5402_v45 = vmul.f32 %v8495_v23, %v9502_v49  ;;  %v5524_v49 = vld [vmem:[#allocation4 + $0x5c0] sm:$0xff]  ;;  %v5742_v28 = vld [vmem:[#allocation2 + $0x1898] sm:$0xff] }
0x25ee   :  { %5480 = vmatpush1.msra.mxu1 %v5408_v27  ;;  %8206 = vmatpush3.msra.mxu0 %v5524_v49  ;;  %v5741_v27 = vld [vmem:[#allocation2 + $0x1890] sm:$0xff] }
0x25ef   :  { %5481 = vmatprep.subr.mxu1 %v5407_v24  ;;  %8210 = vmatprep.subr.mxu0 %v8621_v0  ;;  %v5740_v24 = vld [vmem:[#allocation2 + $0x1888] sm:$0xff] }
0x25f0   :  { %5482 = vmatpush1.msra.mxu1 %v5406_v25  ;;  %v5739_v25 = vld [vmem:[#allocation2 + $0x1880] sm:$0xff] }
0x25f1   :  { %5768 = vmatprep.subr.mxu1 %v5754_v11  ;;  %v5972_v11 = vld [vmem:[#allocation2 + $0x19f8] sm:$0xff] }
0x2691   :  { %v5391_v40 = vpop.f32.mrf.mxu1 }
0x2692   :  { %v5392_v41 = vadd.f32 %v7252_v38, %v5391_v40  ;;  %v5444_v38 = vrot.slane %v9544_v37, %v8751_v22 }
0x2693   :  { %v8190_v42 = vpop.f32.mrf.mxu1 }
0x2694   :  { %v5395_v44 = vmax.f32 %v5392_v41, 0.0 }
0x2696   :  { %v5403_v39 = vadd.f32 %v5402_v45, %v5395_v44  ;;  %v7257_v44 = vld [vmem:[%s9798_s5 + $0x17] ss:$0 sm:$0xff] }
0x2698   :  { %v9533_v50 = vadd.f32 %v9467_v48, %v5403_v39 }
0x269a   :  { %5516 = vmatmul.mubr.f32.vlgmr.msra.gmra.mxu1 %v9533_v50 }
0x269b   :  { %5832 = vmatprep.mubr.f32.mxu1 %v8621_v0  ;;  %5769 = vmatpush1.msra.mxu1 %v5753_v12  ;;  %v5971_v12 = vld [vmem:[#allocation2 + $0x19f0] sm:$0xff] }
0x269c   :  { %5770 = vmatprep.subr.mxu1 %v5752_v13  ;;  %v5970_v13 = vld [vmem:[#allocation2 + $0x19e8] sm:$0xff] }
0x269d   :  { %5771 = vmatpush1.msra.mxu1 %v5751_v4  ;;  %v5969_v4 = vld [vmem:[#allocation2 + $0x19e0] sm:$0xff] }
0x269e   :  { %5772 = vmatprep.subr.mxu1 %v5750_v14  ;;  %v5968_v14 = vld [vmem:[#allocation2 + $0x19d8] sm:$0xff] }
0x269f   :  { %5773 = vmatpush1.msra.mxu1 %v5749_v61  ;;  %v5967_v61 = vld [vmem:[#allocation2 + $0x19d0] sm:$0xff] }
0x26a0   :  { %5774 = vmatprep.subr.mxu1 %v5748_v15  ;;  %v5966_v15 = vld [vmem:[#allocation2 + $0x19c8] sm:$0xff] }
0x26a1   :  { %5775 = vmatpush1.msra.mxu1 %v5747_v16  ;;  %v5965_v16 = vld [vmem:[#allocation2 + $0x19c0] sm:$0xff] }
0x26a2   :  { %5776 = vmatprep.subr.mxu1 %v5746_v17  ;;  %v5964_v17 = vld [vmem:[#allocation2 + $0x19b8] sm:$0xff] }
0x26a3   :  { %5777 = vmatpush1.msra.mxu1 %v5745_v18  ;;  %v5963_v18 = vld [vmem:[#allocation2 + $0x19b0] sm:$0xff] }
0x26a4   :  { %5778 = vmatprep.subr.mxu1 %v5744_v19  ;;  %v5962_v19 = vld [vmem:[#allocation2 + $0x19a8] sm:$0xff] }
0x26a5   :  { %5779 = vmatpush1.msra.mxu1 %v5743_v21  ;;  %v5961_v21 = vld [vmem:[#allocation2 + $0x19a0] sm:$0xff] }
0x26a6   :  { %5780 = vmatprep.subr.mxu1 %v5742_v28  ;;  %v5960_v28 = vld [vmem:[#allocation2 + $0x1998] sm:$0xff] }
0x26a7   :  { %5781 = vmatpush1.msra.mxu1 %v5741_v27  ;;  %v5959_v27 = vld [vmem:[#allocation2 + $0x1990] sm:$0xff] }
0x26a8   :  { %5782 = vmatprep.subr.mxu1 %v5740_v24  ;;  %v5958_v24 = vld [vmem:[#allocation2 + $0x1988] sm:$0xff] }
0x26a9   :  { %5783 = vmatpush1.msra.mxu1 %v5739_v25  ;;  %v5957_v25 = vld [vmem:[#allocation2 + $0x1980] sm:$0xff] }
0x26aa   :  { %5784 = vmatprep.subr.mxu1 %v5738_v29  ;;  %v5956_v29 = vld [vmem:[#allocation2 + $0x1978] sm:$0xff] }
0x26ab   :  { %5785 = vmatpush1.msra.mxu1 %v5737_v20  ;;  %v5955_v20 = vld [vmem:[#allocation2 + $0x1970] sm:$0xff] }
0x26ac   :  { %5786 = vmatprep.subr.mxu1 %v5736_v30  ;;  %v5954_v30 = vld [vmem:[#allocation2 + $0x1968] sm:$0xff] }
0x26ad   :  { %5787 = vmatpush1.msra.mxu1 %v5735_v31  ;;  %v5953_v31 = vld [vmem:[#allocation2 + $0x1960] sm:$0xff] }
0x26ae   :  { %5788 = vmatprep.subr.mxu1 %v5734_v32  ;;  %v5952_v32 = vld [vmem:[#allocation2 + $0x1958] sm:$0xff] }
0x26af   :  { %5789 = vmatpush1.msra.mxu1 %v5733_v33  ;;  %v5951_v33 = vld [vmem:[#allocation2 + $0x1950] sm:$0xff] }
0x26b0   :  { %5790 = vmatprep.subr.mxu1 %v5732_v34  ;;  %v5950_v34 = vld [vmem:[#allocation2 + $0x1948] sm:$0xff] }
0x26b1   :  { %5791 = vmatpush1.msra.mxu1 %v5731_v36  ;;  %v7263_v36 = vld [vmem:[%s9796_s3 + $0x30] sm:$0x3] }
0x26b2   :  { %5792 = vmatprep.subr.mxu1 %v5730_v26  ;;  %v5765_v26 = vrot.slane %v7263_v36, %v8736_v47 }
0x275a   :  { %v9548_v54 = vpop.f32.mrf.mxu1 }
0x275b   :  { %v5518_v23 = vadd.f32 %v9548_v54, %v5444_v38  ;;  %v5729_v54 = vld [vmem:[#allocation2 + $0x1830] sm:$0xff] }
0x275c   :  { %v5519_v43 = vpop.f32.mrf.mxu1  ;;  %5793 = vmatpush1.msra.mxu1 %v5729_v54  ;;  %v6065_v54 = vld [vmem:[#allocation4 + $0x670] sm:$0xff] }
0x275d   :  { %v5520_v55 = vadd.f32 %v5519_v43, %v5448_v53  ;;  %v7259_v40 = vmul.f32 -1.442695, %v5518_v23  ;;  %v5728_v43 = vld [vmem:[#allocation2 + $0x1828] sm:$0xff] }
0x275e   :  { %5794 = vmatprep.subr.mxu1 %v5728_v43  ;;  %v6064_v43 = vld [vmem:[#allocation4 + $0x668] sm:$0xff] }
0x275f   :  { %v5522_v35 = vmax.f32 %v5520_v55, 0.0  ;;  %8496 = vpow2.f32 %v7259_v40  ;;  %v5727_v55 = vld [vmem:[#allocation2 + $0x1820] sm:$0xff] }
0x2760   :  { %5795 = vmatpush1.msra.mxu1 %v5727_v55  ;;  %v6063_v55 = vld [vmem:[#allocation4 + $0x660] sm:$0xff] }
0x2761   :  { %8208 = vmatmul.mubr.msk.f32.vlgmr.msra.gmra.mxu0 %vm230_vm1, %v5522_v35  ;;  %v5726_v35 = vld [vmem:[#allocation2 + $0x1818] sm:$0xff] }
0x2762   :  { %8211 = vmatpush3.msra.mxu0 %v5639_v56  ;;  %8242 = vmatprep.mubr.msk.f32.mxu0 %vm8622_vm0, %v8621_v0  ;;  %v5725_v56 = vld [vmem:[#allocation2 + $0x1810] sm:$0xff] }
0x2763   :  { %8212 = vmatprep.subr.mxu0 %v8621_v0  ;;  %5796 = vmatprep.subr.mxu1 %v5726_v35  ;;  %v5761_v35 = vrot.slane %v7263_v36, %v8751_v22  ;;  %v6173_v36 = vld [vmem:[#allocation2 + $0x1a70] sm:$0xff] }
0x2764   :  { %8213 = vmatpush3.msra.mxu0 %v5638_v57  ;;  %5797 = vmatpush1.msra.mxu1 %v5725_v56  ;;  %v5724_v57 = vld [vmem:[#allocation2 + $0x1808] sm:$0xff] }
0x2765   :  { %8214 = vmatprep.subr.mxu0 %v8621_v0  ;;  %5798 = vmatprep.subr.mxu1 %v5724_v57 }
0x2766   :  { %8215 = vmatpush3.msra.mxu0 %v5637_v58  ;;  %v5848_v58 = vld [vmem:[#allocation4 + $0x638] sm:$0xff] }
0x2767   :  { %8216 = vmatprep.subr.mxu0 %v8621_v0 }
0x2768   :  { %8217 = vmatpush3.msra.mxu0 %v5636_v59  ;;  %v5846_v59 = vld [vmem:[#allocation4 + $0x628] sm:$0xff] }
0x2769   :  { %8218 = vmatprep.subr.mxu0 %v8621_v0 }
0x276a   :  { %8219 = vmatpush3.msra.mxu0 %v5635_v60  ;;  %v5845_v60 = vld [vmem:[#allocation4 + $0x620] sm:$0xff] }
0x276b   :  { %8220 = vmatprep.subr.mxu0 %v8621_v0 }
0x276c   :  { %8221 = vmatpush3.msra.mxu0 %v5634_v62  ;;  %v8497_v41 = vpop.eup %8496  ;;  %v7261_v62 = vld [vmem:[%s9800_s7 + $0x3] ss:$0 sm:$0xff] }
0x276d   :  { %8222 = vmatprep.subr.mxu0 %v8621_v0  ;;  %v5617_v42 = vadd.f32 1.0, %v8497_v41 }
0x276e   :  { %8223 = vmatpush3.msra.mxu0 %v5633_v63 }
0x276f   :  { %8224 = vmatprep.subr.mxu0 %v8621_v0  ;;  %8498 = vrcp.f32 %v5617_v42  ;;  %v5949_v42 = vld [vmem:[#allocation2 + $0x1940] sm:$0xff] }
0x2770   :  { %8225 = vmatpush3.msra.mxu0 %v5632_v5 }
0x2771   :  { %8226 = vmatprep.subr.mxu0 %v8621_v0 }
0x2772   :  { %8227 = vmatpush3.msra.mxu0 %v5631_v1  ;;  %v9589_v1 = vld [vmem:[%s9794_s1 + $0x8] sm:$0x3] }
0x2773   :  { %8228 = vmatprep.subr.mxu0 %v8621_v0 }
0x2774   :  { %8229 = vmatpush3.msra.mxu0 %v5630_v2 }
0x2775   :  { %8230 = vmatprep.subr.mxu0 %v8621_v0 }
0x2776   :  { %8231 = vmatpush3.msra.mxu0 %v5629_v3 }
0x2777   :  { %8232 = vmatprep.subr.mxu0 %v8621_v0 }
0x2778   :  { %8233 = vmatpush3.msra.mxu0 %v5628_v7 }
0x2779   :  { %8234 = vmatprep.subr.mxu0 %v8621_v0 }
0x277a   :  { %8235 = vmatpush3.msra.mxu0 %v5627_v6  ;;  %v5844_v6 = vld [vmem:[#allocation4 + $0x618] sm:$0xff] }
0x277b   :  { %8236 = vmatprep.subr.mxu0 %v8621_v0 }
0x277c   :  { %8237 = vmatpush3.msra.mxu0 %v5626_v8  ;;  %v8499_v45 = vpop.eup %8498  ;;  %v5843_v8 = vld [vmem:[#allocation4 + $0x610] sm:$0xff] }
0x277d   :  { %8238 = vmatprep.subr.mxu0 %v8621_v0  ;;  %v5620_v49 = vmul.f32 %v8499_v45, %v9533_v50  ;;  %v5723_v50 = vld [vmem:[#allocation2 + $0x1800] sm:$0xff]  ;;  %v5947_v45 = vld [vmem:[#allocation2 + $0x1930] sm:$0xff] }
0x277e   :  { %8239 = vmatpush3.msra.mxu0 %v5625_v9  ;;  %5799 = vmatpush1.msra.mxu1 %v5723_v50  ;;  %v5842_v9 = vld [vmem:[#allocation4 + $0x608] sm:$0xff] }
0x277f   :  { %8240 = vmatprep.subr.mxu0 %v8621_v0  ;;  %5986 = vmatprep.subr.mxu1 %v5972_v11  ;;  %v6190_v11 = vld [vmem:[#allocation2 + $0x1af8] sm:$0xff] }
0x2780   :  { %8241 = vmatpush3.msra.mxu0 %v5624_v10  ;;  %v5841_v10 = vld [vmem:[#allocation4 + $0x600] sm:$0xff] }
0x2781   :  { %8245 = vmatprep.subr.mxu0 %v8621_v0 }
0x2821   :  { %v5609_v39 = vpop.f32.mrf.mxu0 }
0x2822   :  { %v5610_v52 = vadd.f32 %v7257_v44, %v5609_v39  ;;  %v5948_v44 = vld [vmem:[#allocation2 + $0x1938] sm:$0xff]  ;;  %v5946_v39 = vld [vmem:[#allocation2 + $0x1928] sm:$0xff] }
0x2823   :  { %v8209_v51 = vpop.f32.mrf.mxu0 }
0x2824   :  { %v5613_v46 = vmax.f32 %v5610_v52, 0.0  ;;  %v5945_v52 = vld [vmem:[#allocation2 + $0x1920] sm:$0xff]  ;;  %v5944_v51 = vld [vmem:[#allocation2 + $0x1918] sm:$0xff] }
0x2826   :  { %v5621_v53 = vadd.f32 %v5620_v49, %v5613_v46  ;;  %v5943_v46 = vld [vmem:[#allocation2 + $0x1910] sm:$0xff]  ;;  %v5942_v49 = vld [vmem:[#allocation2 + $0x1908] sm:$0xff] }
0x2828   :  { %v5622_v37 = vadd.f32 %v9467_v48, %v5621_v53  ;;  %v5847_v48 = vld [vmem:[#allocation4 + $0x630] sm:$0xff]  ;;  %v5941_v53 = vld [vmem:[#allocation2 + $0x1900] sm:$0xff] }
0x282a   :  { %8243 = vmatmul.mubr.f32.vlgmr.msra.gmra.mxu0 %v5622_v37  ;;  %v6066_v37 = vld [vmem:[#allocation4 + $0x678] sm:$0xff] }
0x282b   :  { %8261 = vmatprep.mubr.msk.f32.mxu0 %vm8622_vm0, %v8621_v0  ;;  %8246 = vmatpush3.msra.mxu0 %v5848_v58 }
0x282c   :  { %8247 = vmatprep.subr.mxu0 %v8621_v0 }
0x282d   :  { %8248 = vmatpush3.msra.mxu0 %v5847_v48  ;;  %v7265_v48 = vld [vmem:[%s9798_s5 + $0x18] ss:$0 sm:$0xff] }
0x282e   :  { %8249 = vmatprep.subr.mxu0 %v8621_v0 }
0x282f   :  { %8250 = vmatpush3.msra.mxu0 %v5846_v59 }
0x2830   :  { %8251 = vmatprep.subr.mxu0 %v8621_v0 }
0x2831   :  { %8252 = vmatpush3.msra.mxu0 %v5845_v60 }
0x2832   :  { %8253 = vmatprep.subr.mxu0 %v8621_v0 }
0x2833   :  { %8254 = vmatpush3.msra.mxu0 %v5844_v6 }
0x2834   :  { %8255 = vmatprep.subr.mxu0 %v8621_v0 }
0x2835   :  { %8256 = vmatpush3.msra.mxu0 %v5843_v8  ;;  %v6062_v8 = vld [vmem:[#allocation4 + $0x658] sm:$0xff] }
0x2836   :  { %8257 = vmatprep.subr.mxu0 %v8621_v0 }
0x2837   :  { %8258 = vmatpush3.msra.mxu0 %v5842_v9  ;;  %v6061_v9 = vld [vmem:[#allocation4 + $0x650] sm:$0xff] }
0x2838   :  { %8259 = vmatprep.subr.mxu0 %v8621_v0 }
0x2839   :  { %8260 = vmatpush3.msra.mxu0 %v5841_v10  ;;  %v6060_v10 = vld [vmem:[#allocation4 + $0x648] sm:$0xff] }
0x283a   :  { %8264 = vmatprep.subr.mxu0 %v8621_v0 }
0x28ea   :  { %v5714_v63 = vpop.f32.mrf.mxu0 }
0x28eb   :  { %v5715_v5 = vadd.f32 %v7261_v62, %v5714_v63 }
0x28ec   :  { %v8244_v2 = vpop.f32.mrf.mxu0 }
0x28ed   :  { %v5718_v3 = vmax.f32 %v5715_v5, 0.0 }
0x28ef   :  { %v9592_v7 = vadd.f32 %v9589_v1, %v5718_v3 }
0x28f1   :  { %5833 = vmatmul.mubr.f32.vlgmr.msra.gmra.mxu1 %v9592_v7 }
0x28f2   :  { %6050 = vmatprep.mubr.f32.mxu1 %v8621_v0  ;;  %5987 = vmatpush1.msra.mxu1 %v5971_v12  ;;  %v9629_v12 = vld [vmem:[%s9796_s3 + $0x32] sm:$0x3] }
0x28f3   :  { %5988 = vmatprep.subr.mxu1 %v5970_v13  ;;  %v5983_v13 = vrot.slane %v9629_v12, %v8736_v47 }
0x28f4   :  { %5989 = vmatpush1.msra.mxu1 %v5969_v4 }
0x28f5   :  { %5990 = vmatprep.subr.mxu1 %v5968_v14 }
0x28f6   :  { %5991 = vmatpush1.msra.mxu1 %v5967_v61 }
0x28f7   :  { %5992 = vmatprep.subr.mxu1 %v5966_v15 }
0x28f8   :  { %5993 = vmatpush1.msra.mxu1 %v5965_v16  ;;  %v6189_v16 = vld [vmem:[#allocation2 + $0x1af0] sm:$0xff] }
0x28f9   :  { %5994 = vmatprep.subr.mxu1 %v5964_v17  ;;  %v6188_v17 = vld [vmem:[#allocation2 + $0x1ae8] sm:$0xff] }
0x28fa   :  { %5995 = vmatpush1.msra.mxu1 %v5963_v18  ;;  %v6187_v18 = vld [vmem:[#allocation2 + $0x1ae0] sm:$0xff] }
0x28fb   :  { %5996 = vmatprep.subr.mxu1 %v5962_v19  ;;  %v6186_v19 = vld [vmem:[#allocation2 + $0x1ad8] sm:$0xff] }
0x28fc   :  { %5997 = vmatpush1.msra.mxu1 %v5961_v21  ;;  %v6185_v21 = vld [vmem:[#allocation2 + $0x1ad0] sm:$0xff] }
0x28fd   :  { %5998 = vmatprep.subr.mxu1 %v5960_v28  ;;  %v6184_v28 = vld [vmem:[#allocation2 + $0x1ac8] sm:$0xff] }
0x28fe   :  { %5999 = vmatpush1.msra.mxu1 %v5959_v27  ;;  %v6183_v27 = vld [vmem:[#allocation2 + $0x1ac0] sm:$0xff] }
0x28ff   :  { %6000 = vmatprep.subr.mxu1 %v5958_v24  ;;  %v6182_v24 = vld [vmem:[#allocation2 + $0x1ab8] sm:$0xff] }
0x2900   :  { %6001 = vmatpush1.msra.mxu1 %v5957_v25  ;;  %v6181_v25 = vld [vmem:[#allocation2 + $0x1ab0] sm:$0xff] }
0x2901   :  { %6002 = vmatprep.subr.mxu1 %v5956_v29  ;;  %v6180_v29 = vld [vmem:[#allocation2 + $0x1aa8] sm:$0xff] }
0x2902   :  { %6003 = vmatpush1.msra.mxu1 %v5955_v20  ;;  %v6179_v20 = vld [vmem:[#allocation2 + $0x1aa0] sm:$0xff] }
0x2903   :  { %6004 = vmatprep.subr.mxu1 %v5954_v30  ;;  %v6178_v30 = vld [vmem:[#allocation2 + $0x1a98] sm:$0xff] }
0x2904   :  { %6005 = vmatpush1.msra.mxu1 %v5953_v31  ;;  %v6177_v31 = vld [vmem:[#allocation2 + $0x1a90] sm:$0xff] }
0x2905   :  { %6006 = vmatprep.subr.mxu1 %v5952_v32  ;;  %v6176_v32 = vld [vmem:[#allocation2 + $0x1a88] sm:$0xff] }
0x2906   :  { %6007 = vmatpush1.msra.mxu1 %v5951_v33  ;;  %v6175_v33 = vld [vmem:[#allocation2 + $0x1a80] sm:$0xff] }
0x2907   :  { %6008 = vmatprep.subr.mxu1 %v5950_v34  ;;  %v6174_v34 = vld [vmem:[#allocation2 + $0x1a78] sm:$0xff] }
0x2908   :  { %6009 = vmatpush1.msra.mxu1 %v5949_v42  ;;  %v6167_v42 = vld [vmem:[#allocation2 + $0x1a40] sm:$0xff] }
0x2909   :  { %6010 = vmatprep.subr.mxu1 %v5948_v44  ;;  %v6166_v44 = vld [vmem:[#allocation2 + $0x1a38] sm:$0xff] }
0x290a   :  { %6011 = vmatpush1.msra.mxu1 %v5947_v45  ;;  %v6165_v45 = vld [vmem:[#allocation2 + $0x1a30] sm:$0xff] }
0x290b   :  { %6012 = vmatprep.subr.mxu1 %v5946_v39  ;;  %v6164_v39 = vld [vmem:[#allocation2 + $0x1a28] sm:$0xff] }
0x290c   :  { %6013 = vmatpush1.msra.mxu1 %v5945_v52  ;;  %v6163_v52 = vld [vmem:[#allocation2 + $0x1a20] sm:$0xff] }
0x290d   :  { %6014 = vmatprep.subr.mxu1 %v5944_v51  ;;  %v6162_v51 = vld [vmem:[#allocation2 + $0x1a18] sm:$0xff] }
0x290e   :  { %6015 = vmatpush1.msra.mxu1 %v5943_v46  ;;  %v6161_v46 = vld [vmem:[#allocation2 + $0x1a10] sm:$0xff] }
0x290f   :  { %6016 = vmatprep.subr.mxu1 %v5942_v49  ;;  %v6160_v49 = vld [vmem:[#allocation2 + $0x1a08] sm:$0xff] }
0x2910   :  { %6017 = vmatpush1.msra.mxu1 %v5941_v53  ;;  %v6159_v53 = vld [vmem:[#allocation2 + $0x1a00] sm:$0xff] }
0x2911   :  { %8283 = vmatprep.subr.mxu1 %v8621_v0 }
0x29b1   :  { %v5834_v38 = vpop.f32.mrf.mxu1 }
0x29b2   :  { %v5835_v56 = vadd.f32 %v5834_v38, %v5761_v35  ;;  %v6171_v38 = vld [vmem:[#allocation2 + $0x1a60] sm:$0xff]  ;;  %v5979_v35 = vrot.slane %v9629_v12, %v8751_v22  ;;  %v9661_v12 = vld [vmem:[%s9796_s3 + $0x34] sm:$0x3] }
0x29b3   :  { %v5836_v23 = vpop.f32.mrf.mxu1 }
0x29b4   :  { %v5837_v40 = vadd.f32 %v5836_v23, %v5765_v26  ;;  %v7267_v57 = vmul.f32 -1.442695, %v5835_v56  ;;  %v6172_v26 = vld [vmem:[#allocation2 + $0x1a68] sm:$0xff]  ;;  %v6170_v23 = vld [vmem:[#allocation2 + $0x1a58] sm:$0xff] }
0x29b6   :  { %v5839_v41 = vmax.f32 %v5837_v40, 0.0  ;;  %8500 = vpow2.f32 %v7267_v57  ;;  %v6169_v40 = vld [vmem:[#allocation2 + $0x1a50] sm:$0xff] }
0x29b8   :  { %8262 = vmatmul.mubr.msk.f32.vlgmr.msra.gmra.mxu0 %vm230_vm1, %v5839_v41  ;;  %v6168_v41 = vld [vmem:[#allocation2 + $0x1a48] sm:$0xff] }
0x29b9   :  { %8280 = vmatprep.mubr.msk.f32.mxu0 %vm8622_vm0, %v8621_v0  ;;  %8265 = vmatpush3.msra.mxu0 %v6066_v37  ;;  %v6284_v37 = vld [vmem:[#allocation4 + $0x6b8] sm:$0xff] }
0x29ba   :  { %8266 = vmatprep.subr.mxu0 %v8621_v0 }
0x29bb   :  { %8267 = vmatpush3.msra.mxu0 %v6065_v54  ;;  %v6283_v54 = vld [vmem:[#allocation4 + $0x6b0] sm:$0xff] }
0x29bc   :  { %8268 = vmatprep.subr.mxu0 %v8621_v0 }
0x29bd   :  { %8269 = vmatpush3.msra.mxu0 %v6064_v43  ;;  %v6282_v43 = vld [vmem:[#allocation4 + $0x6a8] sm:$0xff] }
0x29be   :  { %8270 = vmatprep.subr.mxu0 %v8621_v0 }
0x29bf   :  { %8271 = vmatpush3.msra.mxu0 %v6063_v55  ;;  %v6281_v55 = vld [vmem:[#allocation4 + $0x6a0] sm:$0xff] }
0x29c0   :  { %8272 = vmatprep.subr.mxu0 %v8621_v0 }
0x29c1   :  { %8273 = vmatpush3.msra.mxu0 %v6062_v8 }
0x29c2   :  { %8274 = vmatprep.subr.mxu0 %v8621_v0 }
0x29c3   :  { %v8501_v50 = vpop.eup %8500  ;;  %8275 = vmatpush3.msra.mxu0 %v6061_v9  ;;  %v6280_v9 = vld [vmem:[#allocation4 + $0x698] sm:$0xff] }
0x29c4   :  { %v5934_v58 = vadd.f32 1.0, %v8501_v50  ;;  %8276 = vmatprep.subr.mxu0 %v8621_v0 }
0x29c5   :  { %8277 = vmatpush3.msra.mxu0 %v6060_v10  ;;  %v6279_v10 = vld [vmem:[#allocation4 + $0x690] sm:$0xff] }
0x29c6   :  { %8502 = vrcp.f32 %v5934_v58  ;;  %8278 = vmatprep.subr.mxu0 %v8621_v0 }
0x29d3   :  { %v8503_v59 = vpop.eup %8502 }
0x29d4   :  { %v5937_v2 = vmul.f32 %v8503_v59, %v9592_v7  ;;  %v6059_v7 = vld [vmem:[#allocation4 + $0x640] sm:$0xff] }
0x29d5   :  { %8279 = vmatpush3.msra.mxu0 %v6059_v7  ;;  %v6278_v7 = vld [vmem:[#allocation4 + $0x688] sm:$0xff] }
0x29d6   :  { %6204 = vmatprep.subr.mxu0 %v6190_v11  ;;  %v6408_v11 = vld [vmem:[#allocation2 + $0x1bf8] sm:$0xff] }
0x2a78   :  { %v5926_v60 = vpop.f32.mrf.mxu0 }
0x2a79   :  { %v5927_v62 = vadd.f32 %v7265_v48, %v5926_v60  ;;  %v7270_v48 = vld [vmem:[%s9798_s5 + $0x19] ss:$0 sm:$0xff] }
0x2a7a   :  { %v8263_v63 = vpop.f32.mrf.mxu0 }
0x2a7b   :  { %v5930_v5 = vmax.f32 %v5927_v62, 0.0 }
0x2a7d   :  { %v5938_v3 = vadd.f32 %v5937_v2, %v5930_v5 }
0x2a7f   :  { %v9618_v6 = vadd.f32 %v9589_v1, %v5938_v3 }
0x2a81   :  { %6051 = vmatmul.mubr.f32.vlgmr.msra.gmra.mxu1 %v9618_v6 }
0x2a82   :  { %8299 = vmatprep.mubr.msk.f32.mxu1 %vm8622_vm0, %v8621_v0  ;;  %8284 = vmatpush3.msra.mxu1 %v6284_v37  ;;  %v6502_v37 = vld [vmem:[#allocation4 + $0x6f8] sm:$0xff] }
0x2a83   :  { %8285 = vmatprep.subr.mxu1 %v8621_v0 }
0x2a84   :  { %8286 = vmatpush3.msra.mxu1 %v6283_v54  ;;  %v6501_v54 = vld [vmem:[#allocation4 + $0x6f0] sm:$0xff] }
0x2a85   :  { %8287 = vmatprep.subr.mxu1 %v8621_v0 }
0x2a86   :  { %8288 = vmatpush3.msra.mxu1 %v6282_v43  ;;  %v6500_v43 = vld [vmem:[#allocation4 + $0x6e8] sm:$0xff] }
0x2a87   :  { %8289 = vmatprep.subr.mxu1 %v8621_v0 }
0x2a88   :  { %8290 = vmatpush3.msra.mxu1 %v6281_v55  ;;  %v6499_v55 = vld [vmem:[#allocation4 + $0x6e0] sm:$0xff] }
0x2a89   :  { %8291 = vmatprep.subr.mxu1 %v8621_v0 }
0x2a8a   :  { %8292 = vmatpush3.msra.mxu1 %v6280_v9 }
0x2a8b   :  { %8293 = vmatprep.subr.mxu1 %v8621_v0 }
0x2a8c   :  { %8294 = vmatpush3.msra.mxu1 %v6279_v10  ;;  %v6498_v10 = vld [vmem:[#allocation4 + $0x6d8] sm:$0xff] }
0x2a8d   :  { %8295 = vmatprep.subr.mxu1 %v8621_v0 }
0x2a8e   :  { %8296 = vmatpush3.msra.mxu1 %v6278_v7  ;;  %v6497_v7 = vld [vmem:[#allocation4 + $0x6d0] sm:$0xff] }
0x2a8f   :  { %8297 = vmatprep.subr.mxu1 %v8621_v0 }
0x2b41   :  { %v9633_v4 = vpop.f32.mrf.mxu1 }
0x2b42   :  { %v6053_v56 = vadd.f32 %v9633_v4, %v5979_v35  ;;  %v6197_v35 = vrot.slane %v9661_v12, %v8751_v22 }
0x2b43   :  { %v6054_v14 = vpop.f32.mrf.mxu1 }
0x2b44   :  { %v6055_v61 = vadd.f32 %v6054_v14, %v5983_v13  ;;  %v7272_v57 = vmul.f32 -1.442695, %v6053_v56  ;;  %v6201_v13 = vrot.slane %v9661_v12, %v8736_v47  ;;  %v9693_v12 = vld [vmem:[%s9796_s3 + $0x36] sm:$0x3] }
0x2b46   :  { %v6057_v15 = vmax.f32 %v6055_v61, 0.0  ;;  %8504 = vpow2.f32 %v7272_v57 }
0x2b48   :  { %8281 = vmatmul.mubr.msk.f32.vlgmr.msra.gmra.mxu0 %vm230_vm1, %v6057_v15 }
0x2b49   :  { %6205 = vmatpush1.msra.mxu0 %v6189_v16  ;;  %6268 = vmatprep.mubr.f32.mxu0 %v8621_v0  ;;  %v6407_v16 = vld [vmem:[#allocation2 + $0x1bf0] sm:$0xff] }
0x2b4a   :  { %6206 = vmatprep.subr.mxu0 %v6188_v17  ;;  %v6406_v17 = vld [vmem:[#allocation2 + $0x1be8] sm:$0xff] }
0x2b4b   :  { %6207 = vmatpush1.msra.mxu0 %v6187_v18  ;;  %v6405_v18 = vld [vmem:[#allocation2 + $0x1be0] sm:$0xff] }
0x2b4c   :  { %6208 = vmatprep.subr.mxu0 %v6186_v19  ;;  %v6404_v19 = vld [vmem:[#allocation2 + $0x1bd8] sm:$0xff] }
0x2b4d   :  { %6209 = vmatpush1.msra.mxu0 %v6185_v21  ;;  %v6403_v21 = vld [vmem:[#allocation2 + $0x1bd0] sm:$0xff] }
0x2b4e   :  { %6210 = vmatprep.subr.mxu0 %v6184_v28  ;;  %v6402_v28 = vld [vmem:[#allocation2 + $0x1bc8] sm:$0xff] }
0x2b4f   :  { %6211 = vmatpush1.msra.mxu0 %v6183_v27  ;;  %v6401_v27 = vld [vmem:[#allocation2 + $0x1bc0] sm:$0xff] }
0x2b50   :  { %6212 = vmatprep.subr.mxu0 %v6182_v24  ;;  %v6400_v24 = vld [vmem:[#allocation2 + $0x1bb8] sm:$0xff] }
0x2b51   :  { %6213 = vmatpush1.msra.mxu0 %v6181_v25  ;;  %v6399_v25 = vld [vmem:[#allocation2 + $0x1bb0] sm:$0xff] }
0x2b52   :  { %6214 = vmatprep.subr.mxu0 %v6180_v29  ;;  %v6398_v29 = vld [vmem:[#allocation2 + $0x1ba8] sm:$0xff] }
0x2b53   :  { %6215 = vmatpush1.msra.mxu0 %v6179_v20  ;;  %v8505_v50 = vpop.eup %8504  ;;  %v6397_v20 = vld [vmem:[#allocation2 + $0x1ba0] sm:$0xff] }
0x2b54   :  { %6216 = vmatprep.subr.mxu0 %v6178_v30  ;;  %v6152_v58 = vadd.f32 1.0, %v8505_v50  ;;  %v6396_v30 = vld [vmem:[#allocation2 + $0x1b98] sm:$0xff] }
0x2b55   :  { %6217 = vmatpush1.msra.mxu0 %v6177_v31  ;;  %v6395_v31 = vld [vmem:[#allocation2 + $0x1b90] sm:$0xff] }
0x2b56   :  { %6218 = vmatprep.subr.mxu0 %v6176_v32  ;;  %8506 = vrcp.f32 %v6152_v58  ;;  %v6394_v32 = vld [vmem:[#allocation2 + $0x1b88] sm:$0xff] }
0x2b57   :  { %6219 = vmatpush1.msra.mxu0 %v6175_v33  ;;  %v6393_v33 = vld [vmem:[#allocation2 + $0x1b80] sm:$0xff] }
0x2b58   :  { %6220 = vmatprep.subr.mxu0 %v6174_v34  ;;  %v6392_v34 = vld [vmem:[#allocation2 + $0x1b78] sm:$0xff] }
0x2b59   :  { %6221 = vmatpush1.msra.mxu0 %v6173_v36  ;;  %v6391_v36 = vld [vmem:[#allocation2 + $0x1b70] sm:$0xff] }
0x2b5a   :  { %6222 = vmatprep.subr.mxu0 %v6172_v26  ;;  %v6390_v26 = vld [vmem:[#allocation2 + $0x1b68] sm:$0xff] }
0x2b5b   :  { %6223 = vmatpush1.msra.mxu0 %v6171_v38  ;;  %v6389_v38 = vld [vmem:[#allocation2 + $0x1b60] sm:$0xff] }
0x2b5c   :  { %6224 = vmatprep.subr.mxu0 %v6170_v23  ;;  %v6388_v23 = vld [vmem:[#allocation2 + $0x1b58] sm:$0xff] }
0x2b5d   :  { %6225 = vmatpush1.msra.mxu0 %v6169_v40  ;;  %v6387_v40 = vld [vmem:[#allocation2 + $0x1b50] sm:$0xff] }
0x2b5e   :  { %6226 = vmatprep.subr.mxu0 %v6168_v41  ;;  %v6386_v41 = vld [vmem:[#allocation2 + $0x1b48] sm:$0xff] }
0x2b5f   :  { %6227 = vmatpush1.msra.mxu0 %v6167_v42  ;;  %v6385_v42 = vld [vmem:[#allocation2 + $0x1b40] sm:$0xff] }
0x2b60   :  { %6228 = vmatprep.subr.mxu0 %v6166_v44  ;;  %v6384_v44 = vld [vmem:[#allocation2 + $0x1b38] sm:$0xff] }
0x2b61   :  { %6229 = vmatpush1.msra.mxu0 %v6165_v45  ;;  %v6383_v45 = vld [vmem:[#allocation2 + $0x1b30] sm:$0xff] }
0x2b62   :  { %6230 = vmatprep.subr.mxu0 %v6164_v39  ;;  %v6382_v39 = vld [vmem:[#allocation2 + $0x1b28] sm:$0xff] }
0x2b63   :  { %6231 = vmatpush1.msra.mxu0 %v6163_v52  ;;  %v8507_v59 = vpop.eup %8506  ;;  %v6381_v52 = vld [vmem:[#allocation2 + $0x1b20] sm:$0xff] }
0x2b64   :  { %6232 = vmatprep.subr.mxu0 %v6162_v51  ;;  %v6155_v2 = vmul.f32 %v8507_v59, %v9618_v6  ;;  %v6277_v6 = vld [vmem:[#allocation4 + $0x680] sm:$0xff]  ;;  %v6380_v51 = vld [vmem:[#allocation2 + $0x1b18] sm:$0xff] }
0x2b65   :  { %6233 = vmatpush1.msra.mxu0 %v6161_v46  ;;  %8298 = vmatpush3.msra.mxu1 %v6277_v6  ;;  %v6379_v46 = vld [vmem:[#allocation2 + $0x1b10] sm:$0xff]  ;;  %v6496_v6 = vld [vmem:[#allocation4 + $0x6c8] sm:$0xff] }
0x2b66   :  { %6234 = vmatprep.subr.mxu0 %v6160_v49  ;;  %6422 = vmatprep.subr.mxu1 %v6408_v11  ;;  %v6378_v49 = vld [vmem:[#allocation2 + $0x1b08] sm:$0xff]  ;;  %v6626_v11 = vld [vmem:[#allocation2 + $0x1cf8] sm:$0xff] }
0x2b67   :  { %6235 = vmatpush1.msra.mxu0 %v6159_v53  ;;  %v6377_v53 = vld [vmem:[#allocation2 + $0x1b00] sm:$0xff] }
0x2b68   :  { %8302 = vmatprep.subr.mxu0 %v8621_v0 }
0x2c08   :  { %v6144_v60 = vpop.f32.mrf.mxu0 }
0x2c09   :  { %v6145_v62 = vadd.f32 %v7270_v48, %v6144_v60  ;;  %v7275_v48 = vld [vmem:[%s9798_s5 + $0x1a] ss:$0 sm:$0xff] }
0x2c0a   :  { %v8282_v63 = vpop.f32.mrf.mxu0 }
0x2c0b   :  { %v6148_v5 = vmax.f32 %v6145_v62, 0.0 }
0x2c0d   :  { %v6156_v3 = vadd.f32 %v6155_v2, %v6148_v5 }
0x2c0f   :  { %v9650_v8 = vadd.f32 %v9589_v1, %v6156_v3 }
0x2c11   :  { %6269 = vmatmul.mubr.f32.vlgmr.msra.gmra.mxu0 %v9650_v8 }
0x2c12   :  { %8318 = vmatprep.mubr.msk.f32.mxu0 %vm8622_vm0, %v8621_v0  ;;  %8303 = vmatpush3.msra.mxu0 %v6502_v37  ;;  %v6720_v37 = vld [vmem:[#allocation4 + $0x738] sm:$0xff] }
0x2c13   :  { %8304 = vmatprep.subr.mxu0 %v8621_v0 }
0x2c14   :  { %8305 = vmatpush3.msra.mxu0 %v6501_v54  ;;  %v6719_v54 = vld [vmem:[#allocation4 + $0x730] sm:$0xff] }
0x2c15   :  { %8306 = vmatprep.subr.mxu0 %v8621_v0 }
0x2c16   :  { %8307 = vmatpush3.msra.mxu0 %v6500_v43  ;;  %v6718_v43 = vld [vmem:[#allocation4 + $0x728] sm:$0xff] }
0x2c17   :  { %8308 = vmatprep.subr.mxu0 %v8621_v0 }
0x2c18   :  { %8309 = vmatpush3.msra.mxu0 %v6499_v55  ;;  %v6717_v55 = vld [vmem:[#allocation4 + $0x720] sm:$0xff] }
0x2c19   :  { %8310 = vmatprep.subr.mxu0 %v8621_v0 }
0x2c1a   :  { %8311 = vmatpush3.msra.mxu0 %v6498_v10 }
0x2c1b   :  { %8312 = vmatprep.subr.mxu0 %v8621_v0 }
0x2c1c   :  { %8313 = vmatpush3.msra.mxu0 %v6497_v7  ;;  %v6716_v7 = vld [vmem:[#allocation4 + $0x718] sm:$0xff] }
0x2c1d   :  { %8314 = vmatprep.subr.mxu0 %v8621_v0 }
0x2c1e   :  { %8315 = vmatpush3.msra.mxu0 %v6496_v6  ;;  %v6715_v6 = vld [vmem:[#allocation4 + $0x710] sm:$0xff] }
0x2c1f   :  { %8316 = vmatprep.subr.mxu0 %v8621_v0 }
0x2cd1   :  { %v9665_v4 = vpop.f32.mrf.mxu0 }
0x2cd2   :  { %v6271_v56 = vadd.f32 %v9665_v4, %v6197_v35  ;;  %v6415_v35 = vrot.slane %v9693_v12, %v8751_v22 }
0x2cd3   :  { %v6272_v14 = vpop.f32.mrf.mxu0 }
0x2cd4   :  { %v6273_v61 = vadd.f32 %v6272_v14, %v6201_v13  ;;  %v7277_v57 = vmul.f32 -1.442695, %v6271_v56  ;;  %v6419_v13 = vrot.slane %v9693_v12, %v8736_v47 }
0x2cd6   :  { %v6275_v15 = vmax.f32 %v6273_v61, 0.0  ;;  %8508 = vpow2.f32 %v7277_v57 }
0x2cd8   :  { %8300 = vmatmul.mubr.msk.f32.vlgmr.msra.gmra.mxu1 %vm230_vm1, %v6275_v15 }
0x2cd9   :  { %6423 = vmatpush1.msra.mxu1 %v6407_v16  ;;  %6486 = vmatprep.mubr.f32.mxu1 %v8621_v0  ;;  %v6625_v16 = vld [vmem:[#allocation2 + $0x1cf0] sm:$0xff] }
0x2cda   :  { %6424 = vmatprep.subr.mxu1 %v6406_v17  ;;  %v6624_v17 = vld [vmem:[#allocation2 + $0x1ce8] sm:$0xff] }
0x2cdb   :  { %6425 = vmatpush1.msra.mxu1 %v6405_v18  ;;  %v6623_v18 = vld [vmem:[#allocation2 + $0x1ce0] sm:$0xff] }
0x2cdc   :  { %6426 = vmatprep.subr.mxu1 %v6404_v19  ;;  %v6622_v19 = vld [vmem:[#allocation2 + $0x1cd8] sm:$0xff] }
0x2cdd   :  { %6427 = vmatpush1.msra.mxu1 %v6403_v21  ;;  %v6621_v21 = vld [vmem:[#allocation2 + $0x1cd0] sm:$0xff] }
0x2cde   :  { %6428 = vmatprep.subr.mxu1 %v6402_v28  ;;  %v6620_v28 = vld [vmem:[#allocation2 + $0x1cc8] sm:$0xff] }
0x2cdf   :  { %6429 = vmatpush1.msra.mxu1 %v6401_v27  ;;  %v6619_v27 = vld [vmem:[#allocation2 + $0x1cc0] sm:$0xff] }
0x2ce0   :  { %6430 = vmatprep.subr.mxu1 %v6400_v24  ;;  %v6618_v24 = vld [vmem:[#allocation2 + $0x1cb8] sm:$0xff] }
0x2ce1   :  { %6431 = vmatpush1.msra.mxu1 %v6399_v25  ;;  %v6617_v25 = vld [vmem:[#allocation2 + $0x1cb0] sm:$0xff] }
0x2ce2   :  { %6432 = vmatprep.subr.mxu1 %v6398_v29  ;;  %v6616_v29 = vld [vmem:[#allocation2 + $0x1ca8] sm:$0xff] }
0x2ce3   :  { %6433 = vmatpush1.msra.mxu1 %v6397_v20  ;;  %v8509_v50 = vpop.eup %8508  ;;  %v6615_v20 = vld [vmem:[#allocation2 + $0x1ca0] sm:$0xff] }
0x2ce4   :  { %6434 = vmatprep.subr.mxu1 %v6396_v30  ;;  %v6370_v58 = vadd.f32 1.0, %v8509_v50  ;;  %v6614_v30 = vld [vmem:[#allocation2 + $0x1c98] sm:$0xff] }
0x2ce5   :  { %6435 = vmatpush1.msra.mxu1 %v6395_v31  ;;  %v6613_v31 = vld [vmem:[#allocation2 + $0x1c90] sm:$0xff] }
0x2ce6   :  { %6436 = vmatprep.subr.mxu1 %v6394_v32  ;;  %8510 = vrcp.f32 %v6370_v58  ;;  %v6612_v32 = vld [vmem:[#allocation2 + $0x1c88] sm:$0xff] }
0x2ce7   :  { %6437 = vmatpush1.msra.mxu1 %v6393_v33  ;;  %v6611_v33 = vld [vmem:[#allocation2 + $0x1c80] sm:$0xff] }
0x2ce8   :  { %6438 = vmatprep.subr.mxu1 %v6392_v34  ;;  %v6610_v34 = vld [vmem:[#allocation2 + $0x1c78] sm:$0xff] }
0x2ce9   :  { %6439 = vmatpush1.msra.mxu1 %v6391_v36  ;;  %v6609_v36 = vld [vmem:[#allocation2 + $0x1c70] sm:$0xff] }
0x2cea   :  { %6440 = vmatprep.subr.mxu1 %v6390_v26  ;;  %v6608_v26 = vld [vmem:[#allocation2 + $0x1c68] sm:$0xff] }
0x2ceb   :  { %6441 = vmatpush1.msra.mxu1 %v6389_v38  ;;  %v6607_v38 = vld [vmem:[#allocation2 + $0x1c60] sm:$0xff] }
0x2cec   :  { %6442 = vmatprep.subr.mxu1 %v6388_v23  ;;  %v6606_v23 = vld [vmem:[#allocation2 + $0x1c58] sm:$0xff] }
0x2ced   :  { %6443 = vmatpush1.msra.mxu1 %v6387_v40  ;;  %v6605_v40 = vld [vmem:[#allocation2 + $0x1c50] sm:$0xff] }
0x2cee   :  { %6444 = vmatprep.subr.mxu1 %v6386_v41  ;;  %v6604_v41 = vld [vmem:[#allocation2 + $0x1c48] sm:$0xff] }
0x2cef   :  { %6445 = vmatpush1.msra.mxu1 %v6385_v42  ;;  %v6603_v42 = vld [vmem:[#allocation2 + $0x1c40] sm:$0xff] }
0x2cf0   :  { %6446 = vmatprep.subr.mxu1 %v6384_v44  ;;  %v6602_v44 = vld [vmem:[#allocation2 + $0x1c38] sm:$0xff] }
0x2cf1   :  { %6447 = vmatpush1.msra.mxu1 %v6383_v45  ;;  %v6601_v45 = vld [vmem:[#allocation2 + $0x1c30] sm:$0xff] }
0x2cf2   :  { %6448 = vmatprep.subr.mxu1 %v6382_v39  ;;  %v6600_v39 = vld [vmem:[#allocation2 + $0x1c28] sm:$0xff] }
0x2cf3   :  { %6449 = vmatpush1.msra.mxu1 %v6381_v52  ;;  %v8511_v59 = vpop.eup %8510  ;;  %v6599_v52 = vld [vmem:[#allocation2 + $0x1c20] sm:$0xff] }
0x2cf4   :  { %6450 = vmatprep.subr.mxu1 %v6380_v51  ;;  %v6373_v2 = vmul.f32 %v8511_v59, %v9650_v8  ;;  %v6495_v8 = vld [vmem:[#allocation4 + $0x6c0] sm:$0xff]  ;;  %v6598_v51 = vld [vmem:[#allocation2 + $0x1c18] sm:$0xff] }
0x2cf5   :  { %6451 = vmatpush1.msra.mxu1 %v6379_v46  ;;  %8317 = vmatpush3.msra.mxu0 %v6495_v8  ;;  %v6597_v46 = vld [vmem:[#allocation2 + $0x1c10] sm:$0xff]  ;;  %v6714_v8 = vld [vmem:[#allocation4 + $0x708] sm:$0xff] }
0x2cf6   :  { %6452 = vmatprep.subr.mxu1 %v6378_v49  ;;  %6640 = vmatprep.subr.mxu0 %v6626_v11  ;;  %v6596_v49 = vld [vmem:[#allocation2 + $0x1c08] sm:$0xff]  ;;  %v9725_v11 = vld [vmem:[%s9796_s3 + $0x38] sm:$0x3] }
0x2cf7   :  { %6453 = vmatpush1.msra.mxu1 %v6377_v53  ;;  %v6595_v53 = vld [vmem:[#allocation2 + $0x1c00] sm:$0xff]  ;;  %v6637_v12 = vrot.slane %v9725_v11, %v8736_v47 }
0x2cf8   :  { %8321 = vmatprep.subr.mxu1 %v8621_v0 }
0x2d98   :  { %v6362_v60 = vpop.f32.mrf.mxu1 }
0x2d99   :  { %v6363_v62 = vadd.f32 %v7275_v48, %v6362_v60  ;;  %v7280_v48 = vld [vmem:[%s9798_s5 + $0x1b] ss:$0 sm:$0xff] }
0x2d9a   :  { %v8301_v63 = vpop.f32.mrf.mxu1 }
0x2d9b   :  { %v6366_v5 = vmax.f32 %v6363_v62, 0.0 }
0x2d9d   :  { %v6374_v3 = vadd.f32 %v6373_v2, %v6366_v5 }
0x2d9f   :  { %v9682_v9 = vadd.f32 %v9589_v1, %v6374_v3 }
0x2da1   :  { %6487 = vmatmul.mubr.f32.vlgmr.msra.gmra.mxu1 %v9682_v9 }
0x2da2   :  { %8337 = vmatprep.mubr.msk.f32.mxu1 %vm8622_vm0, %v8621_v0  ;;  %8322 = vmatpush3.msra.mxu1 %v6720_v37  ;;  %v6937_v37 = vld [vmem:[#allocation4 + $0x770] sm:$0xff] }
0x2da3   :  { %8323 = vmatprep.subr.mxu1 %v8621_v0 }
0x2da4   :  { %8324 = vmatpush3.msra.mxu1 %v6719_v54  ;;  %v6936_v54 = vld [vmem:[#allocation4 + $0x768] sm:$0xff] }
0x2da5   :  { %8325 = vmatprep.subr.mxu1 %v8621_v0 }
0x2da6   :  { %8326 = vmatpush3.msra.mxu1 %v6718_v43  ;;  %v6935_v43 = vld [vmem:[#allocation4 + $0x760] sm:$0xff] }
0x2da7   :  { %8327 = vmatprep.subr.mxu1 %v8621_v0 }
0x2da8   :  { %8328 = vmatpush3.msra.mxu1 %v6717_v55  ;;  %v6633_v55 = vrot.slane %v9725_v11, %v8751_v22 }
0x2da9   :  { %8329 = vmatprep.subr.mxu1 %v8621_v0 }
0x2daa   :  { %8330 = vmatpush3.msra.mxu1 %v6716_v7 }
0x2dab   :  { %8331 = vmatprep.subr.mxu1 %v8621_v0 }
0x2dac   :  { %8332 = vmatpush3.msra.mxu1 %v6715_v6  ;;  %v6934_v6 = vld [vmem:[#allocation4 + $0x758] sm:$0xff] }
0x2dad   :  { %8333 = vmatprep.subr.mxu1 %v8621_v0 }
0x2dae   :  { %8334 = vmatpush3.msra.mxu1 %v6714_v8  ;;  %v6933_v8 = vld [vmem:[#allocation4 + $0x750] sm:$0xff] }
0x2daf   :  { %8335 = vmatprep.subr.mxu1 %v8621_v0 }
0x2e61   :  { %v9697_v4 = vpop.f32.mrf.mxu1 }
0x2e62   :  { %v6489_v56 = vadd.f32 %v9697_v4, %v6415_v35 }
0x2e63   :  { %v6490_v14 = vpop.f32.mrf.mxu1 }
0x2e64   :  { %v6491_v61 = vadd.f32 %v6490_v14, %v6419_v13  ;;  %v7282_v57 = vmul.f32 -1.442695, %v6489_v56 }
0x2e66   :  { %v6493_v15 = vmax.f32 %v6491_v61, 0.0  ;;  %8512 = vpow2.f32 %v7282_v57 }
0x2e68   :  { %8319 = vmatmul.mubr.msk.f32.vlgmr.msra.gmra.mxu0 %vm230_vm1, %v6493_v15  ;;  %v6843_v15 = vld [vmem:[#allocation2 + $0x1df0] sm:$0xff] }
0x2e69   :  { %6641 = vmatpush1.msra.mxu0 %v6625_v16  ;;  %6704 = vmatprep.mubr.f32.mxu0 %v8621_v0  ;;  %v6842_v16 = vld [vmem:[#allocation2 + $0x1de8] sm:$0xff] }
0x2e6a   :  { %6642 = vmatprep.subr.mxu0 %v6624_v17  ;;  %v6841_v17 = vld [vmem:[#allocation2 + $0x1de0] sm:$0xff] }
0x2e6b   :  { %6643 = vmatpush1.msra.mxu0 %v6623_v18  ;;  %v6840_v18 = vld [vmem:[#allocation2 + $0x1dd8] sm:$0xff] }
0x2e6c   :  { %6644 = vmatprep.subr.mxu0 %v6622_v19  ;;  %v6839_v19 = vld [vmem:[#allocation2 + $0x1dd0] sm:$0xff] }
0x2e6d   :  { %6645 = vmatpush1.msra.mxu0 %v6621_v21  ;;  %v6838_v21 = vld [vmem:[#allocation2 + $0x1dc8] sm:$0xff] }
0x2e6e   :  { %6646 = vmatprep.subr.mxu0 %v6620_v28  ;;  %v6837_v28 = vld [vmem:[#allocation2 + $0x1dc0] sm:$0xff] }
0x2e6f   :  { %6647 = vmatpush1.msra.mxu0 %v6619_v27  ;;  %v6836_v27 = vld [vmem:[#allocation2 + $0x1db8] sm:$0xff] }
0x2e70   :  { %6648 = vmatprep.subr.mxu0 %v6618_v24  ;;  %v6835_v24 = vld [vmem:[#allocation2 + $0x1db0] sm:$0xff] }
0x2e71   :  { %6649 = vmatpush1.msra.mxu0 %v6617_v25  ;;  %v6834_v25 = vld [vmem:[#allocation2 + $0x1da8] sm:$0xff] }
0x2e72   :  { %6650 = vmatprep.subr.mxu0 %v6616_v29  ;;  %v6833_v29 = vld [vmem:[#allocation2 + $0x1da0] sm:$0xff] }
0x2e73   :  { %6651 = vmatpush1.msra.mxu0 %v6615_v20  ;;  %v8513_v50 = vpop.eup %8512  ;;  %v6832_v20 = vld [vmem:[#allocation2 + $0x1d98] sm:$0xff] }
0x2e74   :  { %6652 = vmatprep.subr.mxu0 %v6614_v30  ;;  %v6588_v58 = vadd.f32 1.0, %v8513_v50  ;;  %v6831_v30 = vld [vmem:[#allocation2 + $0x1d90] sm:$0xff] }
0x2e75   :  { %6653 = vmatpush1.msra.mxu0 %v6613_v31  ;;  %v6830_v31 = vld [vmem:[#allocation2 + $0x1d88] sm:$0xff] }
0x2e76   :  { %6654 = vmatprep.subr.mxu0 %v6612_v32  ;;  %8514 = vrcp.f32 %v6588_v58  ;;  %v6829_v32 = vld [vmem:[#allocation2 + $0x1d80] sm:$0xff]  ;;  %v7285_v58 = vld [vmem:[%s9798_s5 + $0x1c] ss:$0 sm:$0xff] }
0x2e77   :  { %6655 = vmatpush1.msra.mxu0 %v6611_v33  ;;  %v6828_v33 = vld [vmem:[#allocation2 + $0x1d78] sm:$0xff] }
0x2e78   :  { %6656 = vmatprep.subr.mxu0 %v6610_v34  ;;  %v6827_v34 = vld [vmem:[#allocation2 + $0x1d70] sm:$0xff] }
0x2e79   :  { %6657 = vmatpush1.msra.mxu0 %v6609_v36  ;;  %v6826_v36 = vld [vmem:[#allocation2 + $0x1d68] sm:$0xff] }
0x2e7a   :  { %6658 = vmatprep.subr.mxu0 %v6608_v26  ;;  %v6825_v26 = vld [vmem:[#allocation2 + $0x1d60] sm:$0xff] }
0x2e7b   :  { %6659 = vmatpush1.msra.mxu0 %v6607_v38  ;;  %v6824_v38 = vld [vmem:[#allocation2 + $0x1d58] sm:$0xff] }
0x2e7c   :  { %6660 = vmatprep.subr.mxu0 %v6606_v23  ;;  %v6823_v23 = vld [vmem:[#allocation2 + $0x1d50] sm:$0xff] }
0x2e7d   :  { %6661 = vmatpush1.msra.mxu0 %v6605_v40  ;;  %v6822_v40 = vld [vmem:[#allocation2 + $0x1d48] sm:$0xff] }
0x2e7e   :  { %6662 = vmatprep.subr.mxu0 %v6604_v41  ;;  %v6821_v41 = vld [vmem:[#allocation2 + $0x1d40] sm:$0xff] }
0x2e7f   :  { %6663 = vmatpush1.msra.mxu0 %v6603_v42  ;;  %v6820_v42 = vld [vmem:[#allocation2 + $0x1d38] sm:$0xff] }
0x2e80   :  { %6664 = vmatprep.subr.mxu0 %v6602_v44  ;;  %v6819_v44 = vld [vmem:[#allocation2 + $0x1d30] sm:$0xff] }
0x2e81   :  { %6665 = vmatpush1.msra.mxu0 %v6601_v45  ;;  %v6818_v45 = vld [vmem:[#allocation2 + $0x1d28] sm:$0xff] }
0x2e82   :  { %6666 = vmatprep.subr.mxu0 %v6600_v39  ;;  %v6817_v39 = vld [vmem:[#allocation2 + $0x1d20] sm:$0xff] }
0x2e83   :  { %6667 = vmatpush1.msra.mxu0 %v6599_v52  ;;  %v8515_v59 = vpop.eup %8514  ;;  %v6816_v52 = vld [vmem:[#allocation2 + $0x1d18] sm:$0xff] }
0x2e84   :  { %6668 = vmatprep.subr.mxu0 %v6598_v51  ;;  %v6591_v2 = vmul.f32 %v8515_v59, %v9682_v9  ;;  %v6713_v9 = vld [vmem:[#allocation4 + $0x700] sm:$0xff]  ;;  %v6815_v51 = vld [vmem:[#allocation2 + $0x1d10] sm:$0xff] }
0x2e85   :  { %6669 = vmatpush1.msra.mxu0 %v6597_v46  ;;  %8336 = vmatpush3.msra.mxu1 %v6713_v9  ;;  %v6814_v46 = vld [vmem:[#allocation2 + $0x1d08] sm:$0xff] }
0x2e86   :  { %6670 = vmatprep.subr.mxu0 %v6596_v49  ;;  %v6813_v49 = vld [vmem:[#allocation2 + $0x1d00] sm:$0xff]  ;;  %v6932_v9 = vld [vmem:[#allocation4 + $0x748] sm:$0xff] }
0x2e87   :  { %6671 = vmatpush1.msra.mxu0 %v6595_v53  ;;  %v6938_v53 = vld [vmem:[#allocation4 + $0x778] sm:$0xff] }
0x2e88   :  { %8340 = vmatprep.subr.mxu0 %v8621_v0 }
0x2f28   :  { %v6580_v60 = vpop.f32.mrf.mxu0 }
0x2f29   :  { %v6581_v62 = vadd.f32 %v7280_v48, %v6580_v60 }
0x2f2a   :  { %v8320_v63 = vpop.f32.mrf.mxu0 }
0x2f2b   :  { %v6584_v5 = vmax.f32 %v6581_v62, 0.0 }
0x2f2d   :  { %v6592_v3 = vadd.f32 %v6591_v2, %v6584_v5 }
0x2f2f   :  { %v9714_v10 = vadd.f32 %v9589_v1, %v6592_v3  ;;  %v6844_v1 = vld [vmem:[#allocation2 + $0x1df8] sm:$0xff]  ;;  %v8526_v3 = vld [vmem:[%s9794_s1 + $0x8] sm:$0x3] }
0x2f30   :  { %6858 = vmatprep.subr.mxu1 %v6844_v1  ;;  %v7288_v1 = vld [vmem:[%s9796_s3 + $0x3a] sm:$0x3] }
0x2f31   :  { %6705 = vmatmul.mubr.f32.vlgmr.msra.gmra.mxu0 %v9714_v10  ;;  %v6855_v11 = vrot.slane %v7288_v1, %v8736_v47  ;;  %v7040_v47 = vld [vmem:[#allocation7 + $0x58] sm:$0xff] }
0x2f32   :  { %8356 = vmatprep.mubr.msk.f32.mxu0 %vm8622_vm0, %v8621_v0  ;;  %8341 = vmatpush3.msra.mxu0 %v6938_v53 }
0x2f33   :  { %8342 = vmatprep.subr.mxu0 %v8621_v0 }
0x2f34   :  { %8343 = vmatpush3.msra.mxu0 %v6937_v37 }
0x2f35   :  { %8344 = vmatprep.subr.mxu0 %v8621_v0 }
0x2f36   :  { %8345 = vmatpush3.msra.mxu0 %v6936_v54 }
0x2f37   :  { %8346 = vmatprep.subr.mxu0 %v8621_v0 }
0x2f38   :  { %8347 = vmatpush3.msra.mxu0 %v6935_v43 }
0x2f39   :  { %8348 = vmatprep.subr.mxu0 %v8621_v0 }
0x2f3a   :  { %8349 = vmatpush3.msra.mxu0 %v6934_v6 }
0x2f3b   :  { %8350 = vmatprep.subr.mxu0 %v8621_v0 }
0x2f3c   :  { %8351 = vmatpush3.msra.mxu0 %v6933_v8 }
0x2f3d   :  { %8352 = vmatprep.subr.mxu0 %v8621_v0 }
0x2f3e   :  { %8353 = vmatpush3.msra.mxu0 %v6932_v9 }
0x2f3f   :  { %8354 = vmatprep.subr.mxu0 %v8621_v0 }
0x2ff1   :  { %v9729_v13 = vpop.f32.mrf.mxu0 }
0x2ff2   :  { %v6707_v35 = vadd.f32 %v9729_v13, %v6633_v55 }
0x2ff3   :  { %v6708_v4 = vpop.f32.mrf.mxu0 }
0x2ff4   :  { %v6709_v14 = vadd.f32 %v6708_v4, %v6637_v12  ;;  %v7287_v56 = vmul.f32 -1.442695, %v6707_v35 }
0x2ff6   :  { %v6711_v61 = vmax.f32 %v6709_v14, 0.0  ;;  %8516 = vpow2.f32 %v7287_v56 }
0x2ff8   :  { %8338 = vmatmul.mubr.msk.f32.vlgmr.msra.gmra.mxu1 %vm230_vm1, %v6711_v61  ;;  %v7044_v61 = vld [vmem:[#allocation7 + $0x78] sm:$0xff] }
0x2ff9   :  { %6859 = vmatpush1.msra.mxu1 %v6843_v15  ;;  %6922 = vmatprep.mubr.f32.mxu1 %v8621_v0  ;;  %v7043_v15 = vld [vmem:[#allocation7 + $0x70] sm:$0xff] }
0x2ffa   :  { %6860 = vmatprep.subr.mxu1 %v6842_v16  ;;  %v7042_v16 = vld [vmem:[#allocation7 + $0x68] sm:$0xff] }
0x2ffb   :  { %6861 = vmatpush1.msra.mxu1 %v6841_v17  ;;  %v7041_v17 = vld [vmem:[#allocation7 + $0x60] sm:$0xff] }
0x2ffc   :  { %6862 = vmatprep.subr.mxu1 %v6840_v18  ;;  %v7039_v18 = vld [vmem:[#allocation7 + $0x50] sm:$0xff] }
0x2ffd   :  { %6863 = vmatpush1.msra.mxu1 %v6839_v19  ;;  %v7038_v19 = vld [vmem:[#allocation7 + $0x48] sm:$0xff] }
0x2ffe   :  { %6864 = vmatprep.subr.mxu1 %v6838_v21  ;;  %v7037_v21 = vld [vmem:[#allocation7 + $0x40] sm:$0xff] }
0x2fff   :  { %6865 = vmatpush1.msra.mxu1 %v6837_v28  ;;  %v7036_v28 = vld [vmem:[#allocation7 + $0x38] sm:$0xff] }
0x3000   :  { %6866 = vmatprep.subr.mxu1 %v6836_v27  ;;  %v7035_v27 = vld [vmem:[#allocation7 + $0x30] sm:$0xff] }
0x3001   :  { %6867 = vmatpush1.msra.mxu1 %v6835_v24  ;;  %v7034_v24 = vld [vmem:[#allocation7 + $0x28] sm:$0xff] }
0x3002   :  { %6868 = vmatprep.subr.mxu1 %v6834_v25  ;;  %v7033_v25 = vld [vmem:[#allocation7 + $0x20] sm:$0xff] }
0x3003   :  { %6869 = vmatpush1.msra.mxu1 %v6833_v29  ;;  %v8517_v57 = vpop.eup %8516  ;;  %v7032_v29 = vld [vmem:[#allocation7 + $0x18] sm:$0xff] }
0x3004   :  { %6870 = vmatprep.subr.mxu1 %v6832_v20  ;;  %v6806_v50 = vadd.f32 1.0, %v8517_v57  ;;  %v7031_v20 = vld [vmem:[#allocation7 + $0x10] sm:$0xff] }
0x3005   :  { %6871 = vmatpush1.msra.mxu1 %v6831_v30  ;;  %v7030_v30 = vld [vmem:[#allocation7 + $0x8] sm:$0xff] }
0x3006   :  { %6872 = vmatprep.subr.mxu1 %v6830_v31  ;;  %8518 = vrcp.f32 %v6806_v50  ;;  %v7029_v31 = vld [vmem:[#allocation7] sm:$0xff] }
0x3007   :  { %6873 = vmatpush1.msra.mxu1 %v6829_v32  ;;  %v6851_v32 = vrot.slane %v7288_v1, %v8751_v22  ;;  %v7293_v22 = vld [vmem:[%s9802_s9] ss:$0 sm:$0xff] }
0x3008   :  { %6874 = vmatprep.subr.mxu1 %v6828_v33 }
0x3009   :  { %6875 = vmatpush1.msra.mxu1 %v6827_v34 }
0x300a   :  { %6876 = vmatprep.subr.mxu1 %v6826_v36 }
0x300b   :  { %6877 = vmatpush1.msra.mxu1 %v6825_v26 }
0x300c   :  { %6878 = vmatprep.subr.mxu1 %v6824_v38  ;;  %v7290_v38 = vld [vmem:[%s9798_s5 + $0x1d] ss:$0 sm:$0xff] }
0x300d   :  { %6879 = vmatpush1.msra.mxu1 %v6823_v23 }
0x300e   :  { %6880 = vmatprep.subr.mxu1 %v6822_v40 }
0x300f   :  { %6881 = vmatpush1.msra.mxu1 %v6821_v41 }
0x3010   :  { %6882 = vmatprep.subr.mxu1 %v6820_v42 }
0x3011   :  { %6883 = vmatpush1.msra.mxu1 %v6819_v44 }
0x3012   :  { %6884 = vmatprep.subr.mxu1 %v6818_v45 }
0x3013   :  { %6885 = vmatpush1.msra.mxu1 %v6817_v39  ;;  %v8519_v48 = vpop.eup %8518 }
0x3014   :  { %6886 = vmatprep.subr.mxu1 %v6816_v52  ;;  %v6809_v5 = vmul.f32 %v8519_v48, %v9714_v10  ;;  %v6931_v10 = vld [vmem:[#allocation4 + $0x740] sm:$0xff] }
0x3015   :  { %6887 = vmatpush1.msra.mxu1 %v6815_v51  ;;  %8355 = vmatpush3.msra.mxu0 %v6931_v10  ;;  %v7122_v52 = vld [vmem:[%s9803_s10] sm:$0x3] }
0x3016   :  { %6888 = vmatprep.subr.mxu1 %v6814_v46  ;;  %8359 = vmatprep.subr.mxu0 %v8621_v0  ;;  %v7124_v46 = vld [vmem:[%s9804_s11] sm:$0x3] }
0x3017   :  { %6889 = vmatpush1.msra.mxu1 %v6813_v49 }
0x30b8   :  { %v6798_v59 = vpop.f32.mrf.mxu1 }
0x30b9   :  { %v6799_v60 = vadd.f32 %v7285_v58, %v6798_v59 }
0x30ba   :  { %v8339_v62 = vpop.f32.mrf.mxu1 }
0x30bb   :  { %v6802_v63 = vmax.f32 %v6799_v60, 0.0 }
0x30bd   :  { %v6810_v2 = vadd.f32 %v6809_v5, %v6802_v63 }
0x30bf   :  { %v9747_v7 = vadd.f32 %v8526_v3, %v6810_v2 }
0x30c1   :  { %6923 = vmatmul.mubr.f32.vlgmr.msra.gmra.mxu1 %v9747_v7 }
0x3181   :  { %v6924_v12 = vpop.f32.mrf.mxu1 }
0x3182   :  { %v6925_v33 = vadd.f32 %v6924_v12, %v6851_v32 }
0x3183   :  { %v6926_v13 = vpop.f32.mrf.mxu1 }
0x3184   :  { %v6927_v4 = vadd.f32 %v6926_v13, %v6855_v11  ;;  %v7292_v34 = vmul.f32 -1.442695, %v6925_v33 }
0x3186   :  { %v6929_v14 = vmax.f32 %v6927_v4, 0.0  ;;  %8520 = vpow2.f32 %v7292_v34 }
0x3188   :  { %8357 = vmatmul.mubr.msk.f32.vlgmr.msra.gmra.mxu0 %vm230_vm1, %v6929_v14 }
0x3189   :  { %8360 = vmatpush3.msra.mxu0 %v7044_v61  ;;  %8391 = vmatprep.mubr.msk.f32.mxu0 %vm8622_vm0, %v8621_v0 }
0x318a   :  { %8361 = vmatprep.subr.mxu0 %v8621_v0 }
0x318b   :  { %8362 = vmatpush3.msra.mxu0 %v7043_v15 }
0x318c   :  { %8363 = vmatprep.subr.mxu0 %v8621_v0 }
0x318d   :  { %8364 = vmatpush3.msra.mxu0 %v7042_v16 }
0x318e   :  { %8365 = vmatprep.subr.mxu0 %v8621_v0 }
0x318f   :  { %8366 = vmatpush3.msra.mxu0 %v7041_v17 }
0x3190   :  { %8367 = vmatprep.subr.mxu0 %v8621_v0 }
0x3191   :  { %8368 = vmatpush3.msra.mxu0 %v7040_v47 }
0x3192   :  { %8369 = vmatprep.subr.mxu0 %v8621_v0 }
0x3193   :  { %8370 = vmatpush3.msra.mxu0 %v7039_v18  ;;  %v8521_v36 = vpop.eup %8520 }
0x3194   :  { %8371 = vmatprep.subr.mxu0 %v8621_v0  ;;  %v7024_v26 = vadd.f32 1.0, %v8521_v36 }
0x3195   :  { %8372 = vmatpush3.msra.mxu0 %v7038_v19 }
0x3196   :  { %8373 = vmatprep.subr.mxu0 %v8621_v0  ;;  %8522 = vrcp.f32 %v7024_v26 }
0x3197   :  { %8374 = vmatpush3.msra.mxu0 %v7037_v21 }
0x3198   :  { %8375 = vmatprep.subr.mxu0 %v8621_v0 }
0x3199   :  { %8376 = vmatpush3.msra.mxu0 %v7036_v28 }
0x319a   :  { %8377 = vmatprep.subr.mxu0 %v8621_v0 }
0x319b   :  { %8378 = vmatpush3.msra.mxu0 %v7035_v27 }
0x319c   :  { %8379 = vmatprep.subr.mxu0 %v8621_v0 }
0x319d   :  { %8380 = vmatpush3.msra.mxu0 %v7034_v24 }
0x319e   :  { %8381 = vmatprep.subr.mxu0 %v8621_v0 }
0x319f   :  { %8382 = vmatpush3.msra.mxu0 %v7033_v25 }
0x31a0   :  { %8383 = vmatprep.subr.mxu0 %v8621_v0 }
0x31a1   :  { %8384 = vmatpush3.msra.mxu0 %v7032_v29 }
0x31a2   :  { %8385 = vmatprep.subr.mxu0 %v8621_v0 }
0x31a3   :  { %8386 = vmatpush3.msra.mxu0 %v7031_v20  ;;  %v8523_v23 = vpop.eup %8522 }
0x31a4   :  { %8387 = vmatprep.subr.mxu0 %v8621_v0 }
0x31a5   :  { %8388 = vmatpush3.msra.mxu0 %v7030_v30 }
0x31a6   :  { %8389 = vmatprep.subr.mxu0 %v8621_v0  ;;  %v7027_v0 = vmul.f32 %v8523_v23, %v9747_v7 }
0x31a7   :  { %8390 = vmatpush3.msra.mxu0 %v7029_v31 }
0x3248   :  { %v7016_v40 = vpop.f32.mrf.mxu0 }
0x3249   :  { %v7017_v41 = vadd.f32 %v7290_v38, %v7016_v40 }
0x324a   :  { %v8358_v42 = vpop.f32.mrf.mxu0 }
0x324b   :  { %v7020_v44 = vmax.f32 %v7017_v41, 0.0 }
0x324d   :  { %v7028_v45 = vadd.f32 %v7027_v0, %v7020_v44 }
0x324f   :  { %8392 = vmatmul.mubr.f32.vlgmr.msra.gmra.mxu0 %v7028_v45 }
0x330f   :  { %v7118_v39 = vpop.f32.mrf.mxu0 }
0x3310   :  { %v7119_v51 = vadd.f32 %v7293_v22, %v7118_v39 }
0x3311   :  { %v8393_v49 = vpop.f32.mrf.mxu0 }
0x3312   :  { %v7123_v53 = vmul.f32 %v7122_v52, %v7119_v51 }
0x3314   :  { %v7125_v37 = vadd.f32 %v7124_v46, %v7123_v53 }
0x3316   :  { %7126 = vst [vmem:[%s9805_s12] sm:$0x3] %v7125_v37 }
0x3317   :  { %7131 = vsyncpa [#allocation3], 1 }
0x3318   :  { %7132 = vsyncpa [#allocation5], 1 }
0x3319   :  { %7133 = vsyncpa [#allocation8], 1 }

</bundles_post_ra>
